<compile_context>
chip_gen: v7x
topology: tpu7x:2x2x1
jax: 0.10.0
libtpu: 0.0.40
codegen_flags: <defaults>
</compile_context>

<pallas_src>
import math

import jax
import jax.numpy as jnp
from jax.experimental import pallas as pl
from jax.experimental.pallas import tpu as pltpu

# ----------------------------- model config ---------------------------------
INPUT_DIM = 1
DEC_SEQ_LEN = 1
OUT_SEQ_LEN = 1
D_MODEL = 32
NHEAD = 4
DH = D_MODEL // NHEAD
NUM_ENC = 2
NUM_DEC = 2
DIM_FF = 64
LN_EPS = 1e-5
MAX_LEN = 64  # positional-encoding table length (>= seq len used below)

# Order of parameter refs passed to the fused kernel (after x and pe).
PARAM_ORDER = (
    # top-level
    'enc_in_w', 'enc_in_b', 'dec_in_w', 'dec_in_b',
    'enc_norm_g', 'enc_norm_b', 'dec_norm_g', 'dec_norm_b',
    'out_w', 'out_b',
    # encoder stack (leading dim = NUM_ENC)
    'enc_wqkv', 'enc_bqkv', 'enc_wo', 'enc_bo',
    'enc_ln1_g', 'enc_ln1_b', 'enc_ln2_g', 'enc_ln2_b',
    'enc_w1', 'enc_b1', 'enc_w2', 'enc_b2',
    # decoder stack (leading dim = NUM_DEC)
    'dec_sa_wv', 'dec_sa_bv', 'dec_sa_wo', 'dec_sa_bo',
    'dec_ca_wq', 'dec_ca_bq', 'dec_ca_wkv', 'dec_ca_bkv',
    'dec_ca_wo', 'dec_ca_bo',
    'dec_ln1_g', 'dec_ln1_b', 'dec_ln2_g', 'dec_ln2_b',
    'dec_ln3_g', 'dec_ln3_b',
    'dec_w1', 'dec_b1', 'dec_w2', 'dec_b2',
)


# ----------------------------- fused Pallas kernel ---------------------------
def _fused_transformer_kernel(*refs):
    x_ref, pe_ref = refs[0], refs[1]
    p = dict(zip(PARAM_ORDER, refs[2:-1]))
    out_ref = refs[-1]

    D = D_MODEL
    H = NHEAD
    dh = DH
    scale = 1.0 / math.sqrt(dh)

    def layer_norm(y, g, b):
        # LayerNorm over the last dim (biased variance, PyTorch eps)
        mean = jnp.mean(y, axis=-1, keepdims=True)
        var = jnp.mean((y - mean) ** 2, axis=-1, keepdims=True)
        return (y - mean) * jax.lax.rsqrt(var + LN_EPS) * g + b

    def mha(q, k, v, wo, bo):
        # q: [B, Tq, D] (already projected, bias included), k/v: [B, Tk, D]
        # Per-head attention with the output projection folded into the head
        # loop:  concat(heads) @ Wo == sum_h head_h @ Wo[h*dh:(h+1)*dh, :]
        acc = None
        for h in range(H):  # static unroll, H=4
            qh = q[:, :, h * dh:(h + 1) * dh] * scale
            kh = k[:, :, h * dh:(h + 1) * dh]
            vh = v[:, :, h * dh:(h + 1) * dh]
            s = jnp.einsum('bqd,bkd->bqk', qh, kh,
                           preferred_element_type=jnp.float32)
            m = jnp.max(s, axis=-1, keepdims=True)
            e = jnp.exp(s - m)
            prob = e * pl.reciprocal(jnp.sum(e, axis=-1, keepdims=True),
                                     approx=True)
            oh = jnp.einsum('bqk,bkd->bqd', prob, vh,
                            preferred_element_type=jnp.float32)
            contrib = jnp.einsum('bqd,de->bqe', oh, wo[h * dh:(h + 1) * dh, :],
                                 preferred_element_type=jnp.float32)
            acc = contrib if acc is None else acc + contrib
        return acc + bo

    def ffn(y, w1, b1, w2, b2):
        h1 = jnp.einsum('btd,df->btf', y, w1,
                        preferred_element_type=jnp.float32) + b1
        h1 = jnp.maximum(h1, 0.0)
        return jnp.einsum('btf,fd->btd', h1, w2,
                          preferred_element_type=jnp.float32) + b2

    x = x_ref[...]                       # [B, S, 1]
    pe = pe_ref[...]                     # [S, D]
    S = x.shape[1]

    # --- encoder embedding: K=1 matmul -> VPU broadcast multiply-add
    enc = x * p['enc_in_w'][...] + p['enc_in_b'][...]        # [B, S, D]
    enc = enc + pe[None, :, :]

    # --- decoder embedding (last DEC_SEQ_LEN=1 time step, no PE)
    x_last = x[:, S - DEC_SEQ_LEN:S, :]                      # [B, 1, 1]
    dec = x_last * p['dec_in_w'][...] + p['dec_in_b'][...]   # [B, 1, D]

    # ---------------- encoder stack (post-norm, relu FFN) --------------------
    mem = enc
    for l in range(NUM_ENC):
        qkv = jnp.einsum('btd,de->bte', mem, p['enc_wqkv'][l],
                         preferred_element_type=jnp.float32) + p['enc_bqkv'][l]
        q = qkv[:, :, 0 * D:1 * D]
        k = qkv[:, :, 1 * D:2 * D]
        v = qkv[:, :, 2 * D:3 * D]
        sa = mha(q, k, v, p['enc_wo'][l], p['enc_bo'][l])
        mem = layer_norm(mem + sa, p['enc_ln1_g'][l], p['enc_ln1_b'][l])
        ff = ffn(mem, p['enc_w1'][l], p['enc_b1'][l],
                 p['enc_w2'][l], p['enc_b2'][l])
        mem = layer_norm(mem + ff, p['enc_ln2_g'][l], p['enc_ln2_b'][l])
    mem = layer_norm(mem, p['enc_norm_g'][...], p['enc_norm_b'][...])

    # ---------------- decoder stack (post-norm) ------------------------------
    out = dec
    for l in range(NUM_DEC):
        # self-attention, Tq = Tk = 1: softmax over one key == 1 -> attn == V
        v = jnp.einsum('btd,de->bte', out, p['dec_sa_wv'][l],
                       preferred_element_type=jnp.float32) + p['dec_sa_bv'][l]
        sa = jnp.einsum('btd,de->bte', v, p['dec_sa_wo'][l],
                        preferred_element_type=jnp.float32) + p['dec_sa_bo'][l]
        out = layer_norm(out + sa, p['dec_ln1_g'][l], p['dec_ln1_b'][l])

        # cross-attention: Q from decoder (T=1), K/V from encoder memory
        q = jnp.einsum('btd,de->bte', out, p['dec_ca_wq'][l],
                       preferred_element_type=jnp.float32) + p['dec_ca_bq'][l]
        kv = jnp.einsum('bsd,de->bse', mem, p['dec_ca_wkv'][l],
                        preferred_element_type=jnp.float32) + p['dec_ca_bkv'][l]
        k = kv[:, :, 0:D]
        v = kv[:, :, D:2 * D]
        ca = mha(q, k, v, p['dec_ca_wo'][l], p['dec_ca_bo'][l])
        out = layer_norm(out + ca, p['dec_ln2_g'][l], p['dec_ln2_b'][l])

        ff = ffn(out, p['dec_w1'][l], p['dec_b1'][l],
                 p['dec_w2'][l], p['dec_b2'][l])
        out = layer_norm(out + ff, p['dec_ln3_g'][l], p['dec_ln3_b'][l])
    out = layer_norm(out, p['dec_norm_g'][...], p['dec_norm_b'][...])

    # --- output head: N=1 matmul -> VPU multiply + lane reduction, then /150
    w_out = p['out_w'][...]                       # [D, 1]
    y = jnp.sum(out * w_out[:, 0], axis=-1, keepdims=True) + p['out_b'][...]
    out_ref[...] = y * (1.0 / 150.0)


# ----------------------------- wrapper ---------------------------------------
def _fullspec(shape):
    """BlockSpec covering the whole array (grid=(1,))."""
    nd = len(shape)
    return pl.BlockSpec(shape, lambda i, _nd=nd: (0,) * _nd)


@jax.jit
def transformer_ts_forward(params, x):
    # x: [B, S, INPUT_DIM] float32
    B, S, _ = x.shape
    pe = params['pe'][:S]
    args = [x.astype(jnp.float32), pe] + [params[name] for name in PARAM_ORDER]
    out = pl.pallas_call(
        _fused_transformer_kernel,
        grid=(1,),
        in_specs=[_fullspec(a.shape) for a in args],
        out_specs=_fullspec((B, DEC_SEQ_LEN, OUT_SEQ_LEN)),
        out_shape=jax.ShapeDtypeStruct((B, DEC_SEQ_LEN, OUT_SEQ_LEN), jnp.float32),
        compiler_params=pltpu.CompilerParams(
            dimension_semantics=("arbitrary",)),
    )(*args)
    return out


# ----------------------------- parameters -----------------------------------
def positional_encoding(max_len, d_model):
    position = jnp.arange(max_len, dtype=jnp.float32)[:, None]
    div_term = jnp.exp(jnp.arange(0, d_model, 2, dtype=jnp.float32)
                       * (-math.log(10000.0) / d_model))
    pe = jnp.zeros((max_len, d_model), jnp.float32)
    pe = pe.at[:, 0::2].set(jnp.sin(position * div_term))
    pe = pe.at[:, 1::2].set(jnp.cos(position * div_term))
    return pe


def init_params(key):
    keys = iter(jax.random.split(key, 128))

    def rnd(shape, scale=0.05):
        return (jax.random.normal(next(keys), shape) * scale).astype(jnp.float32)

    def ones(shape):
        return jnp.ones(shape, jnp.float32)

    def zeros(shape):
        return jnp.zeros(shape, jnp.float32)

    LE, LD, D, FF = NUM_ENC, NUM_DEC, D_MODEL, DIM_FF
    params = {
        'pe': positional_encoding(MAX_LEN, D),
        # input / output heads (weights stored as [D_in, D_out])
        'enc_in_w': rnd((1, D)), 'enc_in_b': rnd((1, D)),
        'dec_in_w': rnd((1, D)), 'dec_in_b': rnd((1, D)),
        'out_w': rnd((D, OUT_SEQ_LEN)), 'out_b': rnd((1, OUT_SEQ_LEN)),
        # final stack norms
        'enc_norm_g': ones((1, D)), 'enc_norm_b': zeros((1, D)),
        'dec_norm_g': ones((1, D)), 'dec_norm_b': zeros((1, D)),
        # encoder layers (stacked on leading layer axis); fused QKV weights
        'enc_wqkv': rnd((LE, D, 3 * D)), 'enc_bqkv': rnd((LE, 1, 3 * D)),
        'enc_wo': rnd((LE, D, D)), 'enc_bo': rnd((LE, 1, D)),
        'enc_ln1_g': ones((LE, 1, D)), 'enc_ln1_b': zeros((LE, 1, D)),
        'enc_ln2_g': ones((LE, 1, D)), 'enc_ln2_b': zeros((LE, 1, D)),
        'enc_w1': rnd((LE, D, FF)), 'enc_b1': rnd((LE, 1, FF)),
        'enc_w2': rnd((LE, FF, D)), 'enc_b2': rnd((LE, 1, D)),
        # decoder layers: self-attn keeps only Wv/Wo (exact for DEC_SEQ_LEN=1,
        # softmax over a single key is identity so Wq/Wk never affect the output)
        'dec_sa_wv': rnd((LD, D, D)), 'dec_sa_bv': rnd((LD, 1, D)),
        'dec_sa_wo': rnd((LD, D, D)), 'dec_sa_bo': rnd((LD, 1, D)),
        'dec_ca_wq': rnd((LD, D, D)), 'dec_ca_bq': rnd((LD, 1, D)),
        'dec_ca_wkv': rnd((LD, D, 2 * D)), 'dec_ca_bkv': rnd((LD, 1, 2 * D)),
        'dec_ca_wo': rnd((LD, D, D)), 'dec_ca_bo': rnd((LD, 1, D)),
        'dec_ln1_g': ones((LD, 1, D)), 'dec_ln1_b': zeros((LD, 1, D)),
        'dec_ln2_g': ones((LD, 1, D)), 'dec_ln2_b': zeros((LD, 1, D)),
        'dec_ln3_g': ones((LD, 1, D)), 'dec_ln3_b': zeros((LD, 1, D)),
        'dec_w1': rnd((LD, D, FF)), 'dec_b1': rnd((LD, 1, FF)),
        'dec_w2': rnd((LD, FF, D)), 'dec_b2': rnd((LD, 1, D)),
    }
    return params


# ----------------------------- main -------------------------------------------
if __name__ == "__main__":
    B, S = 2, 8
    key = jax.random.PRNGKey(0)
    kx, kp = jax.random.split(key)
    x = jax.random.normal(kx, (B, S, INPUT_DIM), jnp.float32)
    params = init_params(kp)

    y = transformer_ts_forward(params, x)
    y = jax.block_until_ready(y)

    assert y.shape == (B, DEC_SEQ_LEN, OUT_SEQ_LEN), y.shape
    assert bool(jnp.all(jnp.isfinite(y)))
    print("KERNEL_OK")
</pallas_src>

<mosaic_0001>
module attributes {stable_mosaic.version = 11 : i64} {
  func.func @_fused_transformer_kernel(%arg0: i32, %arg1: memref<2x8x1xf32, #tpu.memory_space<vmem>>, %arg2: memref<8x32xf32, #tpu.memory_space<vmem>>, %arg3: memref<1x32xf32, #tpu.memory_space<vmem>>, %arg4: memref<1x32xf32, #tpu.memory_space<vmem>>, %arg5: memref<1x32xf32, #tpu.memory_space<vmem>>, %arg6: memref<1x32xf32, #tpu.memory_space<vmem>>, %arg7: memref<1x32xf32, #tpu.memory_space<vmem>>, %arg8: memref<1x32xf32, #tpu.memory_space<vmem>>, %arg9: memref<1x32xf32, #tpu.memory_space<vmem>>, %arg10: memref<1x32xf32, #tpu.memory_space<vmem>>, %arg11: memref<32x1xf32, #tpu.memory_space<vmem>>, %arg12: memref<1x1xf32, #tpu.memory_space<vmem>>, %arg13: memref<2x32x96xf32, #tpu.memory_space<vmem>>, %arg14: memref<2x1x96xf32, #tpu.memory_space<vmem>>, %arg15: memref<2x32x32xf32, #tpu.memory_space<vmem>>, %arg16: memref<2x1x32xf32, #tpu.memory_space<vmem>>, %arg17: memref<2x1x32xf32, #tpu.memory_space<vmem>>, %arg18: memref<2x1x32xf32, #tpu.memory_space<vmem>>, %arg19: memref<2x1x32xf32, #tpu.memory_space<vmem>>, %arg20: memref<2x1x32xf32, #tpu.memory_space<vmem>>, %arg21: memref<2x32x64xf32, #tpu.memory_space<vmem>>, %arg22: memref<2x1x64xf32, #tpu.memory_space<vmem>>, %arg23: memref<2x64x32xf32, #tpu.memory_space<vmem>>, %arg24: memref<2x1x32xf32, #tpu.memory_space<vmem>>, %arg25: memref<2x32x32xf32, #tpu.memory_space<vmem>>, %arg26: memref<2x1x32xf32, #tpu.memory_space<vmem>>, %arg27: memref<2x32x32xf32, #tpu.memory_space<vmem>>, %arg28: memref<2x1x32xf32, #tpu.memory_space<vmem>>, %arg29: memref<2x32x32xf32, #tpu.memory_space<vmem>>, %arg30: memref<2x1x32xf32, #tpu.memory_space<vmem>>, %arg31: memref<2x32x64xf32, #tpu.memory_space<vmem>>, %arg32: memref<2x1x64xf32, #tpu.memory_space<vmem>>, %arg33: memref<2x32x32xf32, #tpu.memory_space<vmem>>, %arg34: memref<2x1x32xf32, #tpu.memory_space<vmem>>, %arg35: memref<2x1x32xf32, #tpu.memory_space<vmem>>, %arg36: memref<2x1x32xf32, #tpu.memory_space<vmem>>, %arg37: memref<2x1x32xf32, #tpu.memory_space<vmem>>, %arg38: memref<2x1x32xf32, #tpu.memory_space<vmem>>, %arg39: memref<2x1x32xf32, #tpu.memory_space<vmem>>, %arg40: memref<2x1x32xf32, #tpu.memory_space<vmem>>, %arg41: memref<2x32x64xf32, #tpu.memory_space<vmem>>, %arg42: memref<2x1x64xf32, #tpu.memory_space<vmem>>, %arg43: memref<2x64x32xf32, #tpu.memory_space<vmem>>, %arg44: memref<2x1x32xf32, #tpu.memory_space<vmem>>, %arg45: memref<2x1x1xf32, #tpu.memory_space<vmem>>) attributes {dimension_semantics = [#tpu.dimension_semantics<arbitrary>], iteration_bounds = array<i64: 1>, scalar_prefetch = 0 : i64, scratch_operands = 0 : i64, tpu.core_type = #tpu.core_type<tc>, window_params = [{pipeline_mode = #tpu.pipeline_mode<synchronous>, transform_indices = @transform_0, window_bounds = array<i64: 2, 8, 1>}, {pipeline_mode = #tpu.pipeline_mode<synchronous>, transform_indices = @transform_1, window_bounds = array<i64: 8, 32>}, {pipeline_mode = #tpu.pipeline_mode<synchronous>, transform_indices = @transform_2, window_bounds = array<i64: 1, 32>}, {pipeline_mode = #tpu.pipeline_mode<synchronous>, transform_indices = @transform_3, window_bounds = array<i64: 1, 32>}, {pipeline_mode = #tpu.pipeline_mode<synchronous>, transform_indices = @transform_4, window_bounds = array<i64: 1, 32>}, {pipeline_mode = #tpu.pipeline_mode<synchronous>, transform_indices = @transform_5, window_bounds = array<i64: 1, 32>}, {pipeline_mode = #tpu.pipeline_mode<synchronous>, transform_indices = @transform_6, window_bounds = array<i64: 1, 32>}, {pipeline_mode = #tpu.pipeline_mode<synchronous>, transform_indices = @transform_7, window_bounds = array<i64: 1, 32>}, {pipeline_mode = #tpu.pipeline_mode<synchronous>, transform_indices = @transform_8, window_bounds = array<i64: 1, 32>}, {pipeline_mode = #tpu.pipeline_mode<synchronous>, transform_indices = @transform_9, window_bounds = array<i64: 1, 32>}, {pipeline_mode = #tpu.pipeline_mode<synchronous>, transform_indices = @transform_10, window_bounds = array<i64: 32, 1>}, {pipeline_mode = #tpu.pipeline_mode<synchronous>, transform_indices = @transform_11, window_bounds = array<i64: 1, 1>}, {pipeline_mode = #tpu.pipeline_mode<synchronous>, transform_indices = @transform_12, window_bounds = array<i64: 2, 32, 96>}, {pipeline_mode = #tpu.pipeline_mode<synchronous>, transform_indices = @transform_13, window_bounds = array<i64: 2, 1, 96>}, {pipeline_mode = #tpu.pipeline_mode<synchronous>, transform_indices = @transform_14, window_bounds = array<i64: 2, 32, 32>}, {pipeline_mode = #tpu.pipeline_mode<synchronous>, transform_indices = @transform_15, window_bounds = array<i64: 2, 1, 32>}, {pipeline_mode = #tpu.pipeline_mode<synchronous>, transform_indices = @transform_16, window_bounds = array<i64: 2, 1, 32>}, {pipeline_mode = #tpu.pipeline_mode<synchronous>, transform_indices = @transform_17, window_bounds = array<i64: 2, 1, 32>}, {pipeline_mode = #tpu.pipeline_mode<synchronous>, transform_indices = @transform_18, window_bounds = array<i64: 2, 1, 32>}, {pipeline_mode = #tpu.pipeline_mode<synchronous>, transform_indices = @transform_19, window_bounds = array<i64: 2, 1, 32>}, {pipeline_mode = #tpu.pipeline_mode<synchronous>, transform_indices = @transform_20, window_bounds = array<i64: 2, 32, 64>}, {pipeline_mode = #tpu.pipeline_mode<synchronous>, transform_indices = @transform_21, window_bounds = array<i64: 2, 1, 64>}, {pipeline_mode = #tpu.pipeline_mode<synchronous>, transform_indices = @transform_22, window_bounds = array<i64: 2, 64, 32>}, {pipeline_mode = #tpu.pipeline_mode<synchronous>, transform_indices = @transform_23, window_bounds = array<i64: 2, 1, 32>}, {pipeline_mode = #tpu.pipeline_mode<synchronous>, transform_indices = @transform_24, window_bounds = array<i64: 2, 32, 32>}, {pipeline_mode = #tpu.pipeline_mode<synchronous>, transform_indices = @transform_25, window_bounds = array<i64: 2, 1, 32>}, {pipeline_mode = #tpu.pipeline_mode<synchronous>, transform_indices = @transform_26, window_bounds = array<i64: 2, 32, 32>}, {pipeline_mode = #tpu.pipeline_mode<synchronous>, transform_indices = @transform_27, window_bounds = array<i64: 2, 1, 32>}, {pipeline_mode = #tpu.pipeline_mode<synchronous>, transform_indices = @transform_28, window_bounds = array<i64: 2, 32, 32>}, {pipeline_mode = #tpu.pipeline_mode<synchronous>, transform_indices = @transform_29, window_bounds = array<i64: 2, 1, 32>}, {pipeline_mode = #tpu.pipeline_mode<synchronous>, transform_indices = @transform_30, window_bounds = array<i64: 2, 32, 64>}, {pipeline_mode = #tpu.pipeline_mode<synchronous>, transform_indices = @transform_31, window_bounds = array<i64: 2, 1, 64>}, {pipeline_mode = #tpu.pipeline_mode<synchronous>, transform_indices = @transform_32, window_bounds = array<i64: 2, 32, 32>}, {pipeline_mode = #tpu.pipeline_mode<synchronous>, transform_indices = @transform_33, window_bounds = array<i64: 2, 1, 32>}, {pipeline_mode = #tpu.pipeline_mode<synchronous>, transform_indices = @transform_34, window_bounds = array<i64: 2, 1, 32>}, {pipeline_mode = #tpu.pipeline_mode<synchronous>, transform_indices = @transform_35, window_bounds = array<i64: 2, 1, 32>}, {pipeline_mode = #tpu.pipeline_mode<synchronous>, transform_indices = @transform_36, window_bounds = array<i64: 2, 1, 32>}, {pipeline_mode = #tpu.pipeline_mode<synchronous>, transform_indices = @transform_37, window_bounds = array<i64: 2, 1, 32>}, {pipeline_mode = #tpu.pipeline_mode<synchronous>, transform_indices = @transform_38, window_bounds = array<i64: 2, 1, 32>}, {pipeline_mode = #tpu.pipeline_mode<synchronous>, transform_indices = @transform_39, window_bounds = array<i64: 2, 1, 32>}, {pipeline_mode = #tpu.pipeline_mode<synchronous>, transform_indices = @transform_40, window_bounds = array<i64: 2, 32, 64>}, {pipeline_mode = #tpu.pipeline_mode<synchronous>, transform_indices = @transform_41, window_bounds = array<i64: 2, 1, 64>}, {pipeline_mode = #tpu.pipeline_mode<synchronous>, transform_indices = @transform_42, window_bounds = array<i64: 2, 64, 32>}, {pipeline_mode = #tpu.pipeline_mode<synchronous>, transform_indices = @transform_43, window_bounds = array<i64: 2, 1, 32>}, {pipeline_mode = #tpu.pipeline_mode<synchronous>, transform_indices = @transform_44, window_bounds = array<i64: 2, 1, 1>}]} {
    %c0 = arith.constant 0 : index
    %c0_0 = arith.constant 0 : index
    %c0_1 = arith.constant 0 : index
    %0 = vector.load %arg1[%c0, %c0_0, %c0_1] : memref<2x8x1xf32, #tpu.memory_space<vmem>>, vector<2x8x1xf32>
    %c0_2 = arith.constant 0 : index
    %c0_3 = arith.constant 0 : index
    %1 = vector.load %arg2[%c0_2, %c0_3] : memref<8x32xf32, #tpu.memory_space<vmem>>, vector<8x32xf32>
    %c0_4 = arith.constant 0 : index
    %c0_5 = arith.constant 0 : index
    %2 = vector.load %arg3[%c0_4, %c0_5] : memref<1x32xf32, #tpu.memory_space<vmem>>, vector<1x32xf32>
    %3 = vector.shape_cast %2 : vector<1x32xf32> to vector<1x1x32xf32>
    %4 = vector.broadcast %0 : vector<2x8x1xf32> to vector<2x8x32xf32>
    %5 = vector.broadcast %3 : vector<1x1x32xf32> to vector<2x8x32xf32>
    %6 = arith.mulf %4, %5 : vector<2x8x32xf32>
    %c0_6 = arith.constant 0 : index
    %c0_7 = arith.constant 0 : index
    %7 = vector.load %arg4[%c0_6, %c0_7] : memref<1x32xf32, #tpu.memory_space<vmem>>, vector<1x32xf32>
    %8 = vector.shape_cast %7 : vector<1x32xf32> to vector<1x1x32xf32>
    %9 = vector.broadcast %8 : vector<1x1x32xf32> to vector<2x8x32xf32>
    %10 = arith.addf %6, %9 : vector<2x8x32xf32>
    %11 = vector.shape_cast %1 : vector<8x32xf32> to vector<1x8x32xf32>
    %12 = vector.broadcast %11 : vector<1x8x32xf32> to vector<2x8x32xf32>
    %13 = arith.addf %10, %12 : vector<2x8x32xf32>
    %14 = vector.extract_strided_slice %0 {offsets = [0, 7, 0], sizes = [2, 1, 1], strides = [1, 1, 1]} : vector<2x8x1xf32> to vector<2x1x1xf32>
    %c0_8 = arith.constant 0 : index
    %c0_9 = arith.constant 0 : index
    %15 = vector.load %arg5[%c0_8, %c0_9] : memref<1x32xf32, #tpu.memory_space<vmem>>, vector<1x32xf32>
    %16 = vector.shape_cast %15 : vector<1x32xf32> to vector<1x1x32xf32>
    %17 = vector.broadcast %14 : vector<2x1x1xf32> to vector<2x1x32xf32>
    %18 = vector.broadcast %16 : vector<1x1x32xf32> to vector<2x1x32xf32>
    %19 = arith.mulf %17, %18 : vector<2x1x32xf32>
    %c0_10 = arith.constant 0 : index
    %c0_11 = arith.constant 0 : index
    %20 = vector.load %arg6[%c0_10, %c0_11] : memref<1x32xf32, #tpu.memory_space<vmem>>, vector<1x32xf32>
    %21 = vector.shape_cast %20 : vector<1x32xf32> to vector<1x1x32xf32>
    %22 = vector.broadcast %21 : vector<1x1x32xf32> to vector<2x1x32xf32>
    %23 = arith.addf %19, %22 : vector<2x1x32xf32>
    %c0_12 = arith.constant 0 : index
    %c0_13 = arith.constant 0 : index
    %c0_14 = arith.constant 0 : index
    %24 = vector.load %arg13[%c0_12, %c0_13, %c0_14] : memref<2x32x96xf32, #tpu.memory_space<vmem>>, vector<1x32x96xf32>
    %25 = vector.shape_cast %24 : vector<1x32x96xf32> to vector<32x96xf32>
    "tpu.trace_start"() <{level = 10 : i32, message = "btd,de->bte"}> : () -> ()
    %cst = arith.constant dense<0.000000e+00> : vector<2x8x96xf32>
    %26 = tpu.matmul %13, %25, %cst {dimension_numbers = #tpu.dot_dimension_numbers<[2], [0], [0, 1], [1], [0, 0, 0, 1, 1, 1], [], []>} : vector<2x8x32xf32>, vector<32x96xf32>, vector<2x8x96xf32> -> vector<2x8x96xf32>
    "tpu.trace_stop"() : () -> ()
    %c0_15 = arith.constant 0 : index
    %c0_16 = arith.constant 0 : index
    %c0_17 = arith.constant 0 : index
    %27 = vector.load %arg14[%c0_15, %c0_16, %c0_17] : memref<2x1x96xf32, #tpu.memory_space<vmem>>, vector<1x1x96xf32>
    %28 = vector.shape_cast %27 : vector<1x1x96xf32> to vector<1x96xf32>
    %29 = vector.shape_cast %28 : vector<1x96xf32> to vector<1x1x96xf32>
    %30 = vector.broadcast %29 : vector<1x1x96xf32> to vector<2x8x96xf32>
    %31 = arith.addf %26, %30 : vector<2x8x96xf32>
    %32 = vector.extract_strided_slice %31 {offsets = [0, 0, 0], sizes = [2, 8, 32], strides = [1, 1, 1]} : vector<2x8x96xf32> to vector<2x8x32xf32>
    %33 = vector.extract_strided_slice %31 {offsets = [0, 0, 32], sizes = [2, 8, 32], strides = [1, 1, 1]} : vector<2x8x96xf32> to vector<2x8x32xf32>
    %34 = vector.extract_strided_slice %31 {offsets = [0, 0, 64], sizes = [2, 8, 32], strides = [1, 1, 1]} : vector<2x8x96xf32> to vector<2x8x32xf32>
    %c0_18 = arith.constant 0 : index
    %c0_19 = arith.constant 0 : index
    %c0_20 = arith.constant 0 : index
    %35 = vector.load %arg15[%c0_18, %c0_19, %c0_20] : memref<2x32x32xf32, #tpu.memory_space<vmem>>, vector<1x32x32xf32>
    %36 = vector.shape_cast %35 : vector<1x32x32xf32> to vector<32x32xf32>
    %c0_21 = arith.constant 0 : index
    %c0_22 = arith.constant 0 : index
    %c0_23 = arith.constant 0 : index
    %37 = vector.load %arg16[%c0_21, %c0_22, %c0_23] : memref<2x1x32xf32, #tpu.memory_space<vmem>>, vector<1x1x32xf32>
    %38 = vector.shape_cast %37 : vector<1x1x32xf32> to vector<1x32xf32>
    %39 = vector.extract_strided_slice %32 {offsets = [0, 0, 0], sizes = [2, 8, 8], strides = [1, 1, 1]} : vector<2x8x32xf32> to vector<2x8x8xf32>
    %cst_24 = arith.constant 0.353553385 : f32
    %40 = vector.broadcast %cst_24 : f32 to vector<2x8x8xf32>
    %41 = arith.mulf %39, %40 : vector<2x8x8xf32>
    %42 = vector.extract_strided_slice %33 {offsets = [0, 0, 0], sizes = [2, 8, 8], strides = [1, 1, 1]} : vector<2x8x32xf32> to vector<2x8x8xf32>
    %43 = vector.extract_strided_slice %34 {offsets = [0, 0, 0], sizes = [2, 8, 8], strides = [1, 1, 1]} : vector<2x8x32xf32> to vector<2x8x8xf32>
    "tpu.trace_start"() <{level = 10 : i32, message = "bqd,bkd->bqk"}> : () -> ()
    %cst_25 = arith.constant dense<0.000000e+00> : vector<2x8x8xf32>
    %44 = tpu.matmul %41, %42, %cst_25 {dimension_numbers = #tpu.dot_dimension_numbers<[2], [2], [1], [1], [0, 0, 0, 1, 1, 1], [0], [0]>} : vector<2x8x8xf32>, vector<2x8x8xf32>, vector<2x8x8xf32> -> vector<2x8x8xf32>
    "tpu.trace_stop"() : () -> ()
    %cst_26 = arith.constant dense<0xFF800000> : vector<2x8xf32>
    %45 = vector.multi_reduction <maximumf>, %44, %cst_26 [2] : vector<2x8x8xf32> to vector<2x8xf32>
    %46 = vector.shape_cast %45 : vector<2x8xf32> to vector<2x8x1xf32>
    %47 = vector.broadcast %46 : vector<2x8x1xf32> to vector<2x8x8xf32>
    %48 = arith.subf %44, %47 : vector<2x8x8xf32>
    %49 = math.exp %48 : vector<2x8x8xf32>
    %cst_27 = arith.constant dense<0.000000e+00> : vector<2x8xf32>
    %50 = vector.multi_reduction <add>, %49, %cst_27 [2] : vector<2x8x8xf32> to vector<2x8xf32>
    %51 = vector.shape_cast %50 : vector<2x8xf32> to vector<2x8x1xf32>
    %52 = tpu.reciprocal %51 {approx = true} : vector<2x8x1xf32> -> vector<2x8x1xf32>
    %53 = vector.broadcast %52 : vector<2x8x1xf32> to vector<2x8x8xf32>
    %54 = arith.mulf %49, %53 : vector<2x8x8xf32>
    "tpu.trace_start"() <{level = 10 : i32, message = "bqk,bkd->bqd"}> : () -> ()
    %cst_28 = arith.constant dense<0.000000e+00> : vector<2x8x8xf32>
    %55 = tpu.matmul %54, %43, %cst_28 {dimension_numbers = #tpu.dot_dimension_numbers<[2], [1], [1], [2], [0, 0, 0, 1, 1, 2], [0], [0]>} : vector<2x8x8xf32>, vector<2x8x8xf32>, vector<2x8x8xf32> -> vector<2x8x8xf32>
    "tpu.trace_stop"() : () -> ()
    %56 = vector.extract_strided_slice %36 {offsets = [0, 0], sizes = [8, 32], strides = [1, 1]} : vector<32x32xf32> to vector<8x32xf32>
    "tpu.trace_start"() <{level = 10 : i32, message = "bqd,de->bqe"}> : () -> ()
    %cst_29 = arith.constant dense<0.000000e+00> : vector<2x8x32xf32>
    %57 = tpu.matmul %55, %56, %cst_29 {dimension_numbers = #tpu.dot_dimension_numbers<[2], [0], [0, 1], [1], [0, 0, 0, 1, 1, 1], [], []>} : vector<2x8x8xf32>, vector<8x32xf32>, vector<2x8x32xf32> -> vector<2x8x32xf32>
    "tpu.trace_stop"() : () -> ()
    %58 = vector.extract_strided_slice %32 {offsets = [0, 0, 8], sizes = [2, 8, 8], strides = [1, 1, 1]} : vector<2x8x32xf32> to vector<2x8x8xf32>
    %cst_30 = arith.constant 0.353553385 : f32
    %59 = vector.broadcast %cst_30 : f32 to vector<2x8x8xf32>
    %60 = arith.mulf %58, %59 : vector<2x8x8xf32>
    %61 = vector.extract_strided_slice %33 {offsets = [0, 0, 8], sizes = [2, 8, 8], strides = [1, 1, 1]} : vector<2x8x32xf32> to vector<2x8x8xf32>
    %62 = vector.extract_strided_slice %34 {offsets = [0, 0, 8], sizes = [2, 8, 8], strides = [1, 1, 1]} : vector<2x8x32xf32> to vector<2x8x8xf32>
    "tpu.trace_start"() <{level = 10 : i32, message = "bqd,bkd->bqk"}> : () -> ()
    %cst_31 = arith.constant dense<0.000000e+00> : vector<2x8x8xf32>
    %63 = tpu.matmul %60, %61, %cst_31 {dimension_numbers = #tpu.dot_dimension_numbers<[2], [2], [1], [1], [0, 0, 0, 1, 1, 1], [0], [0]>} : vector<2x8x8xf32>, vector<2x8x8xf32>, vector<2x8x8xf32> -> vector<2x8x8xf32>
    "tpu.trace_stop"() : () -> ()
    %cst_32 = arith.constant dense<0xFF800000> : vector<2x8xf32>
    %64 = vector.multi_reduction <maximumf>, %63, %cst_32 [2] : vector<2x8x8xf32> to vector<2x8xf32>
    %65 = vector.shape_cast %64 : vector<2x8xf32> to vector<2x8x1xf32>
    %66 = vector.broadcast %65 : vector<2x8x1xf32> to vector<2x8x8xf32>
    %67 = arith.subf %63, %66 : vector<2x8x8xf32>
    %68 = math.exp %67 : vector<2x8x8xf32>
    %cst_33 = arith.constant dense<0.000000e+00> : vector<2x8xf32>
    %69 = vector.multi_reduction <add>, %68, %cst_33 [2] : vector<2x8x8xf32> to vector<2x8xf32>
    %70 = vector.shape_cast %69 : vector<2x8xf32> to vector<2x8x1xf32>
    %71 = tpu.reciprocal %70 {approx = true} : vector<2x8x1xf32> -> vector<2x8x1xf32>
    %72 = vector.broadcast %71 : vector<2x8x1xf32> to vector<2x8x8xf32>
    %73 = arith.mulf %68, %72 : vector<2x8x8xf32>
    "tpu.trace_start"() <{level = 10 : i32, message = "bqk,bkd->bqd"}> : () -> ()
    %cst_34 = arith.constant dense<0.000000e+00> : vector<2x8x8xf32>
    %74 = tpu.matmul %73, %62, %cst_34 {dimension_numbers = #tpu.dot_dimension_numbers<[2], [1], [1], [2], [0, 0, 0, 1, 1, 2], [0], [0]>} : vector<2x8x8xf32>, vector<2x8x8xf32>, vector<2x8x8xf32> -> vector<2x8x8xf32>
    "tpu.trace_stop"() : () -> ()
    %75 = vector.extract_strided_slice %36 {offsets = [8, 0], sizes = [8, 32], strides = [1, 1]} : vector<32x32xf32> to vector<8x32xf32>
    "tpu.trace_start"() <{level = 10 : i32, message = "bqd,de->bqe"}> : () -> ()
    %cst_35 = arith.constant dense<0.000000e+00> : vector<2x8x32xf32>
    %76 = tpu.matmul %74, %75, %cst_35 {dimension_numbers = #tpu.dot_dimension_numbers<[2], [0], [0, 1], [1], [0, 0, 0, 1, 1, 1], [], []>} : vector<2x8x8xf32>, vector<8x32xf32>, vector<2x8x32xf32> -> vector<2x8x32xf32>
    "tpu.trace_stop"() : () -> ()
    %77 = arith.addf %57, %76 : vector<2x8x32xf32>
    %78 = vector.extract_strided_slice %32 {offsets = [0, 0, 16], sizes = [2, 8, 8], strides = [1, 1, 1]} : vector<2x8x32xf32> to vector<2x8x8xf32>
    %cst_36 = arith.constant 0.353553385 : f32
    %79 = vector.broadcast %cst_36 : f32 to vector<2x8x8xf32>
    %80 = arith.mulf %78, %79 : vector<2x8x8xf32>
    %81 = vector.extract_strided_slice %33 {offsets = [0, 0, 16], sizes = [2, 8, 8], strides = [1, 1, 1]} : vector<2x8x32xf32> to vector<2x8x8xf32>
    %82 = vector.extract_strided_slice %34 {offsets = [0, 0, 16], sizes = [2, 8, 8], strides = [1, 1, 1]} : vector<2x8x32xf32> to vector<2x8x8xf32>
    "tpu.trace_start"() <{level = 10 : i32, message = "bqd,bkd->bqk"}> : () -> ()
    %cst_37 = arith.constant dense<0.000000e+00> : vector<2x8x8xf32>
    %83 = tpu.matmul %80, %81, %cst_37 {dimension_numbers = #tpu.dot_dimension_numbers<[2], [2], [1], [1], [0, 0, 0, 1, 1, 1], [0], [0]>} : vector<2x8x8xf32>, vector<2x8x8xf32>, vector<2x8x8xf32> -> vector<2x8x8xf32>
    "tpu.trace_stop"() : () -> ()
    %cst_38 = arith.constant dense<0xFF800000> : vector<2x8xf32>
    %84 = vector.multi_reduction <maximumf>, %83, %cst_38 [2] : vector<2x8x8xf32> to vector<2x8xf32>
    %85 = vector.shape_cast %84 : vector<2x8xf32> to vector<2x8x1xf32>
    %86 = vector.broadcast %85 : vector<2x8x1xf32> to vector<2x8x8xf32>
    %87 = arith.subf %83, %86 : vector<2x8x8xf32>
    %88 = math.exp %87 : vector<2x8x8xf32>
    %cst_39 = arith.constant dense<0.000000e+00> : vector<2x8xf32>
    %89 = vector.multi_reduction <add>, %88, %cst_39 [2] : vector<2x8x8xf32> to vector<2x8xf32>
    %90 = vector.shape_cast %89 : vector<2x8xf32> to vector<2x8x1xf32>
    %91 = tpu.reciprocal %90 {approx = true} : vector<2x8x1xf32> -> vector<2x8x1xf32>
    %92 = vector.broadcast %91 : vector<2x8x1xf32> to vector<2x8x8xf32>
    %93 = arith.mulf %88, %92 : vector<2x8x8xf32>
    "tpu.trace_start"() <{level = 10 : i32, message = "bqk,bkd->bqd"}> : () -> ()
    %cst_40 = arith.constant dense<0.000000e+00> : vector<2x8x8xf32>
    %94 = tpu.matmul %93, %82, %cst_40 {dimension_numbers = #tpu.dot_dimension_numbers<[2], [1], [1], [2], [0, 0, 0, 1, 1, 2], [0], [0]>} : vector<2x8x8xf32>, vector<2x8x8xf32>, vector<2x8x8xf32> -> vector<2x8x8xf32>
    "tpu.trace_stop"() : () -> ()
    %95 = vector.extract_strided_slice %36 {offsets = [16, 0], sizes = [8, 32], strides = [1, 1]} : vector<32x32xf32> to vector<8x32xf32>
    "tpu.trace_start"() <{level = 10 : i32, message = "bqd,de->bqe"}> : () -> ()
    %cst_41 = arith.constant dense<0.000000e+00> : vector<2x8x32xf32>
    %96 = tpu.matmul %94, %95, %cst_41 {dimension_numbers = #tpu.dot_dimension_numbers<[2], [0], [0, 1], [1], [0, 0, 0, 1, 1, 1], [], []>} : vector<2x8x8xf32>, vector<8x32xf32>, vector<2x8x32xf32> -> vector<2x8x32xf32>
    "tpu.trace_stop"() : () -> ()
    %97 = arith.addf %77, %96 : vector<2x8x32xf32>
    %98 = vector.extract_strided_slice %32 {offsets = [0, 0, 24], sizes = [2, 8, 8], strides = [1, 1, 1]} : vector<2x8x32xf32> to vector<2x8x8xf32>
    %cst_42 = arith.constant 0.353553385 : f32
    %99 = vector.broadcast %cst_42 : f32 to vector<2x8x8xf32>
    %100 = arith.mulf %98, %99 : vector<2x8x8xf32>
    %101 = vector.extract_strided_slice %33 {offsets = [0, 0, 24], sizes = [2, 8, 8], strides = [1, 1, 1]} : vector<2x8x32xf32> to vector<2x8x8xf32>
    %102 = vector.extract_strided_slice %34 {offsets = [0, 0, 24], sizes = [2, 8, 8], strides = [1, 1, 1]} : vector<2x8x32xf32> to vector<2x8x8xf32>
    "tpu.trace_start"() <{level = 10 : i32, message = "bqd,bkd->bqk"}> : () -> ()
    %cst_43 = arith.constant dense<0.000000e+00> : vector<2x8x8xf32>
    %103 = tpu.matmul %100, %101, %cst_43 {dimension_numbers = #tpu.dot_dimension_numbers<[2], [2], [1], [1], [0, 0, 0, 1, 1, 1], [0], [0]>} : vector<2x8x8xf32>, vector<2x8x8xf32>, vector<2x8x8xf32> -> vector<2x8x8xf32>
    "tpu.trace_stop"() : () -> ()
    %cst_44 = arith.constant dense<0xFF800000> : vector<2x8xf32>
    %104 = vector.multi_reduction <maximumf>, %103, %cst_44 [2] : vector<2x8x8xf32> to vector<2x8xf32>
    %105 = vector.shape_cast %104 : vector<2x8xf32> to vector<2x8x1xf32>
    %106 = vector.broadcast %105 : vector<2x8x1xf32> to vector<2x8x8xf32>
    %107 = arith.subf %103, %106 : vector<2x8x8xf32>
    %108 = math.exp %107 : vector<2x8x8xf32>
    %cst_45 = arith.constant dense<0.000000e+00> : vector<2x8xf32>
    %109 = vector.multi_reduction <add>, %108, %cst_45 [2] : vector<2x8x8xf32> to vector<2x8xf32>
    %110 = vector.shape_cast %109 : vector<2x8xf32> to vector<2x8x1xf32>
    %111 = tpu.reciprocal %110 {approx = true} : vector<2x8x1xf32> -> vector<2x8x1xf32>
    %112 = vector.broadcast %111 : vector<2x8x1xf32> to vector<2x8x8xf32>
    %113 = arith.mulf %108, %112 : vector<2x8x8xf32>
    "tpu.trace_start"() <{level = 10 : i32, message = "bqk,bkd->bqd"}> : () -> ()
    %cst_46 = arith.constant dense<0.000000e+00> : vector<2x8x8xf32>
    %114 = tpu.matmul %113, %102, %cst_46 {dimension_numbers = #tpu.dot_dimension_numbers<[2], [1], [1], [2], [0, 0, 0, 1, 1, 2], [0], [0]>} : vector<2x8x8xf32>, vector<2x8x8xf32>, vector<2x8x8xf32> -> vector<2x8x8xf32>
    "tpu.trace_stop"() : () -> ()
    %115 = vector.extract_strided_slice %36 {offsets = [24, 0], sizes = [8, 32], strides = [1, 1]} : vector<32x32xf32> to vector<8x32xf32>
    "tpu.trace_start"() <{level = 10 : i32, message = "bqd,de->bqe"}> : () -> ()
    %cst_47 = arith.constant dense<0.000000e+00> : vector<2x8x32xf32>
    %116 = tpu.matmul %114, %115, %cst_47 {dimension_numbers = #tpu.dot_dimension_numbers<[2], [0], [0, 1], [1], [0, 0, 0, 1, 1, 1], [], []>} : vector<2x8x8xf32>, vector<8x32xf32>, vector<2x8x32xf32> -> vector<2x8x32xf32>
    "tpu.trace_stop"() : () -> ()
    %117 = arith.addf %97, %116 : vector<2x8x32xf32>
    %118 = vector.shape_cast %38 : vector<1x32xf32> to vector<1x1x32xf32>
    %119 = vector.broadcast %118 : vector<1x1x32xf32> to vector<2x8x32xf32>
    %120 = arith.addf %117, %119 : vector<2x8x32xf32>
    %121 = arith.addf %13, %120 : vector<2x8x32xf32>
    %c0_48 = arith.constant 0 : index
    %c0_49 = arith.constant 0 : index
    %c0_50 = arith.constant 0 : index
    %122 = vector.load %arg17[%c0_48, %c0_49, %c0_50] : memref<2x1x32xf32, #tpu.memory_space<vmem>>, vector<1x1x32xf32>
    %123 = vector.shape_cast %122 : vector<1x1x32xf32> to vector<1x32xf32>
    %c0_51 = arith.constant 0 : index
    %c0_52 = arith.constant 0 : index
    %c0_53 = arith.constant 0 : index
    %124 = vector.load %arg18[%c0_51, %c0_52, %c0_53] : memref<2x1x32xf32, #tpu.memory_space<vmem>>, vector<1x1x32xf32>
    %125 = vector.shape_cast %124 : vector<1x1x32xf32> to vector<1x32xf32>
    %cst_54 = arith.constant dense<0.000000e+00> : vector<2x8xf32>
    %126 = vector.multi_reduction <add>, %121, %cst_54 [2] : vector<2x8x32xf32> to vector<2x8xf32>
    %127 = vector.shape_cast %126 : vector<2x8xf32> to vector<2x8x1xf32>
    %cst_55 = arith.constant 3.200000e+01 : f32
    %128 = vector.broadcast %cst_55 : f32 to vector<2x8x1xf32>
    %129 = arith.divf %127, %128 : vector<2x8x1xf32>
    %130 = vector.broadcast %129 : vector<2x8x1xf32> to vector<2x8x32xf32>
    %131 = arith.subf %121, %130 : vector<2x8x32xf32>
    %132 = arith.mulf %131, %131 : vector<2x8x32xf32>
    %cst_56 = arith.constant dense<0.000000e+00> : vector<2x8xf32>
    %133 = vector.multi_reduction <add>, %132, %cst_56 [2] : vector<2x8x32xf32> to vector<2x8xf32>
    %134 = vector.shape_cast %133 : vector<2x8xf32> to vector<2x8x1xf32>
    %cst_57 = arith.constant 3.200000e+01 : f32
    %135 = vector.broadcast %cst_57 : f32 to vector<2x8x1xf32>
    %136 = arith.divf %134, %135 : vector<2x8x1xf32>
    %137 = vector.broadcast %129 : vector<2x8x1xf32> to vector<2x8x32xf32>
    %138 = arith.subf %121, %137 : vector<2x8x32xf32>
    %cst_58 = arith.constant 9.99999974E-6 : f32
    %139 = vector.broadcast %cst_58 : f32 to vector<2x8x1xf32>
    %140 = arith.addf %136, %139 : vector<2x8x1xf32>
    %141 = math.rsqrt %140 : vector<2x8x1xf32>
    %142 = vector.broadcast %141 : vector<2x8x1xf32> to vector<2x8x32xf32>
    %143 = arith.mulf %138, %142 : vector<2x8x32xf32>
    %144 = vector.shape_cast %123 : vector<1x32xf32> to vector<1x1x32xf32>
    %145 = vector.broadcast %144 : vector<1x1x32xf32> to vector<2x8x32xf32>
    %146 = arith.mulf %143, %145 : vector<2x8x32xf32>
    %147 = vector.shape_cast %125 : vector<1x32xf32> to vector<1x1x32xf32>
    %148 = vector.broadcast %147 : vector<1x1x32xf32> to vector<2x8x32xf32>
    %149 = arith.addf %146, %148 : vector<2x8x32xf32>
    %c0_59 = arith.constant 0 : index
    %c0_60 = arith.constant 0 : index
    %c0_61 = arith.constant 0 : index
    %150 = vector.load %arg21[%c0_59, %c0_60, %c0_61] : memref<2x32x64xf32, #tpu.memory_space<vmem>>, vector<1x32x64xf32>
    %151 = vector.shape_cast %150 : vector<1x32x64xf32> to vector<32x64xf32>
    %c0_62 = arith.constant 0 : index
    %c0_63 = arith.constant 0 : index
    %c0_64 = arith.constant 0 : index
    %152 = vector.load %arg22[%c0_62, %c0_63, %c0_64] : memref<2x1x64xf32, #tpu.memory_space<vmem>>, vector<1x1x64xf32>
    %153 = vector.shape_cast %152 : vector<1x1x64xf32> to vector<1x64xf32>
    %c0_65 = arith.constant 0 : index
    %c0_66 = arith.constant 0 : index
    %c0_67 = arith.constant 0 : index
    %154 = vector.load %arg23[%c0_65, %c0_66, %c0_67] : memref<2x64x32xf32, #tpu.memory_space<vmem>>, vector<1x64x32xf32>
    %155 = vector.shape_cast %154 : vector<1x64x32xf32> to vector<64x32xf32>
    %c0_68 = arith.constant 0 : index
    %c0_69 = arith.constant 0 : index
    %c0_70 = arith.constant 0 : index
    %156 = vector.load %arg24[%c0_68, %c0_69, %c0_70] : memref<2x1x32xf32, #tpu.memory_space<vmem>>, vector<1x1x32xf32>
    %157 = vector.shape_cast %156 : vector<1x1x32xf32> to vector<1x32xf32>
    "tpu.trace_start"() <{level = 10 : i32, message = "btd,df->btf"}> : () -> ()
    %cst_71 = arith.constant dense<0.000000e+00> : vector<2x8x64xf32>
    %158 = tpu.matmul %149, %151, %cst_71 {dimension_numbers = #tpu.dot_dimension_numbers<[2], [0], [0, 1], [1], [0, 0, 0, 1, 1, 1], [], []>} : vector<2x8x32xf32>, vector<32x64xf32>, vector<2x8x64xf32> -> vector<2x8x64xf32>
    "tpu.trace_stop"() : () -> ()
    %159 = vector.shape_cast %153 : vector<1x64xf32> to vector<1x1x64xf32>
    %160 = vector.broadcast %159 : vector<1x1x64xf32> to vector<2x8x64xf32>
    %161 = arith.addf %158, %160 : vector<2x8x64xf32>
    %cst_72 = arith.constant 0.000000e+00 : f32
    %162 = vector.broadcast %cst_72 : f32 to vector<2x8x64xf32>
    %163 = arith.maximumf %161, %162 : vector<2x8x64xf32>
    "tpu.trace_start"() <{level = 10 : i32, message = "btf,fd->btd"}> : () -> ()
    %cst_73 = arith.constant dense<0.000000e+00> : vector<2x8x32xf32>
    %164 = tpu.matmul %163, %155, %cst_73 {dimension_numbers = #tpu.dot_dimension_numbers<[2], [0], [0, 1], [1], [0, 0, 0, 1, 1, 1], [], []>} : vector<2x8x64xf32>, vector<64x32xf32>, vector<2x8x32xf32> -> vector<2x8x32xf32>
    "tpu.trace_stop"() : () -> ()
    %165 = vector.shape_cast %157 : vector<1x32xf32> to vector<1x1x32xf32>
    %166 = vector.broadcast %165 : vector<1x1x32xf32> to vector<2x8x32xf32>
    %167 = arith.addf %164, %166 : vector<2x8x32xf32>
    %168 = arith.addf %149, %167 : vector<2x8x32xf32>
    %c0_74 = arith.constant 0 : index
    %c0_75 = arith.constant 0 : index
    %c0_76 = arith.constant 0 : index
    %169 = vector.load %arg19[%c0_74, %c0_75, %c0_76] : memref<2x1x32xf32, #tpu.memory_space<vmem>>, vector<1x1x32xf32>
    %170 = vector.shape_cast %169 : vector<1x1x32xf32> to vector<1x32xf32>
    %c0_77 = arith.constant 0 : index
    %c0_78 = arith.constant 0 : index
    %c0_79 = arith.constant 0 : index
    %171 = vector.load %arg20[%c0_77, %c0_78, %c0_79] : memref<2x1x32xf32, #tpu.memory_space<vmem>>, vector<1x1x32xf32>
    %172 = vector.shape_cast %171 : vector<1x1x32xf32> to vector<1x32xf32>
    %cst_80 = arith.constant dense<0.000000e+00> : vector<2x8xf32>
    %173 = vector.multi_reduction <add>, %168, %cst_80 [2] : vector<2x8x32xf32> to vector<2x8xf32>
    %174 = vector.shape_cast %173 : vector<2x8xf32> to vector<2x8x1xf32>
    %cst_81 = arith.constant 3.200000e+01 : f32
    %175 = vector.broadcast %cst_81 : f32 to vector<2x8x1xf32>
    %176 = arith.divf %174, %175 : vector<2x8x1xf32>
    %177 = vector.broadcast %176 : vector<2x8x1xf32> to vector<2x8x32xf32>
    %178 = arith.subf %168, %177 : vector<2x8x32xf32>
    %179 = arith.mulf %178, %178 : vector<2x8x32xf32>
    %cst_82 = arith.constant dense<0.000000e+00> : vector<2x8xf32>
    %180 = vector.multi_reduction <add>, %179, %cst_82 [2] : vector<2x8x32xf32> to vector<2x8xf32>
    %181 = vector.shape_cast %180 : vector<2x8xf32> to vector<2x8x1xf32>
    %cst_83 = arith.constant 3.200000e+01 : f32
    %182 = vector.broadcast %cst_83 : f32 to vector<2x8x1xf32>
    %183 = arith.divf %181, %182 : vector<2x8x1xf32>
    %184 = vector.broadcast %176 : vector<2x8x1xf32> to vector<2x8x32xf32>
    %185 = arith.subf %168, %184 : vector<2x8x32xf32>
    %cst_84 = arith.constant 9.99999974E-6 : f32
    %186 = vector.broadcast %cst_84 : f32 to vector<2x8x1xf32>
    %187 = arith.addf %183, %186 : vector<2x8x1xf32>
    %188 = math.rsqrt %187 : vector<2x8x1xf32>
    %189 = vector.broadcast %188 : vector<2x8x1xf32> to vector<2x8x32xf32>
    %190 = arith.mulf %185, %189 : vector<2x8x32xf32>
    %191 = vector.shape_cast %170 : vector<1x32xf32> to vector<1x1x32xf32>
    %192 = vector.broadcast %191 : vector<1x1x32xf32> to vector<2x8x32xf32>
    %193 = arith.mulf %190, %192 : vector<2x8x32xf32>
    %194 = vector.shape_cast %172 : vector<1x32xf32> to vector<1x1x32xf32>
    %195 = vector.broadcast %194 : vector<1x1x32xf32> to vector<2x8x32xf32>
    %196 = arith.addf %193, %195 : vector<2x8x32xf32>
    %c1 = arith.constant 1 : index
    %c0_85 = arith.constant 0 : index
    %c0_86 = arith.constant 0 : index
    %197 = vector.load %arg13[%c1, %c0_85, %c0_86] : memref<2x32x96xf32, #tpu.memory_space<vmem>>, vector<1x32x96xf32>
    %198 = vector.shape_cast %197 : vector<1x32x96xf32> to vector<32x96xf32>
    "tpu.trace_start"() <{level = 10 : i32, message = "btd,de->bte"}> : () -> ()
    %cst_87 = arith.constant dense<0.000000e+00> : vector<2x8x96xf32>
    %199 = tpu.matmul %196, %198, %cst_87 {dimension_numbers = #tpu.dot_dimension_numbers<[2], [0], [0, 1], [1], [0, 0, 0, 1, 1, 1], [], []>} : vector<2x8x32xf32>, vector<32x96xf32>, vector<2x8x96xf32> -> vector<2x8x96xf32>
    "tpu.trace_stop"() : () -> ()
    %c1_88 = arith.constant 1 : index
    %c0_89 = arith.constant 0 : index
    %c0_90 = arith.constant 0 : index
    %200 = vector.load %arg14[%c1_88, %c0_89, %c0_90] : memref<2x1x96xf32, #tpu.memory_space<vmem>>, vector<1x1x96xf32>
    %201 = vector.shape_cast %200 : vector<1x1x96xf32> to vector<1x96xf32>
    %202 = vector.shape_cast %201 : vector<1x96xf32> to vector<1x1x96xf32>
    %203 = vector.broadcast %202 : vector<1x1x96xf32> to vector<2x8x96xf32>
    %204 = arith.addf %199, %203 : vector<2x8x96xf32>
    %205 = vector.extract_strided_slice %204 {offsets = [0, 0, 0], sizes = [2, 8, 32], strides = [1, 1, 1]} : vector<2x8x96xf32> to vector<2x8x32xf32>
    %206 = vector.extract_strided_slice %204 {offsets = [0, 0, 32], sizes = [2, 8, 32], strides = [1, 1, 1]} : vector<2x8x96xf32> to vector<2x8x32xf32>
    %207 = vector.extract_strided_slice %204 {offsets = [0, 0, 64], sizes = [2, 8, 32], strides = [1, 1, 1]} : vector<2x8x96xf32> to vector<2x8x32xf32>
    %c1_91 = arith.constant 1 : index
    %c0_92 = arith.constant 0 : index
    %c0_93 = arith.constant 0 : index
    %208 = vector.load %arg15[%c1_91, %c0_92, %c0_93] : memref<2x32x32xf32, #tpu.memory_space<vmem>>, vector<1x32x32xf32>
    %209 = vector.shape_cast %208 : vector<1x32x32xf32> to vector<32x32xf32>
    %c1_94 = arith.constant 1 : index
    %c0_95 = arith.constant 0 : index
    %c0_96 = arith.constant 0 : index
    %210 = vector.load %arg16[%c1_94, %c0_95, %c0_96] : memref<2x1x32xf32, #tpu.memory_space<vmem>>, vector<1x1x32xf32>
    %211 = vector.shape_cast %210 : vector<1x1x32xf32> to vector<1x32xf32>
    %212 = vector.extract_strided_slice %205 {offsets = [0, 0, 0], sizes = [2, 8, 8], strides = [1, 1, 1]} : vector<2x8x32xf32> to vector<2x8x8xf32>
    %cst_97 = arith.constant 0.353553385 : f32
    %213 = vector.broadcast %cst_97 : f32 to vector<2x8x8xf32>
    %214 = arith.mulf %212, %213 : vector<2x8x8xf32>
    %215 = vector.extract_strided_slice %206 {offsets = [0, 0, 0], sizes = [2, 8, 8], strides = [1, 1, 1]} : vector<2x8x32xf32> to vector<2x8x8xf32>
    %216 = vector.extract_strided_slice %207 {offsets = [0, 0, 0], sizes = [2, 8, 8], strides = [1, 1, 1]} : vector<2x8x32xf32> to vector<2x8x8xf32>
    "tpu.trace_start"() <{level = 10 : i32, message = "bqd,bkd->bqk"}> : () -> ()
    %cst_98 = arith.constant dense<0.000000e+00> : vector<2x8x8xf32>
    %217 = tpu.matmul %214, %215, %cst_98 {dimension_numbers = #tpu.dot_dimension_numbers<[2], [2], [1], [1], [0, 0, 0, 1, 1, 1], [0], [0]>} : vector<2x8x8xf32>, vector<2x8x8xf32>, vector<2x8x8xf32> -> vector<2x8x8xf32>
    "tpu.trace_stop"() : () -> ()
    %cst_99 = arith.constant dense<0xFF800000> : vector<2x8xf32>
    %218 = vector.multi_reduction <maximumf>, %217, %cst_99 [2] : vector<2x8x8xf32> to vector<2x8xf32>
    %219 = vector.shape_cast %218 : vector<2x8xf32> to vector<2x8x1xf32>
    %220 = vector.broadcast %219 : vector<2x8x1xf32> to vector<2x8x8xf32>
    %221 = arith.subf %217, %220 : vector<2x8x8xf32>
    %222 = math.exp %221 : vector<2x8x8xf32>
    %cst_100 = arith.constant dense<0.000000e+00> : vector<2x8xf32>
    %223 = vector.multi_reduction <add>, %222, %cst_100 [2] : vector<2x8x8xf32> to vector<2x8xf32>
    %224 = vector.shape_cast %223 : vector<2x8xf32> to vector<2x8x1xf32>
    %225 = tpu.reciprocal %224 {approx = true} : vector<2x8x1xf32> -> vector<2x8x1xf32>
    %226 = vector.broadcast %225 : vector<2x8x1xf32> to vector<2x8x8xf32>
    %227 = arith.mulf %222, %226 : vector<2x8x8xf32>
    "tpu.trace_start"() <{level = 10 : i32, message = "bqk,bkd->bqd"}> : () -> ()
    %cst_101 = arith.constant dense<0.000000e+00> : vector<2x8x8xf32>
    %228 = tpu.matmul %227, %216, %cst_101 {dimension_numbers = #tpu.dot_dimension_numbers<[2], [1], [1], [2], [0, 0, 0, 1, 1, 2], [0], [0]>} : vector<2x8x8xf32>, vector<2x8x8xf32>, vector<2x8x8xf32> -> vector<2x8x8xf32>
    "tpu.trace_stop"() : () -> ()
    %229 = vector.extract_strided_slice %209 {offsets = [0, 0], sizes = [8, 32], strides = [1, 1]} : vector<32x32xf32> to vector<8x32xf32>
    "tpu.trace_start"() <{level = 10 : i32, message = "bqd,de->bqe"}> : () -> ()
    %cst_102 = arith.constant dense<0.000000e+00> : vector<2x8x32xf32>
    %230 = tpu.matmul %228, %229, %cst_102 {dimension_numbers = #tpu.dot_dimension_numbers<[2], [0], [0, 1], [1], [0, 0, 0, 1, 1, 1], [], []>} : vector<2x8x8xf32>, vector<8x32xf32>, vector<2x8x32xf32> -> vector<2x8x32xf32>
    "tpu.trace_stop"() : () -> ()
    %231 = vector.extract_strided_slice %205 {offsets = [0, 0, 8], sizes = [2, 8, 8], strides = [1, 1, 1]} : vector<2x8x32xf32> to vector<2x8x8xf32>
    %cst_103 = arith.constant 0.353553385 : f32
    %232 = vector.broadcast %cst_103 : f32 to vector<2x8x8xf32>
    %233 = arith.mulf %231, %232 : vector<2x8x8xf32>
    %234 = vector.extract_strided_slice %206 {offsets = [0, 0, 8], sizes = [2, 8, 8], strides = [1, 1, 1]} : vector<2x8x32xf32> to vector<2x8x8xf32>
    %235 = vector.extract_strided_slice %207 {offsets = [0, 0, 8], sizes = [2, 8, 8], strides = [1, 1, 1]} : vector<2x8x32xf32> to vector<2x8x8xf32>
    "tpu.trace_start"() <{level = 10 : i32, message = "bqd,bkd->bqk"}> : () -> ()
    %cst_104 = arith.constant dense<0.000000e+00> : vector<2x8x8xf32>
    %236 = tpu.matmul %233, %234, %cst_104 {dimension_numbers = #tpu.dot_dimension_numbers<[2], [2], [1], [1], [0, 0, 0, 1, 1, 1], [0], [0]>} : vector<2x8x8xf32>, vector<2x8x8xf32>, vector<2x8x8xf32> -> vector<2x8x8xf32>
    "tpu.trace_stop"() : () -> ()
    %cst_105 = arith.constant dense<0xFF800000> : vector<2x8xf32>
    %237 = vector.multi_reduction <maximumf>, %236, %cst_105 [2] : vector<2x8x8xf32> to vector<2x8xf32>
    %238 = vector.shape_cast %237 : vector<2x8xf32> to vector<2x8x1xf32>
    %239 = vector.broadcast %238 : vector<2x8x1xf32> to vector<2x8x8xf32>
    %240 = arith.subf %236, %239 : vector<2x8x8xf32>
    %241 = math.exp %240 : vector<2x8x8xf32>
    %cst_106 = arith.constant dense<0.000000e+00> : vector<2x8xf32>
    %242 = vector.multi_reduction <add>, %241, %cst_106 [2] : vector<2x8x8xf32> to vector<2x8xf32>
    %243 = vector.shape_cast %242 : vector<2x8xf32> to vector<2x8x1xf32>
    %244 = tpu.reciprocal %243 {approx = true} : vector<2x8x1xf32> -> vector<2x8x1xf32>
    %245 = vector.broadcast %244 : vector<2x8x1xf32> to vector<2x8x8xf32>
    %246 = arith.mulf %241, %245 : vector<2x8x8xf32>
    "tpu.trace_start"() <{level = 10 : i32, message = "bqk,bkd->bqd"}> : () -> ()
    %cst_107 = arith.constant dense<0.000000e+00> : vector<2x8x8xf32>
    %247 = tpu.matmul %246, %235, %cst_107 {dimension_numbers = #tpu.dot_dimension_numbers<[2], [1], [1], [2], [0, 0, 0, 1, 1, 2], [0], [0]>} : vector<2x8x8xf32>, vector<2x8x8xf32>, vector<2x8x8xf32> -> vector<2x8x8xf32>
    "tpu.trace_stop"() : () -> ()
    %248 = vector.extract_strided_slice %209 {offsets = [8, 0], sizes = [8, 32], strides = [1, 1]} : vector<32x32xf32> to vector<8x32xf32>
    "tpu.trace_start"() <{level = 10 : i32, message = "bqd,de->bqe"}> : () -> ()
    %cst_108 = arith.constant dense<0.000000e+00> : vector<2x8x32xf32>
    %249 = tpu.matmul %247, %248, %cst_108 {dimension_numbers = #tpu.dot_dimension_numbers<[2], [0], [0, 1], [1], [0, 0, 0, 1, 1, 1], [], []>} : vector<2x8x8xf32>, vector<8x32xf32>, vector<2x8x32xf32> -> vector<2x8x32xf32>
    "tpu.trace_stop"() : () -> ()
    %250 = arith.addf %230, %249 : vector<2x8x32xf32>
    %251 = vector.extract_strided_slice %205 {offsets = [0, 0, 16], sizes = [2, 8, 8], strides = [1, 1, 1]} : vector<2x8x32xf32> to vector<2x8x8xf32>
    %cst_109 = arith.constant 0.353553385 : f32
    %252 = vector.broadcast %cst_109 : f32 to vector<2x8x8xf32>
    %253 = arith.mulf %251, %252 : vector<2x8x8xf32>
    %254 = vector.extract_strided_slice %206 {offsets = [0, 0, 16], sizes = [2, 8, 8], strides = [1, 1, 1]} : vector<2x8x32xf32> to vector<2x8x8xf32>
    %255 = vector.extract_strided_slice %207 {offsets = [0, 0, 16], sizes = [2, 8, 8], strides = [1, 1, 1]} : vector<2x8x32xf32> to vector<2x8x8xf32>
    "tpu.trace_start"() <{level = 10 : i32, message = "bqd,bkd->bqk"}> : () -> ()
    %cst_110 = arith.constant dense<0.000000e+00> : vector<2x8x8xf32>
    %256 = tpu.matmul %253, %254, %cst_110 {dimension_numbers = #tpu.dot_dimension_numbers<[2], [2], [1], [1], [0, 0, 0, 1, 1, 1], [0], [0]>} : vector<2x8x8xf32>, vector<2x8x8xf32>, vector<2x8x8xf32> -> vector<2x8x8xf32>
    "tpu.trace_stop"() : () -> ()
    %cst_111 = arith.constant dense<0xFF800000> : vector<2x8xf32>
    %257 = vector.multi_reduction <maximumf>, %256, %cst_111 [2] : vector<2x8x8xf32> to vector<2x8xf32>
    %258 = vector.shape_cast %257 : vector<2x8xf32> to vector<2x8x1xf32>
    %259 = vector.broadcast %258 : vector<2x8x1xf32> to vector<2x8x8xf32>
    %260 = arith.subf %256, %259 : vector<2x8x8xf32>
    %261 = math.exp %260 : vector<2x8x8xf32>
    %cst_112 = arith.constant dense<0.000000e+00> : vector<2x8xf32>
    %262 = vector.multi_reduction <add>, %261, %cst_112 [2] : vector<2x8x8xf32> to vector<2x8xf32>
    %263 = vector.shape_cast %262 : vector<2x8xf32> to vector<2x8x1xf32>
    %264 = tpu.reciprocal %263 {approx = true} : vector<2x8x1xf32> -> vector<2x8x1xf32>
    %265 = vector.broadcast %264 : vector<2x8x1xf32> to vector<2x8x8xf32>
    %266 = arith.mulf %261, %265 : vector<2x8x8xf32>
    "tpu.trace_start"() <{level = 10 : i32, message = "bqk,bkd->bqd"}> : () -> ()
    %cst_113 = arith.constant dense<0.000000e+00> : vector<2x8x8xf32>
    %267 = tpu.matmul %266, %255, %cst_113 {dimension_numbers = #tpu.dot_dimension_numbers<[2], [1], [1], [2], [0, 0, 0, 1, 1, 2], [0], [0]>} : vector<2x8x8xf32>, vector<2x8x8xf32>, vector<2x8x8xf32> -> vector<2x8x8xf32>
    "tpu.trace_stop"() : () -> ()
    %268 = vector.extract_strided_slice %209 {offsets = [16, 0], sizes = [8, 32], strides = [1, 1]} : vector<32x32xf32> to vector<8x32xf32>
    "tpu.trace_start"() <{level = 10 : i32, message = "bqd,de->bqe"}> : () -> ()
    %cst_114 = arith.constant dense<0.000000e+00> : vector<2x8x32xf32>
    %269 = tpu.matmul %267, %268, %cst_114 {dimension_numbers = #tpu.dot_dimension_numbers<[2], [0], [0, 1], [1], [0, 0, 0, 1, 1, 1], [], []>} : vector<2x8x8xf32>, vector<8x32xf32>, vector<2x8x32xf32> -> vector<2x8x32xf32>
    "tpu.trace_stop"() : () -> ()
    %270 = arith.addf %250, %269 : vector<2x8x32xf32>
    %271 = vector.extract_strided_slice %205 {offsets = [0, 0, 24], sizes = [2, 8, 8], strides = [1, 1, 1]} : vector<2x8x32xf32> to vector<2x8x8xf32>
    %cst_115 = arith.constant 0.353553385 : f32
    %272 = vector.broadcast %cst_115 : f32 to vector<2x8x8xf32>
    %273 = arith.mulf %271, %272 : vector<2x8x8xf32>
    %274 = vector.extract_strided_slice %206 {offsets = [0, 0, 24], sizes = [2, 8, 8], strides = [1, 1, 1]} : vector<2x8x32xf32> to vector<2x8x8xf32>
    %275 = vector.extract_strided_slice %207 {offsets = [0, 0, 24], sizes = [2, 8, 8], strides = [1, 1, 1]} : vector<2x8x32xf32> to vector<2x8x8xf32>
    "tpu.trace_start"() <{level = 10 : i32, message = "bqd,bkd->bqk"}> : () -> ()
    %cst_116 = arith.constant dense<0.000000e+00> : vector<2x8x8xf32>
    %276 = tpu.matmul %273, %274, %cst_116 {dimension_numbers = #tpu.dot_dimension_numbers<[2], [2], [1], [1], [0, 0, 0, 1, 1, 1], [0], [0]>} : vector<2x8x8xf32>, vector<2x8x8xf32>, vector<2x8x8xf32> -> vector<2x8x8xf32>
    "tpu.trace_stop"() : () -> ()
    %cst_117 = arith.constant dense<0xFF800000> : vector<2x8xf32>
    %277 = vector.multi_reduction <maximumf>, %276, %cst_117 [2] : vector<2x8x8xf32> to vector<2x8xf32>
    %278 = vector.shape_cast %277 : vector<2x8xf32> to vector<2x8x1xf32>
    %279 = vector.broadcast %278 : vector<2x8x1xf32> to vector<2x8x8xf32>
    %280 = arith.subf %276, %279 : vector<2x8x8xf32>
    %281 = math.exp %280 : vector<2x8x8xf32>
    %cst_118 = arith.constant dense<0.000000e+00> : vector<2x8xf32>
    %282 = vector.multi_reduction <add>, %281, %cst_118 [2] : vector<2x8x8xf32> to vector<2x8xf32>
    %283 = vector.shape_cast %282 : vector<2x8xf32> to vector<2x8x1xf32>
    %284 = tpu.reciprocal %283 {approx = true} : vector<2x8x1xf32> -> vector<2x8x1xf32>
    %285 = vector.broadcast %284 : vector<2x8x1xf32> to vector<2x8x8xf32>
    %286 = arith.mulf %281, %285 : vector<2x8x8xf32>
    "tpu.trace_start"() <{level = 10 : i32, message = "bqk,bkd->bqd"}> : () -> ()
    %cst_119 = arith.constant dense<0.000000e+00> : vector<2x8x8xf32>
    %287 = tpu.matmul %286, %275, %cst_119 {dimension_numbers = #tpu.dot_dimension_numbers<[2], [1], [1], [2], [0, 0, 0, 1, 1, 2], [0], [0]>} : vector<2x8x8xf32>, vector<2x8x8xf32>, vector<2x8x8xf32> -> vector<2x8x8xf32>
    "tpu.trace_stop"() : () -> ()
    %288 = vector.extract_strided_slice %209 {offsets = [24, 0], sizes = [8, 32], strides = [1, 1]} : vector<32x32xf32> to vector<8x32xf32>
    "tpu.trace_start"() <{level = 10 : i32, message = "bqd,de->bqe"}> : () -> ()
    %cst_120 = arith.constant dense<0.000000e+00> : vector<2x8x32xf32>
    %289 = tpu.matmul %287, %288, %cst_120 {dimension_numbers = #tpu.dot_dimension_numbers<[2], [0], [0, 1], [1], [0, 0, 0, 1, 1, 1], [], []>} : vector<2x8x8xf32>, vector<8x32xf32>, vector<2x8x32xf32> -> vector<2x8x32xf32>
    "tpu.trace_stop"() : () -> ()
    %290 = arith.addf %270, %289 : vector<2x8x32xf32>
    %291 = vector.shape_cast %211 : vector<1x32xf32> to vector<1x1x32xf32>
    %292 = vector.broadcast %291 : vector<1x1x32xf32> to vector<2x8x32xf32>
    %293 = arith.addf %290, %292 : vector<2x8x32xf32>
    %294 = arith.addf %196, %293 : vector<2x8x32xf32>
    %c1_121 = arith.constant 1 : index
    %c0_122 = arith.constant 0 : index
    %c0_123 = arith.constant 0 : index
    %295 = vector.load %arg17[%c1_121, %c0_122, %c0_123] : memref<2x1x32xf32, #tpu.memory_space<vmem>>, vector<1x1x32xf32>
    %296 = vector.shape_cast %295 : vector<1x1x32xf32> to vector<1x32xf32>
    %c1_124 = arith.constant 1 : index
    %c0_125 = arith.constant 0 : index
    %c0_126 = arith.constant 0 : index
    %297 = vector.load %arg18[%c1_124, %c0_125, %c0_126] : memref<2x1x32xf32, #tpu.memory_space<vmem>>, vector<1x1x32xf32>
    %298 = vector.shape_cast %297 : vector<1x1x32xf32> to vector<1x32xf32>
    %cst_127 = arith.constant dense<0.000000e+00> : vector<2x8xf32>
    %299 = vector.multi_reduction <add>, %294, %cst_127 [2] : vector<2x8x32xf32> to vector<2x8xf32>
    %300 = vector.shape_cast %299 : vector<2x8xf32> to vector<2x8x1xf32>
    %cst_128 = arith.constant 3.200000e+01 : f32
    %301 = vector.broadcast %cst_128 : f32 to vector<2x8x1xf32>
    %302 = arith.divf %300, %301 : vector<2x8x1xf32>
    %303 = vector.broadcast %302 : vector<2x8x1xf32> to vector<2x8x32xf32>
    %304 = arith.subf %294, %303 : vector<2x8x32xf32>
    %305 = arith.mulf %304, %304 : vector<2x8x32xf32>
    %cst_129 = arith.constant dense<0.000000e+00> : vector<2x8xf32>
    %306 = vector.multi_reduction <add>, %305, %cst_129 [2] : vector<2x8x32xf32> to vector<2x8xf32>
    %307 = vector.shape_cast %306 : vector<2x8xf32> to vector<2x8x1xf32>
    %cst_130 = arith.constant 3.200000e+01 : f32
    %308 = vector.broadcast %cst_130 : f32 to vector<2x8x1xf32>
    %309 = arith.divf %307, %308 : vector<2x8x1xf32>
    %310 = vector.broadcast %302 : vector<2x8x1xf32> to vector<2x8x32xf32>
    %311 = arith.subf %294, %310 : vector<2x8x32xf32>
    %cst_131 = arith.constant 9.99999974E-6 : f32
    %312 = vector.broadcast %cst_131 : f32 to vector<2x8x1xf32>
    %313 = arith.addf %309, %312 : vector<2x8x1xf32>
    %314 = math.rsqrt %313 : vector<2x8x1xf32>
    %315 = vector.broadcast %314 : vector<2x8x1xf32> to vector<2x8x32xf32>
    %316 = arith.mulf %311, %315 : vector<2x8x32xf32>
    %317 = vector.shape_cast %296 : vector<1x32xf32> to vector<1x1x32xf32>
    %318 = vector.broadcast %317 : vector<1x1x32xf32> to vector<2x8x32xf32>
    %319 = arith.mulf %316, %318 : vector<2x8x32xf32>
    %320 = vector.shape_cast %298 : vector<1x32xf32> to vector<1x1x32xf32>
    %321 = vector.broadcast %320 : vector<1x1x32xf32> to vector<2x8x32xf32>
    %322 = arith.addf %319, %321 : vector<2x8x32xf32>
    %c1_132 = arith.constant 1 : index
    %c0_133 = arith.constant 0 : index
    %c0_134 = arith.constant 0 : index
    %323 = vector.load %arg21[%c1_132, %c0_133, %c0_134] : memref<2x32x64xf32, #tpu.memory_space<vmem>>, vector<1x32x64xf32>
    %324 = vector.shape_cast %323 : vector<1x32x64xf32> to vector<32x64xf32>
    %c1_135 = arith.constant 1 : index
    %c0_136 = arith.constant 0 : index
    %c0_137 = arith.constant 0 : index
    %325 = vector.load %arg22[%c1_135, %c0_136, %c0_137] : memref<2x1x64xf32, #tpu.memory_space<vmem>>, vector<1x1x64xf32>
    %326 = vector.shape_cast %325 : vector<1x1x64xf32> to vector<1x64xf32>
    %c1_138 = arith.constant 1 : index
    %c0_139 = arith.constant 0 : index
    %c0_140 = arith.constant 0 : index
    %327 = vector.load %arg23[%c1_138, %c0_139, %c0_140] : memref<2x64x32xf32, #tpu.memory_space<vmem>>, vector<1x64x32xf32>
    %328 = vector.shape_cast %327 : vector<1x64x32xf32> to vector<64x32xf32>
    %c1_141 = arith.constant 1 : index
    %c0_142 = arith.constant 0 : index
    %c0_143 = arith.constant 0 : index
    %329 = vector.load %arg24[%c1_141, %c0_142, %c0_143] : memref<2x1x32xf32, #tpu.memory_space<vmem>>, vector<1x1x32xf32>
    %330 = vector.shape_cast %329 : vector<1x1x32xf32> to vector<1x32xf32>
    "tpu.trace_start"() <{level = 10 : i32, message = "btd,df->btf"}> : () -> ()
    %cst_144 = arith.constant dense<0.000000e+00> : vector<2x8x64xf32>
    %331 = tpu.matmul %322, %324, %cst_144 {dimension_numbers = #tpu.dot_dimension_numbers<[2], [0], [0, 1], [1], [0, 0, 0, 1, 1, 1], [], []>} : vector<2x8x32xf32>, vector<32x64xf32>, vector<2x8x64xf32> -> vector<2x8x64xf32>
    "tpu.trace_stop"() : () -> ()
    %332 = vector.shape_cast %326 : vector<1x64xf32> to vector<1x1x64xf32>
    %333 = vector.broadcast %332 : vector<1x1x64xf32> to vector<2x8x64xf32>
    %334 = arith.addf %331, %333 : vector<2x8x64xf32>
    %cst_145 = arith.constant 0.000000e+00 : f32
    %335 = vector.broadcast %cst_145 : f32 to vector<2x8x64xf32>
    %336 = arith.maximumf %334, %335 : vector<2x8x64xf32>
    "tpu.trace_start"() <{level = 10 : i32, message = "btf,fd->btd"}> : () -> ()
    %cst_146 = arith.constant dense<0.000000e+00> : vector<2x8x32xf32>
    %337 = tpu.matmul %336, %328, %cst_146 {dimension_numbers = #tpu.dot_dimension_numbers<[2], [0], [0, 1], [1], [0, 0, 0, 1, 1, 1], [], []>} : vector<2x8x64xf32>, vector<64x32xf32>, vector<2x8x32xf32> -> vector<2x8x32xf32>
    "tpu.trace_stop"() : () -> ()
    %338 = vector.shape_cast %330 : vector<1x32xf32> to vector<1x1x32xf32>
    %339 = vector.broadcast %338 : vector<1x1x32xf32> to vector<2x8x32xf32>
    %340 = arith.addf %337, %339 : vector<2x8x32xf32>
    %341 = arith.addf %322, %340 : vector<2x8x32xf32>
    %c1_147 = arith.constant 1 : index
    %c0_148 = arith.constant 0 : index
    %c0_149 = arith.constant 0 : index
    %342 = vector.load %arg19[%c1_147, %c0_148, %c0_149] : memref<2x1x32xf32, #tpu.memory_space<vmem>>, vector<1x1x32xf32>
    %343 = vector.shape_cast %342 : vector<1x1x32xf32> to vector<1x32xf32>
    %c1_150 = arith.constant 1 : index
    %c0_151 = arith.constant 0 : index
    %c0_152 = arith.constant 0 : index
    %344 = vector.load %arg20[%c1_150, %c0_151, %c0_152] : memref<2x1x32xf32, #tpu.memory_space<vmem>>, vector<1x1x32xf32>
    %345 = vector.shape_cast %344 : vector<1x1x32xf32> to vector<1x32xf32>
    %cst_153 = arith.constant dense<0.000000e+00> : vector<2x8xf32>
    %346 = vector.multi_reduction <add>, %341, %cst_153 [2] : vector<2x8x32xf32> to vector<2x8xf32>
    %347 = vector.shape_cast %346 : vector<2x8xf32> to vector<2x8x1xf32>
    %cst_154 = arith.constant 3.200000e+01 : f32
    %348 = vector.broadcast %cst_154 : f32 to vector<2x8x1xf32>
    %349 = arith.divf %347, %348 : vector<2x8x1xf32>
    %350 = vector.broadcast %349 : vector<2x8x1xf32> to vector<2x8x32xf32>
    %351 = arith.subf %341, %350 : vector<2x8x32xf32>
    %352 = arith.mulf %351, %351 : vector<2x8x32xf32>
    %cst_155 = arith.constant dense<0.000000e+00> : vector<2x8xf32>
    %353 = vector.multi_reduction <add>, %352, %cst_155 [2] : vector<2x8x32xf32> to vector<2x8xf32>
    %354 = vector.shape_cast %353 : vector<2x8xf32> to vector<2x8x1xf32>
    %cst_156 = arith.constant 3.200000e+01 : f32
    %355 = vector.broadcast %cst_156 : f32 to vector<2x8x1xf32>
    %356 = arith.divf %354, %355 : vector<2x8x1xf32>
    %357 = vector.broadcast %349 : vector<2x8x1xf32> to vector<2x8x32xf32>
    %358 = arith.subf %341, %357 : vector<2x8x32xf32>
    %cst_157 = arith.constant 9.99999974E-6 : f32
    %359 = vector.broadcast %cst_157 : f32 to vector<2x8x1xf32>
    %360 = arith.addf %356, %359 : vector<2x8x1xf32>
    %361 = math.rsqrt %360 : vector<2x8x1xf32>
    %362 = vector.broadcast %361 : vector<2x8x1xf32> to vector<2x8x32xf32>
    %363 = arith.mulf %358, %362 : vector<2x8x32xf32>
    %364 = vector.shape_cast %343 : vector<1x32xf32> to vector<1x1x32xf32>
    %365 = vector.broadcast %364 : vector<1x1x32xf32> to vector<2x8x32xf32>
    %366 = arith.mulf %363, %365 : vector<2x8x32xf32>
    %367 = vector.shape_cast %345 : vector<1x32xf32> to vector<1x1x32xf32>
    %368 = vector.broadcast %367 : vector<1x1x32xf32> to vector<2x8x32xf32>
    %369 = arith.addf %366, %368 : vector<2x8x32xf32>
    %c0_158 = arith.constant 0 : index
    %c0_159 = arith.constant 0 : index
    %370 = vector.load %arg7[%c0_158, %c0_159] : memref<1x32xf32, #tpu.memory_space<vmem>>, vector<1x32xf32>
    %c0_160 = arith.constant 0 : index
    %c0_161 = arith.constant 0 : index
    %371 = vector.load %arg8[%c0_160, %c0_161] : memref<1x32xf32, #tpu.memory_space<vmem>>, vector<1x32xf32>
    %cst_162 = arith.constant dense<0.000000e+00> : vector<2x8xf32>
    %372 = vector.multi_reduction <add>, %369, %cst_162 [2] : vector<2x8x32xf32> to vector<2x8xf32>
    %373 = vector.shape_cast %372 : vector<2x8xf32> to vector<2x8x1xf32>
    %cst_163 = arith.constant 3.200000e+01 : f32
    %374 = vector.broadcast %cst_163 : f32 to vector<2x8x1xf32>
    %375 = arith.divf %373, %374 : vector<2x8x1xf32>
    %376 = vector.broadcast %375 : vector<2x8x1xf32> to vector<2x8x32xf32>
    %377 = arith.subf %369, %376 : vector<2x8x32xf32>
    %378 = arith.mulf %377, %377 : vector<2x8x32xf32>
    %cst_164 = arith.constant dense<0.000000e+00> : vector<2x8xf32>
    %379 = vector.multi_reduction <add>, %378, %cst_164 [2] : vector<2x8x32xf32> to vector<2x8xf32>
    %380 = vector.shape_cast %379 : vector<2x8xf32> to vector<2x8x1xf32>
    %cst_165 = arith.constant 3.200000e+01 : f32
    %381 = vector.broadcast %cst_165 : f32 to vector<2x8x1xf32>
    %382 = arith.divf %380, %381 : vector<2x8x1xf32>
    %383 = vector.broadcast %375 : vector<2x8x1xf32> to vector<2x8x32xf32>
    %384 = arith.subf %369, %383 : vector<2x8x32xf32>
    %cst_166 = arith.constant 9.99999974E-6 : f32
    %385 = vector.broadcast %cst_166 : f32 to vector<2x8x1xf32>
    %386 = arith.addf %382, %385 : vector<2x8x1xf32>
    %387 = math.rsqrt %386 : vector<2x8x1xf32>
    %388 = vector.broadcast %387 : vector<2x8x1xf32> to vector<2x8x32xf32>
    %389 = arith.mulf %384, %388 : vector<2x8x32xf32>
    %390 = vector.shape_cast %370 : vector<1x32xf32> to vector<1x1x32xf32>
    %391 = vector.broadcast %390 : vector<1x1x32xf32> to vector<2x8x32xf32>
    %392 = arith.mulf %389, %391 : vector<2x8x32xf32>
    %393 = vector.shape_cast %371 : vector<1x32xf32> to vector<1x1x32xf32>
    %394 = vector.broadcast %393 : vector<1x1x32xf32> to vector<2x8x32xf32>
    %395 = arith.addf %392, %394 : vector<2x8x32xf32>
    %c0_167 = arith.constant 0 : index
    %c0_168 = arith.constant 0 : index
    %c0_169 = arith.constant 0 : index
    %396 = vector.load %arg25[%c0_167, %c0_168, %c0_169] : memref<2x32x32xf32, #tpu.memory_space<vmem>>, vector<1x32x32xf32>
    %397 = vector.shape_cast %396 : vector<1x32x32xf32> to vector<32x32xf32>
    "tpu.trace_start"() <{level = 10 : i32, message = "btd,de->bte"}> : () -> ()
    %cst_170 = arith.constant dense<0.000000e+00> : vector<2x1x32xf32>
    %398 = tpu.matmul %23, %397, %cst_170 {dimension_numbers = #tpu.dot_dimension_numbers<[2], [0], [0, 1], [1], [0, 0, 0, 1, 1, 1], [], []>} : vector<2x1x32xf32>, vector<32x32xf32>, vector<2x1x32xf32> -> vector<2x1x32xf32>
    "tpu.trace_stop"() : () -> ()
    %c0_171 = arith.constant 0 : index
    %c0_172 = arith.constant 0 : index
    %c0_173 = arith.constant 0 : index
    %399 = vector.load %arg26[%c0_171, %c0_172, %c0_173] : memref<2x1x32xf32, #tpu.memory_space<vmem>>, vector<1x1x32xf32>
    %400 = vector.shape_cast %399 : vector<1x1x32xf32> to vector<1x32xf32>
    %401 = vector.shape_cast %400 : vector<1x32xf32> to vector<1x1x32xf32>
    %402 = vector.broadcast %401 : vector<1x1x32xf32> to vector<2x1x32xf32>
    %403 = arith.addf %398, %402 : vector<2x1x32xf32>
    %c0_174 = arith.constant 0 : index
    %c0_175 = arith.constant 0 : index
    %c0_176 = arith.constant 0 : index
    %404 = vector.load %arg27[%c0_174, %c0_175, %c0_176] : memref<2x32x32xf32, #tpu.memory_space<vmem>>, vector<1x32x32xf32>
    %405 = vector.shape_cast %404 : vector<1x32x32xf32> to vector<32x32xf32>
    "tpu.trace_start"() <{level = 10 : i32, message = "btd,de->bte"}> : () -> ()
    %cst_177 = arith.constant dense<0.000000e+00> : vector<2x1x32xf32>
    %406 = tpu.matmul %403, %405, %cst_177 {dimension_numbers = #tpu.dot_dimension_numbers<[2], [0], [0, 1], [1], [0, 0, 0, 1, 1, 1], [], []>} : vector<2x1x32xf32>, vector<32x32xf32>, vector<2x1x32xf32> -> vector<2x1x32xf32>
    "tpu.trace_stop"() : () -> ()
    %c0_178 = arith.constant 0 : index
    %c0_179 = arith.constant 0 : index
    %c0_180 = arith.constant 0 : index
    %407 = vector.load %arg28[%c0_178, %c0_179, %c0_180] : memref<2x1x32xf32, #tpu.memory_space<vmem>>, vector<1x1x32xf32>
    %408 = vector.shape_cast %407 : vector<1x1x32xf32> to vector<1x32xf32>
    %409 = vector.shape_cast %408 : vector<1x32xf32> to vector<1x1x32xf32>
    %410 = vector.broadcast %409 : vector<1x1x32xf32> to vector<2x1x32xf32>
    %411 = arith.addf %406, %410 : vector<2x1x32xf32>
    %412 = arith.addf %23, %411 : vector<2x1x32xf32>
    %c0_181 = arith.constant 0 : index
    %c0_182 = arith.constant 0 : index
    %c0_183 = arith.constant 0 : index
    %413 = vector.load %arg35[%c0_181, %c0_182, %c0_183] : memref<2x1x32xf32, #tpu.memory_space<vmem>>, vector<1x1x32xf32>
    %414 = vector.shape_cast %413 : vector<1x1x32xf32> to vector<1x32xf32>
    %c0_184 = arith.constant 0 : index
    %c0_185 = arith.constant 0 : index
    %c0_186 = arith.constant 0 : index
    %415 = vector.load %arg36[%c0_184, %c0_185, %c0_186] : memref<2x1x32xf32, #tpu.memory_space<vmem>>, vector<1x1x32xf32>
    %416 = vector.shape_cast %415 : vector<1x1x32xf32> to vector<1x32xf32>
    %cst_187 = arith.constant dense<0.000000e+00> : vector<2x1xf32>
    %417 = vector.multi_reduction <add>, %412, %cst_187 [2] : vector<2x1x32xf32> to vector<2x1xf32>
    %418 = vector.shape_cast %417 : vector<2x1xf32> to vector<2x1x1xf32>
    %cst_188 = arith.constant 3.200000e+01 : f32
    %419 = vector.broadcast %cst_188 : f32 to vector<2x1x1xf32>
    %420 = arith.divf %418, %419 : vector<2x1x1xf32>
    %421 = vector.broadcast %420 : vector<2x1x1xf32> to vector<2x1x32xf32>
    %422 = arith.subf %412, %421 : vector<2x1x32xf32>
    %423 = arith.mulf %422, %422 : vector<2x1x32xf32>
    %cst_189 = arith.constant dense<0.000000e+00> : vector<2x1xf32>
    %424 = vector.multi_reduction <add>, %423, %cst_189 [2] : vector<2x1x32xf32> to vector<2x1xf32>
    %425 = vector.shape_cast %424 : vector<2x1xf32> to vector<2x1x1xf32>
    %cst_190 = arith.constant 3.200000e+01 : f32
    %426 = vector.broadcast %cst_190 : f32 to vector<2x1x1xf32>
    %427 = arith.divf %425, %426 : vector<2x1x1xf32>
    %428 = vector.broadcast %420 : vector<2x1x1xf32> to vector<2x1x32xf32>
    %429 = arith.subf %412, %428 : vector<2x1x32xf32>
    %cst_191 = arith.constant 9.99999974E-6 : f32
    %430 = vector.broadcast %cst_191 : f32 to vector<2x1x1xf32>
    %431 = arith.addf %427, %430 : vector<2x1x1xf32>
    %432 = math.rsqrt %431 : vector<2x1x1xf32>
    %433 = vector.broadcast %432 : vector<2x1x1xf32> to vector<2x1x32xf32>
    %434 = arith.mulf %429, %433 : vector<2x1x32xf32>
    %435 = vector.shape_cast %414 : vector<1x32xf32> to vector<1x1x32xf32>
    %436 = vector.broadcast %435 : vector<1x1x32xf32> to vector<2x1x32xf32>
    %437 = arith.mulf %434, %436 : vector<2x1x32xf32>
    %438 = vector.shape_cast %416 : vector<1x32xf32> to vector<1x1x32xf32>
    %439 = vector.broadcast %438 : vector<1x1x32xf32> to vector<2x1x32xf32>
    %440 = arith.addf %437, %439 : vector<2x1x32xf32>
    %c0_192 = arith.constant 0 : index
    %c0_193 = arith.constant 0 : index
    %c0_194 = arith.constant 0 : index
    %441 = vector.load %arg29[%c0_192, %c0_193, %c0_194] : memref<2x32x32xf32, #tpu.memory_space<vmem>>, vector<1x32x32xf32>
    %442 = vector.shape_cast %441 : vector<1x32x32xf32> to vector<32x32xf32>
    "tpu.trace_start"() <{level = 10 : i32, message = "btd,de->bte"}> : () -> ()
    %cst_195 = arith.constant dense<0.000000e+00> : vector<2x1x32xf32>
    %443 = tpu.matmul %440, %442, %cst_195 {dimension_numbers = #tpu.dot_dimension_numbers<[2], [0], [0, 1], [1], [0, 0, 0, 1, 1, 1], [], []>} : vector<2x1x32xf32>, vector<32x32xf32>, vector<2x1x32xf32> -> vector<2x1x32xf32>
    "tpu.trace_stop"() : () -> ()
    %c0_196 = arith.constant 0 : index
    %c0_197 = arith.constant 0 : index
    %c0_198 = arith.constant 0 : index
    %444 = vector.load %arg30[%c0_196, %c0_197, %c0_198] : memref<2x1x32xf32, #tpu.memory_space<vmem>>, vector<1x1x32xf32>
    %445 = vector.shape_cast %444 : vector<1x1x32xf32> to vector<1x32xf32>
    %446 = vector.shape_cast %445 : vector<1x32xf32> to vector<1x1x32xf32>
    %447 = vector.broadcast %446 : vector<1x1x32xf32> to vector<2x1x32xf32>
    %448 = arith.addf %443, %447 : vector<2x1x32xf32>
    %c0_199 = arith.constant 0 : index
    %c0_200 = arith.constant 0 : index
    %c0_201 = arith.constant 0 : index
    %449 = vector.load %arg31[%c0_199, %c0_200, %c0_201] : memref<2x32x64xf32, #tpu.memory_space<vmem>>, vector<1x32x64xf32>
    %450 = vector.shape_cast %449 : vector<1x32x64xf32> to vector<32x64xf32>
    "tpu.trace_start"() <{level = 10 : i32, message = "bsd,de->bse"}> : () -> ()
    %cst_202 = arith.constant dense<0.000000e+00> : vector<2x8x64xf32>
    %451 = tpu.matmul %395, %450, %cst_202 {dimension_numbers = #tpu.dot_dimension_numbers<[2], [0], [0, 1], [1], [0, 0, 0, 1, 1, 1], [], []>} : vector<2x8x32xf32>, vector<32x64xf32>, vector<2x8x64xf32> -> vector<2x8x64xf32>
    "tpu.trace_stop"() : () -> ()
    %c0_203 = arith.constant 0 : index
    %c0_204 = arith.constant 0 : index
    %c0_205 = arith.constant 0 : index
    %452 = vector.load %arg32[%c0_203, %c0_204, %c0_205] : memref<2x1x64xf32, #tpu.memory_space<vmem>>, vector<1x1x64xf32>
    %453 = vector.shape_cast %452 : vector<1x1x64xf32> to vector<1x64xf32>
    %454 = vector.shape_cast %453 : vector<1x64xf32> to vector<1x1x64xf32>
    %455 = vector.broadcast %454 : vector<1x1x64xf32> to vector<2x8x64xf32>
    %456 = arith.addf %451, %455 : vector<2x8x64xf32>
    %457 = vector.extract_strided_slice %456 {offsets = [0, 0, 0], sizes = [2, 8, 32], strides = [1, 1, 1]} : vector<2x8x64xf32> to vector<2x8x32xf32>
    %458 = vector.extract_strided_slice %456 {offsets = [0, 0, 32], sizes = [2, 8, 32], strides = [1, 1, 1]} : vector<2x8x64xf32> to vector<2x8x32xf32>
    %c0_206 = arith.constant 0 : index
    %c0_207 = arith.constant 0 : index
    %c0_208 = arith.constant 0 : index
    %459 = vector.load %arg33[%c0_206, %c0_207, %c0_208] : memref<2x32x32xf32, #tpu.memory_space<vmem>>, vector<1x32x32xf32>
    %460 = vector.shape_cast %459 : vector<1x32x32xf32> to vector<32x32xf32>
    %c0_209 = arith.constant 0 : index
    %c0_210 = arith.constant 0 : index
    %c0_211 = arith.constant 0 : index
    %461 = vector.load %arg34[%c0_209, %c0_210, %c0_211] : memref<2x1x32xf32, #tpu.memory_space<vmem>>, vector<1x1x32xf32>
    %462 = vector.shape_cast %461 : vector<1x1x32xf32> to vector<1x32xf32>
    %463 = vector.extract_strided_slice %448 {offsets = [0, 0, 0], sizes = [2, 1, 8], strides = [1, 1, 1]} : vector<2x1x32xf32> to vector<2x1x8xf32>
    %cst_212 = arith.constant 0.353553385 : f32
    %464 = vector.broadcast %cst_212 : f32 to vector<2x1x8xf32>
    %465 = arith.mulf %463, %464 : vector<2x1x8xf32>
    %466 = vector.extract_strided_slice %457 {offsets = [0, 0, 0], sizes = [2, 8, 8], strides = [1, 1, 1]} : vector<2x8x32xf32> to vector<2x8x8xf32>
    %467 = vector.extract_strided_slice %458 {offsets = [0, 0, 0], sizes = [2, 8, 8], strides = [1, 1, 1]} : vector<2x8x32xf32> to vector<2x8x8xf32>
    "tpu.trace_start"() <{level = 10 : i32, message = "bqd,bkd->bqk"}> : () -> ()
    %cst_213 = arith.constant dense<0.000000e+00> : vector<2x1x8xf32>
    %468 = tpu.matmul %465, %466, %cst_213 {dimension_numbers = #tpu.dot_dimension_numbers<[2], [2], [1], [1], [0, 0, 0, 1, 1, 1], [0], [0]>} : vector<2x1x8xf32>, vector<2x8x8xf32>, vector<2x1x8xf32> -> vector<2x1x8xf32>
    "tpu.trace_stop"() : () -> ()
    %cst_214 = arith.constant dense<0xFF800000> : vector<2x1xf32>
    %469 = vector.multi_reduction <maximumf>, %468, %cst_214 [2] : vector<2x1x8xf32> to vector<2x1xf32>
    %470 = vector.shape_cast %469 : vector<2x1xf32> to vector<2x1x1xf32>
    %471 = vector.broadcast %470 : vector<2x1x1xf32> to vector<2x1x8xf32>
    %472 = arith.subf %468, %471 : vector<2x1x8xf32>
    %473 = math.exp %472 : vector<2x1x8xf32>
    %cst_215 = arith.constant dense<0.000000e+00> : vector<2x1xf32>
    %474 = vector.multi_reduction <add>, %473, %cst_215 [2] : vector<2x1x8xf32> to vector<2x1xf32>
    %475 = vector.shape_cast %474 : vector<2x1xf32> to vector<2x1x1xf32>
    %476 = tpu.reciprocal %475 {approx = true} : vector<2x1x1xf32> -> vector<2x1x1xf32>
    %477 = vector.broadcast %476 : vector<2x1x1xf32> to vector<2x1x8xf32>
    %478 = arith.mulf %473, %477 : vector<2x1x8xf32>
    "tpu.trace_start"() <{level = 10 : i32, message = "bqk,bkd->bqd"}> : () -> ()
    %cst_216 = arith.constant dense<0.000000e+00> : vector<2x1x8xf32>
    %479 = tpu.matmul %478, %467, %cst_216 {dimension_numbers = #tpu.dot_dimension_numbers<[2], [1], [1], [2], [0, 0, 0, 1, 1, 2], [0], [0]>} : vector<2x1x8xf32>, vector<2x8x8xf32>, vector<2x1x8xf32> -> vector<2x1x8xf32>
    "tpu.trace_stop"() : () -> ()
    %480 = vector.extract_strided_slice %460 {offsets = [0, 0], sizes = [8, 32], strides = [1, 1]} : vector<32x32xf32> to vector<8x32xf32>
    "tpu.trace_start"() <{level = 10 : i32, message = "bqd,de->bqe"}> : () -> ()
    %cst_217 = arith.constant dense<0.000000e+00> : vector<2x1x32xf32>
    %481 = tpu.matmul %479, %480, %cst_217 {dimension_numbers = #tpu.dot_dimension_numbers<[2], [0], [0, 1], [1], [0, 0, 0, 1, 1, 1], [], []>} : vector<2x1x8xf32>, vector<8x32xf32>, vector<2x1x32xf32> -> vector<2x1x32xf32>
    "tpu.trace_stop"() : () -> ()
    %482 = vector.extract_strided_slice %448 {offsets = [0, 0, 8], sizes = [2, 1, 8], strides = [1, 1, 1]} : vector<2x1x32xf32> to vector<2x1x8xf32>
    %cst_218 = arith.constant 0.353553385 : f32
    %483 = vector.broadcast %cst_218 : f32 to vector<2x1x8xf32>
    %484 = arith.mulf %482, %483 : vector<2x1x8xf32>
    %485 = vector.extract_strided_slice %457 {offsets = [0, 0, 8], sizes = [2, 8, 8], strides = [1, 1, 1]} : vector<2x8x32xf32> to vector<2x8x8xf32>
    %486 = vector.extract_strided_slice %458 {offsets = [0, 0, 8], sizes = [2, 8, 8], strides = [1, 1, 1]} : vector<2x8x32xf32> to vector<2x8x8xf32>
    "tpu.trace_start"() <{level = 10 : i32, message = "bqd,bkd->bqk"}> : () -> ()
    %cst_219 = arith.constant dense<0.000000e+00> : vector<2x1x8xf32>
    %487 = tpu.matmul %484, %485, %cst_219 {dimension_numbers = #tpu.dot_dimension_numbers<[2], [2], [1], [1], [0, 0, 0, 1, 1, 1], [0], [0]>} : vector<2x1x8xf32>, vector<2x8x8xf32>, vector<2x1x8xf32> -> vector<2x1x8xf32>
    "tpu.trace_stop"() : () -> ()
    %cst_220 = arith.constant dense<0xFF800000> : vector<2x1xf32>
    %488 = vector.multi_reduction <maximumf>, %487, %cst_220 [2] : vector<2x1x8xf32> to vector<2x1xf32>
    %489 = vector.shape_cast %488 : vector<2x1xf32> to vector<2x1x1xf32>
    %490 = vector.broadcast %489 : vector<2x1x1xf32> to vector<2x1x8xf32>
    %491 = arith.subf %487, %490 : vector<2x1x8xf32>
    %492 = math.exp %491 : vector<2x1x8xf32>
    %cst_221 = arith.constant dense<0.000000e+00> : vector<2x1xf32>
    %493 = vector.multi_reduction <add>, %492, %cst_221 [2] : vector<2x1x8xf32> to vector<2x1xf32>
    %494 = vector.shape_cast %493 : vector<2x1xf32> to vector<2x1x1xf32>
    %495 = tpu.reciprocal %494 {approx = true} : vector<2x1x1xf32> -> vector<2x1x1xf32>
    %496 = vector.broadcast %495 : vector<2x1x1xf32> to vector<2x1x8xf32>
    %497 = arith.mulf %492, %496 : vector<2x1x8xf32>
    "tpu.trace_start"() <{level = 10 : i32, message = "bqk,bkd->bqd"}> : () -> ()
    %cst_222 = arith.constant dense<0.000000e+00> : vector<2x1x8xf32>
    %498 = tpu.matmul %497, %486, %cst_222 {dimension_numbers = #tpu.dot_dimension_numbers<[2], [1], [1], [2], [0, 0, 0, 1, 1, 2], [0], [0]>} : vector<2x1x8xf32>, vector<2x8x8xf32>, vector<2x1x8xf32> -> vector<2x1x8xf32>
    "tpu.trace_stop"() : () -> ()
    %499 = vector.extract_strided_slice %460 {offsets = [8, 0], sizes = [8, 32], strides = [1, 1]} : vector<32x32xf32> to vector<8x32xf32>
    "tpu.trace_start"() <{level = 10 : i32, message = "bqd,de->bqe"}> : () -> ()
    %cst_223 = arith.constant dense<0.000000e+00> : vector<2x1x32xf32>
    %500 = tpu.matmul %498, %499, %cst_223 {dimension_numbers = #tpu.dot_dimension_numbers<[2], [0], [0, 1], [1], [0, 0, 0, 1, 1, 1], [], []>} : vector<2x1x8xf32>, vector<8x32xf32>, vector<2x1x32xf32> -> vector<2x1x32xf32>
    "tpu.trace_stop"() : () -> ()
    %501 = arith.addf %481, %500 : vector<2x1x32xf32>
    %502 = vector.extract_strided_slice %448 {offsets = [0, 0, 16], sizes = [2, 1, 8], strides = [1, 1, 1]} : vector<2x1x32xf32> to vector<2x1x8xf32>
    %cst_224 = arith.constant 0.353553385 : f32
    %503 = vector.broadcast %cst_224 : f32 to vector<2x1x8xf32>
    %504 = arith.mulf %502, %503 : vector<2x1x8xf32>
    %505 = vector.extract_strided_slice %457 {offsets = [0, 0, 16], sizes = [2, 8, 8], strides = [1, 1, 1]} : vector<2x8x32xf32> to vector<2x8x8xf32>
    %506 = vector.extract_strided_slice %458 {offsets = [0, 0, 16], sizes = [2, 8, 8], strides = [1, 1, 1]} : vector<2x8x32xf32> to vector<2x8x8xf32>
    "tpu.trace_start"() <{level = 10 : i32, message = "bqd,bkd->bqk"}> : () -> ()
    %cst_225 = arith.constant dense<0.000000e+00> : vector<2x1x8xf32>
    %507 = tpu.matmul %504, %505, %cst_225 {dimension_numbers = #tpu.dot_dimension_numbers<[2], [2], [1], [1], [0, 0, 0, 1, 1, 1], [0], [0]>} : vector<2x1x8xf32>, vector<2x8x8xf32>, vector<2x1x8xf32> -> vector<2x1x8xf32>
    "tpu.trace_stop"() : () -> ()
    %cst_226 = arith.constant dense<0xFF800000> : vector<2x1xf32>
    %508 = vector.multi_reduction <maximumf>, %507, %cst_226 [2] : vector<2x1x8xf32> to vector<2x1xf32>
    %509 = vector.shape_cast %508 : vector<2x1xf32> to vector<2x1x1xf32>
    %510 = vector.broadcast %509 : vector<2x1x1xf32> to vector<2x1x8xf32>
    %511 = arith.subf %507, %510 : vector<2x1x8xf32>
    %512 = math.exp %511 : vector<2x1x8xf32>
    %cst_227 = arith.constant dense<0.000000e+00> : vector<2x1xf32>
    %513 = vector.multi_reduction <add>, %512, %cst_227 [2] : vector<2x1x8xf32> to vector<2x1xf32>
    %514 = vector.shape_cast %513 : vector<2x1xf32> to vector<2x1x1xf32>
    %515 = tpu.reciprocal %514 {approx = true} : vector<2x1x1xf32> -> vector<2x1x1xf32>
    %516 = vector.broadcast %515 : vector<2x1x1xf32> to vector<2x1x8xf32>
    %517 = arith.mulf %512, %516 : vector<2x1x8xf32>
    "tpu.trace_start"() <{level = 10 : i32, message = "bqk,bkd->bqd"}> : () -> ()
    %cst_228 = arith.constant dense<0.000000e+00> : vector<2x1x8xf32>
    %518 = tpu.matmul %517, %506, %cst_228 {dimension_numbers = #tpu.dot_dimension_numbers<[2], [1], [1], [2], [0, 0, 0, 1, 1, 2], [0], [0]>} : vector<2x1x8xf32>, vector<2x8x8xf32>, vector<2x1x8xf32> -> vector<2x1x8xf32>
    "tpu.trace_stop"() : () -> ()
    %519 = vector.extract_strided_slice %460 {offsets = [16, 0], sizes = [8, 32], strides = [1, 1]} : vector<32x32xf32> to vector<8x32xf32>
    "tpu.trace_start"() <{level = 10 : i32, message = "bqd,de->bqe"}> : () -> ()
    %cst_229 = arith.constant dense<0.000000e+00> : vector<2x1x32xf32>
    %520 = tpu.matmul %518, %519, %cst_229 {dimension_numbers = #tpu.dot_dimension_numbers<[2], [0], [0, 1], [1], [0, 0, 0, 1, 1, 1], [], []>} : vector<2x1x8xf32>, vector<8x32xf32>, vector<2x1x32xf32> -> vector<2x1x32xf32>
    "tpu.trace_stop"() : () -> ()
    %521 = arith.addf %501, %520 : vector<2x1x32xf32>
    %522 = vector.extract_strided_slice %448 {offsets = [0, 0, 24], sizes = [2, 1, 8], strides = [1, 1, 1]} : vector<2x1x32xf32> to vector<2x1x8xf32>
    %cst_230 = arith.constant 0.353553385 : f32
    %523 = vector.broadcast %cst_230 : f32 to vector<2x1x8xf32>
    %524 = arith.mulf %522, %523 : vector<2x1x8xf32>
    %525 = vector.extract_strided_slice %457 {offsets = [0, 0, 24], sizes = [2, 8, 8], strides = [1, 1, 1]} : vector<2x8x32xf32> to vector<2x8x8xf32>
    %526 = vector.extract_strided_slice %458 {offsets = [0, 0, 24], sizes = [2, 8, 8], strides = [1, 1, 1]} : vector<2x8x32xf32> to vector<2x8x8xf32>
    "tpu.trace_start"() <{level = 10 : i32, message = "bqd,bkd->bqk"}> : () -> ()
    %cst_231 = arith.constant dense<0.000000e+00> : vector<2x1x8xf32>
    %527 = tpu.matmul %524, %525, %cst_231 {dimension_numbers = #tpu.dot_dimension_numbers<[2], [2], [1], [1], [0, 0, 0, 1, 1, 1], [0], [0]>} : vector<2x1x8xf32>, vector<2x8x8xf32>, vector<2x1x8xf32> -> vector<2x1x8xf32>
    "tpu.trace_stop"() : () -> ()
    %cst_232 = arith.constant dense<0xFF800000> : vector<2x1xf32>
    %528 = vector.multi_reduction <maximumf>, %527, %cst_232 [2] : vector<2x1x8xf32> to vector<2x1xf32>
    %529 = vector.shape_cast %528 : vector<2x1xf32> to vector<2x1x1xf32>
    %530 = vector.broadcast %529 : vector<2x1x1xf32> to vector<2x1x8xf32>
    %531 = arith.subf %527, %530 : vector<2x1x8xf32>
    %532 = math.exp %531 : vector<2x1x8xf32>
    %cst_233 = arith.constant dense<0.000000e+00> : vector<2x1xf32>
    %533 = vector.multi_reduction <add>, %532, %cst_233 [2] : vector<2x1x8xf32> to vector<2x1xf32>
    %534 = vector.shape_cast %533 : vector<2x1xf32> to vector<2x1x1xf32>
    %535 = tpu.reciprocal %534 {approx = true} : vector<2x1x1xf32> -> vector<2x1x1xf32>
    %536 = vector.broadcast %535 : vector<2x1x1xf32> to vector<2x1x8xf32>
    %537 = arith.mulf %532, %536 : vector<2x1x8xf32>
    "tpu.trace_start"() <{level = 10 : i32, message = "bqk,bkd->bqd"}> : () -> ()
    %cst_234 = arith.constant dense<0.000000e+00> : vector<2x1x8xf32>
    %538 = tpu.matmul %537, %526, %cst_234 {dimension_numbers = #tpu.dot_dimension_numbers<[2], [1], [1], [2], [0, 0, 0, 1, 1, 2], [0], [0]>} : vector<2x1x8xf32>, vector<2x8x8xf32>, vector<2x1x8xf32> -> vector<2x1x8xf32>
    "tpu.trace_stop"() : () -> ()
    %539 = vector.extract_strided_slice %460 {offsets = [24, 0], sizes = [8, 32], strides = [1, 1]} : vector<32x32xf32> to vector<8x32xf32>
    "tpu.trace_start"() <{level = 10 : i32, message = "bqd,de->bqe"}> : () -> ()
    %cst_235 = arith.constant dense<0.000000e+00> : vector<2x1x32xf32>
    %540 = tpu.matmul %538, %539, %cst_235 {dimension_numbers = #tpu.dot_dimension_numbers<[2], [0], [0, 1], [1], [0, 0, 0, 1, 1, 1], [], []>} : vector<2x1x8xf32>, vector<8x32xf32>, vector<2x1x32xf32> -> vector<2x1x32xf32>
    "tpu.trace_stop"() : () -> ()
    %541 = arith.addf %521, %540 : vector<2x1x32xf32>
    %542 = vector.shape_cast %462 : vector<1x32xf32> to vector<1x1x32xf32>
    %543 = vector.broadcast %542 : vector<1x1x32xf32> to vector<2x1x32xf32>
    %544 = arith.addf %541, %543 : vector<2x1x32xf32>
    %545 = arith.addf %440, %544 : vector<2x1x32xf32>
    %c0_236 = arith.constant 0 : index
    %c0_237 = arith.constant 0 : index
    %c0_238 = arith.constant 0 : index
    %546 = vector.load %arg37[%c0_236, %c0_237, %c0_238] : memref<2x1x32xf32, #tpu.memory_space<vmem>>, vector<1x1x32xf32>
    %547 = vector.shape_cast %546 : vector<1x1x32xf32> to vector<1x32xf32>
    %c0_239 = arith.constant 0 : index
    %c0_240 = arith.constant 0 : index
    %c0_241 = arith.constant 0 : index
    %548 = vector.load %arg38[%c0_239, %c0_240, %c0_241] : memref<2x1x32xf32, #tpu.memory_space<vmem>>, vector<1x1x32xf32>
    %549 = vector.shape_cast %548 : vector<1x1x32xf32> to vector<1x32xf32>
    %cst_242 = arith.constant dense<0.000000e+00> : vector<2x1xf32>
    %550 = vector.multi_reduction <add>, %545, %cst_242 [2] : vector<2x1x32xf32> to vector<2x1xf32>
    %551 = vector.shape_cast %550 : vector<2x1xf32> to vector<2x1x1xf32>
    %cst_243 = arith.constant 3.200000e+01 : f32
    %552 = vector.broadcast %cst_243 : f32 to vector<2x1x1xf32>
    %553 = arith.divf %551, %552 : vector<2x1x1xf32>
    %554 = vector.broadcast %553 : vector<2x1x1xf32> to vector<2x1x32xf32>
    %555 = arith.subf %545, %554 : vector<2x1x32xf32>
    %556 = arith.mulf %555, %555 : vector<2x1x32xf32>
    %cst_244 = arith.constant dense<0.000000e+00> : vector<2x1xf32>
    %557 = vector.multi_reduction <add>, %556, %cst_244 [2] : vector<2x1x32xf32> to vector<2x1xf32>
    %558 = vector.shape_cast %557 : vector<2x1xf32> to vector<2x1x1xf32>
    %cst_245 = arith.constant 3.200000e+01 : f32
    %559 = vector.broadcast %cst_245 : f32 to vector<2x1x1xf32>
    %560 = arith.divf %558, %559 : vector<2x1x1xf32>
    %561 = vector.broadcast %553 : vector<2x1x1xf32> to vector<2x1x32xf32>
    %562 = arith.subf %545, %561 : vector<2x1x32xf32>
    %cst_246 = arith.constant 9.99999974E-6 : f32
    %563 = vector.broadcast %cst_246 : f32 to vector<2x1x1xf32>
    %564 = arith.addf %560, %563 : vector<2x1x1xf32>
    %565 = math.rsqrt %564 : vector<2x1x1xf32>
    %566 = vector.broadcast %565 : vector<2x1x1xf32> to vector<2x1x32xf32>
    %567 = arith.mulf %562, %566 : vector<2x1x32xf32>
    %568 = vector.shape_cast %547 : vector<1x32xf32> to vector<1x1x32xf32>
    %569 = vector.broadcast %568 : vector<1x1x32xf32> to vector<2x1x32xf32>
    %570 = arith.mulf %567, %569 : vector<2x1x32xf32>
    %571 = vector.shape_cast %549 : vector<1x32xf32> to vector<1x1x32xf32>
    %572 = vector.broadcast %571 : vector<1x1x32xf32> to vector<2x1x32xf32>
    %573 = arith.addf %570, %572 : vector<2x1x32xf32>
    %c0_247 = arith.constant 0 : index
    %c0_248 = arith.constant 0 : index
    %c0_249 = arith.constant 0 : index
    %574 = vector.load %arg41[%c0_247, %c0_248, %c0_249] : memref<2x32x64xf32, #tpu.memory_space<vmem>>, vector<1x32x64xf32>
    %575 = vector.shape_cast %574 : vector<1x32x64xf32> to vector<32x64xf32>
    %c0_250 = arith.constant 0 : index
    %c0_251 = arith.constant 0 : index
    %c0_252 = arith.constant 0 : index
    %576 = vector.load %arg42[%c0_250, %c0_251, %c0_252] : memref<2x1x64xf32, #tpu.memory_space<vmem>>, vector<1x1x64xf32>
    %577 = vector.shape_cast %576 : vector<1x1x64xf32> to vector<1x64xf32>
    %c0_253 = arith.constant 0 : index
    %c0_254 = arith.constant 0 : index
    %c0_255 = arith.constant 0 : index
    %578 = vector.load %arg43[%c0_253, %c0_254, %c0_255] : memref<2x64x32xf32, #tpu.memory_space<vmem>>, vector<1x64x32xf32>
    %579 = vector.shape_cast %578 : vector<1x64x32xf32> to vector<64x32xf32>
    %c0_256 = arith.constant 0 : index
    %c0_257 = arith.constant 0 : index
    %c0_258 = arith.constant 0 : index
    %580 = vector.load %arg44[%c0_256, %c0_257, %c0_258] : memref<2x1x32xf32, #tpu.memory_space<vmem>>, vector<1x1x32xf32>
    %581 = vector.shape_cast %580 : vector<1x1x32xf32> to vector<1x32xf32>
    "tpu.trace_start"() <{level = 10 : i32, message = "btd,df->btf"}> : () -> ()
    %cst_259 = arith.constant dense<0.000000e+00> : vector<2x1x64xf32>
    %582 = tpu.matmul %573, %575, %cst_259 {dimension_numbers = #tpu.dot_dimension_numbers<[2], [0], [0, 1], [1], [0, 0, 0, 1, 1, 1], [], []>} : vector<2x1x32xf32>, vector<32x64xf32>, vector<2x1x64xf32> -> vector<2x1x64xf32>
    "tpu.trace_stop"() : () -> ()
    %583 = vector.shape_cast %577 : vector<1x64xf32> to vector<1x1x64xf32>
    %584 = vector.broadcast %583 : vector<1x1x64xf32> to vector<2x1x64xf32>
    %585 = arith.addf %582, %584 : vector<2x1x64xf32>
    %cst_260 = arith.constant 0.000000e+00 : f32
    %586 = vector.broadcast %cst_260 : f32 to vector<2x1x64xf32>
    %587 = arith.maximumf %585, %586 : vector<2x1x64xf32>
    "tpu.trace_start"() <{level = 10 : i32, message = "btf,fd->btd"}> : () -> ()
    %cst_261 = arith.constant dense<0.000000e+00> : vector<2x1x32xf32>
    %588 = tpu.matmul %587, %579, %cst_261 {dimension_numbers = #tpu.dot_dimension_numbers<[2], [0], [0, 1], [1], [0, 0, 0, 1, 1, 1], [], []>} : vector<2x1x64xf32>, vector<64x32xf32>, vector<2x1x32xf32> -> vector<2x1x32xf32>
    "tpu.trace_stop"() : () -> ()
    %589 = vector.shape_cast %581 : vector<1x32xf32> to vector<1x1x32xf32>
    %590 = vector.broadcast %589 : vector<1x1x32xf32> to vector<2x1x32xf32>
    %591 = arith.addf %588, %590 : vector<2x1x32xf32>
    %592 = arith.addf %573, %591 : vector<2x1x32xf32>
    %c0_262 = arith.constant 0 : index
    %c0_263 = arith.constant 0 : index
    %c0_264 = arith.constant 0 : index
    %593 = vector.load %arg39[%c0_262, %c0_263, %c0_264] : memref<2x1x32xf32, #tpu.memory_space<vmem>>, vector<1x1x32xf32>
    %594 = vector.shape_cast %593 : vector<1x1x32xf32> to vector<1x32xf32>
    %c0_265 = arith.constant 0 : index
    %c0_266 = arith.constant 0 : index
    %c0_267 = arith.constant 0 : index
    %595 = vector.load %arg40[%c0_265, %c0_266, %c0_267] : memref<2x1x32xf32, #tpu.memory_space<vmem>>, vector<1x1x32xf32>
    %596 = vector.shape_cast %595 : vector<1x1x32xf32> to vector<1x32xf32>
    %cst_268 = arith.constant dense<0.000000e+00> : vector<2x1xf32>
    %597 = vector.multi_reduction <add>, %592, %cst_268 [2] : vector<2x1x32xf32> to vector<2x1xf32>
    %598 = vector.shape_cast %597 : vector<2x1xf32> to vector<2x1x1xf32>
    %cst_269 = arith.constant 3.200000e+01 : f32
    %599 = vector.broadcast %cst_269 : f32 to vector<2x1x1xf32>
    %600 = arith.divf %598, %599 : vector<2x1x1xf32>
    %601 = vector.broadcast %600 : vector<2x1x1xf32> to vector<2x1x32xf32>
    %602 = arith.subf %592, %601 : vector<2x1x32xf32>
    %603 = arith.mulf %602, %602 : vector<2x1x32xf32>
    %cst_270 = arith.constant dense<0.000000e+00> : vector<2x1xf32>
    %604 = vector.multi_reduction <add>, %603, %cst_270 [2] : vector<2x1x32xf32> to vector<2x1xf32>
    %605 = vector.shape_cast %604 : vector<2x1xf32> to vector<2x1x1xf32>
    %cst_271 = arith.constant 3.200000e+01 : f32
    %606 = vector.broadcast %cst_271 : f32 to vector<2x1x1xf32>
    %607 = arith.divf %605, %606 : vector<2x1x1xf32>
    %608 = vector.broadcast %600 : vector<2x1x1xf32> to vector<2x1x32xf32>
    %609 = arith.subf %592, %608 : vector<2x1x32xf32>
    %cst_272 = arith.constant 9.99999974E-6 : f32
    %610 = vector.broadcast %cst_272 : f32 to vector<2x1x1xf32>
    %611 = arith.addf %607, %610 : vector<2x1x1xf32>
    %612 = math.rsqrt %611 : vector<2x1x1xf32>
    %613 = vector.broadcast %612 : vector<2x1x1xf32> to vector<2x1x32xf32>
    %614 = arith.mulf %609, %613 : vector<2x1x32xf32>
    %615 = vector.shape_cast %594 : vector<1x32xf32> to vector<1x1x32xf32>
    %616 = vector.broadcast %615 : vector<1x1x32xf32> to vector<2x1x32xf32>
    %617 = arith.mulf %614, %616 : vector<2x1x32xf32>
    %618 = vector.shape_cast %596 : vector<1x32xf32> to vector<1x1x32xf32>
    %619 = vector.broadcast %618 : vector<1x1x32xf32> to vector<2x1x32xf32>
    %620 = arith.addf %617, %619 : vector<2x1x32xf32>
    %c1_273 = arith.constant 1 : index
    %c0_274 = arith.constant 0 : index
    %c0_275 = arith.constant 0 : index
    %621 = vector.load %arg25[%c1_273, %c0_274, %c0_275] : memref<2x32x32xf32, #tpu.memory_space<vmem>>, vector<1x32x32xf32>
    %622 = vector.shape_cast %621 : vector<1x32x32xf32> to vector<32x32xf32>
    "tpu.trace_start"() <{level = 10 : i32, message = "btd,de->bte"}> : () -> ()
    %cst_276 = arith.constant dense<0.000000e+00> : vector<2x1x32xf32>
    %623 = tpu.matmul %620, %622, %cst_276 {dimension_numbers = #tpu.dot_dimension_numbers<[2], [0], [0, 1], [1], [0, 0, 0, 1, 1, 1], [], []>} : vector<2x1x32xf32>, vector<32x32xf32>, vector<2x1x32xf32> -> vector<2x1x32xf32>
    "tpu.trace_stop"() : () -> ()
    %c1_277 = arith.constant 1 : index
    %c0_278 = arith.constant 0 : index
    %c0_279 = arith.constant 0 : index
    %624 = vector.load %arg26[%c1_277, %c0_278, %c0_279] : memref<2x1x32xf32, #tpu.memory_space<vmem>>, vector<1x1x32xf32>
    %625 = vector.shape_cast %624 : vector<1x1x32xf32> to vector<1x32xf32>
    %626 = vector.shape_cast %625 : vector<1x32xf32> to vector<1x1x32xf32>
    %627 = vector.broadcast %626 : vector<1x1x32xf32> to vector<2x1x32xf32>
    %628 = arith.addf %623, %627 : vector<2x1x32xf32>
    %c1_280 = arith.constant 1 : index
    %c0_281 = arith.constant 0 : index
    %c0_282 = arith.constant 0 : index
    %629 = vector.load %arg27[%c1_280, %c0_281, %c0_282] : memref<2x32x32xf32, #tpu.memory_space<vmem>>, vector<1x32x32xf32>
    %630 = vector.shape_cast %629 : vector<1x32x32xf32> to vector<32x32xf32>
    "tpu.trace_start"() <{level = 10 : i32, message = "btd,de->bte"}> : () -> ()
    %cst_283 = arith.constant dense<0.000000e+00> : vector<2x1x32xf32>
    %631 = tpu.matmul %628, %630, %cst_283 {dimension_numbers = #tpu.dot_dimension_numbers<[2], [0], [0, 1], [1], [0, 0, 0, 1, 1, 1], [], []>} : vector<2x1x32xf32>, vector<32x32xf32>, vector<2x1x32xf32> -> vector<2x1x32xf32>
    "tpu.trace_stop"() : () -> ()
    %c1_284 = arith.constant 1 : index
    %c0_285 = arith.constant 0 : index
    %c0_286 = arith.constant 0 : index
    %632 = vector.load %arg28[%c1_284, %c0_285, %c0_286] : memref<2x1x32xf32, #tpu.memory_space<vmem>>, vector<1x1x32xf32>
    %633 = vector.shape_cast %632 : vector<1x1x32xf32> to vector<1x32xf32>
    %634 = vector.shape_cast %633 : vector<1x32xf32> to vector<1x1x32xf32>
    %635 = vector.broadcast %634 : vector<1x1x32xf32> to vector<2x1x32xf32>
    %636 = arith.addf %631, %635 : vector<2x1x32xf32>
    %637 = arith.addf %620, %636 : vector<2x1x32xf32>
    %c1_287 = arith.constant 1 : index
    %c0_288 = arith.constant 0 : index
    %c0_289 = arith.constant 0 : index
    %638 = vector.load %arg35[%c1_287, %c0_288, %c0_289] : memref<2x1x32xf32, #tpu.memory_space<vmem>>, vector<1x1x32xf32>
    %639 = vector.shape_cast %638 : vector<1x1x32xf32> to vector<1x32xf32>
    %c1_290 = arith.constant 1 : index
    %c0_291 = arith.constant 0 : index
    %c0_292 = arith.constant 0 : index
    %640 = vector.load %arg36[%c1_290, %c0_291, %c0_292] : memref<2x1x32xf32, #tpu.memory_space<vmem>>, vector<1x1x32xf32>
    %641 = vector.shape_cast %640 : vector<1x1x32xf32> to vector<1x32xf32>
    %cst_293 = arith.constant dense<0.000000e+00> : vector<2x1xf32>
    %642 = vector.multi_reduction <add>, %637, %cst_293 [2] : vector<2x1x32xf32> to vector<2x1xf32>
    %643 = vector.shape_cast %642 : vector<2x1xf32> to vector<2x1x1xf32>
    %cst_294 = arith.constant 3.200000e+01 : f32
    %644 = vector.broadcast %cst_294 : f32 to vector<2x1x1xf32>
    %645 = arith.divf %643, %644 : vector<2x1x1xf32>
    %646 = vector.broadcast %645 : vector<2x1x1xf32> to vector<2x1x32xf32>
    %647 = arith.subf %637, %646 : vector<2x1x32xf32>
    %648 = arith.mulf %647, %647 : vector<2x1x32xf32>
    %cst_295 = arith.constant dense<0.000000e+00> : vector<2x1xf32>
    %649 = vector.multi_reduction <add>, %648, %cst_295 [2] : vector<2x1x32xf32> to vector<2x1xf32>
    %650 = vector.shape_cast %649 : vector<2x1xf32> to vector<2x1x1xf32>
    %cst_296 = arith.constant 3.200000e+01 : f32
    %651 = vector.broadcast %cst_296 : f32 to vector<2x1x1xf32>
    %652 = arith.divf %650, %651 : vector<2x1x1xf32>
    %653 = vector.broadcast %645 : vector<2x1x1xf32> to vector<2x1x32xf32>
    %654 = arith.subf %637, %653 : vector<2x1x32xf32>
    %cst_297 = arith.constant 9.99999974E-6 : f32
    %655 = vector.broadcast %cst_297 : f32 to vector<2x1x1xf32>
    %656 = arith.addf %652, %655 : vector<2x1x1xf32>
    %657 = math.rsqrt %656 : vector<2x1x1xf32>
    %658 = vector.broadcast %657 : vector<2x1x1xf32> to vector<2x1x32xf32>
    %659 = arith.mulf %654, %658 : vector<2x1x32xf32>
    %660 = vector.shape_cast %639 : vector<1x32xf32> to vector<1x1x32xf32>
    %661 = vector.broadcast %660 : vector<1x1x32xf32> to vector<2x1x32xf32>
    %662 = arith.mulf %659, %661 : vector<2x1x32xf32>
    %663 = vector.shape_cast %641 : vector<1x32xf32> to vector<1x1x32xf32>
    %664 = vector.broadcast %663 : vector<1x1x32xf32> to vector<2x1x32xf32>
    %665 = arith.addf %662, %664 : vector<2x1x32xf32>
    %c1_298 = arith.constant 1 : index
    %c0_299 = arith.constant 0 : index
    %c0_300 = arith.constant 0 : index
    %666 = vector.load %arg29[%c1_298, %c0_299, %c0_300] : memref<2x32x32xf32, #tpu.memory_space<vmem>>, vector<1x32x32xf32>
    %667 = vector.shape_cast %666 : vector<1x32x32xf32> to vector<32x32xf32>
    "tpu.trace_start"() <{level = 10 : i32, message = "btd,de->bte"}> : () -> ()
    %cst_301 = arith.constant dense<0.000000e+00> : vector<2x1x32xf32>
    %668 = tpu.matmul %665, %667, %cst_301 {dimension_numbers = #tpu.dot_dimension_numbers<[2], [0], [0, 1], [1], [0, 0, 0, 1, 1, 1], [], []>} : vector<2x1x32xf32>, vector<32x32xf32>, vector<2x1x32xf32> -> vector<2x1x32xf32>
    "tpu.trace_stop"() : () -> ()
    %c1_302 = arith.constant 1 : index
    %c0_303 = arith.constant 0 : index
    %c0_304 = arith.constant 0 : index
    %669 = vector.load %arg30[%c1_302, %c0_303, %c0_304] : memref<2x1x32xf32, #tpu.memory_space<vmem>>, vector<1x1x32xf32>
    %670 = vector.shape_cast %669 : vector<1x1x32xf32> to vector<1x32xf32>
    %671 = vector.shape_cast %670 : vector<1x32xf32> to vector<1x1x32xf32>
    %672 = vector.broadcast %671 : vector<1x1x32xf32> to vector<2x1x32xf32>
    %673 = arith.addf %668, %672 : vector<2x1x32xf32>
    %c1_305 = arith.constant 1 : index
    %c0_306 = arith.constant 0 : index
    %c0_307 = arith.constant 0 : index
    %674 = vector.load %arg31[%c1_305, %c0_306, %c0_307] : memref<2x32x64xf32, #tpu.memory_space<vmem>>, vector<1x32x64xf32>
    %675 = vector.shape_cast %674 : vector<1x32x64xf32> to vector<32x64xf32>
    "tpu.trace_start"() <{level = 10 : i32, message = "bsd,de->bse"}> : () -> ()
    %cst_308 = arith.constant dense<0.000000e+00> : vector<2x8x64xf32>
    %676 = tpu.matmul %395, %675, %cst_308 {dimension_numbers = #tpu.dot_dimension_numbers<[2], [0], [0, 1], [1], [0, 0, 0, 1, 1, 1], [], []>} : vector<2x8x32xf32>, vector<32x64xf32>, vector<2x8x64xf32> -> vector<2x8x64xf32>
    "tpu.trace_stop"() : () -> ()
    %c1_309 = arith.constant 1 : index
    %c0_310 = arith.constant 0 : index
    %c0_311 = arith.constant 0 : index
    %677 = vector.load %arg32[%c1_309, %c0_310, %c0_311] : memref<2x1x64xf32, #tpu.memory_space<vmem>>, vector<1x1x64xf32>
    %678 = vector.shape_cast %677 : vector<1x1x64xf32> to vector<1x64xf32>
    %679 = vector.shape_cast %678 : vector<1x64xf32> to vector<1x1x64xf32>
    %680 = vector.broadcast %679 : vector<1x1x64xf32> to vector<2x8x64xf32>
    %681 = arith.addf %676, %680 : vector<2x8x64xf32>
    %682 = vector.extract_strided_slice %681 {offsets = [0, 0, 0], sizes = [2, 8, 32], strides = [1, 1, 1]} : vector<2x8x64xf32> to vector<2x8x32xf32>
    %683 = vector.extract_strided_slice %681 {offsets = [0, 0, 32], sizes = [2, 8, 32], strides = [1, 1, 1]} : vector<2x8x64xf32> to vector<2x8x32xf32>
    %c1_312 = arith.constant 1 : index
    %c0_313 = arith.constant 0 : index
    %c0_314 = arith.constant 0 : index
    %684 = vector.load %arg33[%c1_312, %c0_313, %c0_314] : memref<2x32x32xf32, #tpu.memory_space<vmem>>, vector<1x32x32xf32>
    %685 = vector.shape_cast %684 : vector<1x32x32xf32> to vector<32x32xf32>
    %c1_315 = arith.constant 1 : index
    %c0_316 = arith.constant 0 : index
    %c0_317 = arith.constant 0 : index
    %686 = vector.load %arg34[%c1_315, %c0_316, %c0_317] : memref<2x1x32xf32, #tpu.memory_space<vmem>>, vector<1x1x32xf32>
    %687 = vector.shape_cast %686 : vector<1x1x32xf32> to vector<1x32xf32>
    %688 = vector.extract_strided_slice %673 {offsets = [0, 0, 0], sizes = [2, 1, 8], strides = [1, 1, 1]} : vector<2x1x32xf32> to vector<2x1x8xf32>
    %cst_318 = arith.constant 0.353553385 : f32
    %689 = vector.broadcast %cst_318 : f32 to vector<2x1x8xf32>
    %690 = arith.mulf %688, %689 : vector<2x1x8xf32>
    %691 = vector.extract_strided_slice %682 {offsets = [0, 0, 0], sizes = [2, 8, 8], strides = [1, 1, 1]} : vector<2x8x32xf32> to vector<2x8x8xf32>
    %692 = vector.extract_strided_slice %683 {offsets = [0, 0, 0], sizes = [2, 8, 8], strides = [1, 1, 1]} : vector<2x8x32xf32> to vector<2x8x8xf32>
    "tpu.trace_start"() <{level = 10 : i32, message = "bqd,bkd->bqk"}> : () -> ()
    %cst_319 = arith.constant dense<0.000000e+00> : vector<2x1x8xf32>
    %693 = tpu.matmul %690, %691, %cst_319 {dimension_numbers = #tpu.dot_dimension_numbers<[2], [2], [1], [1], [0, 0, 0, 1, 1, 1], [0], [0]>} : vector<2x1x8xf32>, vector<2x8x8xf32>, vector<2x1x8xf32> -> vector<2x1x8xf32>
    "tpu.trace_stop"() : () -> ()
    %cst_320 = arith.constant dense<0xFF800000> : vector<2x1xf32>
    %694 = vector.multi_reduction <maximumf>, %693, %cst_320 [2] : vector<2x1x8xf32> to vector<2x1xf32>
    %695 = vector.shape_cast %694 : vector<2x1xf32> to vector<2x1x1xf32>
    %696 = vector.broadcast %695 : vector<2x1x1xf32> to vector<2x1x8xf32>
    %697 = arith.subf %693, %696 : vector<2x1x8xf32>
    %698 = math.exp %697 : vector<2x1x8xf32>
    %cst_321 = arith.constant dense<0.000000e+00> : vector<2x1xf32>
    %699 = vector.multi_reduction <add>, %698, %cst_321 [2] : vector<2x1x8xf32> to vector<2x1xf32>
    %700 = vector.shape_cast %699 : vector<2x1xf32> to vector<2x1x1xf32>
    %701 = tpu.reciprocal %700 {approx = true} : vector<2x1x1xf32> -> vector<2x1x1xf32>
    %702 = vector.broadcast %701 : vector<2x1x1xf32> to vector<2x1x8xf32>
    %703 = arith.mulf %698, %702 : vector<2x1x8xf32>
    "tpu.trace_start"() <{level = 10 : i32, message = "bqk,bkd->bqd"}> : () -> ()
    %cst_322 = arith.constant dense<0.000000e+00> : vector<2x1x8xf32>
    %704 = tpu.matmul %703, %692, %cst_322 {dimension_numbers = #tpu.dot_dimension_numbers<[2], [1], [1], [2], [0, 0, 0, 1, 1, 2], [0], [0]>} : vector<2x1x8xf32>, vector<2x8x8xf32>, vector<2x1x8xf32> -> vector<2x1x8xf32>
    "tpu.trace_stop"() : () -> ()
    %705 = vector.extract_strided_slice %685 {offsets = [0, 0], sizes = [8, 32], strides = [1, 1]} : vector<32x32xf32> to vector<8x32xf32>
    "tpu.trace_start"() <{level = 10 : i32, message = "bqd,de->bqe"}> : () -> ()
    %cst_323 = arith.constant dense<0.000000e+00> : vector<2x1x32xf32>
    %706 = tpu.matmul %704, %705, %cst_323 {dimension_numbers = #tpu.dot_dimension_numbers<[2], [0], [0, 1], [1], [0, 0, 0, 1, 1, 1], [], []>} : vector<2x1x8xf32>, vector<8x32xf32>, vector<2x1x32xf32> -> vector<2x1x32xf32>
    "tpu.trace_stop"() : () -> ()
    %707 = vector.extract_strided_slice %673 {offsets = [0, 0, 8], sizes = [2, 1, 8], strides = [1, 1, 1]} : vector<2x1x32xf32> to vector<2x1x8xf32>
    %cst_324 = arith.constant 0.353553385 : f32
    %708 = vector.broadcast %cst_324 : f32 to vector<2x1x8xf32>
    %709 = arith.mulf %707, %708 : vector<2x1x8xf32>
    %710 = vector.extract_strided_slice %682 {offsets = [0, 0, 8], sizes = [2, 8, 8], strides = [1, 1, 1]} : vector<2x8x32xf32> to vector<2x8x8xf32>
    %711 = vector.extract_strided_slice %683 {offsets = [0, 0, 8], sizes = [2, 8, 8], strides = [1, 1, 1]} : vector<2x8x32xf32> to vector<2x8x8xf32>
    "tpu.trace_start"() <{level = 10 : i32, message = "bqd,bkd->bqk"}> : () -> ()
    %cst_325 = arith.constant dense<0.000000e+00> : vector<2x1x8xf32>
    %712 = tpu.matmul %709, %710, %cst_325 {dimension_numbers = #tpu.dot_dimension_numbers<[2], [2], [1], [1], [0, 0, 0, 1, 1, 1], [0], [0]>} : vector<2x1x8xf32>, vector<2x8x8xf32>, vector<2x1x8xf32> -> vector<2x1x8xf32>
    "tpu.trace_stop"() : () -> ()
    %cst_326 = arith.constant dense<0xFF800000> : vector<2x1xf32>
    %713 = vector.multi_reduction <maximumf>, %712, %cst_326 [2] : vector<2x1x8xf32> to vector<2x1xf32>
    %714 = vector.shape_cast %713 : vector<2x1xf32> to vector<2x1x1xf32>
    %715 = vector.broadcast %714 : vector<2x1x1xf32> to vector<2x1x8xf32>
    %716 = arith.subf %712, %715 : vector<2x1x8xf32>
    %717 = math.exp %716 : vector<2x1x8xf32>
    %cst_327 = arith.constant dense<0.000000e+00> : vector<2x1xf32>
    %718 = vector.multi_reduction <add>, %717, %cst_327 [2] : vector<2x1x8xf32> to vector<2x1xf32>
    %719 = vector.shape_cast %718 : vector<2x1xf32> to vector<2x1x1xf32>
    %720 = tpu.reciprocal %719 {approx = true} : vector<2x1x1xf32> -> vector<2x1x1xf32>
    %721 = vector.broadcast %720 : vector<2x1x1xf32> to vector<2x1x8xf32>
    %722 = arith.mulf %717, %721 : vector<2x1x8xf32>
    "tpu.trace_start"() <{level = 10 : i32, message = "bqk,bkd->bqd"}> : () -> ()
    %cst_328 = arith.constant dense<0.000000e+00> : vector<2x1x8xf32>
    %723 = tpu.matmul %722, %711, %cst_328 {dimension_numbers = #tpu.dot_dimension_numbers<[2], [1], [1], [2], [0, 0, 0, 1, 1, 2], [0], [0]>} : vector<2x1x8xf32>, vector<2x8x8xf32>, vector<2x1x8xf32> -> vector<2x1x8xf32>
    "tpu.trace_stop"() : () -> ()
    %724 = vector.extract_strided_slice %685 {offsets = [8, 0], sizes = [8, 32], strides = [1, 1]} : vector<32x32xf32> to vector<8x32xf32>
    "tpu.trace_start"() <{level = 10 : i32, message = "bqd,de->bqe"}> : () -> ()
    %cst_329 = arith.constant dense<0.000000e+00> : vector<2x1x32xf32>
    %725 = tpu.matmul %723, %724, %cst_329 {dimension_numbers = #tpu.dot_dimension_numbers<[2], [0], [0, 1], [1], [0, 0, 0, 1, 1, 1], [], []>} : vector<2x1x8xf32>, vector<8x32xf32>, vector<2x1x32xf32> -> vector<2x1x32xf32>
    "tpu.trace_stop"() : () -> ()
    %726 = arith.addf %706, %725 : vector<2x1x32xf32>
    %727 = vector.extract_strided_slice %673 {offsets = [0, 0, 16], sizes = [2, 1, 8], strides = [1, 1, 1]} : vector<2x1x32xf32> to vector<2x1x8xf32>
    %cst_330 = arith.constant 0.353553385 : f32
    %728 = vector.broadcast %cst_330 : f32 to vector<2x1x8xf32>
    %729 = arith.mulf %727, %728 : vector<2x1x8xf32>
    %730 = vector.extract_strided_slice %682 {offsets = [0, 0, 16], sizes = [2, 8, 8], strides = [1, 1, 1]} : vector<2x8x32xf32> to vector<2x8x8xf32>
    %731 = vector.extract_strided_slice %683 {offsets = [0, 0, 16], sizes = [2, 8, 8], strides = [1, 1, 1]} : vector<2x8x32xf32> to vector<2x8x8xf32>
    "tpu.trace_start"() <{level = 10 : i32, message = "bqd,bkd->bqk"}> : () -> ()
    %cst_331 = arith.constant dense<0.000000e+00> : vector<2x1x8xf32>
    %732 = tpu.matmul %729, %730, %cst_331 {dimension_numbers = #tpu.dot_dimension_numbers<[2], [2], [1], [1], [0, 0, 0, 1, 1, 1], [0], [0]>} : vector<2x1x8xf32>, vector<2x8x8xf32>, vector<2x1x8xf32> -> vector<2x1x8xf32>
    "tpu.trace_stop"() : () -> ()
    %cst_332 = arith.constant dense<0xFF800000> : vector<2x1xf32>
    %733 = vector.multi_reduction <maximumf>, %732, %cst_332 [2] : vector<2x1x8xf32> to vector<2x1xf32>
    %734 = vector.shape_cast %733 : vector<2x1xf32> to vector<2x1x1xf32>
    %735 = vector.broadcast %734 : vector<2x1x1xf32> to vector<2x1x8xf32>
    %736 = arith.subf %732, %735 : vector<2x1x8xf32>
    %737 = math.exp %736 : vector<2x1x8xf32>
    %cst_333 = arith.constant dense<0.000000e+00> : vector<2x1xf32>
    %738 = vector.multi_reduction <add>, %737, %cst_333 [2] : vector<2x1x8xf32> to vector<2x1xf32>
    %739 = vector.shape_cast %738 : vector<2x1xf32> to vector<2x1x1xf32>
    %740 = tpu.reciprocal %739 {approx = true} : vector<2x1x1xf32> -> vector<2x1x1xf32>
    %741 = vector.broadcast %740 : vector<2x1x1xf32> to vector<2x1x8xf32>
    %742 = arith.mulf %737, %741 : vector<2x1x8xf32>
    "tpu.trace_start"() <{level = 10 : i32, message = "bqk,bkd->bqd"}> : () -> ()
    %cst_334 = arith.constant dense<0.000000e+00> : vector<2x1x8xf32>
    %743 = tpu.matmul %742, %731, %cst_334 {dimension_numbers = #tpu.dot_dimension_numbers<[2], [1], [1], [2], [0, 0, 0, 1, 1, 2], [0], [0]>} : vector<2x1x8xf32>, vector<2x8x8xf32>, vector<2x1x8xf32> -> vector<2x1x8xf32>
    "tpu.trace_stop"() : () -> ()
    %744 = vector.extract_strided_slice %685 {offsets = [16, 0], sizes = [8, 32], strides = [1, 1]} : vector<32x32xf32> to vector<8x32xf32>
    "tpu.trace_start"() <{level = 10 : i32, message = "bqd,de->bqe"}> : () -> ()
    %cst_335 = arith.constant dense<0.000000e+00> : vector<2x1x32xf32>
    %745 = tpu.matmul %743, %744, %cst_335 {dimension_numbers = #tpu.dot_dimension_numbers<[2], [0], [0, 1], [1], [0, 0, 0, 1, 1, 1], [], []>} : vector<2x1x8xf32>, vector<8x32xf32>, vector<2x1x32xf32> -> vector<2x1x32xf32>
    "tpu.trace_stop"() : () -> ()
    %746 = arith.addf %726, %745 : vector<2x1x32xf32>
    %747 = vector.extract_strided_slice %673 {offsets = [0, 0, 24], sizes = [2, 1, 8], strides = [1, 1, 1]} : vector<2x1x32xf32> to vector<2x1x8xf32>
    %cst_336 = arith.constant 0.353553385 : f32
    %748 = vector.broadcast %cst_336 : f32 to vector<2x1x8xf32>
    %749 = arith.mulf %747, %748 : vector<2x1x8xf32>
    %750 = vector.extract_strided_slice %682 {offsets = [0, 0, 24], sizes = [2, 8, 8], strides = [1, 1, 1]} : vector<2x8x32xf32> to vector<2x8x8xf32>
    %751 = vector.extract_strided_slice %683 {offsets = [0, 0, 24], sizes = [2, 8, 8], strides = [1, 1, 1]} : vector<2x8x32xf32> to vector<2x8x8xf32>
    "tpu.trace_start"() <{level = 10 : i32, message = "bqd,bkd->bqk"}> : () -> ()
    %cst_337 = arith.constant dense<0.000000e+00> : vector<2x1x8xf32>
    %752 = tpu.matmul %749, %750, %cst_337 {dimension_numbers = #tpu.dot_dimension_numbers<[2], [2], [1], [1], [0, 0, 0, 1, 1, 1], [0], [0]>} : vector<2x1x8xf32>, vector<2x8x8xf32>, vector<2x1x8xf32> -> vector<2x1x8xf32>
    "tpu.trace_stop"() : () -> ()
    %cst_338 = arith.constant dense<0xFF800000> : vector<2x1xf32>
    %753 = vector.multi_reduction <maximumf>, %752, %cst_338 [2] : vector<2x1x8xf32> to vector<2x1xf32>
    %754 = vector.shape_cast %753 : vector<2x1xf32> to vector<2x1x1xf32>
    %755 = vector.broadcast %754 : vector<2x1x1xf32> to vector<2x1x8xf32>
    %756 = arith.subf %752, %755 : vector<2x1x8xf32>
    %757 = math.exp %756 : vector<2x1x8xf32>
    %cst_339 = arith.constant dense<0.000000e+00> : vector<2x1xf32>
    %758 = vector.multi_reduction <add>, %757, %cst_339 [2] : vector<2x1x8xf32> to vector<2x1xf32>
    %759 = vector.shape_cast %758 : vector<2x1xf32> to vector<2x1x1xf32>
    %760 = tpu.reciprocal %759 {approx = true} : vector<2x1x1xf32> -> vector<2x1x1xf32>
    %761 = vector.broadcast %760 : vector<2x1x1xf32> to vector<2x1x8xf32>
    %762 = arith.mulf %757, %761 : vector<2x1x8xf32>
    "tpu.trace_start"() <{level = 10 : i32, message = "bqk,bkd->bqd"}> : () -> ()
    %cst_340 = arith.constant dense<0.000000e+00> : vector<2x1x8xf32>
    %763 = tpu.matmul %762, %751, %cst_340 {dimension_numbers = #tpu.dot_dimension_numbers<[2], [1], [1], [2], [0, 0, 0, 1, 1, 2], [0], [0]>} : vector<2x1x8xf32>, vector<2x8x8xf32>, vector<2x1x8xf32> -> vector<2x1x8xf32>
    "tpu.trace_stop"() : () -> ()
    %764 = vector.extract_strided_slice %685 {offsets = [24, 0], sizes = [8, 32], strides = [1, 1]} : vector<32x32xf32> to vector<8x32xf32>
    "tpu.trace_start"() <{level = 10 : i32, message = "bqd,de->bqe"}> : () -> ()
    %cst_341 = arith.constant dense<0.000000e+00> : vector<2x1x32xf32>
    %765 = tpu.matmul %763, %764, %cst_341 {dimension_numbers = #tpu.dot_dimension_numbers<[2], [0], [0, 1], [1], [0, 0, 0, 1, 1, 1], [], []>} : vector<2x1x8xf32>, vector<8x32xf32>, vector<2x1x32xf32> -> vector<2x1x32xf32>
    "tpu.trace_stop"() : () -> ()
    %766 = arith.addf %746, %765 : vector<2x1x32xf32>
    %767 = vector.shape_cast %687 : vector<1x32xf32> to vector<1x1x32xf32>
    %768 = vector.broadcast %767 : vector<1x1x32xf32> to vector<2x1x32xf32>
    %769 = arith.addf %766, %768 : vector<2x1x32xf32>
    %770 = arith.addf %665, %769 : vector<2x1x32xf32>
    %c1_342 = arith.constant 1 : index
    %c0_343 = arith.constant 0 : index
    %c0_344 = arith.constant 0 : index
    %771 = vector.load %arg37[%c1_342, %c0_343, %c0_344] : memref<2x1x32xf32, #tpu.memory_space<vmem>>, vector<1x1x32xf32>
    %772 = vector.shape_cast %771 : vector<1x1x32xf32> to vector<1x32xf32>
    %c1_345 = arith.constant 1 : index
    %c0_346 = arith.constant 0 : index
    %c0_347 = arith.constant 0 : index
    %773 = vector.load %arg38[%c1_345, %c0_346, %c0_347] : memref<2x1x32xf32, #tpu.memory_space<vmem>>, vector<1x1x32xf32>
    %774 = vector.shape_cast %773 : vector<1x1x32xf32> to vector<1x32xf32>
    %cst_348 = arith.constant dense<0.000000e+00> : vector<2x1xf32>
    %775 = vector.multi_reduction <add>, %770, %cst_348 [2] : vector<2x1x32xf32> to vector<2x1xf32>
    %776 = vector.shape_cast %775 : vector<2x1xf32> to vector<2x1x1xf32>
    %cst_349 = arith.constant 3.200000e+01 : f32
    %777 = vector.broadcast %cst_349 : f32 to vector<2x1x1xf32>
    %778 = arith.divf %776, %777 : vector<2x1x1xf32>
    %779 = vector.broadcast %778 : vector<2x1x1xf32> to vector<2x1x32xf32>
    %780 = arith.subf %770, %779 : vector<2x1x32xf32>
    %781 = arith.mulf %780, %780 : vector<2x1x32xf32>
    %cst_350 = arith.constant dense<0.000000e+00> : vector<2x1xf32>
    %782 = vector.multi_reduction <add>, %781, %cst_350 [2] : vector<2x1x32xf32> to vector<2x1xf32>
    %783 = vector.shape_cast %782 : vector<2x1xf32> to vector<2x1x1xf32>
    %cst_351 = arith.constant 3.200000e+01 : f32
    %784 = vector.broadcast %cst_351 : f32 to vector<2x1x1xf32>
    %785 = arith.divf %783, %784 : vector<2x1x1xf32>
    %786 = vector.broadcast %778 : vector<2x1x1xf32> to vector<2x1x32xf32>
    %787 = arith.subf %770, %786 : vector<2x1x32xf32>
    %cst_352 = arith.constant 9.99999974E-6 : f32
    %788 = vector.broadcast %cst_352 : f32 to vector<2x1x1xf32>
    %789 = arith.addf %785, %788 : vector<2x1x1xf32>
    %790 = math.rsqrt %789 : vector<2x1x1xf32>
    %791 = vector.broadcast %790 : vector<2x1x1xf32> to vector<2x1x32xf32>
    %792 = arith.mulf %787, %791 : vector<2x1x32xf32>
    %793 = vector.shape_cast %772 : vector<1x32xf32> to vector<1x1x32xf32>
    %794 = vector.broadcast %793 : vector<1x1x32xf32> to vector<2x1x32xf32>
    %795 = arith.mulf %792, %794 : vector<2x1x32xf32>
    %796 = vector.shape_cast %774 : vector<1x32xf32> to vector<1x1x32xf32>
    %797 = vector.broadcast %796 : vector<1x1x32xf32> to vector<2x1x32xf32>
    %798 = arith.addf %795, %797 : vector<2x1x32xf32>
    %c1_353 = arith.constant 1 : index
    %c0_354 = arith.constant 0 : index
    %c0_355 = arith.constant 0 : index
    %799 = vector.load %arg41[%c1_353, %c0_354, %c0_355] : memref<2x32x64xf32, #tpu.memory_space<vmem>>, vector<1x32x64xf32>
    %800 = vector.shape_cast %799 : vector<1x32x64xf32> to vector<32x64xf32>
    %c1_356 = arith.constant 1 : index
    %c0_357 = arith.constant 0 : index
    %c0_358 = arith.constant 0 : index
    %801 = vector.load %arg42[%c1_356, %c0_357, %c0_358] : memref<2x1x64xf32, #tpu.memory_space<vmem>>, vector<1x1x64xf32>
    %802 = vector.shape_cast %801 : vector<1x1x64xf32> to vector<1x64xf32>
    %c1_359 = arith.constant 1 : index
    %c0_360 = arith.constant 0 : index
    %c0_361 = arith.constant 0 : index
    %803 = vector.load %arg43[%c1_359, %c0_360, %c0_361] : memref<2x64x32xf32, #tpu.memory_space<vmem>>, vector<1x64x32xf32>
    %804 = vector.shape_cast %803 : vector<1x64x32xf32> to vector<64x32xf32>
    %c1_362 = arith.constant 1 : index
    %c0_363 = arith.constant 0 : index
    %c0_364 = arith.constant 0 : index
    %805 = vector.load %arg44[%c1_362, %c0_363, %c0_364] : memref<2x1x32xf32, #tpu.memory_space<vmem>>, vector<1x1x32xf32>
    %806 = vector.shape_cast %805 : vector<1x1x32xf32> to vector<1x32xf32>
    "tpu.trace_start"() <{level = 10 : i32, message = "btd,df->btf"}> : () -> ()
    %cst_365 = arith.constant dense<0.000000e+00> : vector<2x1x64xf32>
    %807 = tpu.matmul %798, %800, %cst_365 {dimension_numbers = #tpu.dot_dimension_numbers<[2], [0], [0, 1], [1], [0, 0, 0, 1, 1, 1], [], []>} : vector<2x1x32xf32>, vector<32x64xf32>, vector<2x1x64xf32> -> vector<2x1x64xf32>
    "tpu.trace_stop"() : () -> ()
    %808 = vector.shape_cast %802 : vector<1x64xf32> to vector<1x1x64xf32>
    %809 = vector.broadcast %808 : vector<1x1x64xf32> to vector<2x1x64xf32>
    %810 = arith.addf %807, %809 : vector<2x1x64xf32>
    %cst_366 = arith.constant 0.000000e+00 : f32
    %811 = vector.broadcast %cst_366 : f32 to vector<2x1x64xf32>
    %812 = arith.maximumf %810, %811 : vector<2x1x64xf32>
    "tpu.trace_start"() <{level = 10 : i32, message = "btf,fd->btd"}> : () -> ()
    %cst_367 = arith.constant dense<0.000000e+00> : vector<2x1x32xf32>
    %813 = tpu.matmul %812, %804, %cst_367 {dimension_numbers = #tpu.dot_dimension_numbers<[2], [0], [0, 1], [1], [0, 0, 0, 1, 1, 1], [], []>} : vector<2x1x64xf32>, vector<64x32xf32>, vector<2x1x32xf32> -> vector<2x1x32xf32>
    "tpu.trace_stop"() : () -> ()
    %814 = vector.shape_cast %806 : vector<1x32xf32> to vector<1x1x32xf32>
    %815 = vector.broadcast %814 : vector<1x1x32xf32> to vector<2x1x32xf32>
    %816 = arith.addf %813, %815 : vector<2x1x32xf32>
    %817 = arith.addf %798, %816 : vector<2x1x32xf32>
    %c1_368 = arith.constant 1 : index
    %c0_369 = arith.constant 0 : index
    %c0_370 = arith.constant 0 : index
    %818 = vector.load %arg39[%c1_368, %c0_369, %c0_370] : memref<2x1x32xf32, #tpu.memory_space<vmem>>, vector<1x1x32xf32>
    %819 = vector.shape_cast %818 : vector<1x1x32xf32> to vector<1x32xf32>
    %c1_371 = arith.constant 1 : index
    %c0_372 = arith.constant 0 : index
    %c0_373 = arith.constant 0 : index
    %820 = vector.load %arg40[%c1_371, %c0_372, %c0_373] : memref<2x1x32xf32, #tpu.memory_space<vmem>>, vector<1x1x32xf32>
    %821 = vector.shape_cast %820 : vector<1x1x32xf32> to vector<1x32xf32>
    %cst_374 = arith.constant dense<0.000000e+00> : vector<2x1xf32>
    %822 = vector.multi_reduction <add>, %817, %cst_374 [2] : vector<2x1x32xf32> to vector<2x1xf32>
    %823 = vector.shape_cast %822 : vector<2x1xf32> to vector<2x1x1xf32>
    %cst_375 = arith.constant 3.200000e+01 : f32
    %824 = vector.broadcast %cst_375 : f32 to vector<2x1x1xf32>
    %825 = arith.divf %823, %824 : vector<2x1x1xf32>
    %826 = vector.broadcast %825 : vector<2x1x1xf32> to vector<2x1x32xf32>
    %827 = arith.subf %817, %826 : vector<2x1x32xf32>
    %828 = arith.mulf %827, %827 : vector<2x1x32xf32>
    %cst_376 = arith.constant dense<0.000000e+00> : vector<2x1xf32>
    %829 = vector.multi_reduction <add>, %828, %cst_376 [2] : vector<2x1x32xf32> to vector<2x1xf32>
    %830 = vector.shape_cast %829 : vector<2x1xf32> to vector<2x1x1xf32>
    %cst_377 = arith.constant 3.200000e+01 : f32
    %831 = vector.broadcast %cst_377 : f32 to vector<2x1x1xf32>
    %832 = arith.divf %830, %831 : vector<2x1x1xf32>
    %833 = vector.broadcast %825 : vector<2x1x1xf32> to vector<2x1x32xf32>
    %834 = arith.subf %817, %833 : vector<2x1x32xf32>
    %cst_378 = arith.constant 9.99999974E-6 : f32
    %835 = vector.broadcast %cst_378 : f32 to vector<2x1x1xf32>
    %836 = arith.addf %832, %835 : vector<2x1x1xf32>
    %837 = math.rsqrt %836 : vector<2x1x1xf32>
    %838 = vector.broadcast %837 : vector<2x1x1xf32> to vector<2x1x32xf32>
    %839 = arith.mulf %834, %838 : vector<2x1x32xf32>
    %840 = vector.shape_cast %819 : vector<1x32xf32> to vector<1x1x32xf32>
    %841 = vector.broadcast %840 : vector<1x1x32xf32> to vector<2x1x32xf32>
    %842 = arith.mulf %839, %841 : vector<2x1x32xf32>
    %843 = vector.shape_cast %821 : vector<1x32xf32> to vector<1x1x32xf32>
    %844 = vector.broadcast %843 : vector<1x1x32xf32> to vector<2x1x32xf32>
    %845 = arith.addf %842, %844 : vector<2x1x32xf32>
    %c0_379 = arith.constant 0 : index
    %c0_380 = arith.constant 0 : index
    %846 = vector.load %arg9[%c0_379, %c0_380] : memref<1x32xf32, #tpu.memory_space<vmem>>, vector<1x32xf32>
    %c0_381 = arith.constant 0 : index
    %c0_382 = arith.constant 0 : index
    %847 = vector.load %arg10[%c0_381, %c0_382] : memref<1x32xf32, #tpu.memory_space<vmem>>, vector<1x32xf32>
    %cst_383 = arith.constant dense<0.000000e+00> : vector<2x1xf32>
    %848 = vector.multi_reduction <add>, %845, %cst_383 [2] : vector<2x1x32xf32> to vector<2x1xf32>
    %849 = vector.shape_cast %848 : vector<2x1xf32> to vector<2x1x1xf32>
    %cst_384 = arith.constant 3.200000e+01 : f32
    %850 = vector.broadcast %cst_384 : f32 to vector<2x1x1xf32>
    %851 = arith.divf %849, %850 : vector<2x1x1xf32>
    %852 = vector.broadcast %851 : vector<2x1x1xf32> to vector<2x1x32xf32>
    %853 = arith.subf %845, %852 : vector<2x1x32xf32>
    %854 = arith.mulf %853, %853 : vector<2x1x32xf32>
    %cst_385 = arith.constant dense<0.000000e+00> : vector<2x1xf32>
    %855 = vector.multi_reduction <add>, %854, %cst_385 [2] : vector<2x1x32xf32> to vector<2x1xf32>
    %856 = vector.shape_cast %855 : vector<2x1xf32> to vector<2x1x1xf32>
    %cst_386 = arith.constant 3.200000e+01 : f32
    %857 = vector.broadcast %cst_386 : f32 to vector<2x1x1xf32>
    %858 = arith.divf %856, %857 : vector<2x1x1xf32>
    %859 = vector.broadcast %851 : vector<2x1x1xf32> to vector<2x1x32xf32>
    %860 = arith.subf %845, %859 : vector<2x1x32xf32>
    %cst_387 = arith.constant 9.99999974E-6 : f32
    %861 = vector.broadcast %cst_387 : f32 to vector<2x1x1xf32>
    %862 = arith.addf %858, %861 : vector<2x1x1xf32>
    %863 = math.rsqrt %862 : vector<2x1x1xf32>
    %864 = vector.broadcast %863 : vector<2x1x1xf32> to vector<2x1x32xf32>
    %865 = arith.mulf %860, %864 : vector<2x1x32xf32>
    %866 = vector.shape_cast %846 : vector<1x32xf32> to vector<1x1x32xf32>
    %867 = vector.broadcast %866 : vector<1x1x32xf32> to vector<2x1x32xf32>
    %868 = arith.mulf %865, %867 : vector<2x1x32xf32>
    %869 = vector.shape_cast %847 : vector<1x32xf32> to vector<1x1x32xf32>
    %870 = vector.broadcast %869 : vector<1x1x32xf32> to vector<2x1x32xf32>
    %871 = arith.addf %868, %870 : vector<2x1x32xf32>
    %c0_388 = arith.constant 0 : index
    %c0_389 = arith.constant 0 : index
    %872 = vector.load %arg11[%c0_388, %c0_389] : memref<32x1xf32, #tpu.memory_space<vmem>>, vector<32x1xf32>
    %873 = vector.shape_cast %872 : vector<32x1xf32> to vector<32xf32>
    %874 = vector.shape_cast %873 : vector<32xf32> to vector<1x1x32xf32>
    %875 = vector.broadcast %874 : vector<1x1x32xf32> to vector<2x1x32xf32>
    %876 = arith.mulf %871, %875 : vector<2x1x32xf32>
    %cst_390 = arith.constant dense<0.000000e+00> : vector<2x1xf32>
    %877 = vector.multi_reduction <add>, %876, %cst_390 [2] : vector<2x1x32xf32> to vector<2x1xf32>
    %878 = vector.shape_cast %877 : vector<2x1xf32> to vector<2x1x1xf32>
    %c0_391 = arith.constant 0 : index
    %c0_392 = arith.constant 0 : index
    %879 = vector.load %arg12[%c0_391, %c0_392] : memref<1x1xf32, #tpu.memory_space<vmem>>, vector<1x1xf32>
    %880 = vector.shape_cast %879 : vector<1x1xf32> to vector<1x1x1xf32>
    %881 = vector.broadcast %880 : vector<1x1x1xf32> to vector<2x1x1xf32>
    %882 = arith.addf %878, %881 : vector<2x1x1xf32>
    %cst_393 = arith.constant 0.00666666683 : f32
    %883 = vector.broadcast %cst_393 : f32 to vector<2x1x1xf32>
    %884 = arith.mulf %882, %883 : vector<2x1x1xf32>
    %c0_394 = arith.constant 0 : index
    %c0_395 = arith.constant 0 : index
    %c0_396 = arith.constant 0 : index
    %885 = vector.load %arg45[%c0_394, %c0_395, %c0_396] : memref<2x1x1xf32, #tpu.memory_space<vmem>>, vector<2x1x1xf32>
    tpu.vector_store %arg45[%c0_394, %c0_395, %c0_396], %884 {strides = array<i32>} : memref<2x1x1xf32, #tpu.memory_space<vmem>>, vector<2x1x1xf32>,
    return
  }
  func.func @transform_0(%arg0: i32) -> (i32, i32, i32) {
    %c0_i32 = arith.constant 0 : i32
    %c0_i32_0 = arith.constant 0 : i32
    %c0_i32_1 = arith.constant 0 : i32
    %c0_i32_2 = arith.constant 0 : i32
    return %c0_i32, %c0_i32_0, %c0_i32_1 : i32, i32, i32
  }
  func.func @transform_1(%arg0: i32) -> (i32, i32) {
    %c0_i32 = arith.constant 0 : i32
    %c0_i32_0 = arith.constant 0 : i32
    %c0_i32_1 = arith.constant 0 : i32
    return %c0_i32, %c0_i32_0 : i32, i32
  }
  func.func @transform_2(%arg0: i32) -> (i32, i32) {
    %c0_i32 = arith.constant 0 : i32
    %c0_i32_0 = arith.constant 0 : i32
    %c0_i32_1 = arith.constant 0 : i32
    return %c0_i32, %c0_i32_0 : i32, i32
  }
  func.func @transform_3(%arg0: i32) -> (i32, i32) {
    %c0_i32 = arith.constant 0 : i32
    %c0_i32_0 = arith.constant 0 : i32
    %c0_i32_1 = arith.constant 0 : i32
    return %c0_i32, %c0_i32_0 : i32, i32
  }
  func.func @transform_4(%arg0: i32) -> (i32, i32) {
    %c0_i32 = arith.constant 0 : i32
    %c0_i32_0 = arith.constant 0 : i32
    %c0_i32_1 = arith.constant 0 : i32
    return %c0_i32, %c0_i32_0 : i32, i32
  }
  func.func @transform_5(%arg0: i32) -> (i32, i32) {
    %c0_i32 = arith.constant 0 : i32
    %c0_i32_0 = arith.constant 0 : i32
    %c0_i32_1 = arith.constant 0 : i32
    return %c0_i32, %c0_i32_0 : i32, i32
  }
  func.func @transform_6(%arg0: i32) -> (i32, i32) {
    %c0_i32 = arith.constant 0 : i32
    %c0_i32_0 = arith.constant 0 : i32
    %c0_i32_1 = arith.constant 0 : i32
    return %c0_i32, %c0_i32_0 : i32, i32
  }
  func.func @transform_7(%arg0: i32) -> (i32, i32) {
    %c0_i32 = arith.constant 0 : i32
    %c0_i32_0 = arith.constant 0 : i32
    %c0_i32_1 = arith.constant 0 : i32
    return %c0_i32, %c0_i32_0 : i32, i32
  }
  func.func @transform_8(%arg0: i32) -> (i32, i32) {
    %c0_i32 = arith.constant 0 : i32
    %c0_i32_0 = arith.constant 0 : i32
    %c0_i32_1 = arith.constant 0 : i32
    return %c0_i32, %c0_i32_0 : i32, i32
  }
  func.func @transform_9(%arg0: i32) -> (i32, i32) {
    %c0_i32 = arith.constant 0 : i32
    %c0_i32_0 = arith.constant 0 : i32
    %c0_i32_1 = arith.constant 0 : i32
    return %c0_i32, %c0_i32_0 : i32, i32
  }
  func.func @transform_10(%arg0: i32) -> (i32, i32) {
    %c0_i32 = arith.constant 0 : i32
    %c0_i32_0 = arith.constant 0 : i32
    %c0_i32_1 = arith.constant 0 : i32
    return %c0_i32, %c0_i32_0 : i32, i32
  }
  func.func @transform_11(%arg0: i32) -> (i32, i32) {
    %c0_i32 = arith.constant 0 : i32
    %c0_i32_0 = arith.constant 0 : i32
    %c0_i32_1 = arith.constant 0 : i32
    return %c0_i32, %c0_i32_0 : i32, i32
  }
  func.func @transform_12(%arg0: i32) -> (i32, i32, i32) {
    %c0_i32 = arith.constant 0 : i32
    %c0_i32_0 = arith.constant 0 : i32
    %c0_i32_1 = arith.constant 0 : i32
    %c0_i32_2 = arith.constant 0 : i32
    return %c0_i32, %c0_i32_0, %c0_i32_1 : i32, i32, i32
  }
  func.func @transform_13(%arg0: i32) -> (i32, i32, i32) {
    %c0_i32 = arith.constant 0 : i32
    %c0_i32_0 = arith.constant 0 : i32
    %c0_i32_1 = arith.constant 0 : i32
    %c0_i32_2 = arith.constant 0 : i32
    return %c0_i32, %c0_i32_0, %c0_i32_1 : i32, i32, i32
  }
  func.func @transform_14(%arg0: i32) -> (i32, i32, i32) {
    %c0_i32 = arith.constant 0 : i32
    %c0_i32_0 = arith.constant 0 : i32
    %c0_i32_1 = arith.constant 0 : i32
    %c0_i32_2 = arith.constant 0 : i32
    return %c0_i32, %c0_i32_0, %c0_i32_1 : i32, i32, i32
  }
  func.func @transform_15(%arg0: i32) -> (i32, i32, i32) {
    %c0_i32 = arith.constant 0 : i32
    %c0_i32_0 = arith.constant 0 : i32
    %c0_i32_1 = arith.constant 0 : i32
    %c0_i32_2 = arith.constant 0 : i32
    return %c0_i32, %c0_i32_0, %c0_i32_1 : i32, i32, i32
  }
  func.func @transform_16(%arg0: i32) -> (i32, i32, i32) {
    %c0_i32 = arith.constant 0 : i32
    %c0_i32_0 = arith.constant 0 : i32
    %c0_i32_1 = arith.constant 0 : i32
    %c0_i32_2 = arith.constant 0 : i32
    return %c0_i32, %c0_i32_0, %c0_i32_1 : i32, i32, i32
  }
  func.func @transform_17(%arg0: i32) -> (i32, i32, i32) {
    %c0_i32 = arith.constant 0 : i32
    %c0_i32_0 = arith.constant 0 : i32
    %c0_i32_1 = arith.constant 0 : i32
    %c0_i32_2 = arith.constant 0 : i32
    return %c0_i32, %c0_i32_0, %c0_i32_1 : i32, i32, i32
  }
  func.func @transform_18(%arg0: i32) -> (i32, i32, i32) {
    %c0_i32 = arith.constant 0 : i32
    %c0_i32_0 = arith.constant 0 : i32
    %c0_i32_1 = arith.constant 0 : i32
    %c0_i32_2 = arith.constant 0 : i32
    return %c0_i32, %c0_i32_0, %c0_i32_1 : i32, i32, i32
  }
  func.func @transform_19(%arg0: i32) -> (i32, i32, i32) {
    %c0_i32 = arith.constant 0 : i32
    %c0_i32_0 = arith.constant 0 : i32
    %c0_i32_1 = arith.constant 0 : i32
    %c0_i32_2 = arith.constant 0 : i32
    return %c0_i32, %c0_i32_0, %c0_i32_1 : i32, i32, i32
  }
  func.func @transform_20(%arg0: i32) -> (i32, i32, i32) {
    %c0_i32 = arith.constant 0 : i32
    %c0_i32_0 = arith.constant 0 : i32
    %c0_i32_1 = arith.constant 0 : i32
    %c0_i32_2 = arith.constant 0 : i32
    return %c0_i32, %c0_i32_0, %c0_i32_1 : i32, i32, i32
  }
  func.func @transform_21(%arg0: i32) -> (i32, i32, i32) {
    %c0_i32 = arith.constant 0 : i32
    %c0_i32_0 = arith.constant 0 : i32
    %c0_i32_1 = arith.constant 0 : i32
    %c0_i32_2 = arith.constant 0 : i32
    return %c0_i32, %c0_i32_0, %c0_i32_1 : i32, i32, i32
  }
  func.func @transform_22(%arg0: i32) -> (i32, i32, i32) {
    %c0_i32 = arith.constant 0 : i32
    %c0_i32_0 = arith.constant 0 : i32
    %c0_i32_1 = arith.constant 0 : i32
    %c0_i32_2 = arith.constant 0 : i32
    return %c0_i32, %c0_i32_0, %c0_i32_1 : i32, i32, i32
  }
  func.func @transform_23(%arg0: i32) -> (i32, i32, i32) {
    %c0_i32 = arith.constant 0 : i32
    %c0_i32_0 = arith.constant 0 : i32
    %c0_i32_1 = arith.constant 0 : i32
    %c0_i32_2 = arith.constant 0 : i32
    return %c0_i32, %c0_i32_0, %c0_i32_1 : i32, i32, i32
  }
  func.func @transform_24(%arg0: i32) -> (i32, i32, i32) {
    %c0_i32 = arith.constant 0 : i32
    %c0_i32_0 = arith.constant 0 : i32
    %c0_i32_1 = arith.constant 0 : i32
    %c0_i32_2 = arith.constant 0 : i32
    return %c0_i32, %c0_i32_0, %c0_i32_1 : i32, i32, i32
  }
  func.func @transform_25(%arg0: i32) -> (i32, i32, i32) {
    %c0_i32 = arith.constant 0 : i32
    %c0_i32_0 = arith.constant 0 : i32
    %c0_i32_1 = arith.constant 0 : i32
    %c0_i32_2 = arith.constant 0 : i32
    return %c0_i32, %c0_i32_0, %c0_i32_1 : i32, i32, i32
  }
  func.func @transform_26(%arg0: i32) -> (i32, i32, i32) {
    %c0_i32 = arith.constant 0 : i32
    %c0_i32_0 = arith.constant 0 : i32
    %c0_i32_1 = arith.constant 0 : i32
    %c0_i32_2 = arith.constant 0 : i32
    return %c0_i32, %c0_i32_0, %c0_i32_1 : i32, i32, i32
  }
  func.func @transform_27(%arg0: i32) -> (i32, i32, i32) {
    %c0_i32 = arith.constant 0 : i32
    %c0_i32_0 = arith.constant 0 : i32
    %c0_i32_1 = arith.constant 0 : i32
    %c0_i32_2 = arith.constant 0 : i32
    return %c0_i32, %c0_i32_0, %c0_i32_1 : i32, i32, i32
  }
  func.func @transform_28(%arg0: i32) -> (i32, i32, i32) {
    %c0_i32 = arith.constant 0 : i32
    %c0_i32_0 = arith.constant 0 : i32
    %c0_i32_1 = arith.constant 0 : i32
    %c0_i32_2 = arith.constant 0 : i32
    return %c0_i32, %c0_i32_0, %c0_i32_1 : i32, i32, i32
  }
  func.func @transform_29(%arg0: i32) -> (i32, i32, i32) {
    %c0_i32 = arith.constant 0 : i32
    %c0_i32_0 = arith.constant 0 : i32
    %c0_i32_1 = arith.constant 0 : i32
    %c0_i32_2 = arith.constant 0 : i32
    return %c0_i32, %c0_i32_0, %c0_i32_1 : i32, i32, i32
  }
  func.func @transform_30(%arg0: i32) -> (i32, i32, i32) {
    %c0_i32 = arith.constant 0 : i32
    %c0_i32_0 = arith.constant 0 : i32
    %c0_i32_1 = arith.constant 0 : i32
    %c0_i32_2 = arith.constant 0 : i32
    return %c0_i32, %c0_i32_0, %c0_i32_1 : i32, i32, i32
  }
  func.func @transform_31(%arg0: i32) -> (i32, i32, i32) {
    %c0_i32 = arith.constant 0 : i32
    %c0_i32_0 = arith.constant 0 : i32
    %c0_i32_1 = arith.constant 0 : i32
    %c0_i32_2 = arith.constant 0 : i32
    return %c0_i32, %c0_i32_0, %c0_i32_1 : i32, i32, i32
  }
  func.func @transform_32(%arg0: i32) -> (i32, i32, i32) {
    %c0_i32 = arith.constant 0 : i32
    %c0_i32_0 = arith.constant 0 : i32
    %c0_i32_1 = arith.constant 0 : i32
    %c0_i32_2 = arith.constant 0 : i32
    return %c0_i32, %c0_i32_0, %c0_i32_1 : i32, i32, i32
  }
  func.func @transform_33(%arg0: i32) -> (i32, i32, i32) {
    %c0_i32 = arith.constant 0 : i32
    %c0_i32_0 = arith.constant 0 : i32
    %c0_i32_1 = arith.constant 0 : i32
    %c0_i32_2 = arith.constant 0 : i32
    return %c0_i32, %c0_i32_0, %c0_i32_1 : i32, i32, i32
  }
  func.func @transform_34(%arg0: i32) -> (i32, i32, i32) {
    %c0_i32 = arith.constant 0 : i32
    %c0_i32_0 = arith.constant 0 : i32
    %c0_i32_1 = arith.constant 0 : i32
    %c0_i32_2 = arith.constant 0 : i32
    return %c0_i32, %c0_i32_0, %c0_i32_1 : i32, i32, i32
  }
  func.func @transform_35(%arg0: i32) -> (i32, i32, i32) {
    %c0_i32 = arith.constant 0 : i32
    %c0_i32_0 = arith.constant 0 : i32
    %c0_i32_1 = arith.constant 0 : i32
    %c0_i32_2 = arith.constant 0 : i32
    return %c0_i32, %c0_i32_0, %c0_i32_1 : i32, i32, i32
  }
  func.func @transform_36(%arg0: i32) -> (i32, i32, i32) {
    %c0_i32 = arith.constant 0 : i32
    %c0_i32_0 = arith.constant 0 : i32
    %c0_i32_1 = arith.constant 0 : i32
    %c0_i32_2 = arith.constant 0 : i32
    return %c0_i32, %c0_i32_0, %c0_i32_1 : i32, i32, i32
  }
  func.func @transform_37(%arg0: i32) -> (i32, i32, i32) {
    %c0_i32 = arith.constant 0 : i32
    %c0_i32_0 = arith.constant 0 : i32
    %c0_i32_1 = arith.constant 0 : i32
    %c0_i32_2 = arith.constant 0 : i32
    return %c0_i32, %c0_i32_0, %c0_i32_1 : i32, i32, i32
  }
  func.func @transform_38(%arg0: i32) -> (i32, i32, i32) {
    %c0_i32 = arith.constant 0 : i32
    %c0_i32_0 = arith.constant 0 : i32
    %c0_i32_1 = arith.constant 0 : i32
    %c0_i32_2 = arith.constant 0 : i32
    return %c0_i32, %c0_i32_0, %c0_i32_1 : i32, i32, i32
  }
  func.func @transform_39(%arg0: i32) -> (i32, i32, i32) {
    %c0_i32 = arith.constant 0 : i32
    %c0_i32_0 = arith.constant 0 : i32
    %c0_i32_1 = arith.constant 0 : i32
    %c0_i32_2 = arith.constant 0 : i32
    return %c0_i32, %c0_i32_0, %c0_i32_1 : i32, i32, i32
  }
  func.func @transform_40(%arg0: i32) -> (i32, i32, i32) {
    %c0_i32 = arith.constant 0 : i32
    %c0_i32_0 = arith.constant 0 : i32
    %c0_i32_1 = arith.constant 0 : i32
    %c0_i32_2 = arith.constant 0 : i32
    return %c0_i32, %c0_i32_0, %c0_i32_1 : i32, i32, i32
  }
  func.func @transform_41(%arg0: i32) -> (i32, i32, i32) {
    %c0_i32 = arith.constant 0 : i32
    %c0_i32_0 = arith.constant 0 : i32
    %c0_i32_1 = arith.constant 0 : i32
    %c0_i32_2 = arith.constant 0 : i32
    return %c0_i32, %c0_i32_0, %c0_i32_1 : i32, i32, i32
  }
  func.func @transform_42(%arg0: i32) -> (i32, i32, i32) {
    %c0_i32 = arith.constant 0 : i32
    %c0_i32_0 = arith.constant 0 : i32
    %c0_i32_1 = arith.constant 0 : i32
    %c0_i32_2 = arith.constant 0 : i32
    return %c0_i32, %c0_i32_0, %c0_i32_1 : i32, i32, i32
  }
  func.func @transform_43(%arg0: i32) -> (i32, i32, i32) {
    %c0_i32 = arith.constant 0 : i32
    %c0_i32_0 = arith.constant 0 : i32
    %c0_i32_1 = arith.constant 0 : i32
    %c0_i32_2 = arith.constant 0 : i32
    return %c0_i32, %c0_i32_0, %c0_i32_1 : i32, i32, i32
  }
  func.func @transform_44(%arg0: i32) -> (i32, i32, i32) {
    %c0_i32 = arith.constant 0 : i32
    %c0_i32_0 = arith.constant 0 : i32
    %c0_i32_1 = arith.constant 0 : i32
    %c0_i32_2 = arith.constant 0 : i32
    return %c0_i32, %c0_i32_0, %c0_i32_1 : i32, i32, i32
  }
}

</mosaic_0001>

<bundles_post_ra>
// kernel: transformer_ts_forward.1
= control target key start
LH: loop header
LB: loop body
LE: loop exit
PB: predicated region body
PF: predicated region fallthrough
CT: control target
= control target key end

     0   :  { %s12035_s6 = smov 1   ;;  %s12036_s10 = smov 2   ;;  %s13560_s0 = inlined_call_operand.smem [shape: u32[45], index: -1, kind: input, shape index: {}] }
   0x1   :  { %s12127_s5 = sld [smem:[%s13560_s0]]   ;;  %s12037_s14 = smov 3  }
   0x2   :  { %s12132_s9 = sld [smem:[%s13560_s0 + %s12035_s6]]   ;;  %s12038_s18 = smov 4  }
   0x3   :  { %s12137_s13 = sld [smem:[%s13560_s0 + %s12036_s10]]   ;;  %s12039_s22 = smov 5  }
   0x4   :  { %s12142_s17 = sld [smem:[%s13560_s0 + %s12037_s14]]   ;;  %s12040_s26 = smov 6  }
   0x5   :  { %s12147_s21 = sld [smem:[%s13560_s0 + %s12038_s18]]   ;;  %s12041_s30 = smov 7  }
   0x6   :  { %s12152_s25 = sld [smem:[%s13560_s0 + %s12039_s22]]   ;;  %s12042_s4 = smov 8  }
   0x7   :  { %13582 = sst [smem:[#allocation45_spill]] %s12127_s5  ;;  %s12043_s10 = smov 9  }
   0x8   :  { %13583 = sst [smem:[#allocation46_spill]] %s12132_s9  ;;  %s12044_s15 = smov 10  }
   0x9   :  { %13584 = sst [smem:[#allocation47_spill]] %s12137_s13  ;;  %s12045_s20 = smov 11  }
   0xa   :  { %13585 = sst [smem:[#allocation48_spill]] %s12142_s17  ;;  %s12047_s1 = smov 13  }
   0xb   :  { %s12157_s29 = sld [smem:[%s13560_s0 + %s12040_s26]]   ;;  %s12046_s26 = smov 12  }
   0xc   :  { %s12162_s3 = sld [smem:[%s13560_s0 + %s12041_s30]]   ;;  %s12048_s7 = smov 14  }
   0xd   :  { %s12167_s8 = sld [smem:[%s13560_s0 + %s12042_s4]]   ;;  %s12050_s22 = smov 16  }
   0xe   :  { %s12172_s14 = sld [smem:[%s13560_s0 + %s12043_s10]]   ;;  %s12051_s28 = smov 17  }
   0xf   :  { %s12177_s19 = sld [smem:[%s13560_s0 + %s12044_s15]]   ;;  %s12049_s15 = smov 15  }
  0x10   :  { %s9954_s24 = sld [smem:[%s13560_s0 + %s12045_s20]]   ;;  %s12054_s23 = smov 20  }
  0x11   :  { %13586 = sst [smem:[#allocation49_spill]] %s12157_s29  ;;  %s12060_s29 = smov 26  }
  0x12   :  { %13587 = sst [smem:[#allocation50_spill]] %s12162_s3  ;;  %s12058_s3 = smov 24  }
  0x13   :  { %s12185_s30 = sld [smem:[%s13560_s0 + %s12046_s26]]  }
  0x14   :  { %s12190_s6 = sld [smem:[%s13560_s0 + %s12047_s1]]  }
  0x15   :  { %13588 = sst [smem:[#allocation51_spill]] %s12177_s19  ;;  %s12057_s19 = smov 23  }
  0x16   :  { %s12195_s12 = sld [smem:[%s13560_s0 + %s12048_s7]]   ;;  %v94_v0 = vstv %s9954_s24  ;;  %s12052_s7 = smov 18  }
  0x17   :  { %s12200_s20 = sld [smem:[%s13560_s0 + %s12049_s15]]   ;;  %95 = vst [vmem:[#allocation2] sm:$0x1] %v94_v0  ;;  %s12053_s15 = smov 19  }
  0x18   :  { %s12205_s27 = sld [smem:[%s13560_s0 + %s12050_s22]]   ;;  %s12055_s24 = smov 21  }
  0x19   :  { %13589 = sst [smem:[#allocation52_spill]] %s12185_s30 }
  0x1a   :  { %13590 = sst [smem:[#allocation53_spill]] %s12190_s6 }
  0x1b   :  { %s12210_s4 = sld [smem:[%s13560_s0 + %s12051_s28]]  }
  0x1c   :  { %13591 = sst [smem:[#allocation54_spill]] %s12195_s12 }
  0x1d   :  { %13592 = sst [smem:[#allocation55_spill]] %s12200_s20 }
  0x1e   :  { %13593 = sst [smem:[#allocation56_spill]] %s12205_s27 }
  0x1f   :  { %s12215_s16 = sld [smem:[%s13560_s0 + %s12052_s7]]   ;;  %s12056_s7 = smov 22  }
  0x20   :  { %s12220_s22 = sld [smem:[%s13560_s0 + %s12053_s15]]  }
  0x21   :  { %13594 = sst [smem:[#allocation57_spill]] %s12210_s4 }
  0x22   :  { %s12225_s28 = sld [smem:[%s13560_s0 + %s12054_s23]]  }
  0x23   :  { %s12230_s10 = sld [smem:[%s13560_s0 + %s12055_s24]]   ;;  %s12059_s24 = smov 25  }
  0x24   :  { %s12245_s4 = sld [smem:[%s13560_s0 + %s12058_s3]]   ;;  %s12062_s3 = smov 28  }
  0x25   :  { %13595 = sst [smem:[#allocation58_spill]] %s12215_s16 }
  0x26   :  { %13596 = sst [smem:[#allocation59_spill]] %s12220_s22 }
  0x27   :  { %s12235_s16 = sld [smem:[%s13560_s0 + %s12056_s7]]  }
  0x28   :  { %13597 = sst [smem:[#allocation60_spill]] %s12225_s28 }
  0x29   :  { %13598 = sst [smem:[#allocation61_spill]] %s12230_s10 }
  0x2a   :  { %s12240_s22 = sld [smem:[%s13560_s0 + %s12057_s19]]   ;;  %s12061_s19 = smov 27  }
  0x2b   :  { %13601 = sst [smem:[#allocation64_spill]] %s12245_s4 }
  0x2c   :  { %s12250_s10 = sld [smem:[%s13560_s0 + %s12059_s24]]   ;;  %s12063_s24 = smov 29  }
  0x2d   :  { %13599 = sst [smem:[#allocation62_spill]] %s12235_s16 }
  0x2e   :  { %s12255_s27 = sld [smem:[%s13560_s0 + %s12060_s29]]   ;;  %s12064_s29 = smov 30  }
  0x2f   :  { %s12265_s4 = sld [smem:[%s13560_s0 + %s12062_s3]]   ;;  %s12066_s3 = smov 32  }
  0x30   :  { %13600 = sst [smem:[#allocation63_spill]] %s12240_s22 }
  0x31   :  { %s12260_s22 = sld [smem:[%s13560_s0 + %s12061_s19]]   ;;  %s12065_s19 = smov 31  }
  0x32   :  { %s12270_s16 = sld [smem:[%s13560_s0 + %s12063_s24]]   ;;  %s12067_s24 = smov 33  }
  0x33   :  { %s12280_s28 = sld [smem:[%s13560_s0 + %s12065_s19]]   ;;  %s12069_s19 = smov 35  }
  0x34   :  { %13602 = sst [smem:[#allocation65_spill]] %s12255_s27 }
  0x35   :  { %13603 = sst [smem:[#allocation66_spill]] %s12265_s4 }
  0x36   :  { %s12275_s27 = sld [smem:[%s13560_s0 + %s12064_s29]]   ;;  %s12068_s29 = smov 34  }
  0x37   :  { %s12285_s4 = sld [smem:[%s13560_s0 + %s12066_s3]]   ;;  %s12070_s3 = smov 36  }
  0x38   :  { %s12290_s20 = sld [smem:[%s13560_s0 + %s12067_s24]]   ;;  %s12071_s24 = smov 37  }
  0x39   :  { %s12295_s12 = sld [smem:[%s13560_s0 + %s12068_s29]]   ;;  %s12072_s29 = smov 38  }
  0x3a   :  { %s12300_s6 = sld [smem:[%s13560_s0 + %s12069_s19]]   ;;  %s12073_s19 = smov 39  }
  0x3b   :  { %s12305_s9 = sld [smem:[%s13560_s0 + %s12070_s3]]   ;;  %s12074_s3 = smov 40  }
  0x3c   :  { %s12310_s17 = sld [smem:[%s13560_s0 + %s12071_s24]]   ;;  %s12075_s24 = smov 41  }
  0x3d   :  { %s12315_s13 = sld [smem:[%s13560_s0 + %s12072_s29]]   ;;  %s12076_s29 = smov 42  }
  0x3e   :  { %13604 = sst [smem:[#allocation67_spill]] %s12290_s20 }
  0x3f   :  { %s12320_s30 = sld [smem:[%s13560_s0 + %s12073_s19]]   ;;  %s12077_s19 = smov 43  }
  0x40   :  { %13605 = sst [smem:[#allocation68_spill]] %s12300_s6 }
  0x41   :  { %s12325_s5 = sld [smem:[%s13560_s0 + %s12074_s3]]   ;;  %s12078_s3 = smov 44  }
  0x42   :  { %13606 = sst [smem:[#allocation69_spill]] %s12310_s17 }
  0x43   :  { %s12330_s17 = sld [smem:[%s13560_s0 + %s12075_s24]]  }
  0x44   :  { %s12335_s6 = sld [smem:[%s13560_s0 + %s12076_s29]]  }
  0x45   :  { %13607 = sst [smem:[#allocation70_spill]] %s12320_s30 }
  0x46   :  { %s12340_s30 = sld [smem:[%s13560_s0 + %s12077_s19]]  }
  0x47   :  { %s12345_s20 = sld [smem:[%s13560_s0 + %s12078_s3]]  }
  0x48   :  { %96 = vsyncpa [#allocation4], 0 }
  0x49   :  { %97 = vsyncpa [#allocation6], 0 }
  0x4a   :  { %98 = vsyncpa [#allocation9], 0 }
  0x4b   :  { %99 = vsyncpa [#allocation12], 0 }
  0x4c   :  { %100 = vsyncpa [#allocation15], 0 }
  0x4d   :  { %101 = vsyncpa [#allocation18], 0 }
  0x4e   :  { %102 = vsyncpa [#allocation21], 0 }
  0x4f   :  { %103 = vsyncpa [#allocation24], 0 }
  0x50   :  { %104 = vsyncpa [#allocation27], 0 }
  0x51   :  { %105 = vsyncpa [#allocation30], 0 }
  0x52   :  { %106 = vsyncpa [#allocation33], 0  ;;  %s12079_s24 = smov [#allocation5]   ;;  %s12080_s2 = smov [#allocation8]  }
  0x53   :  { %s131_s1 = sshll.u32 %s12079_s24, 4  ;;  %s155_s29 = sshll.u32 %s12080_s2, 4  ;;  %s132_s1 = int_to_ptr.vmem [resolvable:$true] %s131_s1  ;;  %s156_s29 = int_to_ptr.vmem [resolvable:$true] %s155_s29 }
  0x54   :  { %s11573_s0 = scalar_lea.hbm %s12152_s25, 16 }
  0x55   :  { %p11574_p0 = scmp.ne.s32.totalorder %s12152_s25, %s11573_s0  ;;  %p11577_p1 = scmp.lt.u32.totalorder %s11573_s0, %s12152_s25 }
  0x57   :  { %p11579_p2 = pnand %p11577_p1, %p11574_p0 }
  0x59   :  { %11582 = shalt.err (!%p11579_p2)
}
  0x5a   :  { %s11583_s7 = scalar_lea.vmem %s132_s1, 16  ;;  %s11587_s11 = scalar_lea.vmem %s132_s1, 32 }
  0x5b   :  { %p11584_p3 = scmp.ne.s32.totalorder %s132_s1, %s11583_s7  ;;  %p11588_p4 = scmp.lt.s32.totalorder %s132_s1, %s132_s1 }
  0x5c   :  { %p11589_p5 = scmp.lt.s32.totalorder %s11587_s11, %s11583_s7 }
  0x5e   :  { %p11590_p6 = por %p11589_p5, %p11588_p4 }
  0x60   :  { %p11591_p7 = pnand %p11590_p6, %p11584_p3 }
  0x62   :  { %11594 = shalt.err (!%p11591_p7)
}
  0x63   :  { %134 = dma.hbm_to_vmem [thread:$0]  %s12152_s25, 16, %s132_s1, [#allocation6]  }
  0x64   :  { %s11595_s19 = scalar_lea.hbm %s12172_s14, 16 }
  0x65   :  { %p11596_p8 = scmp.ne.s32.totalorder %s12172_s14, %s11595_s19  ;;  %p11599_p9 = scmp.lt.u32.totalorder %s11595_s19, %s12172_s14 }
  0x67   :  { %p11601_p10 = pnand %p11599_p9, %p11596_p8 }
  0x69   :  { %11604 = shalt.err (!%p11601_p10)
}
  0x6a   :  { %s11605_s15 = scalar_lea.vmem %s156_s29, 16  ;;  %s11609_s18 = scalar_lea.vmem %s156_s29, 32 }
  0x6b   :  { %p11606_p11 = scmp.ne.s32.totalorder %s156_s29, %s11605_s15  ;;  %p11610_p12 = scmp.lt.s32.totalorder %s156_s29, %s156_s29 }
  0x6c   :  { %p11611_p13 = scmp.lt.s32.totalorder %s11609_s18, %s11605_s15 }
  0x6e   :  { %p11612_p0 = por %p11611_p13, %p11610_p12 }
  0x70   :  { %p11613_p1 = pnand %p11612_p0, %p11606_p11 }
  0x72   :  { %11616 = shalt.err (!%p11613_p1)
}
  0x73   :  { %158 = dma.hbm_to_vmem [thread:$0]  %s12172_s14, 16, %s156_s29, [#allocation9]  }
  0x74   :  { %s12081_s3 = smov [#allocation11]   ;;  %s12082_s23 = smov [#allocation14]  }
  0x75   :  { %s208_s25 = sshll.u32 %s12081_s3, 4  ;;  %s234_s26 = sshll.u32 %s12082_s23, 4  ;;  %s209_s25 = int_to_ptr.vmem [resolvable:$true] %s208_s25  ;;  %s12355_s26 = int_to_ptr.vmem [resolvable:$true] %s234_s26 }
  0x76   :  { %s11617_s24 = scalar_lea.hbm %s12260_s22, 32 }
  0x77   :  { %p11618_p2 = scmp.ne.s32.totalorder %s12260_s22, %s11617_s24  ;;  %p11621_p3 = scmp.lt.u32.totalorder %s11617_s24, %s12260_s22 }
  0x79   :  { %p11623_p4 = pnand %p11621_p3, %p11618_p2 }
  0x7b   :  { %11626 = shalt.err (!%p11623_p4)
}
  0x7c   :  { %s11627_s1 = scalar_lea.vmem %s209_s25, 32  ;;  %p11632_p6 = scmp.lt.s32.totalorder %s209_s25, %s209_s25 }
  0x7d   :  { %p11628_p5 = scmp.ne.s32.totalorder %s209_s25, %s11627_s1  ;;  %p11633_p7 = scmp.lt.s32.totalorder %s11627_s1, %s11627_s1 }
  0x7f   :  { %p11634_p8 = por %p11633_p7, %p11632_p6 }
  0x81   :  { %p11635_p9 = pnand %p11634_p8, %p11628_p5 }
  0x83   :  { %11638 = shalt.err (!%p11635_p9)
}
  0x84   :  { %s12083_s14 = smov 16   ;;  %s12084_s2 = smov 1  }
  0x85   :  { %214 = dma.hbm_to_vmem [thread:$0]  %s12260_s22, 32, %s209_s25, [#allocation12], %s12083_s14, %s12083_s14, %s12084_s2  }
  0x86   :  { %s11639_s29 = scalar_lea.hbm %s12275_s27, 1024 }
  0x87   :  { %p11640_p10 = scmp.ne.s32.totalorder %s12275_s27, %s11639_s29  ;;  %p11643_p11 = scmp.lt.u32.totalorder %s11639_s29, %s12275_s27 }
  0x89   :  { %p11645_p12 = pnand %p11643_p11, %p11640_p10 }
  0x8b   :  { %11648 = shalt.err (!%p11645_p12)
}
  0x8c   :  { %s11649_s0 = scalar_lea.vmem %s12355_s26, 1024  ;;  %p11654_p0 = scmp.lt.s32.totalorder %s12355_s26, %s12355_s26 }
  0x8d   :  { %p11650_p13 = scmp.ne.s32.totalorder %s12355_s26, %s11649_s0  ;;  %p11655_p1 = scmp.lt.s32.totalorder %s11649_s0, %s11649_s0 }
  0x8f   :  { %p11656_p2 = por %p11655_p1, %p11654_p0 }
  0x91   :  { %p11657_p3 = pnand %p11656_p2, %p11650_p13 }
  0x93   :  { %11660 = shalt.err (!%p11657_p3)
}
  0x94   :  { %s12085_s7 = smov 128   ;;  %s12086_s22 = smov 8  }
  0x95   :  { %240 = dma.hbm_to_vmem [thread:$0]  %s12275_s27, 1024, %s12355_s26, [#allocation15], %s12085_s7, %s12085_s7, %s12086_s22  }
  0x96   :  { %s12087_s11 = smov [#allocation17]   ;;  %s12088_s15 = smov [#allocation20]  }
  0x97   :  { %s258_s19 = sshll.u32 %s12087_s11, 4  ;;  %s282_s18 = sshll.u32 %s12088_s15, 4  ;;  %s259_s19 = int_to_ptr.vmem [resolvable:$true] %s258_s19  ;;  %s12376_s18 = int_to_ptr.vmem [resolvable:$true] %s282_s18 }
  0x98   :  { %s11661_s3 = scalar_lea.hbm %s12285_s4, 1024 }
  0x99   :  { %p11662_p4 = scmp.ne.s32.totalorder %s12285_s4, %s11661_s3  ;;  %p11665_p5 = scmp.lt.u32.totalorder %s11661_s3, %s12285_s4 }
  0x9b   :  { %p11667_p6 = pnand %p11665_p5, %p11662_p4 }
  0x9d   :  { %11670 = shalt.err (!%p11667_p6)
}
  0x9e   :  { %s11671_s25 = scalar_lea.vmem %s259_s19, 1024  ;;  %p11676_p8 = scmp.lt.s32.totalorder %s259_s19, %s259_s19 }
  0x9f   :  { %p11672_p7 = scmp.ne.s32.totalorder %s259_s19, %s11671_s25  ;;  %p11677_p9 = scmp.lt.s32.totalorder %s11671_s25, %s11671_s25 }
  0xa1   :  { %p11678_p10 = por %p11677_p9, %p11676_p8 }
  0xa3   :  { %p11679_p11 = pnand %p11678_p10, %p11672_p7 }
  0xa5   :  { %11682 = shalt.err (!%p11679_p11)
}
  0xa6   :  { %264 = dma.hbm_to_vmem [thread:$0]  %s12285_s4, 1024, %s259_s19, [#allocation18], %s12085_s7, %s12085_s7, %s12086_s22  }
  0xa7   :  { %s11683_s27 = scalar_lea.hbm %s12295_s12, 32 }
  0xa8   :  { %p11684_p12 = scmp.ne.s32.totalorder %s12295_s12, %s11683_s27  ;;  %p11687_p13 = scmp.lt.u32.totalorder %s11683_s27, %s12295_s12 }
  0xaa   :  { %p11689_p0 = pnand %p11687_p13, %p11684_p12 }
  0xac   :  { %11692 = shalt.err (!%p11689_p0)
}
  0xad   :  { %s11693_s23 = scalar_lea.vmem %s12376_s18, 32  ;;  %p11698_p2 = scmp.lt.s32.totalorder %s12376_s18, %s12376_s18 }
  0xae   :  { %p11694_p1 = scmp.ne.s32.totalorder %s12376_s18, %s11693_s23  ;;  %p11699_p3 = scmp.lt.s32.totalorder %s11693_s23, %s11693_s23 }
  0xb0   :  { %p11700_p4 = por %p11699_p3, %p11698_p2 }
  0xb2   :  { %p11701_p5 = pnand %p11700_p4, %p11694_p1 }
  0xb4   :  { %11704 = shalt.err (!%p11701_p5)
}
  0xb5   :  { %288 = dma.hbm_to_vmem [thread:$0]  %s12295_s12, 32, %s12376_s18, [#allocation21], %s12083_s14, %s12083_s14, %s12084_s2  }
  0xb6   :  { %s12089_s4 = smov [#allocation23]   ;;  %s12090_s24 = smov [#allocation26]  }
  0xb7   :  { %s306_s26 = sshll.u32 %s12089_s4, 4  ;;  %s330_s1 = sshll.u32 %s12090_s24, 4  ;;  %s307_s26 = int_to_ptr.vmem [resolvable:$true] %s306_s26  ;;  %s12397_s1 = int_to_ptr.vmem [resolvable:$true] %s330_s1 }
  0xb8   :  { %s11705_s29 = scalar_lea.hbm %s12305_s9, 32 }
  0xb9   :  { %p11706_p6 = scmp.ne.s32.totalorder %s12305_s9, %s11705_s29  ;;  %p11709_p7 = scmp.lt.u32.totalorder %s11705_s29, %s12305_s9 }
  0xbb   :  { %p11711_p8 = pnand %p11709_p7, %p11706_p6 }
  0xbd   :  { %11714 = shalt.err (!%p11711_p8)
}
  0xbe   :  { %s11715_s0 = scalar_lea.vmem %s307_s26, 32  ;;  %p11720_p10 = scmp.lt.s32.totalorder %s307_s26, %s307_s26 }
  0xbf   :  { %p11716_p9 = scmp.ne.s32.totalorder %s307_s26, %s11715_s0  ;;  %p11721_p11 = scmp.lt.s32.totalorder %s11715_s0, %s11715_s0 }
  0xc1   :  { %p11722_p12 = por %p11721_p11, %p11720_p10 }
  0xc3   :  { %p11723_p13 = pnand %p11722_p12, %p11716_p9 }
  0xc5   :  { %11726 = shalt.err (!%p11723_p13)
}
  0xc6   :  { %312 = dma.hbm_to_vmem [thread:$0]  %s12305_s9, 32, %s307_s26, [#allocation24], %s12083_s14, %s12083_s14, %s12084_s2  }
  0xc7   :  { %s11727_s12 = scalar_lea.hbm %s12315_s13, 32 }
  0xc8   :  { %p11728_p0 = scmp.ne.s32.totalorder %s12315_s13, %s11727_s12  ;;  %p11731_p1 = scmp.lt.u32.totalorder %s11727_s12, %s12315_s13 }
  0xca   :  { %p11733_p2 = pnand %p11731_p1, %p11728_p0 }
  0xcc   :  { %11736 = shalt.err (!%p11733_p2)
}
  0xcd   :  { %s11737_s11 = scalar_lea.vmem %s12397_s1, 32  ;;  %p11742_p4 = scmp.lt.s32.totalorder %s12397_s1, %s12397_s1 }
  0xce   :  { %p11738_p3 = scmp.ne.s32.totalorder %s12397_s1, %s11737_s11  ;;  %p11743_p5 = scmp.lt.s32.totalorder %s11737_s11, %s11737_s11 }
  0xd0   :  { %p11744_p6 = por %p11743_p5, %p11742_p4 }
  0xd2   :  { %p11745_p7 = pnand %p11744_p6, %p11738_p3 }
  0xd4   :  { %11748 = shalt.err (!%p11745_p7)
}
  0xd5   :  { %336 = dma.hbm_to_vmem [thread:$0]  %s12315_s13, 32, %s12397_s1, [#allocation27], %s12083_s14, %s12083_s14, %s12084_s2  }
  0xd6   :  { %s12091_s9 = smov [#allocation29]   ;;  %s12092_s15 = smov [#allocation3]  }
  0xd7   :  { %s354_s19 = sshll.u32 %s12091_s9, 4  ;;  %s121_s18 = sshll.u32 %s12092_s15, 4  ;;  %s355_s19 = int_to_ptr.vmem [resolvable:$true] %s354_s19  ;;  %s122_s18 = int_to_ptr.vmem [resolvable:$true] %s121_s18 }
  0xd8   :  { %s11749_s3 = scalar_lea.hbm %s12325_s5, 1024 }
  0xd9   :  { %p11750_p8 = scmp.ne.s32.totalorder %s12325_s5, %s11749_s3  ;;  %p11753_p9 = scmp.lt.u32.totalorder %s11749_s3, %s12325_s5 }
  0xdb   :  { %p11755_p10 = pnand %p11753_p9, %p11750_p8 }
  0xdd   :  { %11758 = shalt.err (!%p11755_p10)
}
  0xde   :  { %s11759_s25 = scalar_lea.vmem %s355_s19, 1024  ;;  %p11764_p12 = scmp.lt.s32.totalorder %s355_s19, %s355_s19 }
  0xdf   :  { %p11760_p11 = scmp.ne.s32.totalorder %s355_s19, %s11759_s25  ;;  %p11765_p13 = scmp.lt.s32.totalorder %s11759_s25, %s11759_s25 }
  0xe1   :  { %p11766_p0 = por %p11765_p13, %p11764_p12 }
  0xe3   :  { %p11767_p1 = pnand %p11766_p0, %p11760_p11 }
  0xe5   :  { %11770 = shalt.err (!%p11767_p1)
}
  0xe6   :  { %360 = dma.hbm_to_vmem [thread:$0]  %s12325_s5, 1024, %s355_s19, [#allocation30], %s12085_s7, %s12085_s7, %s12086_s22  }
  0xe7   :  { %s11771_s13 = scalar_lea.hbm %s12147_s21, 16 }
  0xe8   :  { %p11772_p2 = scmp.ne.s32.totalorder %s12147_s21, %s11771_s13  ;;  %p11775_p3 = scmp.lt.u32.totalorder %s11771_s13, %s12147_s21 }
  0xea   :  { %p11777_p4 = pnand %p11775_p3, %p11772_p2 }
  0xec   :  { %11780 = shalt.err (!%p11777_p4)
}
  0xed   :  { %s11781_s27 = scalar_lea.vmem %s122_s18, 16  ;;  %s11785_s23 = scalar_lea.vmem %s122_s18, 32 }
  0xee   :  { %p11782_p5 = scmp.ne.s32.totalorder %s122_s18, %s11781_s27  ;;  %p11786_p6 = scmp.lt.s32.totalorder %s122_s18, %s122_s18 }
  0xef   :  { %p11787_p7 = scmp.lt.s32.totalorder %s11785_s23, %s11781_s27 }
  0xf1   :  { %p11788_p8 = por %p11787_p7, %p11786_p6 }
  0xf3   :  { %p11789_p9 = pnand %p11788_p8, %p11782_p5 }
  0xf5   :  { %11792 = shalt.err (!%p11789_p9)
}
  0xf6   :  { %124 = dma.hbm_to_vmem [thread:$0]  %s12147_s21, 16, %s122_s18, [#allocation4]  }
  0xf7   :  { %s12093_s4 = smov [#allocation7]   ;;  %s12094_s7 = smov [#allocation10]  }
  0xf8   :  { %s145_s5 = sshll.u32 %s12093_s4, 4  ;;  %s194_s22 = sshll.u32 %s12094_s7, 4  ;;  %s146_s5 = int_to_ptr.vmem [resolvable:$true] %s145_s5  ;;  %s12429_s22 = int_to_ptr.vmem [resolvable:$true] %s194_s22 }
  0xf9   :  { %s11793_s26 = scalar_lea.hbm %s12167_s8, 16 }
  0xfa   :  { %p11794_p10 = scmp.ne.s32.totalorder %s12167_s8, %s11793_s26  ;;  %p11797_p11 = scmp.lt.u32.totalorder %s11793_s26, %s12167_s8 }
  0xfc   :  { %p11799_p12 = pnand %p11797_p11, %p11794_p10 }
  0xfe   :  { %11802 = shalt.err (!%p11799_p12)
}
  0xff   :  { %s11803_s24 = scalar_lea.vmem %s146_s5, 16  ;;  %s11807_s1 = scalar_lea.vmem %s146_s5, 32 }
 0x100   :  { %p11804_p13 = scmp.ne.s32.totalorder %s146_s5, %s11803_s24  ;;  %p11808_p0 = scmp.lt.s32.totalorder %s146_s5, %s146_s5 }
 0x101   :  { %p11809_p1 = scmp.lt.s32.totalorder %s11807_s1, %s11803_s24 }
 0x103   :  { %p11810_p2 = por %p11809_p1, %p11808_p0 }
 0x105   :  { %p11811_p3 = pnand %p11810_p2, %p11804_p13 }
 0x107   :  { %11814 = shalt.err (!%p11811_p3)
}
 0x108   :  { %148 = dma.hbm_to_vmem [thread:$0]  %s12167_s8, 16, %s146_s5, [#allocation6]  }
 0x109   :  { %s11815_s21 = scalar_lea.hbm %s12250_s10, 32 }
 0x10a   :  { %p11816_p4 = scmp.ne.s32.totalorder %s12250_s10, %s11815_s21  ;;  %p11819_p5 = scmp.lt.u32.totalorder %s11815_s21, %s12250_s10 }
 0x10c   :  { %p11821_p6 = pnand %p11819_p5, %p11816_p4 }
 0x10e   :  { %11824 = shalt.err (!%p11821_p6)
}
 0x10f   :  { %s11825_s29 = scalar_lea.vmem %s12429_s22, 32  ;;  %p11830_p8 = scmp.lt.s32.totalorder %s12429_s22, %s12429_s22 }
 0x110   :  { %p11826_p7 = scmp.ne.s32.totalorder %s12429_s22, %s11825_s29  ;;  %p11831_p9 = scmp.lt.s32.totalorder %s11825_s29, %s11825_s29 }
 0x112   :  { %p11832_p10 = por %p11831_p9, %p11830_p8 }
 0x114   :  { %p11833_p11 = pnand %p11832_p10, %p11826_p7 }
 0x116   :  { %11836 = shalt.err (!%p11833_p11)
}
 0x117   :  { %200 = dma.hbm_to_vmem [thread:$0]  %s12250_s10, 32, %s12429_s22, [#allocation9], %s12083_s14, %s12083_s14, %s12084_s2  }
 0x118   :  { %s12095_s8 = smov [#allocation13]   ;;  %s12096_s12 = smov [#allocation16]  }
 0x119   :  { %s222_s0 = sshll.u32 %s12095_s8, 4  ;;  %s246_s11 = sshll.u32 %s12096_s12, 4  ;;  %s223_s0 = int_to_ptr.vmem [resolvable:$true] %s222_s0  ;;  %s12447_s11 = int_to_ptr.vmem [resolvable:$true] %s246_s11 }
 0x11a   :  { %s11837_s9 = scalar_lea.hbm %s12270_s16, 32 }
 0x11b   :  { %p11838_p12 = scmp.ne.s32.totalorder %s12270_s16, %s11837_s9  ;;  %p11841_p13 = scmp.lt.u32.totalorder %s11837_s9, %s12270_s16 }
 0x11d   :  { %p11843_p0 = pnand %p11841_p13, %p11838_p12 }
 0x11f   :  { %11846 = shalt.err (!%p11843_p0)
}
 0x120   :  { %s11847_s19 = scalar_lea.vmem %s223_s0, 32  ;;  %p11852_p2 = scmp.lt.s32.totalorder %s223_s0, %s223_s0 }
 0x121   :  { %p11848_p1 = scmp.ne.s32.totalorder %s223_s0, %s11847_s19  ;;  %p11853_p3 = scmp.lt.s32.totalorder %s11847_s19, %s11847_s19 }
 0x123   :  { %p11854_p4 = por %p11853_p3, %p11852_p2 }
 0x125   :  { %p11855_p5 = pnand %p11854_p4, %p11848_p1 }
 0x127   :  { %11858 = shalt.err (!%p11855_p5)
}
 0x128   :  { %228 = dma.hbm_to_vmem [thread:$0]  %s12270_s16, 32, %s223_s0, [#allocation12], %s12083_s14, %s12083_s14, %s12084_s2  }
 0x129   :  { %s11859_s10 = scalar_lea.hbm %s12280_s28, 32 }
 0x12a   :  { %p11860_p6 = scmp.ne.s32.totalorder %s12280_s28, %s11859_s10  ;;  %p11863_p7 = scmp.lt.u32.totalorder %s11859_s10, %s12280_s28 }
 0x12c   :  { %p11865_p8 = pnand %p11863_p7, %p11860_p6 }
 0x12e   :  { %11868 = shalt.err (!%p11865_p8)
}
 0x12f   :  { %s11869_s15 = scalar_lea.vmem %s12447_s11, 32  ;;  %p11874_p10 = scmp.lt.s32.totalorder %s12447_s11, %s12447_s11 }
 0x130   :  { %p11870_p9 = scmp.ne.s32.totalorder %s12447_s11, %s11869_s15  ;;  %p11875_p11 = scmp.lt.s32.totalorder %s11869_s15, %s11869_s15 }
 0x132   :  { %p11876_p12 = por %p11875_p11, %p11874_p10 }
 0x134   :  { %p11877_p13 = pnand %p11876_p12, %p11870_p9 }
 0x136   :  { %11880 = shalt.err (!%p11877_p13)
}
 0x137   :  { %s13608_s16 = sld [smem:[#allocation67_spill]]  ;;  %s12097_s18 = smov [#allocation19]  }
 0x138   :  { %252 = dma.hbm_to_vmem [thread:$0]  %s12280_s28, 32, %s12447_s11, [#allocation15], %s12083_s14, %s12083_s14, %s12084_s2  }
 0x139   :  { %s270_s3 = sshll.u32 %s12097_s18, 4  ;;  %s12098_s25 = smov [#allocation22]   ;;  %s271_s3 = int_to_ptr.vmem [resolvable:$true] %s270_s3 }
 0x13a   :  { %s294_s13 = sshll.u32 %s12098_s25, 4  ;;  %s12468_s13 = int_to_ptr.vmem [resolvable:$true] %s294_s13 }
 0x13d   :  { %s11881_s27 = scalar_lea.hbm %s13608_s16, 32 }
 0x13e   :  { %p11882_p0 = scmp.ne.s32.totalorder %s13608_s16, %s11881_s27  ;;  %p11885_p1 = scmp.lt.u32.totalorder %s11881_s27, %s13608_s16 }
 0x140   :  { %p11887_p2 = pnand %p11885_p1, %p11882_p0 }
 0x142   :  { %11890 = shalt.err (!%p11887_p2)
}
 0x143   :  { %s11891_s23 = scalar_lea.vmem %s271_s3, 32  ;;  %p11896_p4 = scmp.lt.s32.totalorder %s271_s3, %s271_s3 }
 0x144   :  { %p11892_p3 = scmp.ne.s32.totalorder %s271_s3, %s11891_s23  ;;  %p11897_p5 = scmp.lt.s32.totalorder %s11891_s23, %s11891_s23 }
 0x146   :  { %p11898_p6 = por %p11897_p5, %p11896_p4 }
 0x148   :  { %p11899_p7 = pnand %p11898_p6, %p11892_p3 }
 0x14a   :  { %11902 = shalt.err (!%p11899_p7)
}
 0x14b   :  { %s13609_s28 = sld [smem:[#allocation68_spill]] }
 0x14c   :  { %276 = dma.hbm_to_vmem [thread:$0]  %s13608_s16, 32, %s271_s3, [#allocation18], %s12083_s14, %s12083_s14, %s12084_s2  }
 0x151   :  { %s11903_s4 = scalar_lea.hbm %s13609_s28, 32 }
 0x152   :  { %p11904_p8 = scmp.ne.s32.totalorder %s13609_s28, %s11903_s4  ;;  %p11907_p9 = scmp.lt.u32.totalorder %s11903_s4, %s13609_s28 }
 0x154   :  { %p11909_p10 = pnand %p11907_p9, %p11904_p8 }
 0x156   :  { %11912 = shalt.err (!%p11909_p10)
}
 0x157   :  { %s11913_s5 = scalar_lea.vmem %s12468_s13, 32  ;;  %p11918_p12 = scmp.lt.s32.totalorder %s12468_s13, %s12468_s13 }
 0x158   :  { %p11914_p11 = scmp.ne.s32.totalorder %s12468_s13, %s11913_s5  ;;  %p11919_p13 = scmp.lt.s32.totalorder %s11913_s5, %s11913_s5 }
 0x15a   :  { %p11920_p0 = por %p11919_p13, %p11918_p12 }
 0x15c   :  { %p11921_p1 = pnand %p11920_p0, %p11914_p11 }
 0x15e   :  { %11924 = shalt.err (!%p11921_p1)
}
 0x15f   :  { %s13610_s7 = sld [smem:[#allocation69_spill]]  ;;  %s12099_s22 = smov [#allocation25]  }
 0x160   :  { %300 = dma.hbm_to_vmem [thread:$0]  %s13609_s28, 32, %s12468_s13, [#allocation21], %s12083_s14, %s12083_s14, %s12084_s2  }
 0x161   :  { %s318_s26 = sshll.u32 %s12099_s22, 4  ;;  %s12100_s24 = smov [#allocation28]   ;;  %s319_s26 = int_to_ptr.vmem [resolvable:$true] %s318_s26 }
 0x162   :  { %s342_s1 = sshll.u32 %s12100_s24, 4  ;;  %s12489_s1 = int_to_ptr.vmem [resolvable:$true] %s342_s1 }
 0x165   :  { %s11925_s21 = scalar_lea.hbm %s13610_s7, 32 }
 0x166   :  { %p11926_p2 = scmp.ne.s32.totalorder %s13610_s7, %s11925_s21  ;;  %p11929_p3 = scmp.lt.u32.totalorder %s11925_s21, %s13610_s7 }
 0x168   :  { %p11931_p4 = pnand %p11929_p3, %p11926_p2 }
 0x16a   :  { %11934 = shalt.err (!%p11931_p4)
}
 0x16b   :  { %s11935_s29 = scalar_lea.vmem %s319_s26, 32  ;;  %p11940_p6 = scmp.lt.s32.totalorder %s319_s26, %s319_s26 }
 0x16c   :  { %p11936_p5 = scmp.ne.s32.totalorder %s319_s26, %s11935_s29  ;;  %p11941_p7 = scmp.lt.s32.totalorder %s11935_s29, %s11935_s29 }
 0x16e   :  { %p11942_p8 = por %p11941_p7, %p11940_p6 }
 0x170   :  { %p11943_p9 = pnand %p11942_p8, %p11936_p5 }
 0x172   :  { %11946 = shalt.err (!%p11943_p9)
}
 0x173   :  { %s13611_s8 = sld [smem:[#allocation70_spill]] }
 0x174   :  { %324 = dma.hbm_to_vmem [thread:$0]  %s13610_s7, 32, %s319_s26, [#allocation24], %s12083_s14, %s12083_s14, %s12084_s2  }
 0x179   :  { %s11947_s0 = scalar_lea.hbm %s13611_s8, 32 }
 0x17a   :  { %p11948_p10 = scmp.ne.s32.totalorder %s13611_s8, %s11947_s0  ;;  %p11951_p11 = scmp.lt.u32.totalorder %s11947_s0, %s13611_s8 }
 0x17c   :  { %p11953_p12 = pnand %p11951_p11, %p11948_p10 }
 0x17e   :  { %11956 = shalt.err (!%p11953_p12)
}
 0x17f   :  { %s11957_s12 = scalar_lea.vmem %s12489_s1, 32  ;;  %p11962_p0 = scmp.lt.s32.totalorder %s12489_s1, %s12489_s1 }
 0x180   :  { %p11958_p13 = scmp.ne.s32.totalorder %s12489_s1, %s11957_s12  ;;  %p11963_p1 = scmp.lt.s32.totalorder %s11957_s12, %s11957_s12 }
 0x182   :  { %p11964_p2 = por %p11963_p1, %p11962_p0 }
 0x184   :  { %p11965_p3 = pnand %p11964_p2, %p11958_p13 }
 0x186   :  { %11968 = shalt.err (!%p11965_p3)
}
 0x187   :  { %348 = dma.hbm_to_vmem [thread:$0]  %s13611_s8, 32, %s12489_s1, [#allocation27], %s12083_s14, %s12083_s14, %s12084_s2  }
 0x188   :  { %s12101_s11 = smov [#allocation31]   ;;  %s12102_s19 = smov [#allocation32]  }
 0x189   :  { %s366_s9 = sshll.u32 %s12101_s11, 4  ;;  %s380_s10 = sshll.u32 %s12102_s19, 4  ;;  %s367_s9 = int_to_ptr.vmem [resolvable:$true] %s366_s9  ;;  %s12510_s10 = int_to_ptr.vmem [resolvable:$true] %s380_s10 }
 0x18a   :  { %s11969_s15 = scalar_lea.hbm %s12330_s17, 32 }
 0x18b   :  { %p11970_p4 = scmp.ne.s32.totalorder %s12330_s17, %s11969_s15  ;;  %p11973_p5 = scmp.lt.u32.totalorder %s11969_s15, %s12330_s17 }
 0x18d   :  { %p11975_p6 = pnand %p11973_p5, %p11970_p4 }
 0x18f   :  { %11978 = shalt.err (!%p11975_p6)
}
 0x190   :  { %s11979_s16 = scalar_lea.vmem %s367_s9, 32  ;;  %p11984_p8 = scmp.lt.s32.totalorder %s367_s9, %s367_s9 }
 0x191   :  { %p11980_p7 = scmp.ne.s32.totalorder %s367_s9, %s11979_s16  ;;  %p11985_p9 = scmp.lt.s32.totalorder %s11979_s16, %s11979_s16 }
 0x193   :  { %p11986_p10 = por %p11985_p9, %p11984_p8 }
 0x195   :  { %p11987_p11 = pnand %p11986_p10, %p11980_p7 }
 0x197   :  { %11990 = shalt.err (!%p11987_p11)
}
 0x198   :  { %372 = dma.hbm_to_vmem [thread:$0]  %s12330_s17, 32, %s367_s9, [#allocation30], %s12083_s14, %s12083_s14, %s12084_s2  }
 0x199   :  { %s11991_s18 = scalar_lea.hbm %s12340_s30, 32 }
 0x19a   :  { %p11992_p12 = scmp.ne.s32.totalorder %s12340_s30, %s11991_s18  ;;  %p11995_p13 = scmp.lt.u32.totalorder %s11991_s18, %s12340_s30 }
 0x19c   :  { %p11997_p0 = pnand %p11995_p13, %p11992_p12 }
 0x19e   :  { %12000 = shalt.err (!%p11997_p0)
}
 0x19f   :  { %s12001_s3 = scalar_lea.vmem %s12510_s10, 32  ;;  %p12006_p2 = scmp.lt.s32.totalorder %s12510_s10, %s12510_s10 }
 0x1a0   :  { %p12002_p1 = scmp.ne.s32.totalorder %s12510_s10, %s12001_s3  ;;  %p12007_p3 = scmp.lt.s32.totalorder %s12001_s3, %s12001_s3 }
 0x1a2   :  { %p12008_p4 = por %p12007_p3, %p12006_p2 }
 0x1a4   :  { %p12009_p5 = pnand %p12008_p4, %p12002_p1 }
 0x1a6   :  { %12012 = shalt.err (!%p12009_p5)
}
 0x1a7   :  { %386 = dma.hbm_to_vmem [thread:$0]  %s12340_s30, 32, %s12510_s10, [#allocation33], %s12083_s14, %s12083_s14, %s12084_s2  }
 0x1a8   :  { %12013 = dma.done.wait [#allocation4], 16  }
 0x1a9   :  { %12014 = vsyncadd [#allocation4], 4294967280 }
 0x1aa   :  { %12015 = dma.done.wait [#allocation6], 32  }
 0x1ab   :  { %12016 = vsyncadd [#allocation6], 4294967264 }
 0x1ac   :  { %12017 = dma.done.wait [#allocation9], 48  }
 0x1ad   :  { %12018 = vsyncadd [#allocation9], 4294967248 }
 0x1ae   :  { %12019 = dma.done.wait [#allocation12], 64  }
 0x1af   :  { %12020 = vsyncadd [#allocation12], 4294967232 }
 0x1b0   :  { %12021 = dma.done.wait [#allocation15], 1056  }
 0x1b1   :  { %12022 = vsyncadd [#allocation15], 4294966240 }
 0x1b2   :  { %12023 = dma.done.wait [#allocation18], 1056  }
 0x1b3   :  { %12024 = vsyncadd [#allocation18], 4294966240 }
 0x1b4   :  { %12025 = dma.done.wait [#allocation21], 64  }
 0x1b5   :  { %12026 = vsyncadd [#allocation21], 4294967232 }
 0x1b6   :  { %12027 = dma.done.wait [#allocation24], 64  }
 0x1b7   :  { %12028 = vsyncadd [#allocation24], 4294967232 }
 0x1b8   :  { %12029 = dma.done.wait [#allocation27], 64  }
 0x1b9   :  { %12030 = vsyncadd [#allocation27], 4294967232 }
 0x1ba   :  { %12031 = dma.done.wait [#allocation30], 1056  }
 0x1bb   :  { %12032 = vsyncadd [#allocation30], 4294966240 }
 0x1bc   :  { %12033 = dma.done.wait [#allocation33], 32  }
 0x1bd   :  { %12034 = vsyncadd [#allocation33], 4294967264  ;;  %s13612_s17 = sld [smem:[#allocation45_spill]]  ;;  %s13613_s30 = sld [smem:[#allocation52_spill]]  ;;  %v12103_v1 = vmov 0   ;;  %vm509_vm0 = vcmask 261120  }
 0x1be   :  { %11385 = vset.pattern.permute.xlu0 %v12103_v1  ;;  %s13614_s14 = sld [smem:[#allocation47_spill]]  ;;  %11386 = vset.pattern.permute.xlu1 %v12103_v1  ;;  %s13615_s2 = sld [smem:[#allocation48_spill]]  ;;  %v12104_v21 = vmov 0.0   ;;  %vm12105_vm1 = vmmov 0   ;;  %vm601_vm2 = vcmask 64512   ;;  %vm2411_vm3 = vcmask 523264  }
 0x1bf   :  { %s13616_s25 = sld [smem:[#allocation46_spill]]  ;;  %s13617_s13 = sld [smem:[#allocation53_spill]]  ;;  %10519 = vmatprep.subr.mxu1 %v12104_v21  ;;  %10521 = vmatprep.mubr.msk.f32.mxu1 %vm12105_vm1, %v12104_v21  ;;  %vm4641_vm4 = vcmask 1041409   ;;  %vm4864_vm5 = vcmask 261127   ;;  %vm5282_vm6 = vcmask 57344   ;;  %vm9890_vm7 = vcmask 130112  }
 0x1c0   :  { %s12106_s27 = smov 96   ;;  %s12107_s23 = smov 64   ;;  %vm9897_vm8 = vcmask 195712   ;;  %vm9904_vm9 = vcmask 261312   ;;  %vm9926_vm10 = vcmask 7175  }
 0x1c1   :  { %s12108_s28 = smov 120   ;;  %s12109_s4 = smov 88  }
 0x1c2   :  { %s12110_s5 = smov 80   ;;  %s12111_s7 = smov 56  }
 0x1c3   :  { %v447_v2 = vld [vmem:[%s13612_s17] sm:$0xff]  ;;  %v448_v4 = vld [vmem:[%s13612_s17 + $0x8] sm:$0xff]  ;;  %v500_v7 = vld [vmem:[%s13613_s30 + $0x10] sm:$0xff]  ;;  %s12112_s22 = smov 112   ;;  %s12113_s26 = smov 48  }
 0x1c4   :  { %453 = vperm.xlu0 %11385, %v447_v2   ;;  %v498_v3 = vld [vmem:[%s13613_s30] sm:$0xff]  ;;  %v499_v5 = vld [vmem:[%s13613_s30 + $0x8] sm:$0xff]  ;;  %v501_v8 = vld [vmem:[%s13613_s30 + $0x18] sm:$0xff]  ;;  %s12114_s24 = smov 72   ;;  %s12115_s1 = smov 104  }
 0x1c5   :  { %v11133_v6 = vpack.c.bf16 %v499_v5, %v498_v3  ;;  %v11137_v9 = vpack.c.bf16 %v501_v8, %v500_v7  ;;  %v9988_v10 = vld [vmem:[%s13614_s14] ss:$0 sm:$0xff]  ;;  %s13618_s21 = sld [smem:[#allocation54_spill]]  ;;  %s12116_s29 = smov 40  }
 0x1c6   :  { %v9989_v12 = vld [vmem:[%s13615_s2] ss:$0 sm:$0xff]  ;;  %s13619_s8 = sld [smem:[#allocation55_spill]]  ;;  %s13620_s0 = sld [smem:[#allocation60_spill]] }
 0x1c7   :  { %11134 = vmatprep.subr.bf16.mxu0 %v11133_v6  ;;  %v449_v14 = vld [vmem:[%s13616_s25] sm:$0xff]  ;;  %s13621_s12 = sld [smem:[#allocation62_spill]]  ;;  %s13622_s11 = sld [smem:[#allocation56_spill]] }
 0x1c8   :  { %458 = vperm.xlu0 %11385, %v448_v4   ;;  %11136 = vmatpush3.bf16.msra.mxu0 %v11133_v6  ;;  %v9992_v22 = vld [vmem:[%s13617_s13] ss:$0 sm:$0xff]  ;;  %s13623_s9 = sld [smem:[#allocation57_spill]]  ;;  %s13624_s19 = sld [smem:[#allocation61_spill]] }
 0x1c9   :  { %11138 = vmatprep.subr.bf16.mxu0 %v11137_v9  ;;  %s13625_s10 = sld [smem:[#allocation63_spill]]  ;;  %s13626_s15 = sld [smem:[#allocation58_spill]] }
 0x1ca   :  { %s13627_s16 = sld [smem:[#allocation59_spill]]  ;;  %s13628_s18 = sld [smem:[#allocation64_spill]] }
 0x1cb   :  { %s13629_s3 = sld [smem:[#allocation65_spill]]  ;;  %s13630_s17 = sld [smem:[#allocation66_spill]] }
 0x1cc   :  { %11140 = vmatpush3.bf16.msra.mxu0 %v11137_v9  ;;  %s13632_s14 = sld [smem:[#allocation50_spill]] }
 0x1cd   :  { %10514 = vmatprep.subr.mxu0 %v12104_v21 }
 0x243   :  { %v12538_v11 = vpop.permute.xlu0 %453 }
 0x244   :  { %v467_v13 = vmul.f32 %v9988_v10, %v12538_v11 }
 0x246   :  { %v476_v15 = vadd.f32 %v9989_v12, %v467_v13 }
 0x247   :  { %v12543_v16 = vpop.permute.xlu0 %458 }
 0x248   :  { %v468_v17 = vmul.f32 %v9988_v10, %v12543_v16  ;;  %v12546_v18 = vadd.f32 %v476_v15, %v449_v14 }
 0x24a   :  { %v477_v19 = vadd.f32 %v9989_v12, %v468_v17  ;;  %10511 = vmatprep.mubr.msk.f32.mxu0 %vm509_vm0, %v12546_v18 }
 0x24c   :  { %v12550_v20 = vadd.f32 %v477_v19, %v449_v14 }
 0x24e   :  { %10512 = vmatmul.mubr.msk.f32.vlgmr.msra.gmra.mrb[0].mxu0 %vm509_vm0, %v12550_v20 }
 0x24f   :  { %10516 = vmatprep.mubr.msk.f32.mxu0 %vm12105_vm1, %v12104_v21 }
 0x321   :  { %v10513_v23 = vpop.f32.mrb[0].mxu0 }
 0x322   :  { %v12561_v24 = vadd.f32 %v10513_v23, %v9992_v22  ;;  %v582_v25 = vpop.f32.mrb[1].mxu0 }
 0x323   :  { %v12565_v26 = vadd.f32 %v9992_v22, %v582_v25 }
 0x324   :  { %678 = vrot.lane.b32.xlu1 %v12561_v24, %s12106_s27  ;;  %v12571_v28 = vmul.f32 0.35355338, %v12561_v24 }
 0x325   :  { %v12580_v30 = vmul.f32 0.35355338, %v12565_v26 }
 0x328   :  { %599 = vrot.lane.b32.xlu1 %v12565_v26, %s12106_s27 }
 0x396   :  { %v679_v27 = vpop.permute.xlu1 %678 }
 0x397   :  { %10520 = vmatpush3.xpose.msk.msra.mxu1 %vm601_vm2, %v679_v27 }
 0x398   :  { %10529 = vmatprep.subr.mxu1 %v12104_v21 }
 0x39a   :  { %10522 = vmatmul.mubr.msk.f32.vlgmr.msra.gmra.mrb[0].mxu1 %vm601_vm2, %v12571_v28  ;;  %v600_v29 = vpop.permute.xlu1 %599 }
 0x39b   :  { %10515 = vmatpush3.xpose.msk.msra.mxu0 %vm601_vm2, %v600_v29  ;;  %10531 = vmatprep.mubr.msk.f32.mxu1 %vm12105_vm1, %v12104_v21 }
 0x39c   :  { %10524 = vmatprep.subr.mxu0 %v12104_v21 }
 0x39e   :  { %10517 = vmatmul.mubr.msk.f32.vlgmr.msra.gmra.mrb[2].mxu0 %vm601_vm2, %v12580_v30 }
 0x39f   :  { %10526 = vmatprep.mubr.msk.f32.mxu0 %vm12105_vm1, %v12104_v21 }
 0x46d   :  { %v751_v31 = vpop.f32.mrb[0].mxu1 }
 0x46e   :  { %v10523_v32 = vpop.f32.mrb[1].mxu1  ;;  %v758_v33 = vsel %vm601_vm2, %v751_v31, -inf }
 0x46f   :  { %759 = vmax.xlane.f32.xlu0 %v758_v33 }
 0x471   :  { %v673_v34 = vpop.f32.mrb[2].mxu0 }
 0x472   :  { %v10518_v35 = vpop.f32.mrb[3].mxu0  ;;  %v755_v42 = vsel %vm601_vm2, %v673_v34, -inf }
 0x485   :  { %853 = vrot.lane.b32.xlu0 %v12561_v24, %s12107_s23 }
 0x489   :  { %1007 = vrot.lane.b32.xlu0 %v12571_v28, %s12108_s28 }
 0x4fc   :  { %v760_v36 = vpop.xlane.xlu0 %759 }
 0x4fd   :  { %v762_v37 = vsub.f32 %v751_v31, %v760_v36 }
 0x4ff   :  { %v765_v38 = vmul.f32 1.442695, %v762_v37 }
 0x500   :  { %v854_v39 = vpop.permute.xlu0 %853 }
 0x501   :  { %11397 = vpow2.f32 %v765_v38  ;;  %10530 = vmatpush3.msra.mxu1 %v854_v39 }
 0x502   :  { %10539 = vmatprep.subr.mxu1 %v12104_v21 }
 0x504   :  { %v1008_v47 = vpop.permute.xlu0 %1007 }
 0x50b   :  { %v11398_v40 = vpop.eup %11397 }
 0x50c   :  { %v770_v41 = vsel %vm601_vm2, %v11398_v40, 0.0 }
 0x50d   :  { %771 = vadd.xlane.f32.xlu1 %v770_v41 }
 0x51e   :  { %1009 = vrot.lane.b32.xlu1 %v12561_v24, %s12109_s4 }
 0x542   :  { %756 = vmax.xlane.f32.xlu1 %v755_v42 }
 0x553   :  { %931 = vrot.lane.b32.xlu1 %v12565_v26, %s12109_s4 }
 0x557   :  { %929 = vrot.lane.b32.xlu1 %v12580_v30, %s12108_s28 }
 0x55b   :  { %1423 = vrot.lane.b32.xlu1 %v12565_v26, %s12110_s5 }
 0x59a   :  { %v772_v43 = vpop.xlane.xlu1 %771 }
 0x59b   :  { %11399 = vrcp.f32 %v772_v43 }
 0x59e   :  { %v1010_v46 = vpop.permute.xlu1 %1009 }
 0x5a5   :  { %v11400_v44 = vpop.eup %11399 }
 0x5a6   :  { %v776_v45 = vmul.f32 %v11400_v44, %v11398_v40  ;;  %v592_v44 = vld [vmem:[%s13618_s21 + $0x8] sm:$0xff] }
 0x5a8   :  { %10532 = vmatmul.mubr.msk.f32.vlgmr.msra.gmra.mrb[2].mxu1 %vm601_vm2, %v776_v45  ;;  %v591_v45 = vld [vmem:[%s13618_s21] sm:$0xff] }
 0x5a9   :  { %10540 = vmatpush3.xpose.msk.msra.mxu1 %vm601_vm2, %v1010_v46  ;;  %10541 = vmatprep.mubr.msk.f32.mxu1 %vm12105_vm1, %v12104_v21 }
 0x5aa   :  { %10549 = vmatprep.subr.mxu1 %v12104_v21 }
 0x5ac   :  { %10542 = vmatmul.mubr.msk.f32.vlgmr.msra.gmra.mrb[4].mxu1 %vm601_vm2, %v1008_v47 }
 0x5ad   :  { %10551 = vmatprep.mubr.msk.f32.mxu1 %vm12105_vm1, %v12104_v21 }
 0x5cf   :  { %v757_v48 = vpop.xlane.xlu1 %756 }
 0x5d0   :  { %v761_v49 = vsub.f32 %v673_v34, %v757_v48 }
 0x5d2   :  { %v763_v50 = vmul.f32 1.442695, %v761_v49 }
 0x5d3   :  { %v932_v56 = vpop.permute.xlu1 %931 }
 0x5d4   :  { %11401 = vpow2.f32 %v763_v50 }
 0x5d7   :  { %v930_v60 = vpop.permute.xlu1 %929 }
 0x5db   :  { %v1424_v12 = vpop.permute.xlu1 %1423 }
 0x5de   :  { %v11402_v51 = vpop.eup %11401 }
 0x5df   :  { %v767_v52 = vsel %vm601_vm2, %v11402_v51, 0.0 }
 0x5e0   :  { %768 = vadd.xlane.f32.xlu0 %v767_v52 }
 0x5f6   :  { %777 = vrot.lane.b32.xlu0 %v12565_v26, %s12107_s23 }
 0x66d   :  { %v769_v53 = vpop.xlane.xlu0 %768 }
 0x66e   :  { %11403 = vrcp.f32 %v769_v53 }
 0x671   :  { %v778_v54 = vpop.permute.xlu0 %777 }
 0x672   :  { %10525 = vmatpush3.msra.mxu0 %v778_v54 }
 0x673   :  { %10534 = vmatprep.subr.mxu0 %v12104_v21 }
 0x678   :  { %v11404_v55 = vpop.eup %11403 }
 0x679   :  { %v775_v57 = vmul.f32 %v11404_v55, %v11402_v51 }
 0x67b   :  { %10527 = vmatmul.mubr.msk.f32.vlgmr.msra.gmra.mrb[4].mxu0 %vm601_vm2, %v775_v57  ;;  %v12616_v58 = vpop.f32.mrb[2].mxu1 }
 0x67c   :  { %10535 = vmatpush3.xpose.msk.msra.mxu0 %vm601_vm2, %v932_v56  ;;  %v10533_v59 = vpop.f32.mrb[3].mxu1  ;;  %10536 = vmatprep.mubr.msk.f32.mxu0 %vm12105_vm1, %v12104_v21 }
 0x67d   :  { %10544 = vmatprep.subr.mxu0 %v12104_v21 }
 0x67f   :  { %10537 = vmatmul.mubr.msk.f32.vlgmr.msra.gmra.mrb[6].mxu0 %vm601_vm2, %v930_v60  ;;  %v1081_v61 = vpop.f32.mrb[4].mxu1  ;;  %v593_v60 = vld [vmem:[%s13618_s21 + $0x10] sm:$0xff] }
 0x680   :  { %v10543_v62 = vpop.f32.mrb[5].mxu1  ;;  %v1088_v63 = vsel %vm601_vm2, %v1081_v61, -inf  ;;  %10546 = vmatprep.mubr.msk.f32.mxu0 %vm12105_vm1, %v12104_v21 }
 0x681   :  { %1089 = vmax.xlane.f32.xlu0 %v1088_v63 }
 0x697   :  { %1183 = vrot.lane.b32.xlu0 %v12561_v24, %s12111_s7 }
 0x69b   :  { %1421 = vrot.lane.b32.xlu0 %v12580_v30, %s12112_s22 }
 0x69f   :  { %1499 = vrot.lane.b32.xlu0 %v12571_v28, %s12112_s22 }
 0x70e   :  { %v1090_v0 = vpop.xlane.xlu0 %1089 }
 0x70f   :  { %v1092_v1 = vsub.f32 %v1081_v61, %v1090_v0 }
 0x711   :  { %v1095_v2 = vmul.f32 1.442695, %v1092_v1 }
 0x712   :  { %v1184_v3 = vpop.permute.xlu0 %1183 }
 0x713   :  { %11405 = vpow2.f32 %v1095_v2  ;;  %10550 = vmatpush3.msra.mxu1 %v1184_v3 }
 0x714   :  { %10564 = vmatprep.subr.mxu1 %v12104_v21 }
 0x716   :  { %v1422_v17 = vpop.permute.xlu0 %1421 }
 0x71a   :  { %v1500_v22 = vpop.permute.xlu0 %1499 }
 0x71d   :  { %v11406_v4 = vpop.eup %11405 }
 0x71e   :  { %v1100_v5 = vsel %vm601_vm2, %v11406_v4, 0.0 }
 0x71f   :  { %1101 = vadd.xlane.f32.xlu1 %v1100_v5 }
 0x730   :  { %1501 = vrot.lane.b32.xlu1 %v12561_v24, %s12110_s5 }
 0x74e   :  { %v12636_v6 = vpop.f32.mrb[4].mxu0 }
 0x74f   :  { %v10528_v7 = vpop.f32.mrb[5].mxu0 }
 0x752   :  { %v1003_v8 = vpop.f32.mrb[6].mxu0 }
 0x753   :  { %v10538_v9 = vpop.f32.mrb[7].mxu0  ;;  %v1085_v10 = vsel %vm601_vm2, %v1003_v8, -inf }
 0x754   :  { %1086 = vmax.xlane.f32.xlu1 %v1085_v10 }
 0x7ac   :  { %v1102_v13 = vpop.xlane.xlu1 %1101 }
 0x7ad   :  { %11407 = vrcp.f32 %v1102_v13 }
 0x7b0   :  { %v1502_v19 = vpop.permute.xlu1 %1501 }
 0x7b7   :  { %v11408_v14 = vpop.eup %11407 }
 0x7b8   :  { %v1106_v15 = vmul.f32 %v11408_v14, %v11406_v4 }
 0x7ba   :  { %10552 = vmatmul.mubr.msk.f32.vlgmr.msra.gmra.mrb[6].mxu1 %vm601_vm2, %v1106_v15 }
 0x7bb   :  { %10565 = vmatpush3.xpose.msk.msra.mxu1 %vm601_vm2, %v1424_v12  ;;  %10566 = vmatprep.mubr.msk.f32.mxu1 %vm12105_vm1, %v12104_v21 }
 0x7bc   :  { %10569 = vmatprep.subr.mxu1 %v12104_v21 }
 0x7be   :  { %10567 = vmatmul.mubr.msk.f32.vlgmr.msra.gmra.mrb[8].mxu1 %vm601_vm2, %v1422_v17 }
 0x7bf   :  { %10570 = vmatpush3.xpose.msk.msra.mxu1 %vm601_vm2, %v1502_v19  ;;  %10571 = vmatprep.mubr.msk.f32.mxu1 %vm12105_vm1, %v12104_v21 }
 0x7c0   :  { %10579 = vmatprep.subr.mxu1 %v12104_v21 }
 0x7c2   :  { %10572 = vmatmul.mubr.msk.f32.vlgmr.msra.gmra.mrb[10].mxu1 %vm601_vm2, %v1500_v22 }
 0x7c3   :  { %10581 = vmatprep.mubr.msk.f32.mxu1 %vm12105_vm1, %v12104_v21 }
 0x7e1   :  { %v1087_v23 = vpop.xlane.xlu1 %1086 }
 0x7e2   :  { %v1091_v25 = vsub.f32 %v1003_v8, %v1087_v23 }
 0x7e4   :  { %v1093_v27 = vmul.f32 1.442695, %v1091_v25 }
 0x7e6   :  { %11409 = vpow2.f32 %v1093_v27 }
 0x7f0   :  { %v11410_v29 = vpop.eup %11409 }
 0x7f1   :  { %v1097_v31 = vsel %vm601_vm2, %v11410_v29, 0.0 }
 0x7f2   :  { %1098 = vadd.xlane.f32.xlu0 %v1097_v31 }
 0x808   :  { %1107 = vrot.lane.b32.xlu0 %v12565_v26, %s12111_s7 }
 0x80c   :  { %1675 = vrot.lane.b32.xlu0 %v12561_v24, %s12113_s26 }
 0x810   :  { %1836 = vrot.lane.b32.xlu0 %v12565_v26, %s12114_s24 }
 0x814   :  { %1914 = vrot.lane.b32.xlu0 %v12561_v24, %s12114_s24 }
 0x818   :  { %1834 = vrot.lane.b32.xlu0 %v12580_v30, %s12115_s1 }
 0x87f   :  { %v1099_v32 = vpop.xlane.xlu0 %1098 }
 0x880   :  { %11411 = vrcp.f32 %v1099_v32 }
 0x883   :  { %v1108_v33 = vpop.permute.xlu0 %1107 }
 0x884   :  { %10545 = vmatpush3.msra.mxu0 %v1108_v33 }
 0x885   :  { %10554 = vmatprep.subr.mxu0 %v592_v44 }
 0x887   :  { %v1676_v34 = vpop.permute.xlu0 %1675 }
 0x888   :  { %10580 = vmatpush3.msra.mxu1 %v1676_v34 }
 0x889   :  { %10589 = vmatprep.subr.mxu1 %v12104_v21 }
 0x88a   :  { %v11412_v35 = vpop.eup %11411 }
 0x88b   :  { %v1105_v36 = vmul.f32 %v11412_v35, %v11410_v29  ;;  %v1837_v62 = vpop.permute.xlu0 %1836 }
 0x88d   :  { %10547 = vmatmul.mubr.msk.f32.vlgmr.msra.gmra.mrb[8].mxu0 %vm601_vm2, %v1105_v36  ;;  %v1255_v37 = vpop.f32.mrb[6].mxu1 }
 0x88e   :  { %v10553_v38 = vpop.f32.mrb[7].mxu1  ;;  %10555 = vmatpush3.msra.mxu0 %v592_v44 }
 0x88f   :  { %10559 = vmatprep.subr.mxu0 %v591_v45  ;;  %v1915_v2 = vpop.permute.xlu0 %1914  ;;  %v594_v38 = vld [vmem:[%s13618_s21 + $0x18] sm:$0xff] }
 0x891   :  { %v1495_v39 = vpop.f32.mrb[8].mxu1 }
 0x892   :  { %v10568_v40 = vpop.f32.mrb[9].mxu1  ;;  %v1577_v30 = vsel %vm601_vm2, %v1495_v39, -inf }
 0x893   :  { %1578 = vmax.xlane.f32.xlu1 %v1577_v30  ;;  %v1835_v3 = vpop.permute.xlu0 %1834 }
 0x895   :  { %v1573_v41 = vpop.f32.mrb[10].mxu1 }
 0x896   :  { %v10573_v42 = vpop.f32.mrb[11].mxu1  ;;  %v1580_v43 = vsel %vm601_vm2, %v1573_v41, -inf }
 0x897   :  { %1581 = vmax.xlane.f32.xlu1 %v1580_v43 }
 0x920   :  { %v1579_v46 = vpop.xlane.xlu1 %1578 }
 0x921   :  { %v1583_v47 = vsub.f32 %v1495_v39, %v1579_v46 }
 0x923   :  { %v1585_v48 = vmul.f32 1.442695, %v1583_v47 }
 0x924   :  { %v1582_v49 = vpop.xlane.xlu1 %1581 }
 0x925   :  { %11413 = vpow2.f32 %v1585_v48  ;;  %v1584_v50 = vsub.f32 %v1573_v41, %v1582_v49 }
 0x927   :  { %v1587_v51 = vmul.f32 1.442695, %v1584_v50 }
 0x929   :  { %11415 = vpow2.f32 %v1587_v51 }
 0x92f   :  { %v11414_v52 = vpop.eup %11413 }
 0x930   :  { %v1589_v53 = vsel %vm601_vm2, %v11414_v52, 0.0 }
 0x931   :  { %1590 = vadd.xlane.f32.xlu1 %v1589_v53 }
 0x933   :  { %v11416_v54 = vpop.eup %11415 }
 0x934   :  { %v1592_v55 = vsel %vm601_vm2, %v11416_v54, 0.0 }
 0x935   :  { %1593 = vadd.xlane.f32.xlu1 %v1592_v55 }
 0x946   :  { %1599 = vrot.lane.b32.xlu1 %v12565_v26, %s12113_s26 }
 0x94a   :  { %1912 = vrot.lane.b32.xlu1 %v12571_v28, %s12115_s1 }
 0x960   :  { %v1179_v56 = vpop.f32.mrb[8].mxu0 }
 0x961   :  { %v10548_v57 = vpop.f32.mrb[9].mxu0  ;;  %10556 = vmatprep.mubr.msk.f32.mxu0 %vm601_vm2, %v1179_v56 }
 0x962   :  { %10557 = vmatmul.mubr.msk.f32.vlgmr.msra.gmra.mrb[10].mxu0 %vm601_vm2, %v1255_v37 }
 0x963   :  { %10561 = vmatprep.mubr.msk.f32.mxu0 %vm601_vm2, %v12636_v6  ;;  %10560 = vmatpush3.msra.mxu0 %v591_v45 }
 0x964   :  { %10574 = vmatprep.subr.mxu0 %v12104_v21 }
 0x96a   :  { %10562 = vmatmul.mubr.msk.f32.vlgmr.msra.gmra.mrb[10].mxu0 %vm601_vm2, %v12616_v58 }
 0x96b   :  { %10576 = vmatprep.mubr.msk.f32.mxu0 %vm12105_vm1, %v12104_v21 }
 0x9be   :  { %v1591_v59 = vpop.xlane.xlu1 %1590 }
 0x9bf   :  { %11417 = vrcp.f32 %v1591_v59 }
 0x9c2   :  { %v1594_v28 = vpop.xlane.xlu1 %1593 }
 0x9c3   :  { %11419 = vrcp.f32 %v1594_v28 }
 0x9c6   :  { %v1600_v61 = vpop.permute.xlu1 %1599 }
 0x9c7   :  { %10575 = vmatpush3.msra.mxu0 %v1600_v61  ;;  %v2302_v61 = vld [vmem:[%s13620_s0] sm:$0xff] }
 0x9c8   :  { %10584 = vmatprep.subr.mxu0 %v593_v60 }
 0x9c9   :  { %v11418_v63 = vpop.eup %11417 }
 0x9ca   :  { %v1597_v0 = vmul.f32 %v11418_v63, %v11414_v52  ;;  %v1913_v8 = vpop.permute.xlu1 %1912  ;;  %v2304_v63 = vld [vmem:[%s13620_s0 + $0x10] sm:$0xff] }
 0x9cc   :  { %10577 = vmatmul.mubr.msk.f32.vlgmr.msra.gmra.mrb[12].mxu0 %vm601_vm2, %v1597_v0 }
 0x9cd   :  { %v11420_v1 = vpop.eup %11419  ;;  %10585 = vmatpush3.msra.mxu0 %v593_v60 }
 0x9ce   :  { %v1598_v58 = vmul.f32 %v11420_v1, %v11416_v54  ;;  %10594 = vmatprep.subr.mxu0 %v12104_v21  ;;  %v2305_v1 = vld [vmem:[%s13620_s0 + $0x18] sm:$0xff] }
 0x9d0   :  { %10582 = vmatmul.mubr.msk.f32.vlgmr.msra.gmra.mrb[12].mxu1 %vm601_vm2, %v1598_v58  ;;  %v2307_v58 = vld [vmem:[%s13621_s12] sm:$0xff] }
 0x9d1   :  { %10590 = vmatpush3.xpose.msk.msra.mxu1 %vm601_vm2, %v1837_v62  ;;  %10591 = vmatprep.mubr.msk.f32.mxu1 %vm12105_vm1, %v12104_v21  ;;  %v2303_v62 = vld [vmem:[%s13620_s0 + $0x8] sm:$0xff] }
 0x9d2   :  { %10599 = vmatprep.subr.mxu1 %v12104_v21  ;;  %v11141_v0 = vpack.c.bf16 %v2303_v62, %v2302_v61  ;;  %v10039_v61 = vld [vmem:[%s13613_s30 + $0x28] sm:$0xff]  ;;  %v10040_v62 = vld [vmem:[%s13613_s30 + $0x30] sm:$0xff] }
 0x9d4   :  { %10592 = vmatmul.mubr.msk.f32.vlgmr.msra.gmra.mrb[14].mxu1 %vm601_vm2, %v1835_v3  ;;  %v2308_v3 = vld [vmem:[%s13621_s12 + $0x8] sm:$0xff] }
 0x9d5   :  { %10601 = vmatprep.mubr.msk.f32.mxu1 %vm12105_vm1, %v12104_v21 }
 0xa9f   :  { %v1671_v4 = vpop.f32.mrb[12].mxu0 }
 0xaa0   :  { %v10578_v5 = vpop.f32.mrb[13].mxu0  ;;  %10586 = vmatprep.mubr.msk.f32.mxu0 %vm601_vm2, %v1671_v4  ;;  %v2309_v4 = vld [vmem:[%s13621_s12 + $0x10] sm:$0xff] }
 0xaa1   :  { %v11149_v5 = vpack.c.bf16 %v2308_v3, %v2307_v58 }
 0xaa3   :  { %v1747_v6 = vpop.f32.mrb[12].mxu1 }
 0xaa4   :  { %v10583_v7 = vpop.f32.mrb[13].mxu1  ;;  %10587 = vmatmul.mubr.msk.f32.vlgmr.msra.gmra.mrb[10].mxu0 %vm601_vm2, %v1747_v6  ;;  %v2310_v6 = vld [vmem:[%s13621_s12 + $0x18] sm:$0xff] }
 0xaa5   :  { %10595 = vmatpush3.xpose.msk.msra.mxu0 %vm601_vm2, %v1915_v2  ;;  %10596 = vmatprep.mubr.msk.f32.mxu0 %vm12105_vm1, %v12104_v21  ;;  %v11145_v2 = vpack.c.bf16 %v2305_v1, %v2304_v63  ;;  %v11153_v7 = vpack.c.bf16 %v2310_v6, %v2309_v4 }
 0xaa6   :  { %10604 = vmatprep.subr.mxu0 %v12104_v21 }
 0xaa7   :  { %v1908_v9 = vpop.f32.mrb[14].mxu1 }
 0xaa8   :  { %v10593_v10 = vpop.f32.mrb[15].mxu1  ;;  %10597 = vmatmul.mubr.msk.f32.vlgmr.msra.gmra.mrb[14].mxu0 %vm601_vm2, %v1913_v8  ;;  %v1990_v12 = vsel %vm601_vm2, %v1908_v9, -inf  ;;  %v2311_v8 = vld [vmem:[%s13621_s12 + $0x20] sm:$0xff] }
 0xaa9   :  { %1991 = vmax.xlane.f32.xlu0 %v1990_v12  ;;  %10606 = vmatprep.mubr.msk.f32.mxu0 %vm12105_vm1, %v12104_v21 }
 0xb36   :  { %v1992_v13 = vpop.xlane.xlu0 %1991 }
 0xb37   :  { %v1996_v14 = vsub.f32 %v1908_v9, %v1992_v13  ;;  %v2312_v9 = vld [vmem:[%s13621_s12 + $0x28] sm:$0xff] }
 0xb38   :  { %v11157_v10 = vpack.c.bf16 %v2312_v9, %v2311_v8  ;;  %v10036_v8 = vld [vmem:[%s13626_s15] ss:$0 sm:$0xff] }
 0xb39   :  { %v1998_v15 = vmul.f32 1.442695, %v1996_v14 }
 0xb3b   :  { %11421 = vpow2.f32 %v1998_v15 }
 0xb45   :  { %v11422_v17 = vpop.eup %11421 }
 0xb46   :  { %v2002_v19 = vsel %vm601_vm2, %v11422_v17, 0.0 }
 0xb47   :  { %2003 = vadd.xlane.f32.xlu0 %v2002_v19 }
 0xb7b   :  { %v1986_v22 = vpop.f32.mrb[14].mxu0 }
 0xb7c   :  { %v10598_v23 = vpop.f32.mrb[15].mxu0  ;;  %v1993_v25 = vsel %vm601_vm2, %v1986_v22, -inf }
 0xb7d   :  { %1994 = vmax.xlane.f32.xlu1 %v1993_v25  ;;  %v10028_v23 = vld [vmem:[%s13622_s11] ss:$0 sm:$0xff] }
 0xb8e   :  { %2012 = vrot.lane.b32.xlu1 %v12565_v26, %s12116_s29 }
 0xbd4   :  { %v2004_v27 = vpop.xlane.xlu0 %2003 }
 0xbd5   :  { %11423 = vrcp.f32 %v2004_v27 }
 0xbdf   :  { %v11424_v31 = vpop.eup %11423 }
 0xbe0   :  { %v2010_v35 = vmul.f32 %v11424_v31, %v11422_v17  ;;  %v10029_v31 = vld [vmem:[%s13623_s9] ss:$0 sm:$0xff] }
 0xc0a   :  { %v1995_v29 = vpop.xlane.xlu1 %1994 }
 0xc0b   :  { %v1997_v32 = vsub.f32 %v1986_v22, %v1995_v29 }
 0xc0d   :  { %v2000_v33 = vmul.f32 1.442695, %v1997_v32 }
 0xc0e   :  { %v2013_v34 = vpop.permute.xlu1 %2012 }
 0xc0f   :  { %11425 = vpow2.f32 %v2000_v33  ;;  %10600 = vmatpush3.msra.mxu1 %v2013_v34 }
 0xc10   :  { %10602 = vmatmul.mubr.msk.f32.vlgmr.msra.gmra.mrb[16].mxu1 %vm601_vm2, %v2010_v35  ;;  %11142 = vmatprep.subr.bf16.mxu1 %v11141_v0 }
 0xc11   :  { %11144 = vmatpush3.bf16.msra.mxu1 %v11141_v0  ;;  %v10041_v0 = vld [vmem:[%s13613_s30 + $0x38] sm:$0xff] }
 0xc12   :  { %11146 = vmatprep.subr.bf16.mxu1 %v11145_v2  ;;  %v11169_v1 = vpack.c.bf16 %v10041_v0, %v10040_v62 }
 0xc15   :  { %11148 = vmatpush3.bf16.msra.mxu1 %v11145_v2 }
 0xc19   :  { %v11426_v36 = vpop.eup %11425 }
 0xc1a   :  { %v2005_v37 = vsel %vm601_vm2, %v11426_v36, 0.0 }
 0xc1b   :  { %2006 = vadd.xlane.f32.xlu0 %v2005_v37  ;;  %v2314_v37 = vld [vmem:[%s13621_s12 + $0x38] sm:$0xff] }
 0xc31   :  { %2088 = vrot.lane.b32.xlu0 %v12561_v24, %s12116_s29  ;;  %v10027_v24 = vld [vmem:[%s13619_s8] ss:$0 sm:$0xff] }
 0xca8   :  { %v2007_v26 = vpop.xlane.xlu0 %2006 }
 0xca9   :  { %11427 = vrcp.f32 %v2007_v26 }
 0xcac   :  { %v2089_v39 = vpop.permute.xlu0 %2088 }
 0xcad   :  { %10605 = vmatpush3.msra.mxu0 %v2089_v39 }
 0xcae   :  { %10609 = vmatprep.subr.mxu0 %v594_v38 }
 0xcb3   :  { %v11428_v40 = vpop.eup %11427 }
 0xcb4   :  { %v2011_v30 = vmul.f32 %v11428_v40, %v11426_v36  ;;  %v2313_v36 = vld [vmem:[%s13621_s12 + $0x30] sm:$0xff] }
 0xcb5   :  { %v11161_v26 = vpack.c.bf16 %v2314_v37, %v2313_v36 }
 0xcb6   :  { %10607 = vmatmul.mubr.msk.f32.vlgmr.msra.gmra.mrb[16].mxu0 %vm601_vm2, %v2011_v30 }
 0xcb7   :  { %10610 = vmatpush3.msra.mxu0 %v594_v38  ;;  %v10030_v38 = vld [vmem:[%s13624_s19] ss:$0 sm:$0xff] }
 0xcb8   :  { %11150 = vmatprep.subr.bf16.mxu0 %v11149_v5 }
 0xce3   :  { %v2084_v41 = vpop.f32.mrb[16].mxu1 }
 0xce4   :  { %v10603_v42 = vpop.f32.mrb[17].mxu1  ;;  %10611 = vmatprep.mubr.msk.f32.mxu0 %vm601_vm2, %v2084_v41 }
 0xd89   :  { %v2160_v43 = vpop.f32.mrb[16].mxu0 }
 0xd8a   :  { %v10608_v44 = vpop.f32.mrb[17].mxu0  ;;  %10612 = vmatmul.mubr.msk.f32.vlgmr.msra.gmra.mrb[10].mxu0 %vm601_vm2, %v2160_v43 }
 0xd8b   :  { %11152 = vmatpush3.bf16.msra.mxu0 %v11149_v5  ;;  %v10033_v44 = vld [vmem:[%s13625_s10] ss:$0 sm:$0xff] }
 0xd8c   :  { %11154 = vmatprep.subr.bf16.mxu0 %v11153_v7 }
 0xd8f   :  { %11156 = vmatpush3.bf16.msra.mxu0 %v11153_v7 }
 0xd90   :  { %11158 = vmatprep.subr.bf16.mxu0 %v11157_v10 }
 0xd93   :  { %11160 = vmatpush3.bf16.msra.mxu0 %v11157_v10 }
 0xd94   :  { %11162 = vmatprep.subr.bf16.mxu0 %v11161_v26 }
 0xd97   :  { %11164 = vmatpush3.bf16.msra.mxu0 %v11161_v26 }
 0xd98   :  { %10665 = vmatprep.subr.mxu0 %v12104_v21 }
 0xe5d   :  { %v10613_v45 = vpop.f32.mrb[10].mxu0 }
 0xe5e   :  { %v2254_v46 = vadd.f32 %v10613_v45, %v10027_v24  ;;  %v2236_v47 = vpop.f32.mrb[11].mxu0 }
 0xe5f   :  { %v2253_v48 = vadd.f32 %v10027_v24, %v2236_v47 }
 0xe60   :  { %v2256_v49 = vadd.f32 %v2254_v46, %v12550_v20 }
 0xe61   :  { %v2255_v50 = vadd.f32 %v2253_v48, %v12546_v18 }
 0xe62   :  { %v2262_v51 = vsel %vm509_vm0, %v2256_v49, 0.0 }
 0xe63   :  { %2263 = vadd.xlane.f32.xlu0 %v2262_v51  ;;  %v2259_v52 = vsel %vm509_vm0, %v2255_v50, 0.0 }
 0xe64   :  { %2260 = vadd.xlane.f32.xlu1 %v2259_v52 }
 0xef0   :  { %v2264_v53 = vpop.xlane.xlu0 %2263 }
 0xef1   :  { %v2267_v54 = vmul.f32 0.03125, %v2264_v53  ;;  %v2261_v55 = vpop.xlane.xlu1 %2260 }
 0xef2   :  { %v2266_v56 = vmul.f32 0.03125, %v2261_v55 }
 0xef3   :  { %v2269_v57 = vsub.f32 %v2256_v49, %v2267_v54 }
 0xef4   :  { %v2268_v59 = vsub.f32 %v2255_v50, %v2266_v56 }
 0xef5   :  { %v2271_v28 = vmul.f32 %v2269_v57, %v2269_v57 }
 0xef6   :  { %v2270_v20 = vmul.f32 %v2268_v59, %v2268_v59 }
 0xef7   :  { %v2275_v18 = vsel %vm509_vm0, %v2271_v28, 0.0 }
 0xef8   :  { %2276 = vadd.xlane.f32.xlu0 %v2275_v18  ;;  %v2272_v60 = vsel %vm509_vm0, %v2270_v20, 0.0 }
 0xef9   :  { %2273 = vadd.xlane.f32.xlu1 %v2272_v60  ;;  %v10038_v60 = vld [vmem:[%s13613_s30 + $0x20] sm:$0xff]  ;;  %s13631_s30 = sld [smem:[#allocation49_spill]] }
 0xefa   :  { %v11165_v63 = vpack.c.bf16 %v10039_v61, %v10038_v60 }
 0xefc   :  { %11166 = vmatprep.subr.bf16.mxu1 %v11165_v63 }
 0xf85   :  { %v2277_v12 = vpop.xlane.xlu0 %2276 }
 0xf86   :  { %v2279_v13 = vmul.f32 0.03125, %v2277_v12  ;;  %v2274_v14 = vpop.xlane.xlu1 %2273 }
 0xf87   :  { %v2278_v15 = vmul.f32 0.03125, %v2274_v14 }
 0xf88   :  { %v2281_v17 = vadd.f32 1e-05, %v2279_v13  ;;  %v10037_v13 = vld [vmem:[%s13627_s16] ss:$0 sm:$0xff] }
 0xf89   :  { %v2280_v19 = vadd.f32 1e-05, %v2278_v15 }
 0xf8a   :  { %11429 = vrsqrt.f32 %v2281_v17 }
 0xf8b   :  { %11431 = vrsqrt.f32 %v2280_v19 }
 0xf94   :  { %v11430_v22 = vpop.eup %11429 }
 0xf95   :  { %v11432_v25 = vpop.eup %11431  ;;  %v2285_v27 = vmul.f32 %v11430_v22, %v2269_v57  ;;  %v10043_v22 = vld [vmem:[%s13617_s13 + $0x1] ss:$0 sm:$0xff] }
 0xf96   :  { %v2284_v29 = vmul.f32 %v11432_v25, %v2268_v59 }
 0xf97   :  { %v2293_v32 = vmul.f32 %v10028_v23, %v2285_v27 }
 0xf98   :  { %v2292_v33 = vmul.f32 %v10028_v23, %v2284_v29 }
 0xf99   :  { %v2301_v35 = vadd.f32 %v10029_v31, %v2293_v32 }
 0xf9a   :  { %v2300_v34 = vadd.f32 %v10029_v31, %v2292_v33 }
 0xf9c   :  { %10622 = vmatprep.mubr.msk.f32.mxu1 %vm509_vm0, %v2300_v34 }
 0xf9d   :  { %10623 = vmatmul.mubr.msk.f32.vlgmr.msra.gmra.mrb[18].mxu1 %vm509_vm0, %v2301_v35 }
 0xf9e   :  { %11168 = vmatpush3.bf16.msra.mxu1 %v11165_v63 }
 0xf9f   :  { %11170 = vmatprep.subr.bf16.mxu1 %v11169_v1 }
 0xfa2   :  { %11172 = vmatpush3.bf16.msra.mxu1 %v11169_v1 }
 0xfa3   :  { %10655 = vmatprep.subr.mxu1 %v12104_v21 }
0x1070   :  { %v10624_v39 = vpop.f32.mrb[18].mxu1 }
0x1071   :  { %v2400_v40 = vadd.f32 %v10624_v39, %v10030_v38  ;;  %v2394_v30 = vpop.f32.mrb[19].mxu1 }
0x1072   :  { %v2395_v41 = vadd.f32 %v10030_v38, %v2394_v30 }
0x1073   :  { %v2404_v43 = vmax.f32 %v2400_v40, 0.0 }
0x1074   :  { %v2403_v42 = vmax.f32 %v2395_v41, 0.0 }
0x1076   :  { %10641 = vmatprep.mubr.msk.f32.mxu0 %vm2411_vm3, %v2403_v42 }
0x1077   :  { %10642 = vmatmul.mubr.msk.f32.vlgmr.msra.gmra.mrb[18].mxu0 %vm2411_vm3, %v2404_v43 }
0x1078   :  { %10667 = vmatprep.mubr.msk.f32.mxu0 %vm12105_vm1, %v12104_v21 }
0x114a   :  { %v10643_v24 = vpop.f32.mrb[18].mxu0 }
0x114b   :  { %v2490_v45 = vadd.f32 %v10643_v24, %v10033_v44  ;;  %v2484_v46 = vpop.f32.mrb[19].mxu0 }
0x114c   :  { %v2485_v47 = vadd.f32 %v10033_v44, %v2484_v46 }
0x114d   :  { %v2494_v48 = vadd.f32 %v2490_v45, %v2301_v35 }
0x114e   :  { %v2493_v49 = vadd.f32 %v2485_v47, %v2300_v34 }
0x114f   :  { %v2500_v50 = vsel %vm509_vm0, %v2494_v48, 0.0 }
0x1150   :  { %2501 = vadd.xlane.f32.xlu0 %v2500_v50  ;;  %v2497_v51 = vsel %vm509_vm0, %v2493_v49, 0.0 }
0x1151   :  { %2498 = vadd.xlane.f32.xlu1 %v2497_v51 }
0x11dd   :  { %v2502_v52 = vpop.xlane.xlu0 %2501 }
0x11de   :  { %v2504_v53 = vmul.f32 0.03125, %v2502_v52  ;;  %v2499_v54 = vpop.xlane.xlu1 %2498 }
0x11df   :  { %v2503_v55 = vmul.f32 0.03125, %v2499_v54 }
0x11e0   :  { %v2506_v56 = vsub.f32 %v2494_v48, %v2504_v53 }
0x11e1   :  { %v2505_v57 = vsub.f32 %v2493_v49, %v2503_v55 }
0x11e2   :  { %v2508_v59 = vmul.f32 %v2506_v56, %v2506_v56 }
0x11e3   :  { %v2507_v28 = vmul.f32 %v2505_v57, %v2505_v57 }
0x11e4   :  { %v2512_v20 = vsel %vm509_vm0, %v2508_v59, 0.0 }
0x11e5   :  { %2513 = vadd.xlane.f32.xlu0 %v2512_v20  ;;  %v2509_v18 = vsel %vm509_vm0, %v2507_v28, 0.0 }
0x11e6   :  { %2510 = vadd.xlane.f32.xlu1 %v2509_v18 }
0x1272   :  { %v2514_v2 = vpop.xlane.xlu0 %2513 }
0x1273   :  { %v2516_v58 = vmul.f32 0.03125, %v2514_v2  ;;  %v2511_v3 = vpop.xlane.xlu1 %2510 }
0x1274   :  { %v2515_v4 = vmul.f32 0.03125, %v2511_v3 }
0x1275   :  { %v2518_v5 = vadd.f32 1e-05, %v2516_v58 }
0x1276   :  { %v2517_v6 = vadd.f32 1e-05, %v2515_v4 }
0x1277   :  { %11433 = vrsqrt.f32 %v2518_v5 }
0x1278   :  { %11435 = vrsqrt.f32 %v2517_v6 }
0x1281   :  { %v11434_v7 = vpop.eup %11433 }
0x1282   :  { %v11436_v9 = vpop.eup %11435  ;;  %v2522_v10 = vmul.f32 %v11434_v7, %v2506_v56 }
0x1283   :  { %v2521_v12 = vmul.f32 %v11436_v9, %v2505_v57 }
0x1284   :  { %v2530_v14 = vmul.f32 %v10036_v8, %v2522_v10 }
0x1285   :  { %v2529_v15 = vmul.f32 %v10036_v8, %v2521_v12 }
0x1286   :  { %v12760_v19 = vadd.f32 %v10037_v13, %v2530_v14 }
0x1287   :  { %v12758_v17 = vadd.f32 %v10037_v13, %v2529_v15 }
0x1289   :  { %10652 = vmatprep.mubr.msk.f32.mxu1 %vm509_vm0, %v12758_v17 }
0x128a   :  { %10653 = vmatmul.mubr.msk.f32.vlgmr.msra.gmra.mrb[20].mxu1 %vm509_vm0, %v12760_v19 }
0x128b   :  { %10657 = vmatprep.mubr.msk.f32.mxu1 %vm12105_vm1, %v12104_v21 }
0x135d   :  { %v10654_v23 = vpop.f32.mrb[20].mxu1 }
0x135e   :  { %v12769_v25 = vadd.f32 %v10654_v23, %v10043_v22  ;;  %v2624_v27 = vpop.f32.mrb[21].mxu1 }
0x135f   :  { %v12771_v29 = vadd.f32 %v10043_v22, %v2624_v27 }
0x1360   :  { %2721 = vrot.lane.b32.xlu0 %v12769_v25, %s12106_s27  ;;  %v12788_v34 = vmul.f32 0.35355338, %v12769_v25 }
0x1361   :  { %2643 = vrot.lane.b32.xlu1 %v12771_v29, %s12106_s27  ;;  %v12779_v32 = vmul.f32 0.35355338, %v12771_v29 }
0x13d2   :  { %v2722_v33 = vpop.permute.xlu0 %2721 }
0x13d3   :  { %v2644_v31 = vpop.permute.xlu1 %2643 }
0x13d4   :  { %10656 = vmatpush3.xpose.msk.msra.mxu1 %vm601_vm2, %v2644_v31 }
0x13d5   :  { %10660 = vmatprep.subr.mxu1 %v12104_v21 }
0x13d7   :  { %10658 = vmatmul.mubr.msk.f32.vlgmr.msra.gmra.mrb[22].mxu1 %vm601_vm2, %v12779_v32 }
0x13d8   :  { %10661 = vmatpush3.xpose.msk.msra.mxu1 %vm601_vm2, %v2722_v33  ;;  %10662 = vmatprep.mubr.msk.f32.mxu1 %vm12105_vm1, %v12104_v21 }
0x13d9   :  { %10670 = vmatprep.subr.mxu1 %v12104_v21 }
0x13db   :  { %10663 = vmatmul.mubr.msk.f32.vlgmr.msra.gmra.mrb[24].mxu1 %vm601_vm2, %v12788_v34 }
0x13dc   :  { %10672 = vmatprep.mubr.msk.f32.mxu1 %vm12105_vm1, %v12104_v21 }
0x14aa   :  { %v2716_v35 = vpop.f32.mrb[22].mxu1 }
0x14ab   :  { %v10659_v36 = vpop.f32.mrb[23].mxu1  ;;  %v2798_v39 = vsel %vm601_vm2, %v2716_v35, -inf }
0x14ae   :  { %v2794_v37 = vpop.f32.mrb[24].mxu1 }
0x14af   :  { %v10664_v26 = vpop.f32.mrb[25].mxu1  ;;  %v2801_v38 = vsel %vm601_vm2, %v2794_v37, -inf }
0x14b0   :  { %2802 = vmax.xlane.f32.xlu1 %v2801_v38 }
0x14c1   :  { %2896 = vrot.lane.b32.xlu1 %v12769_v25, %s12107_s23 }
0x14c5   :  { %3050 = vrot.lane.b32.xlu1 %v12788_v34, %s12108_s28 }
0x14e9   :  { %2799 = vmax.xlane.f32.xlu1 %v2798_v39 }
0x14fa   :  { %2974 = vrot.lane.b32.xlu1 %v12771_v29, %s12109_s4 }
0x14fe   :  { %2972 = vrot.lane.b32.xlu1 %v12779_v32, %s12108_s28 }
0x1502   :  { %3466 = vrot.lane.b32.xlu1 %v12771_v29, %s12110_s5 }
0x153d   :  { %v2803_v40 = vpop.xlane.xlu1 %2802 }
0x153e   :  { %v2805_v30 = vsub.f32 %v2794_v37, %v2803_v40 }
0x1540   :  { %v2808_v41 = vmul.f32 1.442695, %v2805_v30 }
0x1541   :  { %v2897_v42 = vpop.permute.xlu1 %2896 }
0x1542   :  { %11437 = vpow2.f32 %v2808_v41  ;;  %10671 = vmatpush3.msra.mxu1 %v2897_v42 }
0x1543   :  { %10680 = vmatprep.subr.mxu1 %v12104_v21 }
0x1545   :  { %v3051_v24 = vpop.permute.xlu1 %3050 }
0x154c   :  { %v11438_v43 = vpop.eup %11437 }
0x154d   :  { %v2813_v44 = vsel %vm601_vm2, %v11438_v43, 0.0 }
0x154e   :  { %2814 = vadd.xlane.f32.xlu0 %v2813_v44 }
0x1564   :  { %3052 = vrot.lane.b32.xlu0 %v12769_v25, %s12109_s4 }
0x1576   :  { %v2800_v45 = vpop.xlane.xlu1 %2799 }
0x1577   :  { %v2804_v46 = vsub.f32 %v2716_v35, %v2800_v45  ;;  %v10047_v45 = vld [vmem:[%s13618_s21 + $0x28] sm:$0xff] }
0x1579   :  { %v2806_v47 = vmul.f32 1.442695, %v2804_v46  ;;  %v10046_v46 = vld [vmem:[%s13618_s21 + $0x20] sm:$0xff] }
0x157a   :  { %v2975_v57 = vpop.permute.xlu1 %2974 }
0x157b   :  { %11439 = vpow2.f32 %v2806_v47 }
0x157e   :  { %v2973_v28 = vpop.permute.xlu1 %2972 }
0x1582   :  { %v3467_v9 = vpop.permute.xlu1 %3466 }
0x1585   :  { %v11440_v48 = vpop.eup %11439 }
0x1586   :  { %v2810_v49 = vsel %vm601_vm2, %v11440_v48, 0.0 }
0x1587   :  { %2811 = vadd.xlane.f32.xlu0 %v2810_v49 }
0x159d   :  { %2820 = vrot.lane.b32.xlu0 %v12771_v29, %s12107_s23 }
0x15db   :  { %v2815_v50 = vpop.xlane.xlu0 %2814 }
0x15dc   :  { %11441 = vrcp.f32 %v2815_v50 }
0x15df   :  { %v3053_v53 = vpop.permute.xlu0 %3052 }
0x15e6   :  { %v11442_v51 = vpop.eup %11441 }
0x15e7   :  { %v2819_v52 = vmul.f32 %v11442_v51, %v11438_v43 }
0x15e9   :  { %10673 = vmatmul.mubr.msk.f32.vlgmr.msra.gmra.mrb[26].mxu1 %vm601_vm2, %v2819_v52 }
0x15ea   :  { %10681 = vmatpush3.xpose.msk.msra.mxu1 %vm601_vm2, %v3053_v53  ;;  %10682 = vmatprep.mubr.msk.f32.mxu1 %vm12105_vm1, %v12104_v21 }
0x15eb   :  { %10690 = vmatprep.subr.mxu1 %v12104_v21 }
0x15ed   :  { %10683 = vmatmul.mubr.msk.f32.vlgmr.msra.gmra.mrb[28].mxu1 %vm601_vm2, %v3051_v24 }
0x15ee   :  { %10692 = vmatprep.mubr.msk.f32.mxu1 %vm12105_vm1, %v12104_v21 }
0x1614   :  { %v2812_v54 = vpop.xlane.xlu0 %2811 }
0x1615   :  { %11443 = vrcp.f32 %v2812_v54 }
0x1618   :  { %v2821_v55 = vpop.permute.xlu0 %2820 }
0x1619   :  { %10666 = vmatpush3.msra.mxu0 %v2821_v55 }
0x161a   :  { %10675 = vmatprep.subr.mxu0 %v12104_v21 }
0x161f   :  { %v11444_v56 = vpop.eup %11443 }
0x1620   :  { %v2818_v59 = vmul.f32 %v11444_v56, %v11440_v48 }
0x1622   :  { %10668 = vmatmul.mubr.msk.f32.vlgmr.msra.gmra.mrb[20].mxu0 %vm601_vm2, %v2818_v59 }
0x1623   :  { %10676 = vmatpush3.xpose.msk.msra.mxu0 %vm601_vm2, %v2975_v57  ;;  %10677 = vmatprep.mubr.msk.f32.mxu0 %vm12105_vm1, %v12104_v21 }
0x1624   :  { %10685 = vmatprep.subr.mxu0 %v12104_v21 }
0x1626   :  { %10678 = vmatmul.mubr.msk.f32.vlgmr.msra.gmra.mrb[22].mxu0 %vm601_vm2, %v2973_v28 }
0x1627   :  { %10687 = vmatprep.mubr.msk.f32.mxu0 %vm12105_vm1, %v12104_v21 }
0x16bc   :  { %v12831_v20 = vpop.f32.mrb[26].mxu1 }
0x16bd   :  { %v10674_v18 = vpop.f32.mrb[27].mxu1 }
0x16be   :  { %v10048_v18 = vld [vmem:[%s13618_s21 + $0x30] sm:$0xff] }
0x16c0   :  { %v3124_v60 = vpop.f32.mrb[28].mxu1 }
0x16c1   :  { %v10684_v61 = vpop.f32.mrb[29].mxu1  ;;  %v3131_v62 = vsel %vm601_vm2, %v3124_v60, -inf }
0x16c2   :  { %3132 = vmax.xlane.f32.xlu0 %v3131_v62 }
0x16d8   :  { %3226 = vrot.lane.b32.xlu0 %v12769_v25, %s12111_s7 }
0x16dc   :  { %3464 = vrot.lane.b32.xlu0 %v12779_v32, %s12112_s22 }
0x16e0   :  { %3542 = vrot.lane.b32.xlu0 %v12788_v34, %s12112_s22 }
0x16f5   :  { %v12840_v63 = vpop.f32.mrb[20].mxu0 }
0x16f6   :  { %v10669_v0 = vpop.f32.mrb[21].mxu0 }
0x16f9   :  { %v3046_v1 = vpop.f32.mrb[22].mxu0 }
0x16fa   :  { %v10679_v2 = vpop.f32.mrb[23].mxu0  ;;  %v3128_v8 = vsel %vm601_vm2, %v3046_v1, -inf }
0x174f   :  { %v3133_v58 = vpop.xlane.xlu0 %3132 }
0x1750   :  { %v3135_v3 = vsub.f32 %v3124_v60, %v3133_v58 }
0x1752   :  { %v3138_v4 = vmul.f32 1.442695, %v3135_v3 }
0x1753   :  { %v3227_v5 = vpop.permute.xlu0 %3226 }
0x1754   :  { %11445 = vpow2.f32 %v3138_v4  ;;  %10691 = vmatpush3.msra.mxu1 %v3227_v5 }
0x1755   :  { %10705 = vmatprep.subr.mxu1 %v12104_v21 }
0x1757   :  { %v3465_v14 = vpop.permute.xlu0 %3464 }
0x175b   :  { %v3543_v22 = vpop.permute.xlu0 %3542 }
0x175e   :  { %v11446_v6 = vpop.eup %11445 }
0x175f   :  { %v3143_v7 = vsel %vm601_vm2, %v11446_v6, 0.0 }
0x1760   :  { %3144 = vadd.xlane.f32.xlu1 %v3143_v7 }
0x1771   :  { %3544 = vrot.lane.b32.xlu1 %v12769_v25, %s12110_s5 }
0x1795   :  { %3129 = vmax.xlane.f32.xlu1 %v3128_v8 }
0x17ed   :  { %v3145_v10 = vpop.xlane.xlu1 %3144 }
0x17ee   :  { %11447 = vrcp.f32 %v3145_v10 }
0x17f1   :  { %v3545_v15 = vpop.permute.xlu1 %3544 }
0x17f8   :  { %v11448_v12 = vpop.eup %11447 }
0x17f9   :  { %v3149_v13 = vmul.f32 %v11448_v12, %v11446_v6 }
0x17fb   :  { %10693 = vmatmul.mubr.msk.f32.vlgmr.msra.gmra.mrb[30].mxu1 %vm601_vm2, %v3149_v13 }
0x17fc   :  { %10706 = vmatpush3.xpose.msk.msra.mxu1 %vm601_vm2, %v3467_v9  ;;  %10707 = vmatprep.mubr.msk.f32.mxu1 %vm12105_vm1, %v12104_v21 }
0x17fd   :  { %10710 = vmatprep.subr.mxu1 %v12104_v21 }
0x17ff   :  { %10708 = vmatmul.mubr.msk.f32.vlgmr.msra.gmra.mrb[32].mxu1 %vm601_vm2, %v3465_v14 }
0x1800   :  { %10711 = vmatpush3.xpose.msk.msra.mxu1 %vm601_vm2, %v3545_v15  ;;  %10712 = vmatprep.mubr.msk.f32.mxu1 %vm12105_vm1, %v12104_v21 }
0x1801   :  { %10720 = vmatprep.subr.mxu1 %v12104_v21 }
0x1803   :  { %10713 = vmatmul.mubr.msk.f32.vlgmr.msra.gmra.mrb[34].mxu1 %vm601_vm2, %v3543_v22 }
0x1804   :  { %10722 = vmatprep.mubr.msk.f32.mxu1 %vm12105_vm1, %v12104_v21 }
0x1822   :  { %v3130_v23 = vpop.xlane.xlu1 %3129 }
0x1823   :  { %v3134_v27 = vsub.f32 %v3046_v1, %v3130_v23 }
0x1825   :  { %v3136_v31 = vmul.f32 1.442695, %v3134_v27 }
0x1827   :  { %11449 = vpow2.f32 %v3136_v31 }
0x1831   :  { %v11450_v33 = vpop.eup %11449 }
0x1832   :  { %v3140_v35 = vsel %vm601_vm2, %v11450_v33, 0.0 }
0x1833   :  { %3141 = vadd.xlane.f32.xlu0 %v3140_v35 }
0x1849   :  { %3150 = vrot.lane.b32.xlu0 %v12771_v29, %s12111_s7 }
0x184d   :  { %3718 = vrot.lane.b32.xlu0 %v12769_v25, %s12113_s26 }
0x1851   :  { %3879 = vrot.lane.b32.xlu0 %v12771_v29, %s12114_s24 }
0x1855   :  { %3957 = vrot.lane.b32.xlu0 %v12769_v25, %s12114_s24 }
0x1859   :  { %3877 = vrot.lane.b32.xlu0 %v12779_v32, %s12115_s1 }
0x18c0   :  { %v3142_v36 = vpop.xlane.xlu0 %3141 }
0x18c1   :  { %11451 = vrcp.f32 %v3142_v36 }
0x18c4   :  { %v3151_v37 = vpop.permute.xlu0 %3150 }
0x18c5   :  { %10686 = vmatpush3.msra.mxu0 %v3151_v37 }
0x18c6   :  { %10695 = vmatprep.subr.mxu0 %v10047_v45 }
0x18c8   :  { %v3719_v26 = vpop.permute.xlu0 %3718 }
0x18c9   :  { %10721 = vmatpush3.msra.mxu1 %v3719_v26 }
0x18ca   :  { %10730 = vmatprep.subr.mxu1 %v12104_v21 }
0x18cb   :  { %v11452_v38 = vpop.eup %11451 }
0x18cc   :  { %v3148_v39 = vmul.f32 %v11452_v38, %v11450_v33  ;;  %v3880_v61 = vpop.permute.xlu0 %3879 }
0x18ce   :  { %10688 = vmatmul.mubr.msk.f32.vlgmr.msra.gmra.mrb[24].mxu0 %vm601_vm2, %v3148_v39  ;;  %v3298_v40 = vpop.f32.mrb[30].mxu1 }
0x18cf   :  { %v10694_v30 = vpop.f32.mrb[31].mxu1  ;;  %10696 = vmatpush3.msra.mxu0 %v10047_v45 }
0x18d0   :  { %10700 = vmatprep.subr.mxu0 %v10046_v46  ;;  %v3958_v1 = vpop.permute.xlu0 %3957  ;;  %v10049_v30 = vld [vmem:[%s13618_s21 + $0x38] sm:$0xff] }
0x18d2   :  { %v3538_v41 = vpop.f32.mrb[32].mxu1 }
0x18d3   :  { %v10709_v42 = vpop.f32.mrb[33].mxu1  ;;  %v3620_v32 = vsel %vm601_vm2, %v3538_v41, -inf }
0x18d4   :  { %3621 = vmax.xlane.f32.xlu1 %v3620_v32  ;;  %v3878_v2 = vpop.permute.xlu0 %3877 }
0x18d6   :  { %v3616_v43 = vpop.f32.mrb[34].mxu1 }
0x18d7   :  { %v10714_v44 = vpop.f32.mrb[35].mxu1  ;;  %v3623_v24 = vsel %vm601_vm2, %v3616_v43, -inf }
0x18d8   :  { %3624 = vmax.xlane.f32.xlu1 %v3623_v24 }
0x1961   :  { %v3622_v47 = vpop.xlane.xlu1 %3621 }
0x1962   :  { %v3626_v48 = vsub.f32 %v3538_v41, %v3622_v47 }
0x1964   :  { %v3628_v49 = vmul.f32 1.442695, %v3626_v48 }
0x1965   :  { %v3625_v50 = vpop.xlane.xlu1 %3624 }
0x1966   :  { %11453 = vpow2.f32 %v3628_v49  ;;  %v3627_v51 = vsub.f32 %v3616_v43, %v3625_v50 }
0x1968   :  { %v3630_v52 = vmul.f32 1.442695, %v3627_v51 }
0x196a   :  { %11455 = vpow2.f32 %v3630_v52 }
0x1970   :  { %v11454_v53 = vpop.eup %11453 }
0x1971   :  { %v3632_v54 = vsel %vm601_vm2, %v11454_v53, 0.0 }
0x1972   :  { %3633 = vadd.xlane.f32.xlu1 %v3632_v54 }
0x1974   :  { %v11456_v55 = vpop.eup %11455 }
0x1975   :  { %v3635_v56 = vsel %vm601_vm2, %v11456_v55, 0.0 }
0x1976   :  { %3636 = vadd.xlane.f32.xlu1 %v3635_v56 }
0x1987   :  { %3642 = vrot.lane.b32.xlu1 %v12771_v29, %s12113_s26 }
0x198b   :  { %3955 = vrot.lane.b32.xlu1 %v12788_v34, %s12115_s1 }
0x19a1   :  { %v3222_v57 = vpop.f32.mrb[24].mxu0 }
0x19a2   :  { %v10689_v59 = vpop.f32.mrb[25].mxu0  ;;  %10697 = vmatprep.mubr.msk.f32.mxu0 %vm601_vm2, %v3222_v57 }
0x19a3   :  { %10698 = vmatmul.mubr.msk.f32.vlgmr.msra.gmra.mrb[26].mxu0 %vm601_vm2, %v3298_v40 }
0x19a4   :  { %10702 = vmatprep.mubr.msk.f32.mxu0 %vm601_vm2, %v12840_v63  ;;  %10701 = vmatpush3.msra.mxu0 %v10046_v46 }
0x19a5   :  { %10715 = vmatprep.subr.mxu0 %v12104_v21 }
0x19ab   :  { %10703 = vmatmul.mubr.msk.f32.vlgmr.msra.gmra.mrb[26].mxu0 %vm601_vm2, %v12831_v20 }
0x19ac   :  { %10717 = vmatprep.mubr.msk.f32.mxu0 %vm12105_vm1, %v12104_v21 }
0x19ff   :  { %v3634_v28 = vpop.xlane.xlu1 %3633 }
0x1a00   :  { %11457 = vrcp.f32 %v3634_v28 }
0x1a03   :  { %v3637_v34 = vpop.xlane.xlu1 %3636 }
0x1a04   :  { %11459 = vrcp.f32 %v3637_v34 }
0x1a07   :  { %v3643_v60 = vpop.permute.xlu1 %3642 }
0x1a08   :  { %10716 = vmatpush3.msra.mxu0 %v3643_v60  ;;  %v10088_v60 = vld [vmem:[%s13620_s0 + $0x20] sm:$0xff] }
0x1a09   :  { %10725 = vmatprep.subr.mxu0 %v10048_v18 }
0x1a0a   :  { %v11458_v62 = vpop.eup %11457 }
0x1a0b   :  { %v3640_v63 = vmul.f32 %v11458_v62, %v11454_v53  ;;  %v3956_v6 = vpop.permute.xlu1 %3955  ;;  %v10090_v62 = vld [vmem:[%s13620_s0 + $0x30] sm:$0xff] }
0x1a0d   :  { %10718 = vmatmul.mubr.msk.f32.vlgmr.msra.gmra.mrb[28].mxu0 %vm601_vm2, %v3640_v63 }
0x1a0e   :  { %v11460_v0 = vpop.eup %11459  ;;  %10726 = vmatpush3.msra.mxu0 %v10048_v18 }
0x1a0f   :  { %v3641_v20 = vmul.f32 %v11460_v0, %v11456_v55  ;;  %10735 = vmatprep.subr.mxu0 %v12104_v21  ;;  %v10091_v0 = vld [vmem:[%s13620_s0 + $0x38] sm:$0xff] }
0x1a11   :  { %10723 = vmatmul.mubr.msk.f32.vlgmr.msra.gmra.mrb[36].mxu1 %vm601_vm2, %v3641_v20  ;;  %v12117_v20 = vmov 0.0|0.0  }
0x1a12   :  { %10731 = vmatpush3.xpose.msk.msra.mxu1 %vm601_vm2, %v3880_v61  ;;  %10732 = vmatprep.mubr.msk.f32.mxu1 %vm12105_vm1, %v12104_v21  ;;  %v10089_v61 = vld [vmem:[%s13620_s0 + $0x28] sm:$0xff] }
0x1a13   :  { %10740 = vmatprep.subr.mxu1 %v12104_v21  ;;  %v11173_v63 = vpack.c.bf16 %v10089_v61, %v10088_v60  ;;  %v10102_v60 = vld [vmem:[%s13624_s19 + $0x1] ss:$0 sm:$0xff] }
0x1a15   :  { %10733 = vmatmul.mubr.msk.f32.vlgmr.msra.gmra.mrb[38].mxu1 %vm601_vm2, %v3878_v2  ;;  %v10093_v2 = vld [vmem:[%s13621_s12 + $0x40] sm:$0xff] }
0x1a16   :  { %10742 = vmatprep.mubr.msk.f32.mxu1 %vm12105_vm1, %v12104_v21 }
0x1ae0   :  { %v3714_v58 = vpop.f32.mrb[28].mxu0 }
0x1ae1   :  { %v10719_v3 = vpop.f32.mrb[29].mxu0  ;;  %10727 = vmatprep.mubr.msk.f32.mxu0 %vm601_vm2, %v3714_v58  ;;  %v10094_v58 = vld [vmem:[%s13621_s12 + $0x48] sm:$0xff] }
0x1ae2   :  { %v10095_v3 = vld [vmem:[%s13621_s12 + $0x50] sm:$0xff] }
0x1ae4   :  { %v3790_v4 = vpop.f32.mrb[36].mxu1 }
0x1ae5   :  { %v10724_v5 = vpop.f32.mrb[37].mxu1  ;;  %10728 = vmatmul.mubr.msk.f32.vlgmr.msra.gmra.mrb[26].mxu0 %vm601_vm2, %v3790_v4  ;;  %v11181_v4 = vpack.c.bf16 %v10094_v58, %v10093_v2 }
0x1ae6   :  { %10736 = vmatpush3.xpose.msk.msra.mxu0 %vm601_vm2, %v3958_v1  ;;  %10737 = vmatprep.mubr.msk.f32.mxu0 %vm12105_vm1, %v12104_v21  ;;  %v11177_v1 = vpack.c.bf16 %v10091_v0, %v10090_v62  ;;  %v10096_v5 = vld [vmem:[%s13621_s12 + $0x58] sm:$0xff] }
0x1ae7   :  { %10745 = vmatprep.subr.mxu0 %v12104_v21 }
0x1ae8   :  { %v3951_v7 = vpop.f32.mrb[38].mxu1 }
0x1ae9   :  { %v10734_v8 = vpop.f32.mrb[39].mxu1  ;;  %10738 = vmatmul.mubr.msk.f32.vlgmr.msra.gmra.mrb[30].mxu0 %vm601_vm2, %v3956_v6  ;;  %v4033_v9 = vsel %vm601_vm2, %v3951_v7, -inf  ;;  %v11185_v6 = vpack.c.bf16 %v10096_v5, %v10095_v3 }
0x1aea   :  { %4034 = vmax.xlane.f32.xlu0 %v4033_v9  ;;  %10747 = vmatprep.mubr.msk.f32.mxu0 %vm12105_vm1, %v12104_v21  ;;  %v10098_v8 = vld [vmem:[%s13621_s12 + $0x68] sm:$0xff] }
0x1b77   :  { %v4035_v10 = vpop.xlane.xlu0 %4034 }
0x1b78   :  { %v4039_v12 = vsub.f32 %v3951_v7, %v4035_v10  ;;  %v10097_v7 = vld [vmem:[%s13621_s12 + $0x60] sm:$0xff] }
0x1b79   :  { %v11189_v9 = vpack.c.bf16 %v10098_v8, %v10097_v7  ;;  %v10105_v7 = vld [vmem:[%s13625_s10 + $0x1] ss:$0 sm:$0xff] }
0x1b7a   :  { %v4041_v13 = vmul.f32 1.442695, %v4039_v12 }
0x1b7c   :  { %11461 = vpow2.f32 %v4041_v13 }
0x1b86   :  { %v11462_v14 = vpop.eup %11461 }
0x1b87   :  { %v4045_v15 = vsel %vm601_vm2, %v11462_v14, 0.0 }
0x1b88   :  { %4046 = vadd.xlane.f32.xlu0 %v4045_v15 }
0x1bbc   :  { %v4029_v22 = vpop.f32.mrb[30].mxu0 }
0x1bbd   :  { %v10739_v23 = vpop.f32.mrb[31].mxu0  ;;  %v4036_v27 = vsel %vm601_vm2, %v4029_v22, -inf }
0x1bbe   :  { %4037 = vmax.xlane.f32.xlu1 %v4036_v27  ;;  %v10086_v27 = vld [vmem:[%s13622_s11 + $0x1] ss:$0 sm:$0xff] }
0x1bcf   :  { %4055 = vrot.lane.b32.xlu1 %v12771_v29, %s12116_s29 }
0x1c15   :  { %v4047_v31 = vpop.xlane.xlu0 %4046 }
0x1c16   :  { %11463 = vrcp.f32 %v4047_v31 }
0x1c20   :  { %v11464_v35 = vpop.eup %11463 }
0x1c21   :  { %v4053_v38 = vmul.f32 %v11464_v35, %v11462_v14  ;;  %v9990_v35 = vld [vmem:[#allocation3] ss:$0 sm:$0xff] }
0x1c4b   :  { %v4038_v33 = vpop.xlane.xlu1 %4037 }
0x1c4c   :  { %v4040_v36 = vsub.f32 %v4029_v22, %v4038_v33 }
0x1c4e   :  { %v4043_v37 = vmul.f32 1.442695, %v4040_v36 }
0x1c4f   :  { %v4056_v26 = vpop.permute.xlu1 %4055 }
0x1c50   :  { %11465 = vpow2.f32 %v4043_v37  ;;  %10741 = vmatpush3.msra.mxu1 %v4056_v26  ;;  %v10087_v37 = vld [vmem:[%s13623_s9 + $0x1] ss:$0 sm:$0xff] }
0x1c51   :  { %10743 = vmatmul.mubr.msk.f32.vlgmr.msra.gmra.mrb[40].mxu1 %vm601_vm2, %v4053_v38  ;;  %11174 = vmatprep.subr.bf16.mxu1 %v11173_v63  ;;  %v4632_v38 = vld [vmem:[%s13628_s18] sm:$0xff] }
0x1c52   :  { %11176 = vmatpush3.bf16.msra.mxu1 %v11173_v63 }
0x1c53   :  { %11178 = vmatprep.subr.bf16.mxu1 %v11177_v1 }
0x1c56   :  { %11180 = vmatpush3.bf16.msra.mxu1 %v11177_v1 }
0x1c57   :  { %11197 = vmatprep.subr.bf16.mxu1 %v12117_v20 }
0x1c5a   :  { %v11466_v39 = vpop.eup %11465 }
0x1c5b   :  { %v4048_v40 = vsel %vm601_vm2, %v11466_v39, 0.0 }
0x1c5c   :  { %4049 = vadd.xlane.f32.xlu0 %v4048_v40  ;;  %v488_v40 = vmul.f32 %v9990_v35, %v12543_v16 }
0x1c72   :  { %4131 = vrot.lane.b32.xlu0 %v12769_v25, %s12116_s29  ;;  %v10083_v25 = vld [vmem:[%s13619_s8 + $0x1] ss:$0 sm:$0xff] }
0x1ce9   :  { %v4050_v29 = vpop.xlane.xlu0 %4049 }
0x1cea   :  { %11467 = vrcp.f32 %v4050_v29 }
0x1ced   :  { %v4132_v41 = vpop.permute.xlu0 %4131 }
0x1cee   :  { %10746 = vmatpush3.msra.mxu0 %v4132_v41 }
0x1cef   :  { %10750 = vmatprep.subr.mxu0 %v10049_v30 }
0x1cf4   :  { %v11468_v42 = vpop.eup %11467 }
0x1cf5   :  { %v4054_v32 = vmul.f32 %v11468_v42, %v11466_v39  ;;  %v4633_v39 = vld [vmem:[%s13628_s18 + $0x8] sm:$0xff] }
0x1cf6   :  { %v11198_v42 = vpack.c.bf16 %v4633_v39, %v4632_v38 }
0x1cf7   :  { %10748 = vmatmul.mubr.msk.f32.vlgmr.msra.gmra.mrb[32].mxu0 %vm601_vm2, %v4054_v32  ;;  %v9991_v32 = vld [vmem:[#allocation5] ss:$0 sm:$0xff] }
0x1cf8   :  { %10751 = vmatpush3.msra.mxu0 %v10049_v30  ;;  %v487_v30 = vmul.f32 %v9990_v35, %v12538_v11 }
0x1cf9   :  { %11182 = vmatprep.subr.bf16.mxu0 %v11181_v4 }
0x1cfa   :  { %v12958_v16 = vadd.f32 %v9991_v32, %v487_v30 }
0x1d24   :  { %v4127_v43 = vpop.f32.mrb[40].mxu1 }
0x1d25   :  { %v10744_v44 = vpop.f32.mrb[41].mxu1  ;;  %10752 = vmatprep.mubr.msk.f32.mxu0 %vm601_vm2, %v4127_v43 }
0x1d26   :  { %v4634_v44 = vld [vmem:[%s13628_s18 + $0x10] sm:$0xff] }
0x1dca   :  { %v4203_v24 = vpop.f32.mrb[32].mxu0 }
0x1dcb   :  { %v10749_v45 = vpop.f32.mrb[33].mxu0  ;;  %10753 = vmatmul.mubr.msk.f32.vlgmr.msra.gmra.mrb[26].mxu0 %vm601_vm2, %v4203_v24  ;;  %v4635_v24 = vld [vmem:[%s13628_s18 + $0x18] sm:$0xff] }
0x1dcc   :  { %11184 = vmatpush3.bf16.msra.mxu0 %v11181_v4  ;;  %v12953_v45 = vadd.f32 %v9991_v32, %v488_v40  ;;  %v11201_v11 = vpack.c.bf16 %v4635_v24, %v4634_v44 }
0x1dcd   :  { %11186 = vmatprep.subr.bf16.mxu0 %v11185_v6 }
0x1dd0   :  { %11188 = vmatpush3.bf16.msra.mxu0 %v11185_v6 }
0x1dd1   :  { %11190 = vmatprep.subr.bf16.mxu0 %v11189_v9 }
0x1dd4   :  { %11192 = vmatpush3.bf16.msra.mxu0 %v11189_v9 }
0x1e9e   :  { %v10754_v46 = vpop.f32.mrb[26].mxu0 }
0x1e9f   :  { %v4297_v47 = vadd.f32 %v10754_v46, %v10083_v25  ;;  %v4279_v48 = vpop.f32.mrb[27].mxu0  ;;  %v4639_v46 = vrot.slane %v12958_v16, 7 }
0x1ea0   :  { %v4296_v49 = vadd.f32 %v10083_v25, %v4279_v48  ;;  %v4640_v25 = vrot.slane %v12953_v45, 6  ;;  %v10099_v48 = vld [vmem:[%s13621_s12 + $0x70] sm:$0xff] }
0x1ea1   :  { %v4299_v50 = vadd.f32 %v4297_v47, %v12760_v19 }
0x1ea2   :  { %v4298_v51 = vadd.f32 %v4296_v49, %v12758_v17  ;;  %v4642_v47 = vsel %vm4641_vm4, %v4640_v25, %v4639_v46  ;;  %v10100_v49 = vld [vmem:[%s13621_s12 + $0x78] sm:$0xff] }
0x1ea3   :  { %v4307_v52 = vsel %vm509_vm0, %v4299_v50, 0.0 }
0x1ea4   :  { %4308 = vadd.xlane.f32.xlu0 %v4307_v52  ;;  %v4304_v53 = vsel %vm509_vm0, %v4298_v51, 0.0  ;;  %v4733_v52 = vld [vmem:[%s13629_s3 + $0x8] sm:$0xff] }
0x1ea5   :  { %4305 = vadd.xlane.f32.xlu1 %v4304_v53 }
0x1f31   :  { %v4309_v54 = vpop.xlane.xlu0 %4308 }
0x1f32   :  { %v4311_v55 = vmul.f32 0.03125, %v4309_v54  ;;  %v4306_v56 = vpop.xlane.xlu1 %4305  ;;  %v4734_v54 = vld [vmem:[%s13629_s3 + $0x10] sm:$0xff] }
0x1f33   :  { %v4310_v57 = vmul.f32 0.03125, %v4306_v56 }
0x1f34   :  { %v4313_v59 = vsub.f32 %v4299_v50, %v4311_v55  ;;  %v4732_v50 = vld [vmem:[%s13629_s3] sm:$0xff]  ;;  %v4735_v55 = vld [vmem:[%s13629_s3 + $0x18] sm:$0xff] }
0x1f35   :  { %v4312_v28 = vsub.f32 %v4298_v51, %v4310_v57  ;;  %v11193_v51 = vpack.c.bf16 %v10100_v49, %v10099_v48  ;;  %v11204_v53 = vpack.c.bf16 %v4733_v52, %v4732_v50  ;;  %v11207_v56 = vpack.c.bf16 %v4735_v55, %v4734_v54 }
0x1f36   :  { %v4315_v34 = vmul.f32 %v4313_v59, %v4313_v59  ;;  %v12118_v57 = vmov 1966171168  }
0x1f37   :  { %v4314_v19 = vmul.f32 %v4312_v28, %v4312_v28  ;;  %11194 = vmatprep.subr.bf16.mxu0 %v11193_v51 }
0x1f38   :  { %v4319_v17 = vsel %vm509_vm0, %v4315_v34, 0.0  ;;  %11196 = vmatpush3.bf16.msra.mxu0 %v11193_v51 }
0x1f39   :  { %4320 = vadd.xlane.f32.xlu0 %v4319_v17  ;;  %v4316_v18 = vsel %vm509_vm0, %v4314_v19, 0.0  ;;  %11209 = vmatprep.subr.bf16.mxu0 %v12117_v20  ;;  %v11387_v17 = vld [vmem:[#allocation10] ss:$0 sps:$4 sm:$0x11]  }
0x1f3a   :  { %4317 = vadd.xlane.f32.xlu1 %v4316_v18 }
0x1fc6   :  { %v4321_v10 = vpop.xlane.xlu0 %4320 }
0x1fc7   :  { %v4323_v12 = vmul.f32 0.03125, %v4321_v10  ;;  %v4318_v13 = vpop.xlane.xlu1 %4317 }
0x1fc8   :  { %v4322_v14 = vmul.f32 0.03125, %v4318_v13 }
0x1fc9   :  { %v4325_v15 = vadd.f32 1e-05, %v4323_v12 }
0x1fca   :  { %v4324_v22 = vadd.f32 1e-05, %v4322_v14 }
0x1fcb   :  { %11469 = vrsqrt.f32 %v4325_v15 }
0x1fcc   :  { %11471 = vrsqrt.f32 %v4324_v22 }
0x1fd5   :  { %v11470_v23 = vpop.eup %11469 }
0x1fd6   :  { %v11472_v31 = vpop.eup %11471  ;;  %v4329_v33 = vmul.f32 %v11470_v23, %v4313_v59  ;;  %v4646_v59 = vunpack.c.l.s4 %v12118_v57 }
0x1fd7   :  { %v4328_v36 = vmul.f32 %v11472_v31, %v4312_v28  ;;  %v4648_v28 = vlaneseq  ;;  %v11388_v31 = vld [vmem:[#allocation11] ss:$0 sps:$4 sm:$0x11]  }
0x1fd8   :  { %v4337_v26 = vmul.f32 %v10086_v27, %v4329_v33  ;;  %v4647_v34 = vunpack.c.0.s8 %v4646_v59 }
0x1fd9   :  { %v4336_v29 = vmul.f32 %v10086_v27, %v4328_v36  ;;  %v12979_v19 = vshrl.u32 %v4648_v28, 7 }
0x1fda   :  { %v4345_v43 = vadd.f32 %v10087_v37, %v4337_v26 }
0x1fdb   :  { %v12949_v41 = vadd.f32 %v10087_v37, %v4336_v29  ;;  %v12982_v18 = vsub.s32 %v4647_v34, %v12979_v19  ;;  %v13002_v29 = vsub.s32 0, %v12979_v19 }
0x1fdd   :  { %10763 = vmatprep.mubr.msk.f32.mxu1 %vm509_vm0, %v12949_v41  ;;  %v4651_v0 = vrot.slane %v11387_v17, %v12982_v18  ;;  %v4745_v33 = vrot.slane %v11388_v31, %v12982_v18 }
0x1fde   :  { %10764 = vmatmul.mubr.msk.f32.vlgmr.msra.gmra.mrb[42].mxu1 %vm509_vm0, %v4345_v43 }
0x1fdf   :  { %11199 = vmatpush3.bf16.msra.mxu1 %v11198_v42  ;;  %10793 = vmatprep.mubr.msk.f32.mxu1 %vm12105_vm1, %v12104_v21  ;;  %v4658_v3 = vrot.slane %v4651_v0, %v12982_v18  ;;  %v4752_v35 = vrot.slane %v4745_v33, %v12982_v18 }
0x1fe0   :  { %11200 = vmatprep.subr.bf16.mxu1 %v12117_v20 }
0x1fe3   :  { %11202 = vmatpush3.bf16.msra.mxu1 %v11201_v11 }
0x1fe4   :  { %11203 = vmatprep.subr.bf16.mxu1 %v12117_v20 }
0x1fe6   :  { %10794 = vmatmul.mubr.msk.f32.vlgmr.msra.gmra.mrb[44].mxu1 %vm509_vm0, %v4642_v47 }
0x1fe7   :  { %10804 = vmatprep.mubr.msk.f32.mxu1 %vm12105_vm1, %v12104_v21  ;;  %11205 = vmatpush3.bf16.msra.mxu1 %v11204_v53 }
0x1fe8   :  { %11206 = vmatprep.subr.bf16.mxu1 %v12117_v20 }
0x1feb   :  { %11208 = vmatpush3.bf16.msra.mxu1 %v11207_v56 }
0x20b1   :  { %v10765_v61 = vpop.f32.mrb[42].mxu1 }
0x20b2   :  { %v4448_v62 = vadd.f32 %v10765_v61, %v10102_v60  ;;  %v4442_v63 = vpop.f32.mrb[43].mxu1 }
0x20b3   :  { %v4443_v1 = vadd.f32 %v10102_v60, %v4442_v63  ;;  %v10110_v60 = vld [vmem:[%s13626_s15 + $0x1] ss:$0 sm:$0xff] }
0x20b4   :  { %v4452_v58 = vmax.f32 %v4448_v62, 0.0  ;;  %v10111_v63 = vld [vmem:[%s13627_s16 + $0x1] ss:$0 sm:$0xff] }
0x20b5   :  { %v4451_v2 = vmax.f32 %v4443_v1, 0.0 }
0x20b7   :  { %10782 = vmatprep.mubr.msk.f32.mxu0 %vm2411_vm3, %v4451_v2 }
0x20b8   :  { %10783 = vmatmul.mubr.msk.f32.vlgmr.msra.gmra.mrb[34].mxu0 %vm2411_vm3, %v4452_v58 }
0x20b9   :  { %v4728_v4 = vpop.f32.mrb[44].mxu1  ;;  %10815 = vmatprep.mubr.msk.f32.mxu0 %vm12105_vm1, %v12104_v21 }
0x20ba   :  { %v4729_v5 = vadd.f32 %v4728_v4, %v4658_v3  ;;  %v10795_v6 = vpop.f32.mrb[45].mxu1 }
0x20bc   :  { %10805 = vmatmul.mubr.msk.f32.vlgmr.msra.gmra.mrb[46].mxu1 %vm509_vm0, %v4729_v5 }
0x218b   :  { %v10784_v8 = vpop.f32.mrb[34].mxu0 }
0x218c   :  { %v4537_v9 = vadd.f32 %v10784_v8, %v10105_v7  ;;  %v4531_v10 = vpop.f32.mrb[35].mxu0 }
0x218d   :  { %v4532_v12 = vadd.f32 %v10105_v7, %v4531_v10 }
0x218e   :  { %v4541_v13 = vadd.f32 %v4537_v9, %v4345_v43 }
0x218f   :  { %v4823_v14 = vpop.f32.mrb[46].mxu1  ;;  %v4540_v15 = vadd.f32 %v4532_v12, %v12949_v41 }
0x2190   :  { %v10806_v22 = vpop.f32.mrb[47].mxu1  ;;  %v4549_v23 = vsel %vm509_vm0, %v4541_v13, 0.0  ;;  %v4824_v36 = vadd.f32 %v4823_v14, %v4752_v35  ;;  %v4908_v14 = vld [vmem:[%s13630_s17 + $0x8] sm:$0xff] }
0x2191   :  { %4550 = vadd.xlane.f32.xlu0 %v4549_v23  ;;  %v4546_v27 = vsel %vm509_vm0, %v4540_v15, 0.0  ;;  %v4910_v23 = vld [vmem:[%s13630_s17 + $0x18] sm:$0xff] }
0x2192   :  { %4547 = vadd.xlane.f32.xlu1 %v4546_v27  ;;  %v4834_v37 = vrot.slane %v4824_v36, %v12982_v18 }
0x2194   :  { %v4835_v26 = vcombine.high %v4834_v37, %v4834_v37  ;;  %v4842_v39 = vrot.slane %v4834_v37, %v12982_v18 }
0x2196   :  { %v4849_v38 = vrot.slane %v4835_v26, %v12982_v18  ;;  %v4853_v24 = vrot.slane %v4842_v39, %v13002_v29 }
0x2198   :  { %v4857_v43 = vrot.slane %v4849_v38, %v13002_v29  ;;  %v4860_v49 = vadd.f32 %v4853_v24, %v12958_v16 }
0x219a   :  { %v4861_v47 = vadd.f32 %v4857_v43, %v12953_v45  ;;  %v4865_v51 = vsel %vm4864_vm5, %v4860_v49, 0.0 }
0x219c   :  { %v4868_v50 = vsel %vm4864_vm5, %v4861_v47, 0.0 }
0x221e   :  { %v4551_v40 = vpop.xlane.xlu0 %4550 }
0x221f   :  { %v4553_v30 = vmul.f32 0.03125, %v4551_v40  ;;  %v4548_v41 = vpop.xlane.xlu1 %4547 }
0x2220   :  { %v4552_v42 = vmul.f32 0.03125, %v4548_v41 }
0x2221   :  { %v4555_v32 = vsub.f32 %v4541_v13, %v4553_v30  ;;  %v4907_v13 = vld [vmem:[%s13630_s17] sm:$0xff] }
0x2222   :  { %v4554_v44 = vsub.f32 %v4540_v15, %v4552_v42  ;;  %v4909_v15 = vld [vmem:[%s13630_s17 + $0x10] sm:$0xff]  ;;  %v11210_v22 = vpack.c.bf16 %v4908_v14, %v4907_v13  ;;  %v11389_v14 = vld [vmem:[#allocation13] ss:$0 sps:$4 sm:$0x11]  }
0x2223   :  { %v4557_v11 = vmul.f32 %v4555_v32, %v4555_v32  ;;  %v11213_v27 = vpack.c.bf16 %v4910_v23, %v4909_v15  ;;  %v4925_v15 = vrot.slane %v11389_v14, %v12982_v18 }
0x2224   :  { %v4556_v25 = vmul.f32 %v4554_v44, %v4554_v44  ;;  %11211 = vmatpush3.bf16.msra.mxu0 %v11210_v22 }
0x2225   :  { %v4561_v46 = vsel %vm509_vm0, %v4557_v11, 0.0  ;;  %11212 = vmatprep.subr.bf16.mxu0 %v12117_v20  ;;  %v4932_v22 = vrot.slane %v4925_v15, %v12982_v18 }
0x2226   :  { %4562 = vadd.xlane.f32.xlu0 %v4561_v46  ;;  %v4558_v48 = vsel %vm509_vm0, %v4556_v25, 0.0  ;;  %v10116_v25 = vld [vmem:[#allocation20] ss:$0 sm:$0xff] }
0x2227   :  { %4559 = vadd.xlane.f32.xlu1 %v4558_v48 }
0x2228   :  { %11214 = vmatpush3.bf16.msra.mxu0 %v11213_v27 }
0x2229   :  { %10829 = vmatprep.subr.mxu0 %v12104_v21 }
0x222a   :  { %4869 = vadd.xlane.f32.xlu0 %v4868_v50 }
0x222b   :  { %4866 = vadd.xlane.f32.xlu1 %v4865_v51 }
0x22b3   :  { %v4563_v52 = vpop.xlane.xlu0 %4562 }
0x22b4   :  { %v4565_v53 = vmul.f32 0.03125, %v4563_v52  ;;  %v4560_v54 = vpop.xlane.xlu1 %4559 }
0x22b5   :  { %v4564_v55 = vmul.f32 0.03125, %v4560_v54 }
0x22b6   :  { %v4567_v45 = vadd.f32 1e-05, %v4565_v53 }
0x22b7   :  { %v4566_v56 = vadd.f32 1e-05, %v4564_v55  ;;  %v4870_v57 = vpop.xlane.xlu0 %4869 }
0x22b8   :  { %11473 = vrsqrt.f32 %v4567_v45  ;;  %v4867_v16 = vpop.xlane.xlu1 %4866  ;;  %v4872_v59 = vmul.f32 0.03125, %v4870_v57  ;;  %v5031_v45 = vld [vmem:[#allocation14] sm:$0xff]  ;;  %v5033_v57 = vld [vmem:[#allocation14 + $0x10] sm:$0xff] }
0x22b9   :  { %11475 = vrsqrt.f32 %v4566_v56  ;;  %v4871_v17 = vmul.f32 0.03125, %v4867_v16  ;;  %v5032_v56 = vld [vmem:[#allocation14 + $0x8] sm:$0xff] }
0x22ba   :  { %v4874_v1 = vsub.f32 %v4861_v47, %v4872_v59  ;;  %v11215_v16 = vpack.c.bf16 %v5032_v56, %v5031_v45  ;;  %v5034_v59 = vld [vmem:[#allocation14 + $0x18] sm:$0xff] }
0x22bb   :  { %v4873_v58 = vsub.f32 %v4860_v49, %v4871_v17  ;;  %v10117_v49 = vld [vmem:[#allocation22] ss:$0 sm:$0xff]  ;;  %v11219_v17 = vpack.c.bf16 %v5034_v59, %v5033_v57 }
0x22bc   :  { %v4876_v7 = vmul.f32 %v4874_v1, %v4874_v1  ;;  %11216 = vmatprep.subr.bf16.mxu1 %v11215_v16 }
0x22bd   :  { %v4875_v9 = vmul.f32 %v4873_v58, %v4873_v58  ;;  %11218 = vmatpush3.bf16.msra.mxu1 %v11215_v16 }
0x22be   :  { %v4880_v10 = vsel %vm4864_vm5, %v4876_v7, 0.0  ;;  %11220 = vmatprep.subr.bf16.mxu1 %v11219_v17 }
0x22bf   :  { %v4877_v12 = vsel %vm4864_vm5, %v4875_v9, 0.0 }
0x22c1   :  { %11222 = vmatpush3.bf16.msra.mxu1 %v11219_v17 }
0x22c2   :  { %v11474_v34 = vpop.eup %11473  ;;  %10834 = vmatprep.subr.mxu1 %v12104_v21 }
0x22c3   :  { %v11476_v61 = vpop.eup %11475  ;;  %v4571_v62 = vmul.f32 %v11474_v34, %v4555_v32 }
0x22c4   :  { %v4570_v0 = vmul.f32 %v11476_v61, %v4554_v44 }
0x22c5   :  { %v4579_v2 = vmul.f32 %v10110_v60, %v4571_v62 }
0x22c6   :  { %v4578_v3 = vmul.f32 %v10110_v60, %v4570_v0 }
0x22c7   :  { %v4587_v4 = vadd.f32 %v10111_v63, %v4579_v2 }
0x22c8   :  { %v4586_v5 = vadd.f32 %v10111_v63, %v4578_v3 }
0x22c9   :  { %v4593_v6 = vsel %vm509_vm0, %v4587_v4, 0.0 }
0x22ca   :  { %4594 = vadd.xlane.f32.xlu0 %v4593_v6  ;;  %v4590_v8 = vsel %vm509_vm0, %v4586_v5, 0.0  ;;  %v10113_v6 = vld [vmem:[%s13632_s14] ss:$0 sm:$0xff] }
0x22cb   :  { %4591 = vadd.xlane.f32.xlu1 %v4590_v8 }
0x22ce   :  { %4881 = vadd.xlane.f32.xlu0 %v4880_v10 }
0x22cf   :  { %4878 = vadd.xlane.f32.xlu1 %v4877_v12 }
0x2357   :  { %v4595_v31 = vpop.xlane.xlu0 %4594 }
0x2358   :  { %v4597_v33 = vmul.f32 0.03125, %v4595_v31  ;;  %v4592_v35 = vpop.xlane.xlu1 %4591 }
0x2359   :  { %v4596_v36 = vmul.f32 0.03125, %v4592_v35 }
0x235a   :  { %v4599_v37 = vsub.f32 %v4587_v4, %v4597_v33  ;;  %v10119_v33 = vld [vmem:[#allocation16] ss:$0 sm:$0xff] }
0x235b   :  { %v4598_v26 = vsub.f32 %v4586_v5, %v4596_v36  ;;  %v4882_v38 = vpop.xlane.xlu0 %4881 }
0x235c   :  { %v4884_v39 = vmul.f32 0.03125, %v4882_v38  ;;  %v4879_v40 = vpop.xlane.xlu1 %4878  ;;  %v4601_v30 = vmul.f32 %v4599_v37, %v4599_v37 }
0x235d   :  { %v4883_v41 = vmul.f32 0.03125, %v4879_v40  ;;  %v4600_v42 = vmul.f32 %v4598_v26, %v4598_v26 }
0x235e   :  { %v4886_v32 = vadd.f32 1e-05, %v4884_v39  ;;  %v4605_v43 = vsel %vm509_vm0, %v4601_v30, 0.0 }
0x235f   :  { %v4885_v44 = vadd.f32 1e-05, %v4883_v41  ;;  %4606 = vadd.xlane.f32.xlu0 %v4605_v43  ;;  %v4602_v24 = vsel %vm509_vm0, %v4600_v42, 0.0 }
0x2360   :  { %11477 = vrsqrt.f32 %v4886_v32  ;;  %4603 = vadd.xlane.f32.xlu1 %v4602_v24 }
0x2361   :  { %11479 = vrsqrt.f32 %v4885_v44 }
0x236a   :  { %v11478_v11 = vpop.eup %11477 }
0x236b   :  { %v11480_v46 = vpop.eup %11479  ;;  %v4890_v47 = vmul.f32 %v11478_v11, %v4874_v1 }
0x236c   :  { %v4889_v48 = vmul.f32 %v11480_v46, %v4873_v58  ;;  %v10112_v58 = vld [vmem:[%s13631_s30] ss:$0 sm:$0xff] }
0x236d   :  { %v4898_v50 = vmul.f32 %v10116_v25, %v4890_v47 }
0x236e   :  { %v4897_v51 = vmul.f32 %v10116_v25, %v4889_v48 }
0x236f   :  { %v13026_v52 = vadd.f32 %v10117_v49, %v4898_v50 }
0x2370   :  { %v13028_v53 = vadd.f32 %v10117_v49, %v4897_v51 }
0x2371   :  { %v4915_v54 = vrot.slane %v13026_v52, 6 }
0x2372   :  { %v4914_v55 = vrot.slane %v13028_v53, 7 }
0x2374   :  { %v4916_v34 = vsel %vm4641_vm4, %v4915_v54, %v4914_v55 }
0x2375   :  { %10816 = vmatmul.mubr.msk.f32.vlgmr.msra.gmra.mrb[36].mxu0 %vm509_vm0, %v4916_v34 }
0x2376   :  { %10831 = vmatprep.mubr.msk.f32.mxu0 %vm12105_vm1, %v12104_v21 }
0x23ec   :  { %v4607_v60 = vpop.xlane.xlu0 %4606 }
0x23ed   :  { %v4609_v61 = vmul.f32 0.03125, %v4607_v60  ;;  %v4604_v62 = vpop.xlane.xlu1 %4603 }
0x23ee   :  { %v4608_v63 = vmul.f32 0.03125, %v4604_v62 }
0x23ef   :  { %v4611_v0 = vadd.f32 1e-05, %v4609_v61 }
0x23f0   :  { %v4610_v1 = vadd.f32 1e-05, %v4608_v63 }
0x23f1   :  { %11481 = vrsqrt.f32 %v4611_v0 }
0x23f2   :  { %11483 = vrsqrt.f32 %v4610_v1 }
0x23fb   :  { %v11482_v2 = vpop.eup %11481 }
0x23fc   :  { %v11484_v3 = vpop.eup %11483  ;;  %v4615_v4 = vmul.f32 %v11482_v2, %v4599_v37 }
0x23fd   :  { %v4614_v5 = vmul.f32 %v11484_v3, %v4598_v26 }
0x23fe   :  { %v4623_v7 = vmul.f32 %v10112_v58, %v4615_v4 }
0x23ff   :  { %v4622_v8 = vmul.f32 %v10112_v58, %v4614_v5 }
0x2400   :  { %v13041_v10 = vadd.f32 %v10113_v6, %v4623_v7 }
0x2401   :  { %v13039_v9 = vadd.f32 %v10113_v6, %v4622_v8 }
0x2403   :  { %10826 = vmatprep.mubr.msk.f32.mxu1 %vm509_vm0, %v13039_v9 }
0x2404   :  { %10827 = vmatmul.mubr.msk.f32.vlgmr.msra.gmra.mrb[48].mxu1 %vm509_vm0, %v13041_v10 }
0x2405   :  { %10836 = vmatprep.mubr.msk.f32.mxu1 %vm12105_vm1, %v12104_v21 }
0x2448   :  { %v5002_v12 = vpop.f32.mrb[36].mxu0 }
0x2449   :  { %v10817_v13 = vpop.f32.mrb[37].mxu0  ;;  %v5003_v23 = vadd.f32 %v5002_v12, %v4932_v22 }
0x244b   :  { %v5013_v27 = vrot.slane %v5003_v23, %v12982_v18 }
0x244d   :  { %v5014_v31 = vcombine.high %v5013_v27, %v5013_v27  ;;  %v5021_v37 = vrot.slane %v5013_v27, %v12982_v18 }
0x244f   :  { %v5028_v35 = vrot.slane %v5014_v31, %v12982_v18  ;;  %v5128_v30 = vmul.f32 0.35355338, %v5021_v37 }
0x2451   :  { %v5129_v40 = vmul.f32 0.35355338, %v5028_v35  ;;  %v13082_v25 = vrot.slane %v5128_v30, %v13002_v29 }
0x2453   :  { %v13074_v24 = vrot.slane %v5129_v40, %v13002_v29 }
0x24d7   :  { %v10828_v36 = vpop.f32.mrb[48].mxu1 }
0x24d8   :  { %v13054_v26 = vadd.f32 %v10828_v36, %v10119_v33  ;;  %v5114_v38 = vpop.f32.mrb[49].mxu1 }
0x24d9   :  { %v13056_v39 = vadd.f32 %v10119_v33, %v5114_v38 }
0x24da   :  { %10835 = vmatpush3.xpose.msk.msra.mxu1 %vm601_vm2, %v13054_v26 }
0x24db   :  { %10830 = vmatpush3.xpose.msk.msra.mxu0 %vm601_vm2, %v13056_v39  ;;  %10844 = vmatprep.subr.mxu1 %v12104_v21 }
0x24dc   :  { %10839 = vmatprep.subr.mxu0 %v12104_v21 }
0x24dd   :  { %10837 = vmatmul.mubr.msk.f32.vlgmr.msra.gmra.mrb[50].mxu1 %vm601_vm2, %v5129_v40 }
0x24de   :  { %10832 = vmatmul.mubr.msk.f32.vlgmr.msra.gmra.mrb[38].mxu0 %vm601_vm2, %v5128_v30  ;;  %10846 = vmatprep.mubr.msk.f32.mxu1 %vm12105_vm1, %v12104_v21 }
0x24df   :  { %10841 = vmatprep.mubr.msk.f32.mxu0 %vm12105_vm1, %v12104_v21 }
0x25b0   :  { %v5278_v41 = vpop.f32.mrb[50].mxu1 }
0x25b1   :  { %v5202_v42 = vpop.f32.mrb[38].mxu0  ;;  %v10838_v32 = vpop.f32.mrb[51].mxu1  ;;  %v5286_v43 = vsel %vm5282_vm6, %v5278_v41, -inf }
0x25b2   :  { %5287 = vmax.xlane.f32.xlu1 %v5286_v43  ;;  %v10833_v44 = vpop.f32.mrb[39].mxu0  ;;  %v5283_v11 = vsel %vm5282_vm6, %v5202_v42, -inf }
0x25c3   :  { %5381 = vrot.lane.b32.xlu1 %v13054_v26, %s12106_s27 }
0x25c7   :  { %5543 = vrot.lane.b32.xlu1 %v13074_v24, %s12108_s28 }
0x25eb   :  { %5284 = vmax.xlane.f32.xlu1 %v5283_v11 }
0x25fc   :  { %5463 = vrot.lane.b32.xlu1 %v13056_v39, %s12108_s28 }
0x2600   :  { %5461 = vrot.lane.b32.xlu1 %v13082_v25, %s12108_s28 }
0x2604   :  { %5974 = vrot.lane.b32.xlu1 %v13056_v39, %s12112_s22 }
0x263f   :  { %v5288_v46 = vpop.xlane.xlu1 %5287 }
0x2640   :  { %v5290_v47 = vsub.f32 %v5278_v41, %v5288_v46 }
0x2642   :  { %v5293_v48 = vmul.f32 1.442695, %v5290_v47 }
0x2643   :  { %v5382_v49 = vpop.permute.xlu1 %5381 }
0x2644   :  { %11485 = vpow2.f32 %v5293_v48  ;;  %10845 = vmatpush3.msra.mxu1 %v5382_v49 }
0x2645   :  { %10854 = vmatprep.subr.mxu1 %v12104_v21 }
0x2647   :  { %v5544_v54 = vpop.permute.xlu1 %5543 }
0x264e   :  { %v11486_v50 = vpop.eup %11485 }
0x264f   :  { %v5298_v51 = vsel %vm5282_vm6, %v11486_v50, 0.0 }
0x2650   :  { %5299 = vadd.xlane.f32.xlu0 %v5298_v51 }
0x2666   :  { %5545 = vrot.lane.b32.xlu0 %v13054_v26, %s12108_s28 }
0x2678   :  { %v5285_v55 = vpop.xlane.xlu1 %5284 }
0x2679   :  { %v5289_v45 = vsub.f32 %v5202_v42, %v5285_v55 }
0x267b   :  { %v5291_v56 = vmul.f32 1.442695, %v5289_v45 }
0x267c   :  { %v5464_v0 = vpop.permute.xlu1 %5463 }
0x267d   :  { %11487 = vpow2.f32 %v5291_v56 }
0x2680   :  { %v5462_v2 = vpop.permute.xlu1 %5461 }
0x2684   :  { %v5975_v37 = vpop.permute.xlu1 %5974 }
0x2687   :  { %v11488_v57 = vpop.eup %11487 }
0x2688   :  { %v5295_v16 = vsel %vm5282_vm6, %v11488_v57, 0.0 }
0x2689   :  { %5296 = vadd.xlane.f32.xlu0 %v5295_v16 }
0x269f   :  { %5305 = vrot.lane.b32.xlu0 %v13056_v39, %s12106_s27 }
0x26dd   :  { %v5300_v59 = vpop.xlane.xlu0 %5299 }
0x26de   :  { %11489 = vrcp.f32 %v5300_v59 }
0x26e1   :  { %v5546_v60 = vpop.permute.xlu0 %5545 }
0x26e8   :  { %v11490_v34 = vpop.eup %11489 }
0x26e9   :  { %v5304_v17 = vmul.f32 %v11490_v34, %v11486_v50  ;;  %v5124_v34 = vld [vmem:[#allocation17 + $0x8] sm:$0xff] }
0x26eb   :  { %10847 = vmatmul.mubr.msk.f32.vlgmr.msra.gmra.mrb[52].mxu1 %vm601_vm2, %v5304_v17 }
0x26ec   :  { %10855 = vmatpush3.xpose.msk.msra.mxu1 %vm601_vm2, %v5546_v60  ;;  %10856 = vmatprep.mubr.msk.f32.mxu1 %vm12105_vm1, %v12104_v21 }
0x26ed   :  { %10864 = vmatprep.subr.mxu1 %v12104_v21 }
0x26ef   :  { %10857 = vmatmul.mubr.msk.f32.vlgmr.msra.gmra.mrb[54].mxu1 %vm601_vm2, %v5544_v54 }
0x26f0   :  { %10866 = vmatprep.mubr.msk.f32.mxu1 %vm12105_vm1, %v12104_v21 }
0x2716   :  { %v5297_v61 = vpop.xlane.xlu0 %5296 }
0x2717   :  { %11491 = vrcp.f32 %v5297_v61 }
0x271a   :  { %v5306_v62 = vpop.permute.xlu0 %5305 }
0x271b   :  { %10840 = vmatpush3.msra.mxu0 %v5306_v62 }
0x271c   :  { %10849 = vmatprep.subr.mxu0 %v12104_v21 }
0x2721   :  { %v11492_v63 = vpop.eup %11491 }
0x2722   :  { %v5303_v1 = vmul.f32 %v11492_v63, %v11488_v57 }
0x2724   :  { %10842 = vmatmul.mubr.msk.f32.vlgmr.msra.gmra.mrb[40].mxu0 %vm601_vm2, %v5303_v1 }
0x2725   :  { %10850 = vmatpush3.xpose.msk.msra.mxu0 %vm601_vm2, %v5464_v0  ;;  %10851 = vmatprep.mubr.msk.f32.mxu0 %vm12105_vm1, %v12104_v21 }
0x2726   :  { %10859 = vmatprep.subr.mxu0 %v12104_v21 }
0x2728   :  { %10852 = vmatmul.mubr.msk.f32.vlgmr.msra.gmra.mrb[42].mxu0 %vm601_vm2, %v5462_v2 }
0x2729   :  { %10861 = vmatprep.mubr.msk.f32.mxu0 %vm12105_vm1, %v12104_v21 }
0x27be   :  { %v5453_v58 = vpop.f32.mrb[52].mxu1 }
0x27bf   :  { %v10848_v3 = vpop.f32.mrb[53].mxu1  ;;  %v5873_v7 = vrot.slane %v5453_v58, 7 }
0x27c2   :  { %v5617_v4 = vpop.f32.mrb[54].mxu1 }
0x27c3   :  { %v10858_v5 = vpop.f32.mrb[55].mxu1  ;;  %v5624_v6 = vsel %vm5282_vm6, %v5617_v4, -inf }
0x27c4   :  { %5625 = vmax.xlane.f32.xlu0 %v5624_v6  ;;  %v5123_v6 = vld [vmem:[#allocation17] sm:$0xff] }
0x27da   :  { %5719 = vrot.lane.b32.xlu0 %v13054_v26, %s12109_s4 }
0x27de   :  { %5972 = vrot.lane.b32.xlu0 %v13082_v25, %s12112_s22 }
0x27e2   :  { %6050 = vrot.lane.b32.xlu0 %v13074_v24, %s12112_s22 }
0x27f7   :  { %v5377_v8 = vpop.f32.mrb[40].mxu0 }
0x27f8   :  { %v13120_v12 = vsel %vm4641_vm4, %v5873_v7, %v5377_v8  ;;  %v10843_v13 = vpop.f32.mrb[41].mxu0 }
0x27fb   :  { %v5535_v14 = vpop.f32.mrb[42].mxu0 }
0x27fc   :  { %v10853_v15 = vpop.f32.mrb[43].mxu0  ;;  %v5621_v36 = vsel %vm5282_vm6, %v5535_v14, -inf }
0x2851   :  { %v5626_v22 = vpop.xlane.xlu0 %5625 }
0x2852   :  { %v5628_v23 = vsub.f32 %v5617_v4, %v5626_v22 }
0x2854   :  { %v5631_v27 = vmul.f32 1.442695, %v5628_v23 }
0x2855   :  { %v5720_v31 = vpop.permute.xlu0 %5719 }
0x2856   :  { %11493 = vpow2.f32 %v5631_v27  ;;  %10865 = vmatpush3.msra.mxu1 %v5720_v31 }
0x2857   :  { %10879 = vmatprep.subr.mxu1 %v12104_v21 }
0x2859   :  { %v5973_v41 = vpop.permute.xlu0 %5972 }
0x285d   :  { %v6051_v32 = vpop.permute.xlu0 %6050 }
0x2860   :  { %v11494_v33 = vpop.eup %11493 }
0x2861   :  { %v5636_v35 = vsel %vm5282_vm6, %v11494_v33, 0.0 }
0x2862   :  { %5637 = vadd.xlane.f32.xlu1 %v5636_v35 }
0x2873   :  { %6052 = vrot.lane.b32.xlu1 %v13054_v26, %s12112_s22 }
0x2897   :  { %5622 = vmax.xlane.f32.xlu1 %v5621_v36  ;;  %v5125_v36 = vld [vmem:[#allocation17 + $0x10] sm:$0xff] }
0x28ef   :  { %v5638_v38 = vpop.xlane.xlu1 %5637 }
0x28f0   :  { %11495 = vrcp.f32 %v5638_v38 }
0x28f3   :  { %v6053_v42 = vpop.permute.xlu1 %6052 }
0x28fa   :  { %v11496_v40 = vpop.eup %11495 }
0x28fb   :  { %v5642_v30 = vmul.f32 %v11496_v40, %v11494_v33 }
0x28fd   :  { %10867 = vmatmul.mubr.msk.f32.vlgmr.msra.gmra.mrb[56].mxu1 %vm601_vm2, %v5642_v30 }
0x28fe   :  { %10880 = vmatpush3.xpose.msk.msra.mxu1 %vm601_vm2, %v5975_v37  ;;  %10881 = vmatprep.mubr.msk.f32.mxu1 %vm12105_vm1, %v12104_v21 }
0x28ff   :  { %10884 = vmatprep.subr.mxu1 %v12104_v21 }
0x2901   :  { %10882 = vmatmul.mubr.msk.f32.vlgmr.msra.gmra.mrb[58].mxu1 %vm601_vm2, %v5973_v41 }
0x2902   :  { %10885 = vmatpush3.xpose.msk.msra.mxu1 %vm601_vm2, %v6053_v42  ;;  %10886 = vmatprep.mubr.msk.f32.mxu1 %vm12105_vm1, %v12104_v21 }
0x2903   :  { %10894 = vmatprep.subr.mxu1 %v12104_v21 }
0x2905   :  { %10887 = vmatmul.mubr.msk.f32.vlgmr.msra.gmra.mrb[60].mxu1 %vm601_vm2, %v6051_v32 }
0x2906   :  { %10896 = vmatprep.mubr.msk.f32.mxu1 %vm12105_vm1, %v12104_v21 }
0x2924   :  { %v5623_v43 = vpop.xlane.xlu1 %5622 }
0x2925   :  { %v5627_v44 = vsub.f32 %v5535_v14, %v5623_v43 }
0x2927   :  { %v5629_v11 = vmul.f32 1.442695, %v5627_v44 }
0x2929   :  { %11497 = vpow2.f32 %v5629_v11 }
0x2933   :  { %v11498_v46 = vpop.eup %11497 }
0x2934   :  { %v5633_v47 = vsel %vm5282_vm6, %v11498_v46, 0.0 }
0x2935   :  { %5634 = vadd.xlane.f32.xlu0 %v5633_v47 }
0x294b   :  { %5643 = vrot.lane.b32.xlu0 %v13056_v39, %s12109_s4 }
0x294f   :  { %6150 = vrot.lane.b32.xlu0 %v13056_v39, %s12110_s5 }
0x2953   :  { %6485 = vrot.lane.b32.xlu0 %v13054_v26, %s12115_s1 }
0x2957   :  { %6407 = vrot.lane.b32.xlu0 %v13056_v39, %s12115_s1 }
0x295b   :  { %6483 = vrot.lane.b32.xlu0 %v13074_v24, %s12115_s1 }
0x29c2   :  { %v5635_v48 = vpop.xlane.xlu0 %5634 }
0x29c3   :  { %11499 = vrcp.f32 %v5635_v48 }
0x29c6   :  { %v5644_v49 = vpop.permute.xlu0 %5643 }
0x29c7   :  { %10860 = vmatpush3.msra.mxu0 %v5644_v49 }
0x29c8   :  { %10869 = vmatprep.subr.mxu0 %v12104_v21 }
0x29ca   :  { %v6151_v13 = vpop.permute.xlu0 %6150 }
0x29cd   :  { %v11500_v50 = vpop.eup %11499 }
0x29ce   :  { %v5641_v51 = vmul.f32 %v11500_v50, %v11498_v46  ;;  %v6486_v23 = vpop.permute.xlu0 %6485 }
0x29d0   :  { %10862 = vmatmul.mubr.msk.f32.vlgmr.msra.gmra.mrb[44].mxu0 %vm601_vm2, %v5641_v51  ;;  %v5791_v54 = vpop.f32.mrb[56].mxu1 }
0x29d1   :  { %v10868_v55 = vpop.f32.mrb[57].mxu1  ;;  %10871 = vmatprep.mubr.msk.f32.mxu0 %vm12105_vm1, %v12104_v21  ;;  %10870 = vmatpush3.msra.mxu0 %v5124_v34  ;;  %v5797_v4 = vrot.slane %v5791_v54, 7 }
0x29d2   :  { %10874 = vmatprep.subr.mxu0 %v12104_v21  ;;  %v6408_v33 = vpop.permute.xlu0 %6407 }
0x29d4   :  { %v6046_v45 = vpop.f32.mrb[58].mxu1 }
0x29d5   :  { %v10883_v56 = vpop.f32.mrb[59].mxu1  ;;  %v6128_v59 = vsel %vm5282_vm6, %v6046_v45, -inf }
0x29d6   :  { %v6484_v47 = vpop.permute.xlu0 %6483 }
0x29d8   :  { %v6124_v57 = vpop.f32.mrb[60].mxu1 }
0x29d9   :  { %v10888_v16 = vpop.f32.mrb[61].mxu1  ;;  %v6131_v24 = vsel %vm5282_vm6, %v6124_v57, -inf }
0x29da   :  { %6132 = vmax.xlane.f32.xlu1 %v6131_v24 }
0x29de   :  { %6129 = vmax.xlane.f32.xlu1 %v6128_v59 }
0x2a67   :  { %v6133_v17 = vpop.xlane.xlu1 %6132 }
0x2a68   :  { %v6135_v60 = vsub.f32 %v6124_v57, %v6133_v17 }
0x2a6a   :  { %v6138_v63 = vmul.f32 1.442695, %v6135_v60 }
0x2a6b   :  { %v6130_v61 = vpop.xlane.xlu1 %6129 }
0x2a6c   :  { %v6134_v62 = vsub.f32 %v6046_v45, %v6130_v61 }
0x2a6e   :  { %v6136_v0 = vmul.f32 1.442695, %v6134_v62 }
0x2a70   :  { %11501 = vpow2.f32 %v6136_v0 }
0x2a71   :  { %11503 = vpow2.f32 %v6138_v63 }
0x2a7a   :  { %v11502_v1 = vpop.eup %11501 }
0x2a7b   :  { %v6140_v2 = vsel %vm5282_vm6, %v11502_v1, 0.0  ;;  %v11504_v58 = vpop.eup %11503 }
0x2a7c   :  { %6141 = vadd.xlane.f32.xlu1 %v6140_v2  ;;  %v6143_v3 = vsel %vm5282_vm6, %v11504_v58, 0.0 }
0x2a80   :  { %6144 = vadd.xlane.f32.xlu1 %v6143_v3 }
0x2a91   :  { %6226 = vrot.lane.b32.xlu1 %v13054_v26, %s12110_s5 }
0x2a95   :  { %6405 = vrot.lane.b32.xlu1 %v13082_v25, %s12115_s1 }
0x2aa3   :  { %v5715_v5 = vpop.f32.mrb[44].mxu0 }
0x2aa4   :  { %v5798_v7 = vsel %vm4641_vm4, %v5797_v4, %v5715_v5  ;;  %v10863_v8 = vpop.f32.mrb[45].mxu0 }
0x2aa5   :  { %10872 = vmatmul.mubr.msk.f32.vlgmr.msra.gmra.mrb[46].mxu0 %vm601_vm2, %v5798_v7 }
0x2aa6   :  { %10875 = vmatpush3.msra.mxu0 %v5123_v6  ;;  %10876 = vmatprep.mubr.msk.f32.mxu0 %vm12105_vm1, %v12104_v21 }
0x2aa7   :  { %10889 = vmatprep.subr.mxu0 %v12104_v21 }
0x2aad   :  { %10877 = vmatmul.mubr.msk.f32.vlgmr.msra.gmra.mrb[46].mxu0 %vm601_vm2, %v13120_v12 }
0x2aae   :  { %10890 = vmatpush3.msra.mxu0 %v6151_v13  ;;  %10891 = vmatprep.mubr.msk.f32.mxu0 %vm12105_vm1, %v12104_v21 }
0x2aaf   :  { %10899 = vmatprep.subr.mxu0 %v12104_v21 }
0x2b09   :  { %v6142_v25 = vpop.xlane.xlu1 %6141 }
0x2b0a   :  { %11505 = vrcp.f32 %v6142_v25 }
0x2b0d   :  { %v6145_v14 = vpop.xlane.xlu1 %6144 }
0x2b0e   :  { %11507 = vrcp.f32 %v6145_v14 }
0x2b11   :  { %v6227_v15 = vpop.permute.xlu1 %6226 }
0x2b12   :  { %10895 = vmatpush3.msra.mxu1 %v6227_v15 }
0x2b13   :  { %10904 = vmatprep.subr.mxu1 %v12104_v21 }
0x2b14   :  { %v11506_v22 = vpop.eup %11505 }
0x2b15   :  { %v6148_v27 = vmul.f32 %v11506_v22, %v11502_v1  ;;  %v6406_v35 = vpop.permute.xlu1 %6405 }
0x2b17   :  { %10892 = vmatmul.mubr.msk.f32.vlgmr.msra.gmra.mrb[48].mxu0 %vm601_vm2, %v6148_v27 }
0x2b18   :  { %v11508_v12 = vpop.eup %11507  ;;  %10901 = vmatprep.mubr.msk.f32.mxu0 %vm12105_vm1, %v12104_v21  ;;  %10900 = vmatpush3.msra.mxu0 %v5125_v36 }
0x2b19   :  { %v6149_v31 = vmul.f32 %v11508_v12, %v11504_v58  ;;  %10909 = vmatprep.subr.mxu0 %v12104_v21 }
0x2b1b   :  { %10897 = vmatmul.mubr.msk.f32.vlgmr.msra.gmra.mrb[62].mxu1 %vm601_vm2, %v6149_v31 }
0x2b1c   :  { %10905 = vmatpush3.xpose.msk.msra.mxu1 %vm601_vm2, %v6408_v33  ;;  %10906 = vmatprep.mubr.msk.f32.mxu1 %vm12105_vm1, %v12104_v21 }
0x2b1d   :  { %10914 = vmatprep.subr.mxu1 %v12104_v21 }
0x2b1f   :  { %10907 = vmatmul.mubr.msk.f32.vlgmr.msra.gmra.mrb[64].mxu1 %vm601_vm2, %v6406_v35 }
0x2b20   :  { %10916 = vmatprep.mubr.msk.f32.mxu1 %vm12105_vm1, %v12104_v21 }
0x2b80   :  { %v5943_v37 = vpop.f32.mrb[46].mxu0 }
0x2b81   :  { %v10878_v38 = vpop.f32.mrb[47].mxu0  ;;  %v5954_v54 = vrot.slane %v5943_v37, %v12982_v18 }
0x2b83   :  { %v5955_v45 = vcombine.high %v5954_v54, %v5954_v54  ;;  %v5962_v16 = vrot.slane %v5954_v54, %v12982_v18 }
0x2b85   :  { %v5969_v34 = vrot.slane %v5955_v45, %v12982_v18 }
0x2bea   :  { %v6222_v40 = vpop.f32.mrb[48].mxu0 }
0x2beb   :  { %v10893_v30 = vpop.f32.mrb[49].mxu0 }
0x2bec   :  { %v5127_v30 = vld [vmem:[#allocation19] sm:$0x1] }
0x2bee   :  { %v6298_v41 = vpop.f32.mrb[62].mxu1 }
0x2bef   :  { %v6304_v42 = vrot.slane %v6298_v41, 7  ;;  %v10898_v32 = vpop.f32.mrb[63].mxu1 }
0x2bf1   :  { %v6305_v43 = vsel %vm4641_vm4, %v6304_v42, %v6222_v40 }
0x2bf2   :  { %10902 = vmatmul.mubr.msk.f32.vlgmr.msra.gmra.mrb[50].mxu0 %vm601_vm2, %v6305_v43  ;;  %v6479_v44 = vpop.f32.mrb[64].mxu1 }
0x2bf3   :  { %10910 = vmatpush3.xpose.msk.msra.mxu0 %vm601_vm2, %v6486_v23  ;;  %v10908_v11 = vpop.f32.mrb[65].mxu1  ;;  %v6561_v46 = vsel %vm5282_vm6, %v6479_v44, -inf  ;;  %10911 = vmatprep.mubr.msk.f32.mxu0 %vm12105_vm1, %v12104_v21 }
0x2bf4   :  { %6562 = vmax.xlane.f32.xlu1 %v6561_v46  ;;  %10919 = vmatprep.subr.mxu0 %v12104_v21 }
0x2bf6   :  { %10912 = vmatmul.mubr.msk.f32.vlgmr.msra.gmra.mrb[52].mxu0 %vm601_vm2, %v6484_v47 }
0x2bf7   :  { %10921 = vmatprep.mubr.msk.f32.mxu0 %vm12105_vm1, %v12104_v21 }
0x2c05   :  { %6659 = vrot.lane.b32.xlu1 %v13054_v26, %s12114_s24 }
0x2c81   :  { %v6563_v48 = vpop.xlane.xlu1 %6562 }
0x2c82   :  { %v6567_v50 = vsub.f32 %v6479_v44, %v6563_v48 }
0x2c84   :  { %v6569_v51 = vmul.f32 1.442695, %v6567_v50 }
0x2c85   :  { %v6660_v49 = vpop.permute.xlu1 %6659 }
0x2c86   :  { %10920 = vmatpush3.msra.mxu0 %v6660_v49  ;;  %11509 = vpow2.f32 %v6569_v51 }
0x2c87   :  { %11223 = vmatprep.subr.bf16.mxu0 %v12117_v20 }
0x2c90   :  { %v11510_v63 = vpop.eup %11509 }
0x2c91   :  { %v6573_v1 = vsel %vm5282_vm6, %v11510_v63, 0.0 }
0x2cc5   :  { %v6374_v55 = vpop.f32.mrb[50].mxu0 }
0x2cc6   :  { %v6385_v56 = vrot.slane %v6374_v55, %v12982_v18  ;;  %v10903_v57 = vpop.f32.mrb[51].mxu0 }
0x2cc8   :  { %v6386_v24 = vcombine.high %v6385_v56, %v6385_v56  ;;  %v6393_v26 = vrot.slane %v6385_v56, %v12982_v18 }
0x2cc9   :  { %v6557_v59 = vpop.f32.mrb[52].mxu0 }
0x2cca   :  { %v6400_v17 = vrot.slane %v6386_v24, %v12982_v18  ;;  %v6403_v60 = vadd.f32 %v6393_v26, %v5962_v16  ;;  %v10913_v61 = vpop.f32.mrb[53].mxu0  ;;  %v6564_v62 = vsel %vm5282_vm6, %v6557_v59, -inf }
0x2ccb   :  { %6565 = vmax.xlane.f32.xlu0 %v6564_v62 }
0x2ccc   :  { %v6404_v0 = vadd.f32 %v6400_v17, %v5969_v34  ;;  %v6900_v34 = vld [vmem:[#allocation29 + $0x10] sm:$0xff] }
0x2ccf   :  { %6574 = vadd.xlane.f32.xlu0 %v6573_v1 }
0x2d58   :  { %v6566_v2 = vpop.xlane.xlu0 %6565 }
0x2d59   :  { %v6568_v58 = vsub.f32 %v6557_v59, %v6566_v2  ;;  %v6898_v59 = vld [vmem:[#allocation29] sm:$0xff] }
0x2d5b   :  { %v6571_v3 = vmul.f32 1.442695, %v6568_v58 }
0x2d5c   :  { %v6575_v6 = vpop.xlane.xlu0 %6574 }
0x2d5d   :  { %11511 = vpow2.f32 %v6571_v3 }
0x2d5e   :  { %11513 = vrcp.f32 %v6575_v6 }
0x2d67   :  { %v11512_v4 = vpop.eup %11511 }
0x2d68   :  { %v6576_v5 = vsel %vm5282_vm6, %v11512_v4, 0.0  ;;  %v11514_v8 = vpop.eup %11513 }
0x2d69   :  { %6577 = vadd.xlane.f32.xlu0 %v6576_v5  ;;  %v6581_v13 = vmul.f32 %v11514_v8, %v11510_v63 }
0x2d7f   :  { %6583 = vrot.lane.b32.xlu0 %v13056_v39, %s12114_s24  ;;  %v5126_v39 = vld [vmem:[#allocation17 + $0x18] sm:$0xff] }
0x2df6   :  { %v6578_v7 = vpop.xlane.xlu0 %6577 }
0x2df7   :  { %11515 = vrcp.f32 %v6578_v7  ;;  %v10151_v7 = vld [vmem:[#allocation25] ss:$0 sm:$0xff] }
0x2dfa   :  { %v6584_v25 = vpop.permute.xlu0 %6583 }
0x2dfb   :  { %10915 = vmatpush3.msra.mxu1 %v6584_v25 }
0x2dfc   :  { %10917 = vmatmul.mubr.msk.f32.vlgmr.msra.gmra.mrb[66].mxu1 %vm601_vm2, %v6581_v13  ;;  %10924 = vmatprep.subr.mxu1 %v12104_v21 }
0x2dfd   :  { %10926 = vmatprep.mubr.msk.f32.mxu1 %vm12105_vm1, %v12104_v21  ;;  %10925 = vmatpush3.msra.mxu1 %v5126_v39 }
0x2dfe   :  { %11229 = vmatprep.subr.bf16.mxu1 %v12117_v20 }
0x2e01   :  { %v11516_v14 = vpop.eup %11515 }
0x2e02   :  { %v6582_v15 = vmul.f32 %v11516_v14, %v11512_v4  ;;  %v10150_v4 = vld [vmem:[#allocation23] ss:$0 sm:$0xff] }
0x2e04   :  { %10922 = vmatmul.mubr.msk.f32.vlgmr.msra.gmra.mrb[54].mxu0 %vm601_vm2, %v6582_v15 }
0x2e05   :  { %10937 = vmatprep.mubr.msk.f32.mxu0 %vm12105_vm1, %v12104_v21 }
0x2ecf   :  { %v6655_v22 = vpop.f32.mrb[66].mxu1 }
0x2ed0   :  { %v10918_v23 = vpop.f32.mrb[67].mxu1 }
0x2ed7   :  { %v6731_v27 = vpop.f32.mrb[54].mxu0 }
0x2ed8   :  { %v6737_v12 = vrot.slane %v6731_v27, 7  ;;  %v10923_v31 = vpop.f32.mrb[55].mxu0  ;;  %v6903_v27 = vld [vmem:[%s12335_s6] sm:$0xff] }
0x2eda   :  { %v6738_v33 = vsel %vm4641_vm4, %v6737_v12, %v6655_v22  ;;  %v6904_v12 = vld [vmem:[%s12335_s6 + $0x8] sm:$0xff] }
0x2edb   :  { %10927 = vmatmul.mubr.msk.f32.vlgmr.msra.gmra.mrb[68].mxu1 %vm601_vm2, %v6738_v33  ;;  %v11230_v31 = vpack.c.bf16 %v6904_v12, %v6903_v27  ;;  %v6905_v33 = vld [vmem:[%s12335_s6 + $0x10] sm:$0xff]  ;;  %v10159_v12 = vld [vmem:[%s13628_s18 + $0x38] sm:$0xff] }
0x2edc   :  { %10956 = vmatprep.mubr.msk.f32.mxu1 %vm12105_vm1, %v12104_v21 }
0x2edd   :  { %11231 = vmatpush3.bf16.msra.mxu1 %v11230_v31 }
0x2ede   :  { %11232 = vmatprep.subr.bf16.mxu1 %v12117_v20 }
0x2fae   :  { %v6807_v35 = vpop.f32.mrb[68].mxu1 }
0x2faf   :  { %v6818_v36 = vrot.slane %v6807_v35, %v12982_v18  ;;  %v10928_v37 = vpop.f32.mrb[69].mxu1  ;;  %v6906_v35 = vld [vmem:[%s12335_s6 + $0x18] sm:$0xff] }
0x2fb0   :  { %v6907_v37 = vld [vmem:[%s12335_s6 + $0x20] sm:$0xff] }
0x2fb1   :  { %v6819_v38 = vcombine.high %v6818_v36, %v6818_v36  ;;  %v6826_v40 = vrot.slane %v6818_v36, %v12982_v18  ;;  %v11233_v36 = vpack.c.bf16 %v6906_v35, %v6905_v33 }
0x2fb3   :  { %v6833_v41 = vrot.slane %v6819_v38, %v12982_v18  ;;  %v6836_v42 = vadd.f32 %v6826_v40, %v6403_v60  ;;  %v6901_v60 = vld [vmem:[#allocation29 + $0x18] sm:$0xff]  ;;  %11234 = vmatpush3.bf16.msra.mxu1 %v11233_v36  ;;  %v6908_v38 = vld [vmem:[%s12335_s6 + $0x28] sm:$0xff] }
0x2fb4   :  { %v11227_v61 = vpack.c.bf16 %v6901_v60, %v6900_v34  ;;  %11235 = vmatprep.subr.bf16.mxu1 %v12117_v20  ;;  %v11236_v40 = vpack.c.bf16 %v6908_v38, %v6907_v37 }
0x2fb5   :  { %v6837_v32 = vadd.f32 %v6833_v41, %v6404_v0  ;;  %v6838_v43 = vadd.f32 %v6836_v42, %v5127_v30  ;;  %v6910_v41 = vld [vmem:[%s12335_s6 + $0x38] sm:$0xff] }
0x2fb7   :  { %v6845_v44 = vrot.slane %v6838_v43, %v13002_v29  ;;  %v6839_v11 = vadd.f32 %v6837_v32, %v5127_v30  ;;  %11237 = vmatpush3.bf16.msra.mxu1 %v11236_v40  ;;  %v6909_v30 = vld [vmem:[%s12335_s6 + $0x30] sm:$0xff]  ;;  %v11390_v32 = vld [vmem:[#allocation31] ss:$0 sps:$4 sm:$0x11]  }
0x2fb8   :  { %11238 = vmatprep.subr.bf16.mxu1 %v12117_v20  ;;  %v11239_v42 = vpack.c.bf16 %v6910_v41, %v6909_v30  ;;  %v6925_v43 = vrot.slane %v11390_v32, %v12982_v18  ;;  %v10154_v41 = vld [vmem:[#allocation26] ss:$0 sm:$0xff] }
0x2fb9   :  { %v6852_v46 = vadd.f32 %v6845_v44, %v13028_v53  ;;  %v6849_v47 = vrot.slane %v6839_v11, %v13002_v29 }
0x2fba   :  { %v6932_v44 = vrot.slane %v6925_v43, %v12982_v18  ;;  %v10155_v43 = vld [vmem:[#allocation28] ss:$0 sm:$0xff] }
0x2fbb   :  { %v6856_v48 = vsel %vm4864_vm5, %v6852_v46, 0.0  ;;  %v6853_v49 = vadd.f32 %v6849_v47, %v13026_v52  ;;  %v6899_v52 = vld [vmem:[#allocation29 + $0x8] sm:$0xff]  ;;  %11240 = vmatpush3.bf16.msra.mxu1 %v11239_v42 }
0x2fbc   :  { %6857 = vadd.xlane.f32.xlu1 %v6856_v48  ;;  %v11224_v17 = vpack.c.bf16 %v6899_v52, %v6898_v59  ;;  %11253 = vmatprep.subr.bf16.mxu1 %v12117_v20 }
0x2fbd   :  { %v6859_v50 = vsel %vm4864_vm5, %v6853_v49, 0.0 }
0x2fbe   :  { %6860 = vadd.xlane.f32.xlu0 %v6859_v50  ;;  %11225 = vmatpush3.bf16.msra.mxu0 %v11224_v17 }
0x2fbf   :  { %11226 = vmatprep.subr.bf16.mxu0 %v12117_v20 }
0x2fc2   :  { %11228 = vmatpush3.bf16.msra.mxu0 %v11227_v61 }
0x2fc3   :  { %11241 = vmatprep.subr.bf16.mxu0 %v12117_v20 }
0x3049   :  { %v6858_v51 = vpop.xlane.xlu1 %6857 }
0x304a   :  { %v6862_v54 = vmul.f32 0.03125, %v6858_v51 }
0x304b   :  { %v6861_v55 = vpop.xlane.xlu0 %6860 }
0x304c   :  { %v6864_v45 = vsub.f32 %v6852_v46, %v6862_v54  ;;  %v6863_v56 = vmul.f32 0.03125, %v6861_v55 }
0x304e   :  { %v6865_v57 = vsub.f32 %v6853_v49, %v6863_v56  ;;  %v6866_v16 = vmul.f32 %v6864_v45, %v6864_v45 }
0x3050   :  { %v6868_v24 = vsel %vm4864_vm5, %v6866_v16, 0.0  ;;  %v6867_v53 = vmul.f32 %v6865_v57, %v6865_v57  ;;  %v11391_v16 = vld [vmem:[#allocation32] ss:$0 sps:$4 sm:$0x11]  }
0x3051   :  { %6869 = vadd.xlane.f32.xlu1 %v6868_v24  ;;  %v7058_v24 = vrot.slane %v11391_v16, %v12982_v18 }
0x3052   :  { %v6871_v26 = vsel %vm4864_vm5, %v6867_v53, 0.0 }
0x3053   :  { %6872 = vadd.xlane.f32.xlu0 %v6871_v26  ;;  %v7065_v53 = vrot.slane %v7058_v24, %v12982_v18  ;;  %v7624_v24 = vld [vmem:[#allocation14 + $0x20] sm:$0xff] }
0x30de   :  { %v6870_v62 = vpop.xlane.xlu1 %6869 }
0x30df   :  { %v6874_v63 = vmul.f32 0.03125, %v6870_v62 }
0x30e0   :  { %v6873_v0 = vpop.xlane.xlu0 %6872 }
0x30e1   :  { %v6876_v1 = vadd.f32 1e-05, %v6874_v63  ;;  %v6875_v2 = vmul.f32 0.03125, %v6873_v0 }
0x30e3   :  { %11517 = vrsqrt.f32 %v6876_v1  ;;  %v6877_v58 = vadd.f32 1e-05, %v6875_v2 }
0x30e5   :  { %11519 = vrsqrt.f32 %v6877_v58 }
0x30ed   :  { %v11518_v3 = vpop.eup %11517 }
0x30ee   :  { %v6880_v5 = vmul.f32 %v11518_v3, %v6864_v45 }
0x30ef   :  { %v11520_v6 = vpop.eup %11519 }
0x30f0   :  { %v6881_v8 = vmul.f32 %v11520_v6, %v6865_v57  ;;  %v6888_v13 = vmul.f32 %v10150_v4, %v6880_v5 }
0x30f2   :  { %v6889_v25 = vmul.f32 %v10150_v4, %v6881_v8  ;;  %v6896_v14 = vadd.f32 %v10151_v7, %v6888_v13 }
0x30f4   :  { %v6897_v15 = vadd.f32 %v10151_v7, %v6889_v25  ;;  %v6914_v39 = vrot.slane %v6896_v14, 7 }
0x30f6   :  { %v6915_v22 = vrot.slane %v6897_v15, 6 }
0x30f8   :  { %v6916_v23 = vsel %vm4641_vm4, %v6915_v22, %v6914_v39  ;;  %v10156_v39 = vld [vmem:[%s13628_s18 + $0x20] sm:$0xff]  ;;  %v10157_v22 = vld [vmem:[%s13628_s18 + $0x28] sm:$0xff] }
0x30f9   :  { %10938 = vmatmul.mubr.msk.f32.vlgmr.msra.gmra.mrb[56].mxu0 %vm509_vm0, %v6916_v23  ;;  %v10158_v23 = vld [vmem:[%s13628_s18 + $0x30] sm:$0xff]  ;;  %v11242_v27 = vpack.c.bf16 %v10157_v22, %v10156_v39 }
0x30fa   :  { %10967 = vmatprep.mubr.msk.f32.mxu0 %vm12105_vm1, %v12104_v21  ;;  %v11245_v31 = vpack.c.bf16 %v10159_v12, %v10158_v23 }
0x30fb   :  { %11243 = vmatpush3.bf16.msra.mxu0 %v11242_v27 }
0x30fc   :  { %11244 = vmatprep.subr.bf16.mxu0 %v12117_v20 }
0x30ff   :  { %11246 = vmatpush3.bf16.msra.mxu0 %v11245_v31 }
0x3100   :  { %11247 = vmatprep.subr.bf16.mxu0 %v12117_v20 }
0x31cc   :  { %v7002_v11 = vpop.f32.mrb[56].mxu0 }
0x31cd   :  { %v7003_v46 = vadd.f32 %v7002_v11, %v6932_v44  ;;  %v10939_v47 = vpop.f32.mrb[57].mxu0 }
0x31cf   :  { %v7013_v48 = vrot.slane %v7003_v46, %v12982_v18 }
0x31d1   :  { %v7014_v49 = vcombine.high %v7013_v48, %v7013_v48  ;;  %v7021_v50 = vrot.slane %v7013_v48, %v12982_v18  ;;  %v10161_v48 = vld [vmem:[%s13629_s3 + $0x20] sm:$0xff] }
0x31d3   :  { %v7028_v51 = vrot.slane %v7014_v49, %v12982_v18  ;;  %v7031_v54 = vmax.f32 %v7021_v50, 0.0  ;;  %v10162_v49 = vld [vmem:[%s13629_s3 + $0x28] sm:$0xff] }
0x31d5   :  { %v7032_v55 = vmax.f32 %v7028_v51, 0.0 }
0x31d7   :  { %v7035_v45 = vcombine.low %v7031_v54, %v7032_v55  ;;  %v11248_v55 = vpack.c.bf16 %v10162_v49, %v10161_v48 }
0x31d9   :  { %v7042_v56 = vrot.slane %v7035_v45, %v12982_v18  ;;  %v10163_v45 = vld [vmem:[%s13629_s3 + $0x30] sm:$0xff] }
0x31db   :  { %v7049_v57 = vrot.slane %v7042_v56, %v12982_v18  ;;  %v10164_v56 = vld [vmem:[%s13629_s3 + $0x38] sm:$0xff] }
0x31dc   :  { %v11251_v16 = vpack.c.bf16 %v10164_v56, %v10163_v45  ;;  %v10166_v56 = vld [vmem:[#allocation20 + $0x1] ss:$0 sm:$0xff] }
0x31dd   :  { %10957 = vmatmul.mubr.msk.f32.vlgmr.msra.gmra.mrb[70].mxu1 %vm2411_vm3, %v7049_v57 }
0x31de   :  { %10989 = vmatprep.mubr.msk.f32.mxu1 %vm12105_vm1, %v12104_v21 }
0x32b0   :  { %v7135_v26 = vpop.f32.mrb[70].mxu1 }
0x32b1   :  { %v7136_v59 = vadd.f32 %v7135_v26, %v7065_v53  ;;  %v10958_v52 = vpop.f32.mrb[71].mxu1  ;;  %v7625_v53 = vld [vmem:[#allocation14 + $0x28] sm:$0xff] }
0x32b2   :  { %v11259_v26 = vpack.c.bf16 %v7625_v53, %v7624_v24  ;;  %v10167_v24 = vld [vmem:[#allocation22 + $0x1] ss:$0 sm:$0xff] }
0x32b3   :  { %v7146_v34 = vrot.slane %v7136_v59, %v12982_v18  ;;  %v11392_v59 = vld [vmem:[#allocation10 + $0x1] ss:$0 sps:$4 sm:$0x11]  }
0x32b4   :  { %v7238_v52 = vrot.slane %v11392_v59, %v12982_v18 }
0x32b5   :  { %v7147_v17 = vcombine.high %v7146_v34, %v7146_v34  ;;  %v7154_v60 = vrot.slane %v7146_v34, %v12982_v18 }
0x32b6   :  { %v7245_v34 = vrot.slane %v7238_v52, %v12982_v18 }
0x32b7   :  { %v7161_v61 = vrot.slane %v7147_v17, %v12982_v18  ;;  %v7165_v62 = vrot.slane %v7154_v60, %v13002_v29  ;;  %v7626_v17 = vld [vmem:[#allocation14 + $0x30] sm:$0xff]  ;;  %v7627_v60 = vld [vmem:[#allocation14 + $0x38] sm:$0xff] }
0x32b9   :  { %v7172_v63 = vadd.f32 %v7165_v62, %v6896_v14  ;;  %v7169_v0 = vrot.slane %v7161_v61, %v13002_v29 }
0x32bb   :  { %v7176_v1 = vsel %vm4864_vm5, %v7172_v63, 0.0  ;;  %v7173_v2 = vadd.f32 %v7169_v0, %v6897_v15  ;;  %v11263_v0 = vpack.c.bf16 %v7627_v60, %v7626_v17 }
0x32bc   :  { %7177 = vadd.xlane.f32.xlu1 %v7176_v1  ;;  %v11393_v1 = vld [vmem:[#allocation11 + $0x1] ss:$0 sps:$4 sm:$0x11]  }
0x32bd   :  { %v7179_v58 = vsel %vm4864_vm5, %v7173_v2, 0.0 }
0x32be   :  { %7180 = vadd.xlane.f32.xlu0 %v7179_v58 }
0x3349   :  { %v7178_v3 = vpop.xlane.xlu1 %7177 }
0x334a   :  { %v7182_v4 = vmul.f32 0.03125, %v7178_v3 }
0x334b   :  { %v7181_v5 = vpop.xlane.xlu0 %7180 }
0x334c   :  { %v7184_v6 = vsub.f32 %v7172_v63, %v7182_v4  ;;  %v7183_v7 = vmul.f32 0.03125, %v7181_v5 }
0x334e   :  { %v7185_v8 = vsub.f32 %v7173_v2, %v7183_v7  ;;  %v7186_v13 = vmul.f32 %v7184_v6, %v7184_v6  ;;  %v7334_v2 = vrot.slane %v11393_v1, %v12982_v18 }
0x3350   :  { %v7188_v25 = vsel %vm4864_vm5, %v7186_v13, 0.0  ;;  %v7187_v14 = vmul.f32 %v7185_v8, %v7185_v8  ;;  %v7341_v58 = vrot.slane %v7334_v2, %v12982_v18 }
0x3351   :  { %7189 = vadd.xlane.f32.xlu1 %v7188_v25 }
0x3352   :  { %v7191_v15 = vsel %vm4864_vm5, %v7187_v14, 0.0 }
0x3353   :  { %7192 = vadd.xlane.f32.xlu0 %v7191_v15 }
0x33de   :  { %v7190_v33 = vpop.xlane.xlu1 %7189 }
0x33df   :  { %v7194_v35 = vmul.f32 0.03125, %v7190_v33 }
0x33e0   :  { %v7193_v36 = vpop.xlane.xlu0 %7192 }
0x33e1   :  { %v7196_v37 = vadd.f32 1e-05, %v7194_v35  ;;  %v7195_v38 = vmul.f32 0.03125, %v7193_v36 }
0x33e3   :  { %11521 = vrsqrt.f32 %v7196_v37  ;;  %v7197_v40 = vadd.f32 1e-05, %v7195_v38 }
0x33e5   :  { %11523 = vrsqrt.f32 %v7197_v40 }
0x33ed   :  { %v11522_v30 = vpop.eup %11521 }
0x33ee   :  { %v7200_v42 = vmul.f32 %v11522_v30, %v7184_v6 }
0x33ef   :  { %v11524_v32 = vpop.eup %11523 }
0x33f0   :  { %v7201_v44 = vmul.f32 %v11524_v32, %v7185_v8  ;;  %v7208_v11 = vmul.f32 %v10154_v41, %v7200_v42  ;;  %v10173_v8 = vld [vmem:[#allocation16 + $0x1] ss:$0 sm:$0xff]  ;;  %v10168_v32 = vld [vmem:[%s13630_s17 + $0x20] sm:$0xff] }
0x33f2   :  { %v7209_v46 = vmul.f32 %v10154_v41, %v7201_v44  ;;  %v7216_v47 = vadd.f32 %v10155_v43, %v7208_v11  ;;  %v10170_v11 = vld [vmem:[%s13630_s17 + $0x30] sm:$0xff] }
0x33f4   :  { %v7217_v50 = vadd.f32 %v10155_v43, %v7209_v46  ;;  %v7227_v51 = vrot.slane %v7216_v47, 7  ;;  %v10169_v43 = vld [vmem:[%s13630_s17 + $0x28] sm:$0xff]  ;;  %v10171_v46 = vld [vmem:[%s13630_s17 + $0x38] sm:$0xff] }
0x33f5   :  { %v11254_v44 = vpack.c.bf16 %v10169_v43, %v10168_v32 }
0x33f6   :  { %v7228_v54 = vrot.slane %v7217_v50, 6 }
0x33f7   :  { %11255 = vmatpush3.bf16.msra.mxu1 %v11254_v44 }
0x33f8   :  { %v7229_v57 = vsel %vm4641_vm4, %v7228_v54, %v7227_v51  ;;  %11256 = vmatprep.subr.bf16.mxu1 %v12117_v20 }
0x33f9   :  { %10968 = vmatmul.mubr.msk.f32.vlgmr.msra.gmra.mrb[58].mxu0 %vm509_vm0, %v7229_v57 }
0x33fa   :  { %11249 = vmatpush3.bf16.msra.mxu0 %v11248_v55  ;;  %10978 = vmatprep.mubr.msk.f32.mxu0 %vm12105_vm1, %v12104_v21 }
0x33fb   :  { %11250 = vmatprep.subr.bf16.mxu0 %v12117_v20 }
0x33fe   :  { %11252 = vmatpush3.bf16.msra.mxu0 %v11251_v16 }
0x33ff   :  { %11260 = vmatprep.subr.bf16.mxu0 %v11259_v26 }
0x34cc   :  { %v7315_v61 = vpop.f32.mrb[58].mxu0 }
0x34cd   :  { %v7316_v62 = vadd.f32 %v7315_v61, %v7245_v34  ;;  %v10969_v63 = vpop.f32.mrb[59].mxu0 }
0x34ce   :  { %v11394_v63 = vld [vmem:[#allocation13 + $0x1] ss:$0 sps:$4 sm:$0x11]  }
0x34cf   :  { %10979 = vmatmul.mubr.msk.f32.vlgmr.msra.gmra.mrb[60].mxu0 %vm509_vm0, %v7316_v62 }
0x34d0   :  { %11262 = vmatpush3.bf16.msra.mxu0 %v11259_v26  ;;  %11000 = vmatprep.mubr.msk.f32.mxu0 %vm509_vm0, %v13039_v9 }
0x34d1   :  { %11264 = vmatprep.subr.bf16.mxu0 %v11263_v0 }
0x34d4   :  { %11266 = vmatpush3.bf16.msra.mxu0 %v11263_v0  ;;  %v7517_v0 = vrot.slane %v11394_v63, %v12982_v18 }
0x34d5   :  { %11013 = vmatprep.subr.mxu0 %v12104_v21 }
0x34d6   :  { %v7524_v1 = vrot.slane %v7517_v0, %v12982_v18 }
0x34d7   :  { %11001 = vmatmul.mubr.msk.f32.vlgmr.msra.gmra.mrb[62].mxu0 %vm509_vm0, %v13041_v10 }
0x34d8   :  { %11015 = vmatprep.mubr.msk.f32.mxu0 %vm12105_vm1, %v12104_v21 }
0x35a2   :  { %v7412_v3 = vpop.f32.mrb[60].mxu0 }
0x35a3   :  { %v7413_v4 = vadd.f32 %v7412_v3, %v7341_v58  ;;  %v10980_v5 = vpop.f32.mrb[61].mxu0 }
0x35a5   :  { %v7423_v9 = vrot.slane %v7413_v4, %v12982_v18 }
0x35a7   :  { %v7424_v6 = vcombine.high %v7423_v9, %v7423_v9  ;;  %v7431_v7 = vrot.slane %v7423_v9, %v12982_v18 }
0x35a9   :  { %v7438_v13 = vrot.slane %v7424_v6, %v12982_v18  ;;  %v7442_v10 = vrot.slane %v7431_v7, %v13002_v29 }
0x35aa   :  { %v11002_v25 = vpop.f32.mrb[62].mxu0 }
0x35ab   :  { %v13304_v14 = vadd.f32 %v11002_v25, %v10173_v8  ;;  %v7702_v15 = vpop.f32.mrb[63].mxu0  ;;  %v7449_v39 = vadd.f32 %v7442_v10, %v7216_v47  ;;  %v7446_v22 = vrot.slane %v7438_v13, %v13002_v29  ;;  %v11257_v47 = vpack.c.bf16 %v10171_v46, %v10170_v11 }
0x35ac   :  { %v13323_v61 = vadd.f32 %v10173_v8, %v7702_v15 }
0x35ad   :  { %v7455_v23 = vsel %vm4864_vm5, %v7449_v39, 0.0  ;;  %v7450_v27 = vadd.f32 %v7446_v22, %v7217_v50  ;;  %11258 = vmatpush3.bf16.msra.mxu1 %v11257_v47 }
0x35ae   :  { %7456 = vadd.xlane.f32.xlu1 %v7455_v23  ;;  %11003 = vmatprep.subr.mxu1 %v12104_v21 }
0x35af   :  { %v7458_v12 = vsel %vm4864_vm5, %v7450_v27, 0.0 }
0x35b0   :  { %7459 = vadd.xlane.f32.xlu0 %v7458_v12 }
0x363b   :  { %v7457_v31 = vpop.xlane.xlu1 %7456 }
0x363c   :  { %v7461_v33 = vmul.f32 0.03125, %v7457_v31 }
0x363d   :  { %v7460_v35 = vpop.xlane.xlu0 %7459 }
0x363e   :  { %v7463_v36 = vsub.f32 %v7449_v39, %v7461_v33  ;;  %v7462_v37 = vmul.f32 0.03125, %v7460_v35 }
0x3640   :  { %v7464_v38 = vsub.f32 %v7450_v27, %v7462_v37  ;;  %v7465_v40 = vmul.f32 %v7463_v36, %v7463_v36 }
0x3642   :  { %v7467_v30 = vsel %vm4864_vm5, %v7465_v40, 0.0  ;;  %v7466_v41 = vmul.f32 %v7464_v38, %v7464_v38 }
0x3643   :  { %7468 = vadd.xlane.f32.xlu1 %v7467_v30 }
0x3644   :  { %v7470_v42 = vsel %vm4864_vm5, %v7466_v41, 0.0 }
0x3645   :  { %7471 = vadd.xlane.f32.xlu0 %v7470_v42 }
0x36d0   :  { %v7469_v48 = vpop.xlane.xlu1 %7468 }
0x36d1   :  { %v7473_v49 = vmul.f32 0.03125, %v7469_v48 }
0x36d2   :  { %v7472_v50 = vpop.xlane.xlu0 %7471 }
0x36d3   :  { %v7475_v51 = vadd.f32 1e-05, %v7473_v49  ;;  %v7474_v54 = vmul.f32 0.03125, %v7472_v50 }
0x36d5   :  { %11525 = vrsqrt.f32 %v7475_v51  ;;  %v7476_v55 = vadd.f32 1e-05, %v7474_v54 }
0x36d7   :  { %11527 = vrsqrt.f32 %v7476_v55 }
0x36df   :  { %v11526_v45 = vpop.eup %11525 }
0x36e0   :  { %v7479_v57 = vmul.f32 %v11526_v45, %v7463_v36 }
0x36e1   :  { %v11528_v16 = vpop.eup %11527 }
0x36e2   :  { %v7480_v53 = vmul.f32 %v11528_v16, %v7464_v38  ;;  %v7487_v26 = vmul.f32 %v10166_v56, %v7479_v57 }
0x36e4   :  { %v7488_v59 = vmul.f32 %v10166_v56, %v7480_v53  ;;  %v13317_v52 = vadd.f32 %v10167_v24, %v7487_v26 }
0x36e6   :  { %v13319_v34 = vadd.f32 %v10167_v24, %v7488_v59  ;;  %v7506_v17 = vrot.slane %v13317_v52, 7 }
0x36e8   :  { %v7507_v60 = vrot.slane %v13319_v34, 6 }
0x36ea   :  { %v7508_v62 = vsel %vm4641_vm4, %v7507_v60, %v7506_v17 }
0x36eb   :  { %10990 = vmatmul.mubr.msk.f32.vlgmr.msra.gmra.mrb[72].mxu1 %vm509_vm0, %v7508_v62 }
0x36ec   :  { %11004 = vmatpush3.xpose.msk.msra.mxu1 %vm601_vm2, %v13323_v61  ;;  %11005 = vmatprep.mubr.msk.f32.mxu1 %vm12105_vm1, %v12104_v21 }
0x36ed   :  { %11008 = vmatprep.subr.mxu1 %v12104_v21 }
0x37be   :  { %v7594_v2 = vpop.f32.mrb[72].mxu1 }
0x37bf   :  { %v7595_v58 = vadd.f32 %v7594_v2, %v7524_v1  ;;  %v10991_v3 = vpop.f32.mrb[73].mxu1 }
0x37c1   :  { %v7605_v4 = vrot.slane %v7595_v58, %v12982_v18 }
0x37c3   :  { %v7606_v5 = vcombine.high %v7605_v4, %v7605_v4  ;;  %v7613_v9 = vrot.slane %v7605_v4, %v12982_v18 }
0x37c5   :  { %v7620_v6 = vrot.slane %v7606_v5, %v12982_v18  ;;  %v7718_v7 = vmul.f32 0.35355338, %v7613_v9 }
0x37c7   :  { %11006 = vmatmul.mubr.msk.f32.vlgmr.msra.gmra.mrb[74].mxu1 %vm601_vm2, %v7718_v7  ;;  %v7719_v8 = vmul.f32 0.35355338, %v7620_v6  ;;  %v13358_v27 = vrot.slane %v7718_v7, %v13002_v29 }
0x37c8   :  { %11009 = vmatpush3.xpose.msk.msra.mxu1 %vm601_vm2, %v13304_v14  ;;  %11010 = vmatprep.mubr.msk.f32.mxu1 %vm12105_vm1, %v12104_v21 }
0x37c9   :  { %11018 = vmatprep.subr.mxu1 %v12104_v21  ;;  %v13350_v22 = vrot.slane %v7719_v8, %v13002_v29 }
0x37cb   :  { %11011 = vmatmul.mubr.msk.f32.vlgmr.msra.gmra.mrb[76].mxu1 %vm601_vm2, %v7719_v8 }
0x37cc   :  { %11020 = vmatprep.mubr.msk.f32.mxu1 %vm12105_vm1, %v12104_v21 }
0x389a   :  { %v7792_v13 = vpop.f32.mrb[74].mxu1 }
0x389b   :  { %v11007_v10 = vpop.f32.mrb[75].mxu1  ;;  %v7872_v23 = vsel %vm5282_vm6, %v7792_v13, -inf }
0x389e   :  { %v7868_v25 = vpop.f32.mrb[76].mxu1 }
0x389f   :  { %v11012_v15 = vpop.f32.mrb[77].mxu1  ;;  %v7875_v39 = vsel %vm5282_vm6, %v7868_v25, -inf }
0x38a0   :  { %7876 = vmax.xlane.f32.xlu1 %v7875_v39 }
0x38b1   :  { %7970 = vrot.lane.b32.xlu1 %v13304_v14, %s12106_s27 }
0x38b5   :  { %8132 = vrot.lane.b32.xlu1 %v13350_v22, %s12108_s28 }
0x38d9   :  { %7873 = vmax.xlane.f32.xlu1 %v7872_v23 }
0x38ea   :  { %8052 = vrot.lane.b32.xlu1 %v13323_v61, %s12108_s28 }
0x38ee   :  { %8050 = vrot.lane.b32.xlu1 %v13358_v27, %s12108_s28 }
0x38f2   :  { %8563 = vrot.lane.b32.xlu1 %v13323_v61, %s12112_s22 }
0x392d   :  { %v7877_v12 = vpop.xlane.xlu1 %7876 }
0x392e   :  { %v7879_v31 = vsub.f32 %v7868_v25, %v7877_v12 }
0x3930   :  { %v7882_v33 = vmul.f32 1.442695, %v7879_v31 }
0x3931   :  { %v7971_v35 = vpop.permute.xlu1 %7970 }
0x3932   :  { %11529 = vpow2.f32 %v7882_v33  ;;  %11019 = vmatpush3.msra.mxu1 %v7971_v35 }
0x3933   :  { %11028 = vmatprep.subr.mxu1 %v12104_v21 }
0x3935   :  { %v8133_v38 = vpop.permute.xlu1 %8132 }
0x393c   :  { %v11530_v36 = vpop.eup %11529 }
0x393d   :  { %v7887_v37 = vsel %vm5282_vm6, %v11530_v36, 0.0 }
0x393e   :  { %7888 = vadd.xlane.f32.xlu0 %v7887_v37 }
0x3954   :  { %8134 = vrot.lane.b32.xlu0 %v13304_v14, %s12108_s28 }
0x3966   :  { %v7874_v40 = vpop.xlane.xlu1 %7873 }
0x3967   :  { %v7878_v30 = vsub.f32 %v7792_v13, %v7874_v40 }
0x3969   :  { %v7880_v41 = vmul.f32 1.442695, %v7878_v30 }
0x396a   :  { %v8053_v50 = vpop.permute.xlu1 %8052 }
0x396b   :  { %11531 = vpow2.f32 %v7880_v41 }
0x396e   :  { %v8051_v54 = vpop.permute.xlu1 %8050 }
0x3972   :  { %v8564_v4 = vpop.permute.xlu1 %8563 }
0x3975   :  { %v11532_v42 = vpop.eup %11531 }
0x3976   :  { %v7884_v32 = vsel %vm5282_vm6, %v11532_v42, 0.0 }
0x3977   :  { %7885 = vadd.xlane.f32.xlu0 %v7884_v32  ;;  %v7713_v32 = vld [vmem:[#allocation17 + $0x28] sm:$0xff] }
0x398d   :  { %7894 = vrot.lane.b32.xlu0 %v13323_v61, %s12106_s27 }
0x39cb   :  { %v7889_v43 = vpop.xlane.xlu0 %7888 }
0x39cc   :  { %11533 = vrcp.f32 %v7889_v43 }
0x39cf   :  { %v8135_v46 = vpop.permute.xlu0 %8134 }
0x39d6   :  { %v11534_v44 = vpop.eup %11533 }
0x39d7   :  { %v7893_v11 = vmul.f32 %v11534_v44, %v11530_v36 }
0x39d9   :  { %11021 = vmatmul.mubr.msk.f32.vlgmr.msra.gmra.mrb[78].mxu1 %vm601_vm2, %v7893_v11 }
0x39da   :  { %11029 = vmatpush3.xpose.msk.msra.mxu1 %vm601_vm2, %v8135_v46  ;;  %11030 = vmatprep.mubr.msk.f32.mxu1 %vm12105_vm1, %v12104_v21 }
0x39db   :  { %11038 = vmatprep.subr.mxu1 %v12104_v21 }
0x39dd   :  { %11031 = vmatmul.mubr.msk.f32.vlgmr.msra.gmra.mrb[80].mxu1 %vm601_vm2, %v8133_v38 }
0x39de   :  { %11040 = vmatprep.mubr.msk.f32.mxu1 %vm12105_vm1, %v12104_v21 }
0x3a04   :  { %v7886_v47 = vpop.xlane.xlu0 %7885 }
0x3a05   :  { %11535 = vrcp.f32 %v7886_v47 }
0x3a08   :  { %v7895_v48 = vpop.permute.xlu0 %7894 }
0x3a09   :  { %11014 = vmatpush3.msra.mxu0 %v7895_v48 }
0x3a0a   :  { %11023 = vmatprep.subr.mxu0 %v12104_v21 }
0x3a0f   :  { %v11536_v49 = vpop.eup %11535 }
0x3a10   :  { %v7892_v51 = vmul.f32 %v11536_v49, %v11532_v42 }
0x3a12   :  { %11016 = vmatmul.mubr.msk.f32.vlgmr.msra.gmra.mrb[64].mxu0 %vm601_vm2, %v7892_v51 }
0x3a13   :  { %11024 = vmatpush3.xpose.msk.msra.mxu0 %vm601_vm2, %v8053_v50  ;;  %11025 = vmatprep.mubr.msk.f32.mxu0 %vm12105_vm1, %v12104_v21 }
0x3a14   :  { %11033 = vmatprep.subr.mxu0 %v12104_v21 }
0x3a16   :  { %11026 = vmatmul.mubr.msk.f32.vlgmr.msra.gmra.mrb[66].mxu0 %vm601_vm2, %v8051_v54 }
0x3a17   :  { %11035 = vmatprep.mubr.msk.f32.mxu0 %vm12105_vm1, %v12104_v21 }
0x3aac   :  { %v8042_v55 = vpop.f32.mrb[78].mxu1 }
0x3aad   :  { %v11022_v45 = vpop.f32.mrb[79].mxu1  ;;  %v8462_v24 = vrot.slane %v8042_v55, 7 }
0x3ab0   :  { %v8206_v56 = vpop.f32.mrb[80].mxu1 }
0x3ab1   :  { %v11032_v57 = vpop.f32.mrb[81].mxu1  ;;  %v8213_v16 = vsel %vm5282_vm6, %v8206_v56, -inf }
0x3ab2   :  { %8214 = vmax.xlane.f32.xlu0 %v8213_v16 }
0x3ac8   :  { %8308 = vrot.lane.b32.xlu0 %v13304_v14, %s12109_s4 }
0x3acc   :  { %8561 = vrot.lane.b32.xlu0 %v13358_v27, %s12112_s22 }
0x3ad0   :  { %8639 = vrot.lane.b32.xlu0 %v13350_v22, %s12112_s22 }
0x3ae5   :  { %v7966_v53 = vpop.f32.mrb[64].mxu0 }
0x3ae6   :  { %v13396_v26 = vsel %vm4641_vm4, %v8462_v24, %v7966_v53  ;;  %v11017_v59 = vpop.f32.mrb[65].mxu0 }
0x3ae9   :  { %v8124_v17 = vpop.f32.mrb[66].mxu0 }
0x3aea   :  { %v11027_v60 = vpop.f32.mrb[67].mxu0  ;;  %v8210_v3 = vsel %vm5282_vm6, %v8124_v17, -inf }
0x3b3f   :  { %v8215_v62 = vpop.xlane.xlu0 %8214 }
0x3b40   :  { %v8217_v63 = vsub.f32 %v8206_v56, %v8215_v62  ;;  %v7712_v56 = vld [vmem:[#allocation17 + $0x20] sm:$0xff] }
0x3b42   :  { %v8220_v0 = vmul.f32 1.442695, %v8217_v63 }
0x3b43   :  { %v8309_v1 = vpop.permute.xlu0 %8308 }
0x3b44   :  { %11537 = vpow2.f32 %v8220_v0  ;;  %11039 = vmatpush3.msra.mxu1 %v8309_v1 }
0x3b45   :  { %11053 = vmatprep.subr.mxu1 %v12104_v21 }
0x3b47   :  { %v8562_v7 = vpop.permute.xlu0 %8561 }
0x3b4b   :  { %v8640_v13 = vpop.permute.xlu0 %8639 }
0x3b4e   :  { %v11538_v2 = vpop.eup %11537 }
0x3b4f   :  { %v8225_v58 = vsel %vm5282_vm6, %v11538_v2, 0.0 }
0x3b50   :  { %8226 = vadd.xlane.f32.xlu1 %v8225_v58 }
0x3b61   :  { %8641 = vrot.lane.b32.xlu1 %v13304_v14, %s12112_s22 }
0x3b85   :  { %8211 = vmax.xlane.f32.xlu1 %v8210_v3 }
0x3bdd   :  { %v8227_v5 = vpop.xlane.xlu1 %8226 }
0x3bde   :  { %11539 = vrcp.f32 %v8227_v5 }
0x3be1   :  { %v8642_v8 = vpop.permute.xlu1 %8641 }
0x3be8   :  { %v11540_v9 = vpop.eup %11539 }
0x3be9   :  { %v8231_v6 = vmul.f32 %v11540_v9, %v11538_v2  ;;  %v7714_v2 = vld [vmem:[#allocation17 + $0x30] sm:$0xff] }
0x3beb   :  { %11041 = vmatmul.mubr.msk.f32.vlgmr.msra.gmra.mrb[82].mxu1 %vm601_vm2, %v8231_v6 }
0x3bec   :  { %11054 = vmatpush3.xpose.msk.msra.mxu1 %vm601_vm2, %v8564_v4  ;;  %11055 = vmatprep.mubr.msk.f32.mxu1 %vm12105_vm1, %v12104_v21 }
0x3bed   :  { %11058 = vmatprep.subr.mxu1 %v12104_v21 }
0x3bef   :  { %11056 = vmatmul.mubr.msk.f32.vlgmr.msra.gmra.mrb[84].mxu1 %vm601_vm2, %v8562_v7 }
0x3bf0   :  { %11059 = vmatpush3.xpose.msk.msra.mxu1 %vm601_vm2, %v8642_v8  ;;  %11060 = vmatprep.mubr.msk.f32.mxu1 %vm12105_vm1, %v12104_v21 }
0x3bf1   :  { %11068 = vmatprep.subr.mxu1 %v12104_v21 }
0x3bf3   :  { %11061 = vmatmul.mubr.msk.f32.vlgmr.msra.gmra.mrb[86].mxu1 %vm601_vm2, %v8640_v13 }
0x3bf4   :  { %11070 = vmatprep.mubr.msk.f32.mxu1 %vm12105_vm1, %v12104_v21 }
0x3c12   :  { %v8212_v10 = vpop.xlane.xlu1 %8211 }
0x3c13   :  { %v8216_v25 = vsub.f32 %v8124_v17, %v8212_v10 }
0x3c15   :  { %v8218_v15 = vmul.f32 1.442695, %v8216_v25 }
0x3c17   :  { %11541 = vpow2.f32 %v8218_v15 }
0x3c21   :  { %v11542_v39 = vpop.eup %11541 }
0x3c22   :  { %v8222_v23 = vsel %vm5282_vm6, %v11542_v39, 0.0 }
0x3c23   :  { %8223 = vadd.xlane.f32.xlu0 %v8222_v23 }
0x3c39   :  { %8232 = vrot.lane.b32.xlu0 %v13323_v61, %s12109_s4 }
0x3c3d   :  { %8739 = vrot.lane.b32.xlu0 %v13323_v61, %s12110_s5 }
0x3c41   :  { %9074 = vrot.lane.b32.xlu0 %v13304_v14, %s12115_s1 }
0x3c45   :  { %8996 = vrot.lane.b32.xlu0 %v13323_v61, %s12115_s1 }
0x3c49   :  { %9072 = vrot.lane.b32.xlu0 %v13350_v22, %s12115_s1 }
0x3cb0   :  { %v8224_v12 = vpop.xlane.xlu0 %8223 }
0x3cb1   :  { %11543 = vrcp.f32 %v8224_v12 }
0x3cb4   :  { %v8233_v31 = vpop.permute.xlu0 %8232 }
0x3cb5   :  { %11034 = vmatpush3.msra.mxu0 %v8233_v31 }
0x3cb6   :  { %11043 = vmatprep.subr.mxu0 %v12104_v21 }
0x3cb8   :  { %v8740_v24 = vpop.permute.xlu0 %8739 }
0x3cbb   :  { %v11544_v33 = vpop.eup %11543 }
0x3cbc   :  { %v8230_v35 = vmul.f32 %v11544_v33, %v11542_v39  ;;  %v9075_v60 = vpop.permute.xlu0 %9074 }
0x3cbe   :  { %11036 = vmatmul.mubr.msk.f32.vlgmr.msra.gmra.mrb[68].mxu0 %vm601_vm2, %v8230_v35  ;;  %v8380_v36 = vpop.f32.mrb[82].mxu1 }
0x3cbf   :  { %v11042_v37 = vpop.f32.mrb[83].mxu1  ;;  %11045 = vmatprep.mubr.msk.f32.mxu0 %vm12105_vm1, %v12104_v21  ;;  %11044 = vmatpush3.msra.mxu0 %v7713_v32  ;;  %v8386_v55 = vrot.slane %v8380_v36, 7 }
0x3cc0   :  { %11048 = vmatprep.subr.mxu0 %v12104_v21  ;;  %v8997_v0 = vpop.permute.xlu0 %8996 }
0x3cc2   :  { %v8635_v38 = vpop.f32.mrb[84].mxu1 }
0x3cc3   :  { %v11057_v40 = vpop.f32.mrb[85].mxu1  ;;  %v8717_v42 = vsel %vm5282_vm6, %v8635_v38, -inf }
0x3cc4   :  { %v9073_v15 = vpop.permute.xlu0 %9072 }
0x3cc6   :  { %v8713_v30 = vpop.f32.mrb[86].mxu1 }
0x3cc7   :  { %v11062_v41 = vpop.f32.mrb[87].mxu1  ;;  %v8720_v22 = vsel %vm5282_vm6, %v8713_v30, -inf }
0x3cc8   :  { %8721 = vmax.xlane.f32.xlu1 %v8720_v22 }
0x3ccc   :  { %8718 = vmax.xlane.f32.xlu1 %v8717_v42 }
0x3d55   :  { %v8722_v43 = vpop.xlane.xlu1 %8721 }
0x3d56   :  { %v8724_v44 = vsub.f32 %v8713_v30, %v8722_v43 }
0x3d58   :  { %v8727_v47 = vmul.f32 1.442695, %v8724_v44 }
0x3d59   :  { %v8719_v11 = vpop.xlane.xlu1 %8718 }
0x3d5a   :  { %v8723_v46 = vsub.f32 %v8635_v38, %v8719_v11 }
0x3d5c   :  { %v8725_v48 = vmul.f32 1.442695, %v8723_v46 }
0x3d5e   :  { %11545 = vpow2.f32 %v8725_v48 }
0x3d5f   :  { %11547 = vpow2.f32 %v8727_v47 }
0x3d68   :  { %v11546_v49 = vpop.eup %11545 }
0x3d69   :  { %v8729_v50 = vsel %vm5282_vm6, %v11546_v49, 0.0  ;;  %v11548_v51 = vpop.eup %11547 }
0x3d6a   :  { %8730 = vadd.xlane.f32.xlu1 %v8729_v50  ;;  %v8732_v54 = vsel %vm5282_vm6, %v11548_v51, 0.0 }
0x3d6e   :  { %8733 = vadd.xlane.f32.xlu1 %v8732_v54 }
0x3d7f   :  { %8815 = vrot.lane.b32.xlu1 %v13304_v14, %s12110_s5 }
0x3d83   :  { %8994 = vrot.lane.b32.xlu1 %v13358_v27, %s12115_s1 }
0x3d91   :  { %v8304_v45 = vpop.f32.mrb[68].mxu0 }
0x3d92   :  { %v8387_v57 = vsel %vm4641_vm4, %v8386_v55, %v8304_v45  ;;  %v11037_v16 = vpop.f32.mrb[69].mxu0 }
0x3d93   :  { %11046 = vmatmul.mubr.msk.f32.vlgmr.msra.gmra.mrb[70].mxu0 %vm601_vm2, %v8387_v57 }
0x3d94   :  { %11049 = vmatpush3.msra.mxu0 %v7712_v56  ;;  %11050 = vmatprep.mubr.msk.f32.mxu0 %vm12105_vm1, %v12104_v21 }
0x3d95   :  { %11063 = vmatprep.subr.mxu0 %v12104_v21 }
0x3d9b   :  { %11051 = vmatmul.mubr.msk.f32.vlgmr.msra.gmra.mrb[70].mxu0 %vm601_vm2, %v13396_v26 }
0x3d9c   :  { %11064 = vmatpush3.msra.mxu0 %v8740_v24  ;;  %11065 = vmatprep.mubr.msk.f32.mxu0 %vm12105_vm1, %v12104_v21 }
0x3d9d   :  { %11073 = vmatprep.subr.mxu0 %v12104_v21 }
0x3df7   :  { %v8731_v27 = vpop.xlane.xlu1 %8730 }
0x3df8   :  { %11549 = vrcp.f32 %v8731_v27 }
0x3dfb   :  { %v8734_v53 = vpop.xlane.xlu1 %8733 }
0x3dfc   :  { %11551 = vrcp.f32 %v8734_v53 }
0x3dff   :  { %v8816_v59 = vpop.permute.xlu1 %8815 }
0x3e00   :  { %11069 = vmatpush3.msra.mxu1 %v8816_v59 }
0x3e01   :  { %11078 = vmatprep.subr.mxu1 %v12104_v21 }
0x3e02   :  { %v11550_v17 = vpop.eup %11549 }
0x3e03   :  { %v8737_v62 = vmul.f32 %v11550_v17, %v11546_v49  ;;  %v8995_v1 = vpop.permute.xlu1 %8994 }
0x3e05   :  { %11066 = vmatmul.mubr.msk.f32.vlgmr.msra.gmra.mrb[72].mxu0 %vm601_vm2, %v8737_v62 }
0x3e06   :  { %v11552_v26 = vpop.eup %11551  ;;  %11075 = vmatprep.mubr.msk.f32.mxu0 %vm12105_vm1, %v12104_v21  ;;  %11074 = vmatpush3.msra.mxu0 %v7714_v2 }
0x3e07   :  { %v8738_v63 = vmul.f32 %v11552_v26, %v11548_v51  ;;  %11083 = vmatprep.subr.mxu0 %v12104_v21 }
0x3e09   :  { %11071 = vmatmul.mubr.msk.f32.vlgmr.msra.gmra.mrb[88].mxu1 %vm601_vm2, %v8738_v63 }
0x3e0a   :  { %11079 = vmatpush3.xpose.msk.msra.mxu1 %vm601_vm2, %v8997_v0  ;;  %11080 = vmatprep.mubr.msk.f32.mxu1 %vm12105_vm1, %v12104_v21 }
0x3e0b   :  { %11088 = vmatprep.subr.mxu1 %v12104_v21 }
0x3e0d   :  { %11081 = vmatmul.mubr.msk.f32.vlgmr.msra.gmra.mrb[90].mxu1 %vm601_vm2, %v8995_v1 }
0x3e0e   :  { %11090 = vmatprep.mubr.msk.f32.mxu1 %vm12105_vm1, %v12104_v21 }
0x3e6e   :  { %v8532_v58 = vpop.f32.mrb[70].mxu0 }
0x3e6f   :  { %v11052_v3 = vpop.f32.mrb[71].mxu0  ;;  %v8543_v33 = vrot.slane %v8532_v58, %v12982_v18 }
0x3e70   :  { %v7717_v3 = vld [vmem:[#allocation19 + $0x1] sm:$0x1] }
0x3e71   :  { %v8544_v36 = vcombine.high %v8543_v33, %v8543_v33  ;;  %v8551_v40 = vrot.slane %v8543_v33, %v12982_v18 }
0x3e73   :  { %v8558_v22 = vrot.slane %v8544_v36, %v12982_v18 }
0x3ed8   :  { %v8811_v4 = vpop.f32.mrb[72].mxu0 }
0x3ed9   :  { %v11067_v5 = vpop.f32.mrb[73].mxu0 }
0x3edc   :  { %v8887_v9 = vpop.f32.mrb[88].mxu1 }
0x3edd   :  { %v8893_v6 = vrot.slane %v8887_v9, 7  ;;  %v11072_v7 = vpop.f32.mrb[89].mxu1 }
0x3edf   :  { %v8894_v8 = vsel %vm4641_vm4, %v8893_v6, %v8811_v4 }
0x3ee0   :  { %11076 = vmatmul.mubr.msk.f32.vlgmr.msra.gmra.mrb[74].mxu0 %vm601_vm2, %v8894_v8  ;;  %v9068_v13 = vpop.f32.mrb[90].mxu1 }
0x3ee1   :  { %11084 = vmatpush3.xpose.msk.msra.mxu0 %vm601_vm2, %v9075_v60  ;;  %v11082_v10 = vpop.f32.mrb[91].mxu1  ;;  %v9150_v25 = vsel %vm5282_vm6, %v9068_v13, -inf  ;;  %11085 = vmatprep.mubr.msk.f32.mxu0 %vm12105_vm1, %v12104_v21 }
0x3ee2   :  { %9151 = vmax.xlane.f32.xlu1 %v9150_v25  ;;  %11093 = vmatprep.subr.mxu0 %v12104_v21 }
0x3ee4   :  { %11086 = vmatmul.mubr.msk.f32.vlgmr.msra.gmra.mrb[76].mxu0 %vm601_vm2, %v9073_v15 }
0x3ee5   :  { %11095 = vmatprep.mubr.msk.f32.mxu0 %vm12105_vm1, %v12104_v21 }
0x3ef3   :  { %9248 = vrot.lane.b32.xlu1 %v13304_v14, %s12114_s24 }
0x3f6f   :  { %v9152_v39 = vpop.xlane.xlu1 %9151 }
0x3f70   :  { %v9156_v12 = vsub.f32 %v9068_v13, %v9152_v39 }
0x3f72   :  { %v9158_v31 = vmul.f32 1.442695, %v9156_v12 }
0x3f73   :  { %v9249_v23 = vpop.permute.xlu1 %9248 }
0x3f74   :  { %11094 = vmatpush3.msra.mxu0 %v9249_v23  ;;  %11553 = vpow2.f32 %v9158_v31 }
0x3f75   :  { %11267 = vmatprep.subr.bf16.mxu0 %v12117_v20 }
0x3f7e   :  { %v11554_v11 = vpop.eup %11553 }
0x3f7f   :  { %v9162_v47 = vsel %vm5282_vm6, %v11554_v11, 0.0 }
0x3fb3   :  { %v8963_v35 = vpop.f32.mrb[74].mxu0 }
0x3fb4   :  { %v8974_v37 = vrot.slane %v8963_v35, %v12982_v18  ;;  %v11077_v38 = vpop.f32.mrb[75].mxu0 }
0x3fb6   :  { %v8975_v30 = vcombine.high %v8974_v37, %v8974_v37  ;;  %v8982_v14 = vrot.slane %v8974_v37, %v12982_v18 }
0x3fb7   :  { %v9146_v41 = vpop.f32.mrb[76].mxu0 }
0x3fb8   :  { %v8989_v42 = vrot.slane %v8975_v30, %v12982_v18  ;;  %v8992_v32 = vadd.f32 %v8982_v14, %v8551_v40  ;;  %v11087_v43 = vpop.f32.mrb[77].mxu0  ;;  %v9153_v44 = vsel %vm5282_vm6, %v9146_v41, -inf  ;;  %v9490_v40 = vld [vmem:[#allocation29 + $0x20] sm:$0xff]  ;;  %v9492_v30 = vld [vmem:[#allocation29 + $0x30] sm:$0xff] }
0x3fb9   :  { %9154 = vmax.xlane.f32.xlu0 %v9153_v44 }
0x3fba   :  { %v8993_v46 = vadd.f32 %v8989_v42, %v8558_v22 }
0x3fbd   :  { %9163 = vadd.xlane.f32.xlu0 %v9162_v47 }
0x4046   :  { %v9155_v48 = vpop.xlane.xlu0 %9154 }
0x4047   :  { %v9157_v49 = vsub.f32 %v9146_v41, %v9155_v48  ;;  %v9493_v41 = vld [vmem:[#allocation29 + $0x38] sm:$0xff] }
0x4048   :  { %v11271_v22 = vpack.c.bf16 %v9493_v41, %v9492_v30  ;;  %v10204_v48 = vld [vmem:[#allocation23 + $0x1] ss:$0 sm:$0xff] }
0x4049   :  { %v9160_v50 = vmul.f32 1.442695, %v9157_v49 }
0x404a   :  { %v9164_v55 = vpop.xlane.xlu0 %9163 }
0x404b   :  { %11555 = vpow2.f32 %v9160_v50 }
0x404c   :  { %11557 = vrcp.f32 %v9164_v55 }
0x4055   :  { %v11556_v51 = vpop.eup %11555 }
0x4056   :  { %v9165_v54 = vsel %vm5282_vm6, %v11556_v51, 0.0  ;;  %v11558_v56 = vpop.eup %11557 }
0x4057   :  { %9166 = vadd.xlane.f32.xlu0 %v9165_v54  ;;  %v9170_v57 = vmul.f32 %v11558_v56, %v11554_v11 }
0x406d   :  { %9172 = vrot.lane.b32.xlu0 %v13323_v61, %s12114_s24  ;;  %v7715_v61 = vld [vmem:[#allocation17 + $0x38] sm:$0xff] }
0x40e4   :  { %v9167_v45 = vpop.xlane.xlu0 %9166 }
0x40e5   :  { %11559 = vrcp.f32 %v9167_v45 }
0x40e8   :  { %v9173_v16 = vpop.permute.xlu0 %9172 }
0x40e9   :  { %11089 = vmatpush3.msra.mxu1 %v9173_v16 }
0x40ea   :  { %11091 = vmatmul.mubr.msk.f32.vlgmr.msra.gmra.mrb[92].mxu1 %vm601_vm2, %v9170_v57  ;;  %11098 = vmatprep.subr.mxu1 %v12104_v21 }
0x40eb   :  { %11100 = vmatprep.mubr.msk.f32.mxu1 %vm12105_vm1, %v12104_v21  ;;  %11099 = vmatpush3.msra.mxu1 %v7715_v61  ;;  %v10206_v61 = vld [vmem:[%s12335_s6 + $0x40] sm:$0xff] }
0x40ec   :  { %11273 = vmatprep.subr.bf16.mxu1 %v12117_v20 }
0x40ef   :  { %v11560_v24 = vpop.eup %11559 }
0x40f0   :  { %v9171_v27 = vmul.f32 %v11560_v24, %v11556_v51  ;;  %v10205_v51 = vld [vmem:[#allocation25 + $0x1] ss:$0 sm:$0xff] }
0x40f2   :  { %11096 = vmatmul.mubr.msk.f32.vlgmr.msra.gmra.mrb[78].mxu0 %vm601_vm2, %v9171_v27 }
0x40f3   :  { %11111 = vmatprep.mubr.msk.f32.mxu0 %vm12105_vm1, %v12104_v21 }
0x41bd   :  { %v9244_v53 = vpop.f32.mrb[92].mxu1 }
0x41be   :  { %v11092_v59 = vpop.f32.mrb[93].mxu1 }
0x41c5   :  { %v9320_v17 = vpop.f32.mrb[78].mxu0 }
0x41c6   :  { %v9326_v60 = vrot.slane %v9320_v17, 7  ;;  %v11097_v62 = vpop.f32.mrb[79].mxu0  ;;  %v10208_v17 = vld [vmem:[%s12335_s6 + $0x50] sm:$0xff] }
0x41c8   :  { %v9327_v26 = vsel %vm4641_vm4, %v9326_v60, %v9244_v53  ;;  %v10207_v53 = vld [vmem:[%s12335_s6 + $0x48] sm:$0xff]  ;;  %v10209_v60 = vld [vmem:[%s12335_s6 + $0x58] sm:$0xff] }
0x41c9   :  { %11101 = vmatmul.mubr.msk.f32.vlgmr.msra.gmra.mrb[94].mxu1 %vm601_vm2, %v9327_v26  ;;  %v11274_v59 = vpack.c.bf16 %v10207_v53, %v10206_v61  ;;  %v11277_v62 = vpack.c.bf16 %v10209_v60, %v10208_v17  ;;  %v10210_v26 = vld [vmem:[%s12335_s6 + $0x60] sm:$0xff]  ;;  %v10217_v53 = vld [vmem:[#allocation28 + $0x1] ss:$0 sm:$0xff] }
0x41ca   :  { %11130 = vmatprep.mubr.msk.f32.mxu1 %vm12105_vm1, %v12104_v21 }
0x41cb   :  { %11275 = vmatpush3.bf16.msra.mxu1 %v11274_v59 }
0x41cc   :  { %11276 = vmatprep.subr.bf16.mxu1 %v12117_v20 }
0x41cf   :  { %11278 = vmatpush3.bf16.msra.mxu1 %v11277_v62 }
0x41d0   :  { %11279 = vmatprep.subr.bf16.mxu1 %v12117_v20 }
0x429c   :  { %v9396_v63 = vpop.f32.mrb[94].mxu1 }
0x429d   :  { %v9407_v0 = vrot.slane %v9396_v63, %v12982_v18  ;;  %v11102_v1 = vpop.f32.mrb[95].mxu1  ;;  %v10211_v63 = vld [vmem:[%s12335_s6 + $0x68] sm:$0xff] }
0x429e   :  { %v10212_v1 = vld [vmem:[%s12335_s6 + $0x70] sm:$0xff] }
0x429f   :  { %v9408_v2 = vcombine.high %v9407_v0, %v9407_v0  ;;  %v9415_v58 = vrot.slane %v9407_v0, %v12982_v18  ;;  %v11280_v0 = vpack.c.bf16 %v10211_v63, %v10210_v26 }
0x42a1   :  { %v9422_v4 = vrot.slane %v9408_v2, %v12982_v18  ;;  %v9425_v5 = vadd.f32 %v9415_v58, %v8992_v32  ;;  %11281 = vmatpush3.bf16.msra.mxu1 %v11280_v0  ;;  %v10213_v2 = vld [vmem:[%s12335_s6 + $0x78] sm:$0xff]  ;;  %s13633_s6 = sld [smem:[#allocation51_spill]] }
0x42a2   :  { %11282 = vmatprep.subr.bf16.mxu1 %v12117_v20  ;;  %v11283_v58 = vpack.c.bf16 %v10213_v2, %v10212_v1 }
0x42a3   :  { %v9426_v9 = vadd.f32 %v9422_v4, %v8993_v46  ;;  %v9427_v6 = vadd.f32 %v9425_v5, %v7717_v3 }
0x42a5   :  { %v9434_v7 = vrot.slane %v9427_v6, %v13002_v29  ;;  %v9428_v8 = vadd.f32 %v9426_v9, %v7717_v3  ;;  %11284 = vmatpush3.bf16.msra.mxu1 %v11283_v58  ;;  %v11395_v3 = vld [vmem:[#allocation31 + $0x1] ss:$0 sps:$4 sm:$0x11]  }
0x42a6   :  { %v9520_v4 = vrot.slane %v11395_v3, %v12982_v18 }
0x42a7   :  { %v9441_v13 = vadd.f32 %v9434_v7, %v13317_v52  ;;  %v9438_v21 = vrot.slane %v9428_v8, %v13002_v29  ;;  %v9859_v1 = vld [vmem:[%s13633_s6] sm:$0xff] }
0x42a8   :  { %v9527_v5 = vrot.slane %v9520_v4, %v12982_v18 }
0x42a9   :  { %v9447_v10 = vsel %vm4864_vm5, %v9441_v13, 0.0  ;;  %v9442_v25 = vadd.f32 %v9438_v21, %v13319_v34  ;;  %v9491_v34 = vld [vmem:[#allocation29 + $0x28] sm:$0xff] }
0x42aa   :  { %9448 = vadd.xlane.f32.xlu1 %v9447_v10  ;;  %v11268_v14 = vpack.c.bf16 %v9491_v34, %v9490_v40 }
0x42ab   :  { %v9450_v15 = vsel %vm4864_vm5, %v9442_v25, 0.0 }
0x42ac   :  { %9451 = vadd.xlane.f32.xlu0 %v9450_v15  ;;  %11269 = vmatpush3.bf16.msra.mxu0 %v11268_v14 }
0x42ad   :  { %11270 = vmatprep.subr.bf16.mxu0 %v12117_v20 }
0x42b0   :  { %11272 = vmatpush3.bf16.msra.mxu0 %v11271_v22 }
0x4337   :  { %v9449_v39 = vpop.xlane.xlu1 %9448 }
0x4338   :  { %v9453_v23 = vmul.f32 0.03125, %v9449_v39 }
0x4339   :  { %v9452_v12 = vpop.xlane.xlu0 %9451 }
0x433a   :  { %v9455_v31 = vsub.f32 %v9441_v13, %v9453_v23  ;;  %v9454_v33 = vmul.f32 0.03125, %v9452_v12  ;;  %v11396_v12 = vld [vmem:[#allocation32 + $0x1] ss:$0 sps:$4 sm:$0x11]  }
0x433c   :  { %v9456_v35 = vsub.f32 %v9442_v25, %v9454_v33  ;;  %v9457_v36 = vmul.f32 %v9455_v31, %v9455_v31 }
0x433e   :  { %v9459_v37 = vsel %vm4864_vm5, %v9457_v36, 0.0  ;;  %v9458_v52 = vmul.f32 %v9456_v35, %v9456_v35 }
0x433f   :  { %9460 = vadd.xlane.f32.xlu1 %v9459_v37 }
0x4340   :  { %v9462_v38 = vsel %vm4864_vm5, %v9458_v52, 0.0 }
0x4341   :  { %9463 = vadd.xlane.f32.xlu0 %v9462_v38 }
0x43cc   :  { %v9461_v42 = vpop.xlane.xlu1 %9460 }
0x43cd   :  { %v9465_v32 = vmul.f32 0.03125, %v9461_v42 }
0x43ce   :  { %v9464_v43 = vpop.xlane.xlu0 %9463 }
0x43cf   :  { %v9467_v44 = vadd.f32 1e-05, %v9465_v32  ;;  %v9466_v11 = vmul.f32 0.03125, %v9464_v43 }
0x43d1   :  { %11561 = vrsqrt.f32 %v9467_v44  ;;  %v9468_v46 = vadd.f32 1e-05, %v9466_v11 }
0x43d3   :  { %11563 = vrsqrt.f32 %v9468_v46 }
0x43db   :  { %v11562_v47 = vpop.eup %11561 }
0x43dc   :  { %v9471_v49 = vmul.f32 %v11562_v47, %v9455_v31  ;;  %v9653_v31 = vrot.slane %v11396_v12, %v12982_v18 }
0x43dd   :  { %v11564_v50 = vpop.eup %11563 }
0x43de   :  { %v9472_v54 = vmul.f32 %v11564_v50, %v9456_v35  ;;  %v9479_v55 = vmul.f32 %v10204_v48, %v9471_v49  ;;  %v9660_v33 = vrot.slane %v9653_v31, %v12982_v18 }
0x43e0   :  { %v9480_v45 = vmul.f32 %v10204_v48, %v9472_v54  ;;  %v9487_v56 = vadd.f32 %v10205_v51, %v9479_v55 }
0x43e2   :  { %v9488_v57 = vadd.f32 %v10205_v51, %v9480_v45  ;;  %v9509_v16 = vrot.slane %v9487_v56, 7 }
0x43e4   :  { %v9510_v24 = vrot.slane %v9488_v57, 6 }
0x43e6   :  { %v9511_v27 = vsel %vm4641_vm4, %v9510_v24, %v9509_v16  ;;  %v10216_v24 = vld [vmem:[#allocation26 + $0x1] ss:$0 sm:$0xff] }
0x43e7   :  { %11112 = vmatmul.mubr.msk.f32.vlgmr.msra.gmra.mrb[80].mxu0 %vm509_vm0, %v9511_v27 }
0x44ba   :  { %v9597_v9 = vpop.f32.mrb[80].mxu0 }
0x44bb   :  { %v9598_v6 = vadd.f32 %v9597_v9, %v9527_v5  ;;  %v11113_v7 = vpop.f32.mrb[81].mxu0 }
0x44bd   :  { %v9608_v8 = vrot.slane %v9598_v6, %v12982_v18 }
0x44bf   :  { %v9609_v13 = vcombine.high %v9608_v8, %v9608_v8  ;;  %v9616_v21 = vrot.slane %v9608_v8, %v12982_v18 }
0x44c1   :  { %v9623_v10 = vrot.slane %v9609_v13, %v12982_v18  ;;  %v9626_v20 = vmax.f32 %v9616_v21, 0.0  ;;  %v9861_v21 = vld [vmem:[%s13633_s6 + $0x10] sm:$0xff] }
0x44c3   :  { %v9627_v25 = vmax.f32 %v9623_v10, 0.0  ;;  %v9862_v10 = vld [vmem:[%s13633_s6 + $0x18] sm:$0xff] }
0x44c5   :  { %v9630_v15 = vcombine.low %v9626_v20, %v9627_v25  ;;  %v9860_v20 = vld [vmem:[%s13633_s6 + $0x8] sm:$0xff] }
0x44c7   :  { %v9637_v39 = vrot.slane %v9630_v15, %v12982_v18 }
0x44c9   :  { %v9644_v23 = vrot.slane %v9637_v39, %v12982_v18  ;;  %v9880_v39 = vand.u32 127, %v4648_v28 }
0x44cb   :  { %11131 = vmatmul.mubr.msk.f32.vlgmr.msra.gmra.mrb[96].mxu1 %vm2411_vm3, %v9644_v23 }
0x459e   :  { %v9730_v35 = vpop.f32.mrb[96].mxu1 }
0x459f   :  { %v9731_v36 = vadd.f32 %v9730_v35, %v9660_v33  ;;  %v11132_v37 = vpop.f32.mrb[97].mxu1  ;;  %v9885_v35 = vadd.s32 4294967288, %v9880_v39 }
0x45a1   :  { %v9741_v52 = vrot.slane %v9731_v36, %v12982_v18  ;;  %v9888_v37 = vsub.s32 %v9885_v35, %v12979_v19 }
0x45a3   :  { %v9742_v38 = vcombine.high %v9741_v52, %v9741_v52  ;;  %v9749_v40 = vrot.slane %v9741_v52, %v12982_v18  ;;  %v9892_v52 = vadd.s32 4294967280, %v9880_v39 }
0x45a5   :  { %v9756_v34 = vrot.slane %v9742_v38, %v12982_v18  ;;  %v9760_v30 = vrot.slane %v9749_v40, %v13002_v29  ;;  %v9883_v38 = vsub.s32 %v9880_v39, %v12979_v19 }
0x45a7   :  { %v9767_v14 = vadd.f32 %v9760_v30, %v9487_v56  ;;  %v9764_v41 = vrot.slane %v9756_v34, %v13002_v29  ;;  %v9899_v30 = vadd.s32 4294967272, %v9880_v39 }
0x45a9   :  { %v9773_v22 = vsel %vm4864_vm5, %v9767_v14, 0.0  ;;  %v9768_v42 = vadd.f32 %v9764_v41, %v9488_v57  ;;  %v9895_v41 = vsub.s32 %v9892_v52, %v12979_v19 }
0x45aa   :  { %9774 = vadd.xlane.f32.xlu1 %v9773_v22 }
0x45ab   :  { %v9776_v32 = vsel %vm4864_vm5, %v9768_v42, 0.0 }
0x45ac   :  { %9777 = vadd.xlane.f32.xlu0 %v9776_v32 }
0x4637   :  { %v9775_v43 = vpop.xlane.xlu1 %9774 }
0x4638   :  { %v9779_v44 = vmul.f32 0.03125, %v9775_v43  ;;  %v10218_v43 = vld [vmem:[#allocation7] ss:$0 sm:$0xff] }
0x4639   :  { %v9778_v11 = vpop.xlane.xlu0 %9777 }
0x463a   :  { %v9781_v46 = vsub.f32 %v9767_v14, %v9779_v44  ;;  %v9780_v47 = vmul.f32 0.03125, %v9778_v11 }
0x463c   :  { %v9782_v48 = vsub.f32 %v9768_v42, %v9780_v47  ;;  %v9783_v49 = vmul.f32 %v9781_v46, %v9781_v46  ;;  %v9902_v42 = vsub.s32 %v9899_v30, %v12979_v19 }
0x463e   :  { %v9785_v18 = vsel %vm4864_vm5, %v9783_v49, 0.0  ;;  %v9784_v50 = vmul.f32 %v9782_v48, %v9782_v48 }
0x463f   :  { %9786 = vadd.xlane.f32.xlu1 %v9785_v18 }
0x4640   :  { %v9788_v29 = vsel %vm4864_vm5, %v9784_v50, 0.0 }
0x4641   :  { %9789 = vadd.xlane.f32.xlu0 %v9788_v29 }
0x46cc   :  { %v9787_v51 = vpop.xlane.xlu1 %9786 }
0x46cd   :  { %v9791_v54 = vmul.f32 0.03125, %v9787_v51 }
0x46ce   :  { %v9790_v55 = vpop.xlane.xlu0 %9789 }
0x46cf   :  { %v9793_v45 = vadd.f32 1e-05, %v9791_v54  ;;  %v9792_v56 = vmul.f32 0.03125, %v9790_v55 }
0x46d1   :  { %11565 = vrsqrt.f32 %v9793_v45  ;;  %v9794_v57 = vadd.f32 1e-05, %v9792_v56 }
0x46d3   :  { %11567 = vrsqrt.f32 %v9794_v57 }
0x46db   :  { %v11566_v16 = vpop.eup %11565 }
0x46dc   :  { %v9797_v27 = vmul.f32 %v11566_v16, %v9781_v46 }
0x46dd   :  { %v11568_v61 = vpop.eup %11567 }
0x46de   :  { %v9805_v59 = vmul.f32 %v10216_v24, %v9797_v27  ;;  %v9798_v17 = vmul.f32 %v11568_v61, %v9782_v48  ;;  %v10219_v48 = vld [vmem:[#allocation8] ss:$0 sm:$0xff] }
0x46e0   :  { %v9813_v60 = vadd.f32 %v10217_v53, %v9805_v59  ;;  %v9806_v62 = vmul.f32 %v10216_v24, %v9798_v17  ;;  %v10220_v24 = vld [vmem:[#allocation2] ss:$0 sm:$0xff] }
0x46e2   :  { %v9817_v26 = vsel %vm4864_vm5, %v9813_v60, 0.0  ;;  %v9814_v63 = vadd.f32 %v10217_v53, %v9806_v62 }
0x46e3   :  { %9818 = vadd.xlane.f32.xlu1 %v9817_v26 }
0x46e4   :  { %v9820_v0 = vsel %vm4864_vm5, %v9814_v63, 0.0 }
0x46e5   :  { %9821 = vadd.xlane.f32.xlu0 %v9820_v0 }
0x46f4   :  { %9868 = vperm.xlu1 %11386, %v9859_v1  }
0x4770   :  { %v9819_v2 = vpop.xlane.xlu1 %9818 }
0x4771   :  { %v9823_v58 = vmul.f32 0.03125, %v9819_v2 }
0x4772   :  { %v9822_v3 = vpop.xlane.xlu0 %9821 }
0x4773   :  { %v9825_v4 = vsub.f32 %v9813_v60, %v9823_v58  ;;  %v9824_v5 = vmul.f32 0.03125, %v9822_v3 }
0x4774   :  { %v9869_v25 = vpop.permute.xlu1 %9868 }
0x4775   :  { %v9826_v9 = vsub.f32 %v9814_v63, %v9824_v5  ;;  %v9827_v6 = vmul.f32 %v9825_v4, %v9825_v4  ;;  %v9884_v28 = vrot.slane %v9869_v25, %v9883_v38 }
0x4777   :  { %v9829_v7 = vsel %vm4864_vm5, %v9827_v6, 0.0  ;;  %v9828_v8 = vmul.f32 %v9826_v9, %v9826_v9 }
0x4778   :  { %9830 = vadd.xlane.f32.xlu1 %v9829_v7 }
0x4779   :  { %v9832_v13 = vsel %vm4864_vm5, %v9828_v8, 0.0 }
0x477a   :  { %9833 = vadd.xlane.f32.xlu0 %v9832_v13 }
0x4789   :  { %9874 = vperm.xlu1 %11386, %v9861_v21  }
0x478d   :  { %9877 = vperm.xlu1 %11386, %v9862_v10  }
0x4790   :  { %9871 = vperm.xlu0 %11385, %v9860_v20  }
0x4805   :  { %v9831_v15 = vpop.xlane.xlu1 %9830 }
0x4806   :  { %v9835_v23 = vmul.f32 0.03125, %v9831_v15 }
0x4807   :  { %v9834_v12 = vpop.xlane.xlu0 %9833 }
0x4808   :  { %v9837_v31 = vadd.f32 1e-05, %v9835_v23  ;;  %v9836_v33 = vmul.f32 0.03125, %v9834_v12 }
0x4809   :  { %v9875_v40 = vpop.permute.xlu1 %9874 }
0x480a   :  { %11569 = vrsqrt.f32 %v9837_v31  ;;  %v9838_v36 = vadd.f32 1e-05, %v9836_v33  ;;  %v9896_v44 = vrot.slane %v9875_v40, %v9895_v41 }
0x480c   :  { %11571 = vrsqrt.f32 %v9838_v36 }
0x480d   :  { %v9878_v11 = vpop.permute.xlu1 %9877 }
0x480e   :  { %v9903_v29 = vrot.slane %v9878_v11, %v9902_v42 }
0x480f   :  { %v9872_v34 = vpop.permute.xlu0 %9871 }
0x4810   :  { %v9889_v14 = vrot.slane %v9872_v34, %v9888_v37 }
0x4812   :  { %v9891_v32 = vsel %vm9890_vm7, %v9889_v14, %v9884_v28 }
0x4813   :  { %v9898_v18 = vsel %vm9897_vm8, %v9896_v44, %v9891_v32 }
0x4814   :  { %v11570_v22 = vpop.eup %11569  ;;  %v9905_v55 = vsel %vm9904_vm9, %v9903_v29, %v9898_v18 }
0x4815   :  { %v9841_v46 = vmul.f32 %v11570_v22, %v9825_v4 }
0x4816   :  { %v11572_v47 = vpop.eup %11571 }
0x4817   :  { %v9849_v49 = vmul.f32 %v10218_v43, %v9841_v46  ;;  %v9842_v50 = vmul.f32 %v11572_v47, %v9826_v9 }
0x4819   :  { %v9857_v51 = vadd.f32 %v10219_v48, %v9849_v49  ;;  %v9850_v54 = vmul.f32 %v10218_v43, %v9842_v50 }
0x481b   :  { %v9907_v45 = vmul.f32 %v9905_v55, %v9857_v51  ;;  %v9858_v19 = vadd.f32 %v10219_v48, %v9850_v54 }
0x481d   :  { %v9909_v56 = vsel %vm4864_vm5, %v9907_v45, 0.0  ;;  %v9908_v57 = vmul.f32 %v9905_v55, %v9858_v19 }
0x481e   :  { %9910 = vadd.xlane.f32.xlu0 %v9909_v56 }
0x481f   :  { %v9912_v16 = vsel %vm4864_vm5, %v9908_v57, 0.0 }
0x4820   :  { %9913 = vadd.xlane.f32.xlu1 %v9912_v16 }
0x48ab   :  { %v9911_v27 = vpop.xlane.xlu0 %9910 }
0x48ac   :  { %v9922_v61 = vadd.f32 %v10220_v24, %v9911_v27 }
0x48ad   :  { %v9914_v53 = vpop.xlane.xlu1 %9913 }
0x48ae   :  { %v9924_v59 = vmul.f32 0.006666667, %v9922_v61  ;;  %v9923_v17 = vadd.f32 %v10220_v24, %v9914_v53 }
0x48b0   :  { %9927 = vst.msk [vmem:[%s12345_s20 - $0x7] sm:$0x80] %vm9926_vm10, %v9924_v59  ;;  %v9925_v60 = vmul.f32 0.006666667, %v9923_v17 }
0x48b2   :  { %9928 = vst.msk [vmem:[%s12345_s20 - $0x6] sm:$0x80] %vm9926_vm10, %v9925_v60 }
0x48b3   :  { %9933 = vsyncpa [#allocation4], 1 }
0x48b4   :  { %9934 = vsyncpa [#allocation6], 1 }
0x48b5   :  { %9935 = vsyncpa [#allocation9], 1 }
0x48b6   :  { %9936 = vsyncpa [#allocation12], 1 }
0x48b7   :  { %9937 = vsyncpa [#allocation15], 1 }
0x48b8   :  { %9938 = vsyncpa [#allocation18], 1 }
0x48b9   :  { %9939 = vsyncpa [#allocation21], 1 }
0x48ba   :  { %9940 = vsyncpa [#allocation24], 1 }
0x48bb   :  { %9941 = vsyncpa [#allocation27], 1 }
0x48bc   :  { %9942 = vsyncpa [#allocation30], 1 }
0x48bd   :  { %9943 = vsyncpa [#allocation33], 1 }

</bundles_post_ra>
